<compile_context>
chip_gen: v6e
topology: v6e:2x2x1
jax: 0.10.0
libtpu: 0.0.40
codegen_flags: <defaults>
</compile_context>

<pallas_src>
import functools

import jax
import jax.numpy as jnp
from jax.experimental import pallas as pl
from jax.experimental.pallas import tpu as pltpu


CFG = dict(
    image_size=16,
    patch_size=4,
    num_classes=10,
    dim=32,
    depth=2,
    heads=4,
    dim_head=8,
    mlp_dim=64,
    pool="cls",
    channels=3,
)


# ----------------------------- in-kernel helpers ----------------------------

def _layernorm(x, g, b, eps=1e-5):
    """LayerNorm over last dim; x:(M,D) f32, g/b:(1,D)."""
    mean = jnp.mean(x, axis=-1, keepdims=True)
    var = jnp.mean(jnp.square(x - mean), axis=-1, keepdims=True)
    return (x - mean) * jax.lax.rsqrt(var + eps) * g + b


def _gelu_exact(x):
    """Exact (erf-based) GELU, matching PyTorch nn.GELU default."""
    return 0.5 * x * (1.0 + jax.lax.erf(x * (1.0 / jnp.sqrt(2.0))))


# ----------------------------- fused forward kernel -------------------------

def _vit_forward_kernel(patch_ref, pw_ref, add_ref,
                        ln1g_ref, ln1b_ref, wq_ref, wk_ref, wv_ref,
                        wo_ref, ob_ref,
                        ln2g_ref, ln2b_ref, f1w_ref, f1b_ref, f2w_ref, f2b_ref,
                        hg_ref, hb_ref, hw_ref, hbb_ref,
                        o_ref, *, depth, heads, batch, n_tok):
    """Whole ViT forward for the whole batch, fully resident in VMEM.

    patch:(B*N,PD) (zero row at each cls slot), pw:(PD,D), add:(B*N,D)
    per-layer stacks lead with `depth`; o:(B,C).
    """
    dim = pw_ref.shape[1]

    # ---- patch embedding: one matmul + additive table (cls/pos/bias) -------
    x = jnp.dot(patch_ref[...], pw_ref[...],
                preferred_element_type=jnp.float32) + add_ref[...]      # (M, D)

    # ---- transformer layers, Python-unrolled; x never leaves VMEM ----------
    for l in range(depth):
        # PreNorm(Attention): LN1 fused into the per-head QKV projections.
        xn = _layernorm(x, ln1g_ref[l], ln1b_ref[l])                    # (M, D)
        proj = [jnp.zeros((n_tok, dim), jnp.float32) for _ in range(batch)]
        for h in range(heads):
            # Head extraction = leading-axis weight indexing (no lane slicing).
            # Attention scale is pre-folded into wq.
            q = jnp.dot(xn, wq_ref[l, h], preferred_element_type=jnp.float32)
            k = jnp.dot(xn, wk_ref[l, h], preferred_element_type=jnp.float32)
            v = jnp.dot(xn, wv_ref[l, h], preferred_element_type=jnp.float32)
            for b in range(batch):
                s = b * n_tok
                qb = q[s:s + n_tok, :]
                kb = k[s:s + n_tok, :]
                vb = v[s:s + n_tok, :]
                dots = jnp.dot(qb, kb.T, preferred_element_type=jnp.float32)
                mx = jnp.max(dots, axis=-1, keepdims=True)
                e = jnp.exp(dots - mx)
                attn = e * pl.reciprocal(
                    jnp.sum(e, axis=-1, keepdims=True), approx=True)
                out_bh = jnp.dot(attn, vb, preferred_element_type=jnp.float32)
                # out-projection accumulated per head: sum_h out_h @ W_out[h]
                proj[b] = proj[b] + jnp.dot(out_bh, wo_ref[l, h],
                                            preferred_element_type=jnp.float32)
        x = x + jnp.concatenate(proj, axis=0) + ob_ref[l]               # residual 1

        # PreNorm(FeedForward): LN2 -> FF1 -> GELU -> FF2 -> residual.
        xn2 = _layernorm(x, ln2g_ref[l], ln2b_ref[l])
        h1 = _gelu_exact(jnp.dot(xn2, f1w_ref[l],
                                 preferred_element_type=jnp.float32) + f1b_ref[l])
        x = x + jnp.dot(h1, f2w_ref[l],
                        preferred_element_type=jnp.float32) + f2b_ref[l]  # residual 2

    # ---- classifier head: cls-token pooling + LayerNorm + Linear -----------
    cls_tok = jnp.concatenate(
        [x[b * n_tok:b * n_tok + 1, :] for b in range(batch)], axis=0)   # (B, D)
    hn = _layernorm(cls_tok, hg_ref[...], hb_ref[...])
    o_ref[...] = (jnp.dot(hn, hw_ref[...], preferred_element_type=jnp.float32)
                  + hbb_ref[...]).astype(o_ref.dtype)


# ----------------------------- wrapper --------------------------------------

def vit_forward(img, p, cfg):
    B, Cch, H, W = img.shape
    ps = cfg["patch_size"]
    Hn, Wn = H // ps, W // ps
    D = cfg["dim"]
    depth = cfg["depth"]
    heads = cfg["heads"]
    dh = cfg["dim_head"]
    mlp = cfg["mlp_dim"]
    C = cfg["num_classes"]
    P = Hn * Wn
    N = P + 1
    M = B * N
    PD = Cch * ps * ps

    # Layout glue: 'b c (h p1) (w p2) -> b (h w) (p1 p2 c)', plus a zero row
    # per batch at the cls slot so the kernel's single matmul + add-table
    # produces the cls / pos / patch-bias rows directly.
    patches = img.reshape(B, Cch, Hn, ps, Wn, ps)
    patches = patches.transpose(0, 2, 4, 3, 5, 1).reshape(B, P, PD)
    patches = jnp.pad(patches, ((0, 0), (1, 0), (0, 0))).reshape(M, PD)
    add = jnp.tile(p["embed_add"], (B, 1))                               # (M, D)

    kernel = functools.partial(_vit_forward_kernel, depth=depth,
                               heads=heads, batch=B, n_tok=N)

    def full(shape):
        n = len(shape)
        return pl.BlockSpec(shape, lambda i: (0,) * n)

    shapes = [
        (M, PD), (PD, D), (M, D),
        (depth, 1, D), (depth, 1, D),
        (depth, heads, D, dh), (depth, heads, D, dh), (depth, heads, D, dh),
        (depth, heads, dh, D), (depth, 1, D),
        (depth, 1, D), (depth, 1, D),
        (depth, D, mlp), (depth, 1, mlp), (depth, mlp, D), (depth, 1, D),
        (1, D), (1, D), (D, C), (1, C),
    ]

    # TODO(synk): at real ViT sizes (dim=768, N=197, mlp=3072) tile the token
    # axis, cast MXU operands to bf16 (f32 accum), single-buffer / stream the
    # FFN weights with an explicit vmem_limit_bytes, and split rows/batch over
    # a parallel grid axis so both v7x TensorCores are used.
    return pl.pallas_call(
        kernel,
        out_shape=jax.ShapeDtypeStruct((B, C), jnp.float32),
        grid=(1,),
        in_specs=[full(s) for s in shapes],
        out_specs=full((B, C)),
        compiler_params=pltpu.CompilerParams(dimension_semantics=("arbitrary",)),
    )(patches, p["patch_w"], add,
      p["ln1_g"], p["ln1_b"], p["wq"], p["wk"], p["wv"], p["wo"], p["out_b"],
      p["ln2_g"], p["ln2_b"], p["ff1_w"], p["ff1_b"], p["ff2_w"], p["ff2_b"],
      p["head_ln_g"], p["head_ln_b"], p["head_w"], p["head_b"])


# ----------------------------- params ---------------------------------------

def init_params(key, cfg):
    """Raw parameters in x @ W convention (PyTorch weights transposed)."""
    ih = iw = cfg["image_size"]
    ps = cfg["patch_size"]
    num_patches = (ih // ps) * (iw // ps)
    patch_dim = cfg["channels"] * ps * ps
    dim = cfg["dim"]
    inner = cfg["heads"] * cfg["dim_head"]
    mlp = cfg["mlp_dim"]

    keys = iter(jax.random.split(key, 64))

    def w(shape, scale=0.02):
        return (scale * jax.random.normal(next(keys), shape)).astype(jnp.float32)

    params = {
        "patch_w": w((patch_dim, dim)),
        "patch_b": jnp.zeros((dim,), jnp.float32),
        "pos_emb": w((1, num_patches + 1, dim), scale=1.0),
        "cls_token": w((1, 1, dim), scale=1.0),
        "layers": [],
        "head_ln_g": jnp.ones((dim,), jnp.float32),
        "head_ln_b": jnp.zeros((dim,), jnp.float32),
        "head_w": w((dim, cfg["num_classes"])),
        "head_b": jnp.zeros((cfg["num_classes"],), jnp.float32),
    }
    for _ in range(cfg["depth"]):
        params["layers"].append({
            "ln1_g": jnp.ones((dim,), jnp.float32),
            "ln1_b": jnp.zeros((dim,), jnp.float32),
            "qkv_w": w((dim, 3 * inner)),          # nn.Linear(..., bias=False)
            "out_w": w((inner, dim)),
            "out_b": jnp.zeros((dim,), jnp.float32),
            "ln2_g": jnp.ones((dim,), jnp.float32),
            "ln2_b": jnp.zeros((dim,), jnp.float32),
            "ff1_w": w((dim, mlp)),
            "ff1_b": jnp.zeros((mlp,), jnp.float32),
            "ff2_w": w((mlp, dim)),
            "ff2_b": jnp.zeros((dim,), jnp.float32),
        })
    return params


def prepare_pallas_params(raw, cfg):
    """One-time, HBM-side weight transforms (head split, scale fold, stacks)."""
    D = cfg["dim"]
    heads = cfg["heads"]
    dh = cfg["dim_head"]
    inner = heads * dh
    mlp = cfg["mlp_dim"]
    scale = dh ** (-0.5)
    layers = raw["layers"]

    pos = raw["pos_emb"][0]            # (N, D)
    cls = raw["cls_token"][0, 0]       # (D,)
    # row 0: cls + pos[0]; rows i>0: patch_bias + pos[i]
    embed_add = jnp.concatenate(
        [(cls + pos[0])[None, :], raw["patch_b"][None, :] + pos[1:]], axis=0)

    def stack(fn):
        return jnp.stack([fn(l) for l in layers])

    def split_q(l):        # scale folded into Q columns
        return (l["qkv_w"][:, :inner] * scale).reshape(D, heads, dh).transpose(1, 0, 2)

    def split_k(l):
        return l["qkv_w"][:, inner:2 * inner].reshape(D, heads, dh).transpose(1, 0, 2)

    def split_v(l):
        return l["qkv_w"][:, 2 * inner:].reshape(D, heads, dh).transpose(1, 0, 2)

    return {
        "patch_w": raw["patch_w"],
        "embed_add": embed_add,                                   # (N, D)
        "ln1_g": stack(lambda l: l["ln1_g"].reshape(1, D)),
        "ln1_b": stack(lambda l: l["ln1_b"].reshape(1, D)),
        "wq": stack(split_q),                                     # (depth, H, D, dh)
        "wk": stack(split_k),
        "wv": stack(split_v),
        "wo": stack(lambda l: l["out_w"].reshape(heads, dh, D)),  # (depth, H, dh, D)
        "out_b": stack(lambda l: l["out_b"].reshape(1, D)),
        "ln2_g": stack(lambda l: l["ln2_g"].reshape(1, D)),
        "ln2_b": stack(lambda l: l["ln2_b"].reshape(1, D)),
        "ff1_w": stack(lambda l: l["ff1_w"]),
        "ff1_b": stack(lambda l: l["ff1_b"].reshape(1, mlp)),
        "ff2_w": stack(lambda l: l["ff2_w"]),
        "ff2_b": stack(lambda l: l["ff2_b"].reshape(1, D)),
        "head_ln_g": raw["head_ln_g"].reshape(1, D),
        "head_ln_b": raw["head_ln_b"].reshape(1, D),
        "head_w": raw["head_w"],
        "head_b": raw["head_b"].reshape(1, cfg["num_classes"]),
    }


# ---------------------------------- main ------------------------------------

if __name__ == "__main__":
    key = jax.random.PRNGKey(0)
    k_img, k_params = jax.random.split(key)

    img = jax.random.normal(
        k_img,
        (2, CFG["channels"], CFG["image_size"], CFG["image_size"]),
        dtype=jnp.float32,
    )
    raw_params = init_params(k_params, CFG)
    params = prepare_pallas_params(raw_params, CFG)

    fwd = jax.jit(functools.partial(vit_forward, cfg=CFG))
    logits = fwd(img, params)
    jax.block_until_ready(logits)

    assert logits.shape == (2, CFG["num_classes"]), logits.shape
    assert bool(jnp.all(jnp.isfinite(logits)))
    print("KERNEL_OK")
</pallas_src>

<mosaic_0001>
module attributes {stable_mosaic.version = 11 : i64} {
  func.func @_vit_forward_kernel(%arg0: i32, %arg1: memref<34x48xf32, #tpu.memory_space<vmem>>, %arg2: memref<48x32xf32, #tpu.memory_space<vmem>>, %arg3: memref<34x32xf32, #tpu.memory_space<vmem>>, %arg4: memref<2x1x32xf32, #tpu.memory_space<vmem>>, %arg5: memref<2x1x32xf32, #tpu.memory_space<vmem>>, %arg6: memref<2x4x32x8xf32, #tpu.memory_space<vmem>>, %arg7: memref<2x4x32x8xf32, #tpu.memory_space<vmem>>, %arg8: memref<2x4x32x8xf32, #tpu.memory_space<vmem>>, %arg9: memref<2x4x8x32xf32, #tpu.memory_space<vmem>>, %arg10: memref<2x1x32xf32, #tpu.memory_space<vmem>>, %arg11: memref<2x1x32xf32, #tpu.memory_space<vmem>>, %arg12: memref<2x1x32xf32, #tpu.memory_space<vmem>>, %arg13: memref<2x32x64xf32, #tpu.memory_space<vmem>>, %arg14: memref<2x1x64xf32, #tpu.memory_space<vmem>>, %arg15: memref<2x64x32xf32, #tpu.memory_space<vmem>>, %arg16: memref<2x1x32xf32, #tpu.memory_space<vmem>>, %arg17: memref<1x32xf32, #tpu.memory_space<vmem>>, %arg18: memref<1x32xf32, #tpu.memory_space<vmem>>, %arg19: memref<32x10xf32, #tpu.memory_space<vmem>>, %arg20: memref<1x10xf32, #tpu.memory_space<vmem>>, %arg21: memref<2x10xf32, #tpu.memory_space<vmem>>) attributes {dimension_semantics = [#tpu.dimension_semantics<arbitrary>], iteration_bounds = array<i64: 1>, scalar_prefetch = 0 : i64, scratch_operands = 0 : i64, tpu.core_type = #tpu.core_type<tc>, window_params = [{pipeline_mode = #tpu.pipeline_mode<synchronous>, transform_indices = @transform_0, window_bounds = array<i64: 34, 48>}, {pipeline_mode = #tpu.pipeline_mode<synchronous>, transform_indices = @transform_1, window_bounds = array<i64: 48, 32>}, {pipeline_mode = #tpu.pipeline_mode<synchronous>, transform_indices = @transform_2, window_bounds = array<i64: 34, 32>}, {pipeline_mode = #tpu.pipeline_mode<synchronous>, transform_indices = @transform_3, window_bounds = array<i64: 2, 1, 32>}, {pipeline_mode = #tpu.pipeline_mode<synchronous>, transform_indices = @transform_4, window_bounds = array<i64: 2, 1, 32>}, {pipeline_mode = #tpu.pipeline_mode<synchronous>, transform_indices = @transform_5, window_bounds = array<i64: 2, 4, 32, 8>}, {pipeline_mode = #tpu.pipeline_mode<synchronous>, transform_indices = @transform_6, window_bounds = array<i64: 2, 4, 32, 8>}, {pipeline_mode = #tpu.pipeline_mode<synchronous>, transform_indices = @transform_7, window_bounds = array<i64: 2, 4, 32, 8>}, {pipeline_mode = #tpu.pipeline_mode<synchronous>, transform_indices = @transform_8, window_bounds = array<i64: 2, 4, 8, 32>}, {pipeline_mode = #tpu.pipeline_mode<synchronous>, transform_indices = @transform_9, window_bounds = array<i64: 2, 1, 32>}, {pipeline_mode = #tpu.pipeline_mode<synchronous>, transform_indices = @transform_10, window_bounds = array<i64: 2, 1, 32>}, {pipeline_mode = #tpu.pipeline_mode<synchronous>, transform_indices = @transform_11, window_bounds = array<i64: 2, 1, 32>}, {pipeline_mode = #tpu.pipeline_mode<synchronous>, transform_indices = @transform_12, window_bounds = array<i64: 2, 32, 64>}, {pipeline_mode = #tpu.pipeline_mode<synchronous>, transform_indices = @transform_13, window_bounds = array<i64: 2, 1, 64>}, {pipeline_mode = #tpu.pipeline_mode<synchronous>, transform_indices = @transform_14, window_bounds = array<i64: 2, 64, 32>}, {pipeline_mode = #tpu.pipeline_mode<synchronous>, transform_indices = @transform_15, window_bounds = array<i64: 2, 1, 32>}, {pipeline_mode = #tpu.pipeline_mode<synchronous>, transform_indices = @transform_16, window_bounds = array<i64: 1, 32>}, {pipeline_mode = #tpu.pipeline_mode<synchronous>, transform_indices = @transform_17, window_bounds = array<i64: 1, 32>}, {pipeline_mode = #tpu.pipeline_mode<synchronous>, transform_indices = @transform_18, window_bounds = array<i64: 32, 10>}, {pipeline_mode = #tpu.pipeline_mode<synchronous>, transform_indices = @transform_19, window_bounds = array<i64: 1, 10>}, {pipeline_mode = #tpu.pipeline_mode<synchronous>, transform_indices = @transform_20, window_bounds = array<i64: 2, 10>}]} {
    %c0 = arith.constant 0 : index
    %c0_0 = arith.constant 0 : index
    %0 = vector.load %arg1[%c0, %c0_0] : memref<34x48xf32, #tpu.memory_space<vmem>>, vector<34x48xf32>
    %c0_1 = arith.constant 0 : index
    %c0_2 = arith.constant 0 : index
    %1 = vector.load %arg2[%c0_1, %c0_2] : memref<48x32xf32, #tpu.memory_space<vmem>>, vector<48x32xf32>
    %cst = arith.constant dense<0.000000e+00> : vector<34x32xf32>
    %2 = tpu.matmul %0, %1, %cst {dimension_numbers = #tpu.dot_dimension_numbers<[1], [0], [0], [1], [0, 0, 1, 1], [], []>} : vector<34x48xf32>, vector<48x32xf32>, vector<34x32xf32> -> vector<34x32xf32>
    %c0_3 = arith.constant 0 : index
    %c0_4 = arith.constant 0 : index
    %3 = vector.load %arg3[%c0_3, %c0_4] : memref<34x32xf32, #tpu.memory_space<vmem>>, vector<34x32xf32>
    %4 = arith.addf %2, %3 : vector<34x32xf32>
    %c0_5 = arith.constant 0 : index
    %c0_6 = arith.constant 0 : index
    %c0_7 = arith.constant 0 : index
    %5 = vector.load %arg4[%c0_5, %c0_6, %c0_7] : memref<2x1x32xf32, #tpu.memory_space<vmem>>, vector<1x1x32xf32>
    %6 = vector.shape_cast %5 : vector<1x1x32xf32> to vector<1x32xf32>
    %c0_8 = arith.constant 0 : index
    %c0_9 = arith.constant 0 : index
    %c0_10 = arith.constant 0 : index
    %7 = vector.load %arg5[%c0_8, %c0_9, %c0_10] : memref<2x1x32xf32, #tpu.memory_space<vmem>>, vector<1x1x32xf32>
    %8 = vector.shape_cast %7 : vector<1x1x32xf32> to vector<1x32xf32>
    %cst_11 = arith.constant dense<0.000000e+00> : vector<34xf32>
    %9 = vector.multi_reduction <add>, %4, %cst_11 [1] : vector<34x32xf32> to vector<34xf32>
    %10 = vector.shape_cast %9 : vector<34xf32> to vector<34x1xf32>
    %cst_12 = arith.constant 3.200000e+01 : f32
    %11 = vector.broadcast %cst_12 : f32 to vector<34x1xf32>
    %12 = arith.divf %10, %11 : vector<34x1xf32>
    %13 = vector.broadcast %12 : vector<34x1xf32> to vector<34x32xf32>
    %14 = arith.subf %4, %13 : vector<34x32xf32>
    %15 = arith.mulf %14, %14 : vector<34x32xf32>
    %cst_13 = arith.constant dense<0.000000e+00> : vector<34xf32>
    %16 = vector.multi_reduction <add>, %15, %cst_13 [1] : vector<34x32xf32> to vector<34xf32>
    %17 = vector.shape_cast %16 : vector<34xf32> to vector<34x1xf32>
    %cst_14 = arith.constant 3.200000e+01 : f32
    %18 = vector.broadcast %cst_14 : f32 to vector<34x1xf32>
    %19 = arith.divf %17, %18 : vector<34x1xf32>
    %20 = vector.broadcast %12 : vector<34x1xf32> to vector<34x32xf32>
    %21 = arith.subf %4, %20 : vector<34x32xf32>
    %cst_15 = arith.constant 9.99999974E-6 : f32
    %22 = vector.broadcast %cst_15 : f32 to vector<34x1xf32>
    %23 = arith.addf %19, %22 : vector<34x1xf32>
    %24 = math.rsqrt %23 : vector<34x1xf32>
    %25 = vector.broadcast %24 : vector<34x1xf32> to vector<34x32xf32>
    %26 = arith.mulf %21, %25 : vector<34x32xf32>
    %27 = vector.broadcast %6 : vector<1x32xf32> to vector<34x32xf32>
    %28 = arith.mulf %26, %27 : vector<34x32xf32>
    %29 = vector.broadcast %8 : vector<1x32xf32> to vector<34x32xf32>
    %30 = arith.addf %28, %29 : vector<34x32xf32>
    %cst_16 = arith.constant 0.000000e+00 : f32
    %31 = vector.broadcast %cst_16 : f32 to vector<17x32xf32>
    %cst_17 = arith.constant 0.000000e+00 : f32
    %32 = vector.broadcast %cst_17 : f32 to vector<17x32xf32>
    %c0_18 = arith.constant 0 : index
    %c0_19 = arith.constant 0 : index
    %c0_20 = arith.constant 0 : index
    %c0_21 = arith.constant 0 : index
    %33 = vector.load %arg6[%c0_18, %c0_19, %c0_20, %c0_21] : memref<2x4x32x8xf32, #tpu.memory_space<vmem>>, vector<1x1x32x8xf32>
    %34 = vector.shape_cast %33 : vector<1x1x32x8xf32> to vector<32x8xf32>
    %cst_22 = arith.constant dense<0.000000e+00> : vector<34x8xf32>
    %35 = tpu.matmul %30, %34, %cst_22 {dimension_numbers = #tpu.dot_dimension_numbers<[1], [0], [0], [1], [0, 0, 1, 1], [], []>} : vector<34x32xf32>, vector<32x8xf32>, vector<34x8xf32> -> vector<34x8xf32>
    %c0_23 = arith.constant 0 : index
    %c0_24 = arith.constant 0 : index
    %c0_25 = arith.constant 0 : index
    %c0_26 = arith.constant 0 : index
    %36 = vector.load %arg7[%c0_23, %c0_24, %c0_25, %c0_26] : memref<2x4x32x8xf32, #tpu.memory_space<vmem>>, vector<1x1x32x8xf32>
    %37 = vector.shape_cast %36 : vector<1x1x32x8xf32> to vector<32x8xf32>
    %cst_27 = arith.constant dense<0.000000e+00> : vector<34x8xf32>
    %38 = tpu.matmul %30, %37, %cst_27 {dimension_numbers = #tpu.dot_dimension_numbers<[1], [0], [0], [1], [0, 0, 1, 1], [], []>} : vector<34x32xf32>, vector<32x8xf32>, vector<34x8xf32> -> vector<34x8xf32>
    %c0_28 = arith.constant 0 : index
    %c0_29 = arith.constant 0 : index
    %c0_30 = arith.constant 0 : index
    %c0_31 = arith.constant 0 : index
    %39 = vector.load %arg8[%c0_28, %c0_29, %c0_30, %c0_31] : memref<2x4x32x8xf32, #tpu.memory_space<vmem>>, vector<1x1x32x8xf32>
    %40 = vector.shape_cast %39 : vector<1x1x32x8xf32> to vector<32x8xf32>
    %cst_32 = arith.constant dense<0.000000e+00> : vector<34x8xf32>
    %41 = tpu.matmul %30, %40, %cst_32 {dimension_numbers = #tpu.dot_dimension_numbers<[1], [0], [0], [1], [0, 0, 1, 1], [], []>} : vector<34x32xf32>, vector<32x8xf32>, vector<34x8xf32> -> vector<34x8xf32>
    %42 = vector.extract_strided_slice %35 {offsets = [0, 0], sizes = [17, 8], strides = [1, 1]} : vector<34x8xf32> to vector<17x8xf32>
    %43 = vector.extract_strided_slice %38 {offsets = [0, 0], sizes = [17, 8], strides = [1, 1]} : vector<34x8xf32> to vector<17x8xf32>
    %44 = vector.extract_strided_slice %41 {offsets = [0, 0], sizes = [17, 8], strides = [1, 1]} : vector<34x8xf32> to vector<17x8xf32>
    %45 = tpu.transpose %43, [1, 0] : vector<17x8xf32> -> vector<8x17xf32>
    %cst_33 = arith.constant dense<0.000000e+00> : vector<17x17xf32>
    %46 = tpu.matmul %42, %45, %cst_33 {dimension_numbers = #tpu.dot_dimension_numbers<[1], [0], [0], [1], [0, 0, 1, 1], [], []>} : vector<17x8xf32>, vector<8x17xf32>, vector<17x17xf32> -> vector<17x17xf32>
    %cst_34 = arith.constant dense<0xFF800000> : vector<17xf32>
    %47 = vector.multi_reduction <maximumf>, %46, %cst_34 [1] : vector<17x17xf32> to vector<17xf32>
    %48 = vector.shape_cast %47 : vector<17xf32> to vector<17x1xf32>
    %49 = vector.broadcast %48 : vector<17x1xf32> to vector<17x17xf32>
    %50 = arith.subf %46, %49 : vector<17x17xf32>
    %51 = math.exp %50 : vector<17x17xf32>
    %cst_35 = arith.constant dense<0.000000e+00> : vector<17xf32>
    %52 = vector.multi_reduction <add>, %51, %cst_35 [1] : vector<17x17xf32> to vector<17xf32>
    %53 = vector.shape_cast %52 : vector<17xf32> to vector<17x1xf32>
    %54 = tpu.reciprocal %53 {approx = true} : vector<17x1xf32> -> vector<17x1xf32>
    %55 = vector.broadcast %54 : vector<17x1xf32> to vector<17x17xf32>
    %56 = arith.mulf %51, %55 : vector<17x17xf32>
    %cst_36 = arith.constant dense<0.000000e+00> : vector<17x8xf32>
    %57 = tpu.matmul %56, %44, %cst_36 {dimension_numbers = #tpu.dot_dimension_numbers<[1], [0], [0], [1], [0, 0, 1, 1], [], []>} : vector<17x17xf32>, vector<17x8xf32>, vector<17x8xf32> -> vector<17x8xf32>
    %c0_37 = arith.constant 0 : index
    %c0_38 = arith.constant 0 : index
    %c0_39 = arith.constant 0 : index
    %c0_40 = arith.constant 0 : index
    %58 = vector.load %arg9[%c0_37, %c0_38, %c0_39, %c0_40] : memref<2x4x8x32xf32, #tpu.memory_space<vmem>>, vector<1x1x8x32xf32>
    %59 = vector.shape_cast %58 : vector<1x1x8x32xf32> to vector<8x32xf32>
    %cst_41 = arith.constant dense<0.000000e+00> : vector<17x32xf32>
    %60 = tpu.matmul %57, %59, %cst_41 {dimension_numbers = #tpu.dot_dimension_numbers<[1], [0], [0], [1], [0, 0, 1, 1], [], []>} : vector<17x8xf32>, vector<8x32xf32>, vector<17x32xf32> -> vector<17x32xf32>
    %61 = arith.addf %31, %60 : vector<17x32xf32>
    %62 = vector.extract_strided_slice %35 {offsets = [17, 0], sizes = [17, 8], strides = [1, 1]} : vector<34x8xf32> to vector<17x8xf32>
    %63 = vector.extract_strided_slice %38 {offsets = [17, 0], sizes = [17, 8], strides = [1, 1]} : vector<34x8xf32> to vector<17x8xf32>
    %64 = vector.extract_strided_slice %41 {offsets = [17, 0], sizes = [17, 8], strides = [1, 1]} : vector<34x8xf32> to vector<17x8xf32>
    %65 = tpu.transpose %63, [1, 0] : vector<17x8xf32> -> vector<8x17xf32>
    %cst_42 = arith.constant dense<0.000000e+00> : vector<17x17xf32>
    %66 = tpu.matmul %62, %65, %cst_42 {dimension_numbers = #tpu.dot_dimension_numbers<[1], [0], [0], [1], [0, 0, 1, 1], [], []>} : vector<17x8xf32>, vector<8x17xf32>, vector<17x17xf32> -> vector<17x17xf32>
    %cst_43 = arith.constant dense<0xFF800000> : vector<17xf32>
    %67 = vector.multi_reduction <maximumf>, %66, %cst_43 [1] : vector<17x17xf32> to vector<17xf32>
    %68 = vector.shape_cast %67 : vector<17xf32> to vector<17x1xf32>
    %69 = vector.broadcast %68 : vector<17x1xf32> to vector<17x17xf32>
    %70 = arith.subf %66, %69 : vector<17x17xf32>
    %71 = math.exp %70 : vector<17x17xf32>
    %cst_44 = arith.constant dense<0.000000e+00> : vector<17xf32>
    %72 = vector.multi_reduction <add>, %71, %cst_44 [1] : vector<17x17xf32> to vector<17xf32>
    %73 = vector.shape_cast %72 : vector<17xf32> to vector<17x1xf32>
    %74 = tpu.reciprocal %73 {approx = true} : vector<17x1xf32> -> vector<17x1xf32>
    %75 = vector.broadcast %74 : vector<17x1xf32> to vector<17x17xf32>
    %76 = arith.mulf %71, %75 : vector<17x17xf32>
    %cst_45 = arith.constant dense<0.000000e+00> : vector<17x8xf32>
    %77 = tpu.matmul %76, %64, %cst_45 {dimension_numbers = #tpu.dot_dimension_numbers<[1], [0], [0], [1], [0, 0, 1, 1], [], []>} : vector<17x17xf32>, vector<17x8xf32>, vector<17x8xf32> -> vector<17x8xf32>
    %c0_46 = arith.constant 0 : index
    %c0_47 = arith.constant 0 : index
    %c0_48 = arith.constant 0 : index
    %c0_49 = arith.constant 0 : index
    %78 = vector.load %arg9[%c0_46, %c0_47, %c0_48, %c0_49] : memref<2x4x8x32xf32, #tpu.memory_space<vmem>>, vector<1x1x8x32xf32>
    %79 = vector.shape_cast %78 : vector<1x1x8x32xf32> to vector<8x32xf32>
    %cst_50 = arith.constant dense<0.000000e+00> : vector<17x32xf32>
    %80 = tpu.matmul %77, %79, %cst_50 {dimension_numbers = #tpu.dot_dimension_numbers<[1], [0], [0], [1], [0, 0, 1, 1], [], []>} : vector<17x8xf32>, vector<8x32xf32>, vector<17x32xf32> -> vector<17x32xf32>
    %81 = arith.addf %32, %80 : vector<17x32xf32>
    %c0_51 = arith.constant 0 : index
    %c1 = arith.constant 1 : index
    %c0_52 = arith.constant 0 : index
    %c0_53 = arith.constant 0 : index
    %82 = vector.load %arg6[%c0_51, %c1, %c0_52, %c0_53] : memref<2x4x32x8xf32, #tpu.memory_space<vmem>>, vector<1x1x32x8xf32>
    %83 = vector.shape_cast %82 : vector<1x1x32x8xf32> to vector<32x8xf32>
    %cst_54 = arith.constant dense<0.000000e+00> : vector<34x8xf32>
    %84 = tpu.matmul %30, %83, %cst_54 {dimension_numbers = #tpu.dot_dimension_numbers<[1], [0], [0], [1], [0, 0, 1, 1], [], []>} : vector<34x32xf32>, vector<32x8xf32>, vector<34x8xf32> -> vector<34x8xf32>
    %c0_55 = arith.constant 0 : index
    %c1_56 = arith.constant 1 : index
    %c0_57 = arith.constant 0 : index
    %c0_58 = arith.constant 0 : index
    %85 = vector.load %arg7[%c0_55, %c1_56, %c0_57, %c0_58] : memref<2x4x32x8xf32, #tpu.memory_space<vmem>>, vector<1x1x32x8xf32>
    %86 = vector.shape_cast %85 : vector<1x1x32x8xf32> to vector<32x8xf32>
    %cst_59 = arith.constant dense<0.000000e+00> : vector<34x8xf32>
    %87 = tpu.matmul %30, %86, %cst_59 {dimension_numbers = #tpu.dot_dimension_numbers<[1], [0], [0], [1], [0, 0, 1, 1], [], []>} : vector<34x32xf32>, vector<32x8xf32>, vector<34x8xf32> -> vector<34x8xf32>
    %c0_60 = arith.constant 0 : index
    %c1_61 = arith.constant 1 : index
    %c0_62 = arith.constant 0 : index
    %c0_63 = arith.constant 0 : index
    %88 = vector.load %arg8[%c0_60, %c1_61, %c0_62, %c0_63] : memref<2x4x32x8xf32, #tpu.memory_space<vmem>>, vector<1x1x32x8xf32>
    %89 = vector.shape_cast %88 : vector<1x1x32x8xf32> to vector<32x8xf32>
    %cst_64 = arith.constant dense<0.000000e+00> : vector<34x8xf32>
    %90 = tpu.matmul %30, %89, %cst_64 {dimension_numbers = #tpu.dot_dimension_numbers<[1], [0], [0], [1], [0, 0, 1, 1], [], []>} : vector<34x32xf32>, vector<32x8xf32>, vector<34x8xf32> -> vector<34x8xf32>
    %91 = vector.extract_strided_slice %84 {offsets = [0, 0], sizes = [17, 8], strides = [1, 1]} : vector<34x8xf32> to vector<17x8xf32>
    %92 = vector.extract_strided_slice %87 {offsets = [0, 0], sizes = [17, 8], strides = [1, 1]} : vector<34x8xf32> to vector<17x8xf32>
    %93 = vector.extract_strided_slice %90 {offsets = [0, 0], sizes = [17, 8], strides = [1, 1]} : vector<34x8xf32> to vector<17x8xf32>
    %94 = tpu.transpose %92, [1, 0] : vector<17x8xf32> -> vector<8x17xf32>
    %cst_65 = arith.constant dense<0.000000e+00> : vector<17x17xf32>
    %95 = tpu.matmul %91, %94, %cst_65 {dimension_numbers = #tpu.dot_dimension_numbers<[1], [0], [0], [1], [0, 0, 1, 1], [], []>} : vector<17x8xf32>, vector<8x17xf32>, vector<17x17xf32> -> vector<17x17xf32>
    %cst_66 = arith.constant dense<0xFF800000> : vector<17xf32>
    %96 = vector.multi_reduction <maximumf>, %95, %cst_66 [1] : vector<17x17xf32> to vector<17xf32>
    %97 = vector.shape_cast %96 : vector<17xf32> to vector<17x1xf32>
    %98 = vector.broadcast %97 : vector<17x1xf32> to vector<17x17xf32>
    %99 = arith.subf %95, %98 : vector<17x17xf32>
    %100 = math.exp %99 : vector<17x17xf32>
    %cst_67 = arith.constant dense<0.000000e+00> : vector<17xf32>
    %101 = vector.multi_reduction <add>, %100, %cst_67 [1] : vector<17x17xf32> to vector<17xf32>
    %102 = vector.shape_cast %101 : vector<17xf32> to vector<17x1xf32>
    %103 = tpu.reciprocal %102 {approx = true} : vector<17x1xf32> -> vector<17x1xf32>
    %104 = vector.broadcast %103 : vector<17x1xf32> to vector<17x17xf32>
    %105 = arith.mulf %100, %104 : vector<17x17xf32>
    %cst_68 = arith.constant dense<0.000000e+00> : vector<17x8xf32>
    %106 = tpu.matmul %105, %93, %cst_68 {dimension_numbers = #tpu.dot_dimension_numbers<[1], [0], [0], [1], [0, 0, 1, 1], [], []>} : vector<17x17xf32>, vector<17x8xf32>, vector<17x8xf32> -> vector<17x8xf32>
    %c0_69 = arith.constant 0 : index
    %c1_70 = arith.constant 1 : index
    %c0_71 = arith.constant 0 : index
    %c0_72 = arith.constant 0 : index
    %107 = vector.load %arg9[%c0_69, %c1_70, %c0_71, %c0_72] : memref<2x4x8x32xf32, #tpu.memory_space<vmem>>, vector<1x1x8x32xf32>
    %108 = vector.shape_cast %107 : vector<1x1x8x32xf32> to vector<8x32xf32>
    %cst_73 = arith.constant dense<0.000000e+00> : vector<17x32xf32>
    %109 = tpu.matmul %106, %108, %cst_73 {dimension_numbers = #tpu.dot_dimension_numbers<[1], [0], [0], [1], [0, 0, 1, 1], [], []>} : vector<17x8xf32>, vector<8x32xf32>, vector<17x32xf32> -> vector<17x32xf32>
    %110 = arith.addf %61, %109 : vector<17x32xf32>
    %111 = vector.extract_strided_slice %84 {offsets = [17, 0], sizes = [17, 8], strides = [1, 1]} : vector<34x8xf32> to vector<17x8xf32>
    %112 = vector.extract_strided_slice %87 {offsets = [17, 0], sizes = [17, 8], strides = [1, 1]} : vector<34x8xf32> to vector<17x8xf32>
    %113 = vector.extract_strided_slice %90 {offsets = [17, 0], sizes = [17, 8], strides = [1, 1]} : vector<34x8xf32> to vector<17x8xf32>
    %114 = tpu.transpose %112, [1, 0] : vector<17x8xf32> -> vector<8x17xf32>
    %cst_74 = arith.constant dense<0.000000e+00> : vector<17x17xf32>
    %115 = tpu.matmul %111, %114, %cst_74 {dimension_numbers = #tpu.dot_dimension_numbers<[1], [0], [0], [1], [0, 0, 1, 1], [], []>} : vector<17x8xf32>, vector<8x17xf32>, vector<17x17xf32> -> vector<17x17xf32>
    %cst_75 = arith.constant dense<0xFF800000> : vector<17xf32>
    %116 = vector.multi_reduction <maximumf>, %115, %cst_75 [1] : vector<17x17xf32> to vector<17xf32>
    %117 = vector.shape_cast %116 : vector<17xf32> to vector<17x1xf32>
    %118 = vector.broadcast %117 : vector<17x1xf32> to vector<17x17xf32>
    %119 = arith.subf %115, %118 : vector<17x17xf32>
    %120 = math.exp %119 : vector<17x17xf32>
    %cst_76 = arith.constant dense<0.000000e+00> : vector<17xf32>
    %121 = vector.multi_reduction <add>, %120, %cst_76 [1] : vector<17x17xf32> to vector<17xf32>
    %122 = vector.shape_cast %121 : vector<17xf32> to vector<17x1xf32>
    %123 = tpu.reciprocal %122 {approx = true} : vector<17x1xf32> -> vector<17x1xf32>
    %124 = vector.broadcast %123 : vector<17x1xf32> to vector<17x17xf32>
    %125 = arith.mulf %120, %124 : vector<17x17xf32>
    %cst_77 = arith.constant dense<0.000000e+00> : vector<17x8xf32>
    %126 = tpu.matmul %125, %113, %cst_77 {dimension_numbers = #tpu.dot_dimension_numbers<[1], [0], [0], [1], [0, 0, 1, 1], [], []>} : vector<17x17xf32>, vector<17x8xf32>, vector<17x8xf32> -> vector<17x8xf32>
    %c0_78 = arith.constant 0 : index
    %c1_79 = arith.constant 1 : index
    %c0_80 = arith.constant 0 : index
    %c0_81 = arith.constant 0 : index
    %127 = vector.load %arg9[%c0_78, %c1_79, %c0_80, %c0_81] : memref<2x4x8x32xf32, #tpu.memory_space<vmem>>, vector<1x1x8x32xf32>
    %128 = vector.shape_cast %127 : vector<1x1x8x32xf32> to vector<8x32xf32>
    %cst_82 = arith.constant dense<0.000000e+00> : vector<17x32xf32>
    %129 = tpu.matmul %126, %128, %cst_82 {dimension_numbers = #tpu.dot_dimension_numbers<[1], [0], [0], [1], [0, 0, 1, 1], [], []>} : vector<17x8xf32>, vector<8x32xf32>, vector<17x32xf32> -> vector<17x32xf32>
    %130 = arith.addf %81, %129 : vector<17x32xf32>
    %c0_83 = arith.constant 0 : index
    %c2 = arith.constant 2 : index
    %c0_84 = arith.constant 0 : index
    %c0_85 = arith.constant 0 : index
    %131 = vector.load %arg6[%c0_83, %c2, %c0_84, %c0_85] : memref<2x4x32x8xf32, #tpu.memory_space<vmem>>, vector<1x1x32x8xf32>
    %132 = vector.shape_cast %131 : vector<1x1x32x8xf32> to vector<32x8xf32>
    %cst_86 = arith.constant dense<0.000000e+00> : vector<34x8xf32>
    %133 = tpu.matmul %30, %132, %cst_86 {dimension_numbers = #tpu.dot_dimension_numbers<[1], [0], [0], [1], [0, 0, 1, 1], [], []>} : vector<34x32xf32>, vector<32x8xf32>, vector<34x8xf32> -> vector<34x8xf32>
    %c0_87 = arith.constant 0 : index
    %c2_88 = arith.constant 2 : index
    %c0_89 = arith.constant 0 : index
    %c0_90 = arith.constant 0 : index
    %134 = vector.load %arg7[%c0_87, %c2_88, %c0_89, %c0_90] : memref<2x4x32x8xf32, #tpu.memory_space<vmem>>, vector<1x1x32x8xf32>
    %135 = vector.shape_cast %134 : vector<1x1x32x8xf32> to vector<32x8xf32>
    %cst_91 = arith.constant dense<0.000000e+00> : vector<34x8xf32>
    %136 = tpu.matmul %30, %135, %cst_91 {dimension_numbers = #tpu.dot_dimension_numbers<[1], [0], [0], [1], [0, 0, 1, 1], [], []>} : vector<34x32xf32>, vector<32x8xf32>, vector<34x8xf32> -> vector<34x8xf32>
    %c0_92 = arith.constant 0 : index
    %c2_93 = arith.constant 2 : index
    %c0_94 = arith.constant 0 : index
    %c0_95 = arith.constant 0 : index
    %137 = vector.load %arg8[%c0_92, %c2_93, %c0_94, %c0_95] : memref<2x4x32x8xf32, #tpu.memory_space<vmem>>, vector<1x1x32x8xf32>
    %138 = vector.shape_cast %137 : vector<1x1x32x8xf32> to vector<32x8xf32>
    %cst_96 = arith.constant dense<0.000000e+00> : vector<34x8xf32>
    %139 = tpu.matmul %30, %138, %cst_96 {dimension_numbers = #tpu.dot_dimension_numbers<[1], [0], [0], [1], [0, 0, 1, 1], [], []>} : vector<34x32xf32>, vector<32x8xf32>, vector<34x8xf32> -> vector<34x8xf32>
    %140 = vector.extract_strided_slice %133 {offsets = [0, 0], sizes = [17, 8], strides = [1, 1]} : vector<34x8xf32> to vector<17x8xf32>
    %141 = vector.extract_strided_slice %136 {offsets = [0, 0], sizes = [17, 8], strides = [1, 1]} : vector<34x8xf32> to vector<17x8xf32>
    %142 = vector.extract_strided_slice %139 {offsets = [0, 0], sizes = [17, 8], strides = [1, 1]} : vector<34x8xf32> to vector<17x8xf32>
    %143 = tpu.transpose %141, [1, 0] : vector<17x8xf32> -> vector<8x17xf32>
    %cst_97 = arith.constant dense<0.000000e+00> : vector<17x17xf32>
    %144 = tpu.matmul %140, %143, %cst_97 {dimension_numbers = #tpu.dot_dimension_numbers<[1], [0], [0], [1], [0, 0, 1, 1], [], []>} : vector<17x8xf32>, vector<8x17xf32>, vector<17x17xf32> -> vector<17x17xf32>
    %cst_98 = arith.constant dense<0xFF800000> : vector<17xf32>
    %145 = vector.multi_reduction <maximumf>, %144, %cst_98 [1] : vector<17x17xf32> to vector<17xf32>
    %146 = vector.shape_cast %145 : vector<17xf32> to vector<17x1xf32>
    %147 = vector.broadcast %146 : vector<17x1xf32> to vector<17x17xf32>
    %148 = arith.subf %144, %147 : vector<17x17xf32>
    %149 = math.exp %148 : vector<17x17xf32>
    %cst_99 = arith.constant dense<0.000000e+00> : vector<17xf32>
    %150 = vector.multi_reduction <add>, %149, %cst_99 [1] : vector<17x17xf32> to vector<17xf32>
    %151 = vector.shape_cast %150 : vector<17xf32> to vector<17x1xf32>
    %152 = tpu.reciprocal %151 {approx = true} : vector<17x1xf32> -> vector<17x1xf32>
    %153 = vector.broadcast %152 : vector<17x1xf32> to vector<17x17xf32>
    %154 = arith.mulf %149, %153 : vector<17x17xf32>
    %cst_100 = arith.constant dense<0.000000e+00> : vector<17x8xf32>
    %155 = tpu.matmul %154, %142, %cst_100 {dimension_numbers = #tpu.dot_dimension_numbers<[1], [0], [0], [1], [0, 0, 1, 1], [], []>} : vector<17x17xf32>, vector<17x8xf32>, vector<17x8xf32> -> vector<17x8xf32>
    %c0_101 = arith.constant 0 : index
    %c2_102 = arith.constant 2 : index
    %c0_103 = arith.constant 0 : index
    %c0_104 = arith.constant 0 : index
    %156 = vector.load %arg9[%c0_101, %c2_102, %c0_103, %c0_104] : memref<2x4x8x32xf32, #tpu.memory_space<vmem>>, vector<1x1x8x32xf32>
    %157 = vector.shape_cast %156 : vector<1x1x8x32xf32> to vector<8x32xf32>
    %cst_105 = arith.constant dense<0.000000e+00> : vector<17x32xf32>
    %158 = tpu.matmul %155, %157, %cst_105 {dimension_numbers = #tpu.dot_dimension_numbers<[1], [0], [0], [1], [0, 0, 1, 1], [], []>} : vector<17x8xf32>, vector<8x32xf32>, vector<17x32xf32> -> vector<17x32xf32>
    %159 = arith.addf %110, %158 : vector<17x32xf32>
    %160 = vector.extract_strided_slice %133 {offsets = [17, 0], sizes = [17, 8], strides = [1, 1]} : vector<34x8xf32> to vector<17x8xf32>
    %161 = vector.extract_strided_slice %136 {offsets = [17, 0], sizes = [17, 8], strides = [1, 1]} : vector<34x8xf32> to vector<17x8xf32>
    %162 = vector.extract_strided_slice %139 {offsets = [17, 0], sizes = [17, 8], strides = [1, 1]} : vector<34x8xf32> to vector<17x8xf32>
    %163 = tpu.transpose %161, [1, 0] : vector<17x8xf32> -> vector<8x17xf32>
    %cst_106 = arith.constant dense<0.000000e+00> : vector<17x17xf32>
    %164 = tpu.matmul %160, %163, %cst_106 {dimension_numbers = #tpu.dot_dimension_numbers<[1], [0], [0], [1], [0, 0, 1, 1], [], []>} : vector<17x8xf32>, vector<8x17xf32>, vector<17x17xf32> -> vector<17x17xf32>
    %cst_107 = arith.constant dense<0xFF800000> : vector<17xf32>
    %165 = vector.multi_reduction <maximumf>, %164, %cst_107 [1] : vector<17x17xf32> to vector<17xf32>
    %166 = vector.shape_cast %165 : vector<17xf32> to vector<17x1xf32>
    %167 = vector.broadcast %166 : vector<17x1xf32> to vector<17x17xf32>
    %168 = arith.subf %164, %167 : vector<17x17xf32>
    %169 = math.exp %168 : vector<17x17xf32>
    %cst_108 = arith.constant dense<0.000000e+00> : vector<17xf32>
    %170 = vector.multi_reduction <add>, %169, %cst_108 [1] : vector<17x17xf32> to vector<17xf32>
    %171 = vector.shape_cast %170 : vector<17xf32> to vector<17x1xf32>
    %172 = tpu.reciprocal %171 {approx = true} : vector<17x1xf32> -> vector<17x1xf32>
    %173 = vector.broadcast %172 : vector<17x1xf32> to vector<17x17xf32>
    %174 = arith.mulf %169, %173 : vector<17x17xf32>
    %cst_109 = arith.constant dense<0.000000e+00> : vector<17x8xf32>
    %175 = tpu.matmul %174, %162, %cst_109 {dimension_numbers = #tpu.dot_dimension_numbers<[1], [0], [0], [1], [0, 0, 1, 1], [], []>} : vector<17x17xf32>, vector<17x8xf32>, vector<17x8xf32> -> vector<17x8xf32>
    %c0_110 = arith.constant 0 : index
    %c2_111 = arith.constant 2 : index
    %c0_112 = arith.constant 0 : index
    %c0_113 = arith.constant 0 : index
    %176 = vector.load %arg9[%c0_110, %c2_111, %c0_112, %c0_113] : memref<2x4x8x32xf32, #tpu.memory_space<vmem>>, vector<1x1x8x32xf32>
    %177 = vector.shape_cast %176 : vector<1x1x8x32xf32> to vector<8x32xf32>
    %cst_114 = arith.constant dense<0.000000e+00> : vector<17x32xf32>
    %178 = tpu.matmul %175, %177, %cst_114 {dimension_numbers = #tpu.dot_dimension_numbers<[1], [0], [0], [1], [0, 0, 1, 1], [], []>} : vector<17x8xf32>, vector<8x32xf32>, vector<17x32xf32> -> vector<17x32xf32>
    %179 = arith.addf %130, %178 : vector<17x32xf32>
    %c0_115 = arith.constant 0 : index
    %c3 = arith.constant 3 : index
    %c0_116 = arith.constant 0 : index
    %c0_117 = arith.constant 0 : index
    %180 = vector.load %arg6[%c0_115, %c3, %c0_116, %c0_117] : memref<2x4x32x8xf32, #tpu.memory_space<vmem>>, vector<1x1x32x8xf32>
    %181 = vector.shape_cast %180 : vector<1x1x32x8xf32> to vector<32x8xf32>
    %cst_118 = arith.constant dense<0.000000e+00> : vector<34x8xf32>
    %182 = tpu.matmul %30, %181, %cst_118 {dimension_numbers = #tpu.dot_dimension_numbers<[1], [0], [0], [1], [0, 0, 1, 1], [], []>} : vector<34x32xf32>, vector<32x8xf32>, vector<34x8xf32> -> vector<34x8xf32>
    %c0_119 = arith.constant 0 : index
    %c3_120 = arith.constant 3 : index
    %c0_121 = arith.constant 0 : index
    %c0_122 = arith.constant 0 : index
    %183 = vector.load %arg7[%c0_119, %c3_120, %c0_121, %c0_122] : memref<2x4x32x8xf32, #tpu.memory_space<vmem>>, vector<1x1x32x8xf32>
    %184 = vector.shape_cast %183 : vector<1x1x32x8xf32> to vector<32x8xf32>
    %cst_123 = arith.constant dense<0.000000e+00> : vector<34x8xf32>
    %185 = tpu.matmul %30, %184, %cst_123 {dimension_numbers = #tpu.dot_dimension_numbers<[1], [0], [0], [1], [0, 0, 1, 1], [], []>} : vector<34x32xf32>, vector<32x8xf32>, vector<34x8xf32> -> vector<34x8xf32>
    %c0_124 = arith.constant 0 : index
    %c3_125 = arith.constant 3 : index
    %c0_126 = arith.constant 0 : index
    %c0_127 = arith.constant 0 : index
    %186 = vector.load %arg8[%c0_124, %c3_125, %c0_126, %c0_127] : memref<2x4x32x8xf32, #tpu.memory_space<vmem>>, vector<1x1x32x8xf32>
    %187 = vector.shape_cast %186 : vector<1x1x32x8xf32> to vector<32x8xf32>
    %cst_128 = arith.constant dense<0.000000e+00> : vector<34x8xf32>
    %188 = tpu.matmul %30, %187, %cst_128 {dimension_numbers = #tpu.dot_dimension_numbers<[1], [0], [0], [1], [0, 0, 1, 1], [], []>} : vector<34x32xf32>, vector<32x8xf32>, vector<34x8xf32> -> vector<34x8xf32>
    %189 = vector.extract_strided_slice %182 {offsets = [0, 0], sizes = [17, 8], strides = [1, 1]} : vector<34x8xf32> to vector<17x8xf32>
    %190 = vector.extract_strided_slice %185 {offsets = [0, 0], sizes = [17, 8], strides = [1, 1]} : vector<34x8xf32> to vector<17x8xf32>
    %191 = vector.extract_strided_slice %188 {offsets = [0, 0], sizes = [17, 8], strides = [1, 1]} : vector<34x8xf32> to vector<17x8xf32>
    %192 = tpu.transpose %190, [1, 0] : vector<17x8xf32> -> vector<8x17xf32>
    %cst_129 = arith.constant dense<0.000000e+00> : vector<17x17xf32>
    %193 = tpu.matmul %189, %192, %cst_129 {dimension_numbers = #tpu.dot_dimension_numbers<[1], [0], [0], [1], [0, 0, 1, 1], [], []>} : vector<17x8xf32>, vector<8x17xf32>, vector<17x17xf32> -> vector<17x17xf32>
    %cst_130 = arith.constant dense<0xFF800000> : vector<17xf32>
    %194 = vector.multi_reduction <maximumf>, %193, %cst_130 [1] : vector<17x17xf32> to vector<17xf32>
    %195 = vector.shape_cast %194 : vector<17xf32> to vector<17x1xf32>
    %196 = vector.broadcast %195 : vector<17x1xf32> to vector<17x17xf32>
    %197 = arith.subf %193, %196 : vector<17x17xf32>
    %198 = math.exp %197 : vector<17x17xf32>
    %cst_131 = arith.constant dense<0.000000e+00> : vector<17xf32>
    %199 = vector.multi_reduction <add>, %198, %cst_131 [1] : vector<17x17xf32> to vector<17xf32>
    %200 = vector.shape_cast %199 : vector<17xf32> to vector<17x1xf32>
    %201 = tpu.reciprocal %200 {approx = true} : vector<17x1xf32> -> vector<17x1xf32>
    %202 = vector.broadcast %201 : vector<17x1xf32> to vector<17x17xf32>
    %203 = arith.mulf %198, %202 : vector<17x17xf32>
    %cst_132 = arith.constant dense<0.000000e+00> : vector<17x8xf32>
    %204 = tpu.matmul %203, %191, %cst_132 {dimension_numbers = #tpu.dot_dimension_numbers<[1], [0], [0], [1], [0, 0, 1, 1], [], []>} : vector<17x17xf32>, vector<17x8xf32>, vector<17x8xf32> -> vector<17x8xf32>
    %c0_133 = arith.constant 0 : index
    %c3_134 = arith.constant 3 : index
    %c0_135 = arith.constant 0 : index
    %c0_136 = arith.constant 0 : index
    %205 = vector.load %arg9[%c0_133, %c3_134, %c0_135, %c0_136] : memref<2x4x8x32xf32, #tpu.memory_space<vmem>>, vector<1x1x8x32xf32>
    %206 = vector.shape_cast %205 : vector<1x1x8x32xf32> to vector<8x32xf32>
    %cst_137 = arith.constant dense<0.000000e+00> : vector<17x32xf32>
    %207 = tpu.matmul %204, %206, %cst_137 {dimension_numbers = #tpu.dot_dimension_numbers<[1], [0], [0], [1], [0, 0, 1, 1], [], []>} : vector<17x8xf32>, vector<8x32xf32>, vector<17x32xf32> -> vector<17x32xf32>
    %208 = arith.addf %159, %207 : vector<17x32xf32>
    %209 = vector.extract_strided_slice %182 {offsets = [17, 0], sizes = [17, 8], strides = [1, 1]} : vector<34x8xf32> to vector<17x8xf32>
    %210 = vector.extract_strided_slice %185 {offsets = [17, 0], sizes = [17, 8], strides = [1, 1]} : vector<34x8xf32> to vector<17x8xf32>
    %211 = vector.extract_strided_slice %188 {offsets = [17, 0], sizes = [17, 8], strides = [1, 1]} : vector<34x8xf32> to vector<17x8xf32>
    %212 = tpu.transpose %210, [1, 0] : vector<17x8xf32> -> vector<8x17xf32>
    %cst_138 = arith.constant dense<0.000000e+00> : vector<17x17xf32>
    %213 = tpu.matmul %209, %212, %cst_138 {dimension_numbers = #tpu.dot_dimension_numbers<[1], [0], [0], [1], [0, 0, 1, 1], [], []>} : vector<17x8xf32>, vector<8x17xf32>, vector<17x17xf32> -> vector<17x17xf32>
    %cst_139 = arith.constant dense<0xFF800000> : vector<17xf32>
    %214 = vector.multi_reduction <maximumf>, %213, %cst_139 [1] : vector<17x17xf32> to vector<17xf32>
    %215 = vector.shape_cast %214 : vector<17xf32> to vector<17x1xf32>
    %216 = vector.broadcast %215 : vector<17x1xf32> to vector<17x17xf32>
    %217 = arith.subf %213, %216 : vector<17x17xf32>
    %218 = math.exp %217 : vector<17x17xf32>
    %cst_140 = arith.constant dense<0.000000e+00> : vector<17xf32>
    %219 = vector.multi_reduction <add>, %218, %cst_140 [1] : vector<17x17xf32> to vector<17xf32>
    %220 = vector.shape_cast %219 : vector<17xf32> to vector<17x1xf32>
    %221 = tpu.reciprocal %220 {approx = true} : vector<17x1xf32> -> vector<17x1xf32>
    %222 = vector.broadcast %221 : vector<17x1xf32> to vector<17x17xf32>
    %223 = arith.mulf %218, %222 : vector<17x17xf32>
    %cst_141 = arith.constant dense<0.000000e+00> : vector<17x8xf32>
    %224 = tpu.matmul %223, %211, %cst_141 {dimension_numbers = #tpu.dot_dimension_numbers<[1], [0], [0], [1], [0, 0, 1, 1], [], []>} : vector<17x17xf32>, vector<17x8xf32>, vector<17x8xf32> -> vector<17x8xf32>
    %c0_142 = arith.constant 0 : index
    %c3_143 = arith.constant 3 : index
    %c0_144 = arith.constant 0 : index
    %c0_145 = arith.constant 0 : index
    %225 = vector.load %arg9[%c0_142, %c3_143, %c0_144, %c0_145] : memref<2x4x8x32xf32, #tpu.memory_space<vmem>>, vector<1x1x8x32xf32>
    %226 = vector.shape_cast %225 : vector<1x1x8x32xf32> to vector<8x32xf32>
    %cst_146 = arith.constant dense<0.000000e+00> : vector<17x32xf32>
    %227 = tpu.matmul %224, %226, %cst_146 {dimension_numbers = #tpu.dot_dimension_numbers<[1], [0], [0], [1], [0, 0, 1, 1], [], []>} : vector<17x8xf32>, vector<8x32xf32>, vector<17x32xf32> -> vector<17x32xf32>
    %228 = arith.addf %179, %227 : vector<17x32xf32>
    %229 = tpu.concatenate %208, %228 in 0 : vector<17x32xf32>, vector<17x32xf32> -> vector<34x32xf32>
    %230 = arith.addf %4, %229 : vector<34x32xf32>
    %c0_147 = arith.constant 0 : index
    %c0_148 = arith.constant 0 : index
    %c0_149 = arith.constant 0 : index
    %231 = vector.load %arg10[%c0_147, %c0_148, %c0_149] : memref<2x1x32xf32, #tpu.memory_space<vmem>>, vector<1x1x32xf32>
    %232 = vector.shape_cast %231 : vector<1x1x32xf32> to vector<1x32xf32>
    %233 = vector.broadcast %232 : vector<1x32xf32> to vector<34x32xf32>
    %234 = arith.addf %230, %233 : vector<34x32xf32>
    %c0_150 = arith.constant 0 : index
    %c0_151 = arith.constant 0 : index
    %c0_152 = arith.constant 0 : index
    %235 = vector.load %arg11[%c0_150, %c0_151, %c0_152] : memref<2x1x32xf32, #tpu.memory_space<vmem>>, vector<1x1x32xf32>
    %236 = vector.shape_cast %235 : vector<1x1x32xf32> to vector<1x32xf32>
    %c0_153 = arith.constant 0 : index
    %c0_154 = arith.constant 0 : index
    %c0_155 = arith.constant 0 : index
    %237 = vector.load %arg12[%c0_153, %c0_154, %c0_155] : memref<2x1x32xf32, #tpu.memory_space<vmem>>, vector<1x1x32xf32>
    %238 = vector.shape_cast %237 : vector<1x1x32xf32> to vector<1x32xf32>
    %cst_156 = arith.constant dense<0.000000e+00> : vector<34xf32>
    %239 = vector.multi_reduction <add>, %234, %cst_156 [1] : vector<34x32xf32> to vector<34xf32>
    %240 = vector.shape_cast %239 : vector<34xf32> to vector<34x1xf32>
    %cst_157 = arith.constant 3.200000e+01 : f32
    %241 = vector.broadcast %cst_157 : f32 to vector<34x1xf32>
    %242 = arith.divf %240, %241 : vector<34x1xf32>
    %243 = vector.broadcast %242 : vector<34x1xf32> to vector<34x32xf32>
    %244 = arith.subf %234, %243 : vector<34x32xf32>
    %245 = arith.mulf %244, %244 : vector<34x32xf32>
    %cst_158 = arith.constant dense<0.000000e+00> : vector<34xf32>
    %246 = vector.multi_reduction <add>, %245, %cst_158 [1] : vector<34x32xf32> to vector<34xf32>
    %247 = vector.shape_cast %246 : vector<34xf32> to vector<34x1xf32>
    %cst_159 = arith.constant 3.200000e+01 : f32
    %248 = vector.broadcast %cst_159 : f32 to vector<34x1xf32>
    %249 = arith.divf %247, %248 : vector<34x1xf32>
    %250 = vector.broadcast %242 : vector<34x1xf32> to vector<34x32xf32>
    %251 = arith.subf %234, %250 : vector<34x32xf32>
    %cst_160 = arith.constant 9.99999974E-6 : f32
    %252 = vector.broadcast %cst_160 : f32 to vector<34x1xf32>
    %253 = arith.addf %249, %252 : vector<34x1xf32>
    %254 = math.rsqrt %253 : vector<34x1xf32>
    %255 = vector.broadcast %254 : vector<34x1xf32> to vector<34x32xf32>
    %256 = arith.mulf %251, %255 : vector<34x32xf32>
    %257 = vector.broadcast %236 : vector<1x32xf32> to vector<34x32xf32>
    %258 = arith.mulf %256, %257 : vector<34x32xf32>
    %259 = vector.broadcast %238 : vector<1x32xf32> to vector<34x32xf32>
    %260 = arith.addf %258, %259 : vector<34x32xf32>
    %c0_161 = arith.constant 0 : index
    %c0_162 = arith.constant 0 : index
    %c0_163 = arith.constant 0 : index
    %261 = vector.load %arg13[%c0_161, %c0_162, %c0_163] : memref<2x32x64xf32, #tpu.memory_space<vmem>>, vector<1x32x64xf32>
    %262 = vector.shape_cast %261 : vector<1x32x64xf32> to vector<32x64xf32>
    %cst_164 = arith.constant dense<0.000000e+00> : vector<34x64xf32>
    %263 = tpu.matmul %260, %262, %cst_164 {dimension_numbers = #tpu.dot_dimension_numbers<[1], [0], [0], [1], [0, 0, 1, 1], [], []>} : vector<34x32xf32>, vector<32x64xf32>, vector<34x64xf32> -> vector<34x64xf32>
    %c0_165 = arith.constant 0 : index
    %c0_166 = arith.constant 0 : index
    %c0_167 = arith.constant 0 : index
    %264 = vector.load %arg14[%c0_165, %c0_166, %c0_167] : memref<2x1x64xf32, #tpu.memory_space<vmem>>, vector<1x1x64xf32>
    %265 = vector.shape_cast %264 : vector<1x1x64xf32> to vector<1x64xf32>
    %266 = vector.broadcast %265 : vector<1x64xf32> to vector<34x64xf32>
    %267 = arith.addf %263, %266 : vector<34x64xf32>
    %cst_168 = arith.constant 5.000000e-01 : f32
    %268 = vector.broadcast %cst_168 : f32 to vector<34x64xf32>
    %269 = arith.mulf %268, %267 : vector<34x64xf32>
    %cst_169 = arith.constant 2.000000e+00 : f32
    %270 = math.sqrt %cst_169 : f32
    %cst_170 = arith.constant 1.000000e+00 : f32
    %271 = arith.divf %cst_170, %270 : f32
    %272 = vector.broadcast %271 : f32 to vector<34x64xf32>
    %273 = arith.mulf %267, %272 : vector<34x64xf32>
    %274 = math.erf %273 : vector<34x64xf32>
    %cst_171 = arith.constant 1.000000e+00 : f32
    %275 = vector.broadcast %cst_171 : f32 to vector<34x64xf32>
    %276 = arith.addf %275, %274 : vector<34x64xf32>
    %277 = arith.mulf %269, %276 : vector<34x64xf32>
    %c0_172 = arith.constant 0 : index
    %c0_173 = arith.constant 0 : index
    %c0_174 = arith.constant 0 : index
    %278 = vector.load %arg15[%c0_172, %c0_173, %c0_174] : memref<2x64x32xf32, #tpu.memory_space<vmem>>, vector<1x64x32xf32>
    %279 = vector.shape_cast %278 : vector<1x64x32xf32> to vector<64x32xf32>
    %cst_175 = arith.constant dense<0.000000e+00> : vector<34x32xf32>
    %280 = tpu.matmul %277, %279, %cst_175 {dimension_numbers = #tpu.dot_dimension_numbers<[1], [0], [0], [1], [0, 0, 1, 1], [], []>} : vector<34x64xf32>, vector<64x32xf32>, vector<34x32xf32> -> vector<34x32xf32>
    %281 = arith.addf %234, %280 : vector<34x32xf32>
    %c0_176 = arith.constant 0 : index
    %c0_177 = arith.constant 0 : index
    %c0_178 = arith.constant 0 : index
    %282 = vector.load %arg16[%c0_176, %c0_177, %c0_178] : memref<2x1x32xf32, #tpu.memory_space<vmem>>, vector<1x1x32xf32>
    %283 = vector.shape_cast %282 : vector<1x1x32xf32> to vector<1x32xf32>
    %284 = vector.broadcast %283 : vector<1x32xf32> to vector<34x32xf32>
    %285 = arith.addf %281, %284 : vector<34x32xf32>
    %c1_179 = arith.constant 1 : index
    %c0_180 = arith.constant 0 : index
    %c0_181 = arith.constant 0 : index
    %286 = vector.load %arg4[%c1_179, %c0_180, %c0_181] : memref<2x1x32xf32, #tpu.memory_space<vmem>>, vector<1x1x32xf32>
    %287 = vector.shape_cast %286 : vector<1x1x32xf32> to vector<1x32xf32>
    %c1_182 = arith.constant 1 : index
    %c0_183 = arith.constant 0 : index
    %c0_184 = arith.constant 0 : index
    %288 = vector.load %arg5[%c1_182, %c0_183, %c0_184] : memref<2x1x32xf32, #tpu.memory_space<vmem>>, vector<1x1x32xf32>
    %289 = vector.shape_cast %288 : vector<1x1x32xf32> to vector<1x32xf32>
    %cst_185 = arith.constant dense<0.000000e+00> : vector<34xf32>
    %290 = vector.multi_reduction <add>, %285, %cst_185 [1] : vector<34x32xf32> to vector<34xf32>
    %291 = vector.shape_cast %290 : vector<34xf32> to vector<34x1xf32>
    %cst_186 = arith.constant 3.200000e+01 : f32
    %292 = vector.broadcast %cst_186 : f32 to vector<34x1xf32>
    %293 = arith.divf %291, %292 : vector<34x1xf32>
    %294 = vector.broadcast %293 : vector<34x1xf32> to vector<34x32xf32>
    %295 = arith.subf %285, %294 : vector<34x32xf32>
    %296 = arith.mulf %295, %295 : vector<34x32xf32>
    %cst_187 = arith.constant dense<0.000000e+00> : vector<34xf32>
    %297 = vector.multi_reduction <add>, %296, %cst_187 [1] : vector<34x32xf32> to vector<34xf32>
    %298 = vector.shape_cast %297 : vector<34xf32> to vector<34x1xf32>
    %cst_188 = arith.constant 3.200000e+01 : f32
    %299 = vector.broadcast %cst_188 : f32 to vector<34x1xf32>
    %300 = arith.divf %298, %299 : vector<34x1xf32>
    %301 = vector.broadcast %293 : vector<34x1xf32> to vector<34x32xf32>
    %302 = arith.subf %285, %301 : vector<34x32xf32>
    %cst_189 = arith.constant 9.99999974E-6 : f32
    %303 = vector.broadcast %cst_189 : f32 to vector<34x1xf32>
    %304 = arith.addf %300, %303 : vector<34x1xf32>
    %305 = math.rsqrt %304 : vector<34x1xf32>
    %306 = vector.broadcast %305 : vector<34x1xf32> to vector<34x32xf32>
    %307 = arith.mulf %302, %306 : vector<34x32xf32>
    %308 = vector.broadcast %287 : vector<1x32xf32> to vector<34x32xf32>
    %309 = arith.mulf %307, %308 : vector<34x32xf32>
    %310 = vector.broadcast %289 : vector<1x32xf32> to vector<34x32xf32>
    %311 = arith.addf %309, %310 : vector<34x32xf32>
    %cst_190 = arith.constant 0.000000e+00 : f32
    %312 = vector.broadcast %cst_190 : f32 to vector<17x32xf32>
    %cst_191 = arith.constant 0.000000e+00 : f32
    %313 = vector.broadcast %cst_191 : f32 to vector<17x32xf32>
    %c1_192 = arith.constant 1 : index
    %c0_193 = arith.constant 0 : index
    %c0_194 = arith.constant 0 : index
    %c0_195 = arith.constant 0 : index
    %314 = vector.load %arg6[%c1_192, %c0_193, %c0_194, %c0_195] : memref<2x4x32x8xf32, #tpu.memory_space<vmem>>, vector<1x1x32x8xf32>
    %315 = vector.shape_cast %314 : vector<1x1x32x8xf32> to vector<32x8xf32>
    %cst_196 = arith.constant dense<0.000000e+00> : vector<34x8xf32>
    %316 = tpu.matmul %311, %315, %cst_196 {dimension_numbers = #tpu.dot_dimension_numbers<[1], [0], [0], [1], [0, 0, 1, 1], [], []>} : vector<34x32xf32>, vector<32x8xf32>, vector<34x8xf32> -> vector<34x8xf32>
    %c1_197 = arith.constant 1 : index
    %c0_198 = arith.constant 0 : index
    %c0_199 = arith.constant 0 : index
    %c0_200 = arith.constant 0 : index
    %317 = vector.load %arg7[%c1_197, %c0_198, %c0_199, %c0_200] : memref<2x4x32x8xf32, #tpu.memory_space<vmem>>, vector<1x1x32x8xf32>
    %318 = vector.shape_cast %317 : vector<1x1x32x8xf32> to vector<32x8xf32>
    %cst_201 = arith.constant dense<0.000000e+00> : vector<34x8xf32>
    %319 = tpu.matmul %311, %318, %cst_201 {dimension_numbers = #tpu.dot_dimension_numbers<[1], [0], [0], [1], [0, 0, 1, 1], [], []>} : vector<34x32xf32>, vector<32x8xf32>, vector<34x8xf32> -> vector<34x8xf32>
    %c1_202 = arith.constant 1 : index
    %c0_203 = arith.constant 0 : index
    %c0_204 = arith.constant 0 : index
    %c0_205 = arith.constant 0 : index
    %320 = vector.load %arg8[%c1_202, %c0_203, %c0_204, %c0_205] : memref<2x4x32x8xf32, #tpu.memory_space<vmem>>, vector<1x1x32x8xf32>
    %321 = vector.shape_cast %320 : vector<1x1x32x8xf32> to vector<32x8xf32>
    %cst_206 = arith.constant dense<0.000000e+00> : vector<34x8xf32>
    %322 = tpu.matmul %311, %321, %cst_206 {dimension_numbers = #tpu.dot_dimension_numbers<[1], [0], [0], [1], [0, 0, 1, 1], [], []>} : vector<34x32xf32>, vector<32x8xf32>, vector<34x8xf32> -> vector<34x8xf32>
    %323 = vector.extract_strided_slice %316 {offsets = [0, 0], sizes = [17, 8], strides = [1, 1]} : vector<34x8xf32> to vector<17x8xf32>
    %324 = vector.extract_strided_slice %319 {offsets = [0, 0], sizes = [17, 8], strides = [1, 1]} : vector<34x8xf32> to vector<17x8xf32>
    %325 = vector.extract_strided_slice %322 {offsets = [0, 0], sizes = [17, 8], strides = [1, 1]} : vector<34x8xf32> to vector<17x8xf32>
    %326 = tpu.transpose %324, [1, 0] : vector<17x8xf32> -> vector<8x17xf32>
    %cst_207 = arith.constant dense<0.000000e+00> : vector<17x17xf32>
    %327 = tpu.matmul %323, %326, %cst_207 {dimension_numbers = #tpu.dot_dimension_numbers<[1], [0], [0], [1], [0, 0, 1, 1], [], []>} : vector<17x8xf32>, vector<8x17xf32>, vector<17x17xf32> -> vector<17x17xf32>
    %cst_208 = arith.constant dense<0xFF800000> : vector<17xf32>
    %328 = vector.multi_reduction <maximumf>, %327, %cst_208 [1] : vector<17x17xf32> to vector<17xf32>
    %329 = vector.shape_cast %328 : vector<17xf32> to vector<17x1xf32>
    %330 = vector.broadcast %329 : vector<17x1xf32> to vector<17x17xf32>
    %331 = arith.subf %327, %330 : vector<17x17xf32>
    %332 = math.exp %331 : vector<17x17xf32>
    %cst_209 = arith.constant dense<0.000000e+00> : vector<17xf32>
    %333 = vector.multi_reduction <add>, %332, %cst_209 [1] : vector<17x17xf32> to vector<17xf32>
    %334 = vector.shape_cast %333 : vector<17xf32> to vector<17x1xf32>
    %335 = tpu.reciprocal %334 {approx = true} : vector<17x1xf32> -> vector<17x1xf32>
    %336 = vector.broadcast %335 : vector<17x1xf32> to vector<17x17xf32>
    %337 = arith.mulf %332, %336 : vector<17x17xf32>
    %cst_210 = arith.constant dense<0.000000e+00> : vector<17x8xf32>
    %338 = tpu.matmul %337, %325, %cst_210 {dimension_numbers = #tpu.dot_dimension_numbers<[1], [0], [0], [1], [0, 0, 1, 1], [], []>} : vector<17x17xf32>, vector<17x8xf32>, vector<17x8xf32> -> vector<17x8xf32>
    %c1_211 = arith.constant 1 : index
    %c0_212 = arith.constant 0 : index
    %c0_213 = arith.constant 0 : index
    %c0_214 = arith.constant 0 : index
    %339 = vector.load %arg9[%c1_211, %c0_212, %c0_213, %c0_214] : memref<2x4x8x32xf32, #tpu.memory_space<vmem>>, vector<1x1x8x32xf32>
    %340 = vector.shape_cast %339 : vector<1x1x8x32xf32> to vector<8x32xf32>
    %cst_215 = arith.constant dense<0.000000e+00> : vector<17x32xf32>
    %341 = tpu.matmul %338, %340, %cst_215 {dimension_numbers = #tpu.dot_dimension_numbers<[1], [0], [0], [1], [0, 0, 1, 1], [], []>} : vector<17x8xf32>, vector<8x32xf32>, vector<17x32xf32> -> vector<17x32xf32>
    %342 = arith.addf %312, %341 : vector<17x32xf32>
    %343 = vector.extract_strided_slice %316 {offsets = [17, 0], sizes = [17, 8], strides = [1, 1]} : vector<34x8xf32> to vector<17x8xf32>
    %344 = vector.extract_strided_slice %319 {offsets = [17, 0], sizes = [17, 8], strides = [1, 1]} : vector<34x8xf32> to vector<17x8xf32>
    %345 = vector.extract_strided_slice %322 {offsets = [17, 0], sizes = [17, 8], strides = [1, 1]} : vector<34x8xf32> to vector<17x8xf32>
    %346 = tpu.transpose %344, [1, 0] : vector<17x8xf32> -> vector<8x17xf32>
    %cst_216 = arith.constant dense<0.000000e+00> : vector<17x17xf32>
    %347 = tpu.matmul %343, %346, %cst_216 {dimension_numbers = #tpu.dot_dimension_numbers<[1], [0], [0], [1], [0, 0, 1, 1], [], []>} : vector<17x8xf32>, vector<8x17xf32>, vector<17x17xf32> -> vector<17x17xf32>
    %cst_217 = arith.constant dense<0xFF800000> : vector<17xf32>
    %348 = vector.multi_reduction <maximumf>, %347, %cst_217 [1] : vector<17x17xf32> to vector<17xf32>
    %349 = vector.shape_cast %348 : vector<17xf32> to vector<17x1xf32>
    %350 = vector.broadcast %349 : vector<17x1xf32> to vector<17x17xf32>
    %351 = arith.subf %347, %350 : vector<17x17xf32>
    %352 = math.exp %351 : vector<17x17xf32>
    %cst_218 = arith.constant dense<0.000000e+00> : vector<17xf32>
    %353 = vector.multi_reduction <add>, %352, %cst_218 [1] : vector<17x17xf32> to vector<17xf32>
    %354 = vector.shape_cast %353 : vector<17xf32> to vector<17x1xf32>
    %355 = tpu.reciprocal %354 {approx = true} : vector<17x1xf32> -> vector<17x1xf32>
    %356 = vector.broadcast %355 : vector<17x1xf32> to vector<17x17xf32>
    %357 = arith.mulf %352, %356 : vector<17x17xf32>
    %cst_219 = arith.constant dense<0.000000e+00> : vector<17x8xf32>
    %358 = tpu.matmul %357, %345, %cst_219 {dimension_numbers = #tpu.dot_dimension_numbers<[1], [0], [0], [1], [0, 0, 1, 1], [], []>} : vector<17x17xf32>, vector<17x8xf32>, vector<17x8xf32> -> vector<17x8xf32>
    %c1_220 = arith.constant 1 : index
    %c0_221 = arith.constant 0 : index
    %c0_222 = arith.constant 0 : index
    %c0_223 = arith.constant 0 : index
    %359 = vector.load %arg9[%c1_220, %c0_221, %c0_222, %c0_223] : memref<2x4x8x32xf32, #tpu.memory_space<vmem>>, vector<1x1x8x32xf32>
    %360 = vector.shape_cast %359 : vector<1x1x8x32xf32> to vector<8x32xf32>
    %cst_224 = arith.constant dense<0.000000e+00> : vector<17x32xf32>
    %361 = tpu.matmul %358, %360, %cst_224 {dimension_numbers = #tpu.dot_dimension_numbers<[1], [0], [0], [1], [0, 0, 1, 1], [], []>} : vector<17x8xf32>, vector<8x32xf32>, vector<17x32xf32> -> vector<17x32xf32>
    %362 = arith.addf %313, %361 : vector<17x32xf32>
    %c1_225 = arith.constant 1 : index
    %c1_226 = arith.constant 1 : index
    %c0_227 = arith.constant 0 : index
    %c0_228 = arith.constant 0 : index
    %363 = vector.load %arg6[%c1_225, %c1_226, %c0_227, %c0_228] : memref<2x4x32x8xf32, #tpu.memory_space<vmem>>, vector<1x1x32x8xf32>
    %364 = vector.shape_cast %363 : vector<1x1x32x8xf32> to vector<32x8xf32>
    %cst_229 = arith.constant dense<0.000000e+00> : vector<34x8xf32>
    %365 = tpu.matmul %311, %364, %cst_229 {dimension_numbers = #tpu.dot_dimension_numbers<[1], [0], [0], [1], [0, 0, 1, 1], [], []>} : vector<34x32xf32>, vector<32x8xf32>, vector<34x8xf32> -> vector<34x8xf32>
    %c1_230 = arith.constant 1 : index
    %c1_231 = arith.constant 1 : index
    %c0_232 = arith.constant 0 : index
    %c0_233 = arith.constant 0 : index
    %366 = vector.load %arg7[%c1_230, %c1_231, %c0_232, %c0_233] : memref<2x4x32x8xf32, #tpu.memory_space<vmem>>, vector<1x1x32x8xf32>
    %367 = vector.shape_cast %366 : vector<1x1x32x8xf32> to vector<32x8xf32>
    %cst_234 = arith.constant dense<0.000000e+00> : vector<34x8xf32>
    %368 = tpu.matmul %311, %367, %cst_234 {dimension_numbers = #tpu.dot_dimension_numbers<[1], [0], [0], [1], [0, 0, 1, 1], [], []>} : vector<34x32xf32>, vector<32x8xf32>, vector<34x8xf32> -> vector<34x8xf32>
    %c1_235 = arith.constant 1 : index
    %c1_236 = arith.constant 1 : index
    %c0_237 = arith.constant 0 : index
    %c0_238 = arith.constant 0 : index
    %369 = vector.load %arg8[%c1_235, %c1_236, %c0_237, %c0_238] : memref<2x4x32x8xf32, #tpu.memory_space<vmem>>, vector<1x1x32x8xf32>
    %370 = vector.shape_cast %369 : vector<1x1x32x8xf32> to vector<32x8xf32>
    %cst_239 = arith.constant dense<0.000000e+00> : vector<34x8xf32>
    %371 = tpu.matmul %311, %370, %cst_239 {dimension_numbers = #tpu.dot_dimension_numbers<[1], [0], [0], [1], [0, 0, 1, 1], [], []>} : vector<34x32xf32>, vector<32x8xf32>, vector<34x8xf32> -> vector<34x8xf32>
    %372 = vector.extract_strided_slice %365 {offsets = [0, 0], sizes = [17, 8], strides = [1, 1]} : vector<34x8xf32> to vector<17x8xf32>
    %373 = vector.extract_strided_slice %368 {offsets = [0, 0], sizes = [17, 8], strides = [1, 1]} : vector<34x8xf32> to vector<17x8xf32>
    %374 = vector.extract_strided_slice %371 {offsets = [0, 0], sizes = [17, 8], strides = [1, 1]} : vector<34x8xf32> to vector<17x8xf32>
    %375 = tpu.transpose %373, [1, 0] : vector<17x8xf32> -> vector<8x17xf32>
    %cst_240 = arith.constant dense<0.000000e+00> : vector<17x17xf32>
    %376 = tpu.matmul %372, %375, %cst_240 {dimension_numbers = #tpu.dot_dimension_numbers<[1], [0], [0], [1], [0, 0, 1, 1], [], []>} : vector<17x8xf32>, vector<8x17xf32>, vector<17x17xf32> -> vector<17x17xf32>
    %cst_241 = arith.constant dense<0xFF800000> : vector<17xf32>
    %377 = vector.multi_reduction <maximumf>, %376, %cst_241 [1] : vector<17x17xf32> to vector<17xf32>
    %378 = vector.shape_cast %377 : vector<17xf32> to vector<17x1xf32>
    %379 = vector.broadcast %378 : vector<17x1xf32> to vector<17x17xf32>
    %380 = arith.subf %376, %379 : vector<17x17xf32>
    %381 = math.exp %380 : vector<17x17xf32>
    %cst_242 = arith.constant dense<0.000000e+00> : vector<17xf32>
    %382 = vector.multi_reduction <add>, %381, %cst_242 [1] : vector<17x17xf32> to vector<17xf32>
    %383 = vector.shape_cast %382 : vector<17xf32> to vector<17x1xf32>
    %384 = tpu.reciprocal %383 {approx = true} : vector<17x1xf32> -> vector<17x1xf32>
    %385 = vector.broadcast %384 : vector<17x1xf32> to vector<17x17xf32>
    %386 = arith.mulf %381, %385 : vector<17x17xf32>
    %cst_243 = arith.constant dense<0.000000e+00> : vector<17x8xf32>
    %387 = tpu.matmul %386, %374, %cst_243 {dimension_numbers = #tpu.dot_dimension_numbers<[1], [0], [0], [1], [0, 0, 1, 1], [], []>} : vector<17x17xf32>, vector<17x8xf32>, vector<17x8xf32> -> vector<17x8xf32>
    %c1_244 = arith.constant 1 : index
    %c1_245 = arith.constant 1 : index
    %c0_246 = arith.constant 0 : index
    %c0_247 = arith.constant 0 : index
    %388 = vector.load %arg9[%c1_244, %c1_245, %c0_246, %c0_247] : memref<2x4x8x32xf32, #tpu.memory_space<vmem>>, vector<1x1x8x32xf32>
    %389 = vector.shape_cast %388 : vector<1x1x8x32xf32> to vector<8x32xf32>
    %cst_248 = arith.constant dense<0.000000e+00> : vector<17x32xf32>
    %390 = tpu.matmul %387, %389, %cst_248 {dimension_numbers = #tpu.dot_dimension_numbers<[1], [0], [0], [1], [0, 0, 1, 1], [], []>} : vector<17x8xf32>, vector<8x32xf32>, vector<17x32xf32> -> vector<17x32xf32>
    %391 = arith.addf %342, %390 : vector<17x32xf32>
    %392 = vector.extract_strided_slice %365 {offsets = [17, 0], sizes = [17, 8], strides = [1, 1]} : vector<34x8xf32> to vector<17x8xf32>
    %393 = vector.extract_strided_slice %368 {offsets = [17, 0], sizes = [17, 8], strides = [1, 1]} : vector<34x8xf32> to vector<17x8xf32>
    %394 = vector.extract_strided_slice %371 {offsets = [17, 0], sizes = [17, 8], strides = [1, 1]} : vector<34x8xf32> to vector<17x8xf32>
    %395 = tpu.transpose %393, [1, 0] : vector<17x8xf32> -> vector<8x17xf32>
    %cst_249 = arith.constant dense<0.000000e+00> : vector<17x17xf32>
    %396 = tpu.matmul %392, %395, %cst_249 {dimension_numbers = #tpu.dot_dimension_numbers<[1], [0], [0], [1], [0, 0, 1, 1], [], []>} : vector<17x8xf32>, vector<8x17xf32>, vector<17x17xf32> -> vector<17x17xf32>
    %cst_250 = arith.constant dense<0xFF800000> : vector<17xf32>
    %397 = vector.multi_reduction <maximumf>, %396, %cst_250 [1] : vector<17x17xf32> to vector<17xf32>
    %398 = vector.shape_cast %397 : vector<17xf32> to vector<17x1xf32>
    %399 = vector.broadcast %398 : vector<17x1xf32> to vector<17x17xf32>
    %400 = arith.subf %396, %399 : vector<17x17xf32>
    %401 = math.exp %400 : vector<17x17xf32>
    %cst_251 = arith.constant dense<0.000000e+00> : vector<17xf32>
    %402 = vector.multi_reduction <add>, %401, %cst_251 [1] : vector<17x17xf32> to vector<17xf32>
    %403 = vector.shape_cast %402 : vector<17xf32> to vector<17x1xf32>
    %404 = tpu.reciprocal %403 {approx = true} : vector<17x1xf32> -> vector<17x1xf32>
    %405 = vector.broadcast %404 : vector<17x1xf32> to vector<17x17xf32>
    %406 = arith.mulf %401, %405 : vector<17x17xf32>
    %cst_252 = arith.constant dense<0.000000e+00> : vector<17x8xf32>
    %407 = tpu.matmul %406, %394, %cst_252 {dimension_numbers = #tpu.dot_dimension_numbers<[1], [0], [0], [1], [0, 0, 1, 1], [], []>} : vector<17x17xf32>, vector<17x8xf32>, vector<17x8xf32> -> vector<17x8xf32>
    %c1_253 = arith.constant 1 : index
    %c1_254 = arith.constant 1 : index
    %c0_255 = arith.constant 0 : index
    %c0_256 = arith.constant 0 : index
    %408 = vector.load %arg9[%c1_253, %c1_254, %c0_255, %c0_256] : memref<2x4x8x32xf32, #tpu.memory_space<vmem>>, vector<1x1x8x32xf32>
    %409 = vector.shape_cast %408 : vector<1x1x8x32xf32> to vector<8x32xf32>
    %cst_257 = arith.constant dense<0.000000e+00> : vector<17x32xf32>
    %410 = tpu.matmul %407, %409, %cst_257 {dimension_numbers = #tpu.dot_dimension_numbers<[1], [0], [0], [1], [0, 0, 1, 1], [], []>} : vector<17x8xf32>, vector<8x32xf32>, vector<17x32xf32> -> vector<17x32xf32>
    %411 = arith.addf %362, %410 : vector<17x32xf32>
    %c1_258 = arith.constant 1 : index
    %c2_259 = arith.constant 2 : index
    %c0_260 = arith.constant 0 : index
    %c0_261 = arith.constant 0 : index
    %412 = vector.load %arg6[%c1_258, %c2_259, %c0_260, %c0_261] : memref<2x4x32x8xf32, #tpu.memory_space<vmem>>, vector<1x1x32x8xf32>
    %413 = vector.shape_cast %412 : vector<1x1x32x8xf32> to vector<32x8xf32>
    %cst_262 = arith.constant dense<0.000000e+00> : vector<34x8xf32>
    %414 = tpu.matmul %311, %413, %cst_262 {dimension_numbers = #tpu.dot_dimension_numbers<[1], [0], [0], [1], [0, 0, 1, 1], [], []>} : vector<34x32xf32>, vector<32x8xf32>, vector<34x8xf32> -> vector<34x8xf32>
    %c1_263 = arith.constant 1 : index
    %c2_264 = arith.constant 2 : index
    %c0_265 = arith.constant 0 : index
    %c0_266 = arith.constant 0 : index
    %415 = vector.load %arg7[%c1_263, %c2_264, %c0_265, %c0_266] : memref<2x4x32x8xf32, #tpu.memory_space<vmem>>, vector<1x1x32x8xf32>
    %416 = vector.shape_cast %415 : vector<1x1x32x8xf32> to vector<32x8xf32>
    %cst_267 = arith.constant dense<0.000000e+00> : vector<34x8xf32>
    %417 = tpu.matmul %311, %416, %cst_267 {dimension_numbers = #tpu.dot_dimension_numbers<[1], [0], [0], [1], [0, 0, 1, 1], [], []>} : vector<34x32xf32>, vector<32x8xf32>, vector<34x8xf32> -> vector<34x8xf32>
    %c1_268 = arith.constant 1 : index
    %c2_269 = arith.constant 2 : index
    %c0_270 = arith.constant 0 : index
    %c0_271 = arith.constant 0 : index
    %418 = vector.load %arg8[%c1_268, %c2_269, %c0_270, %c0_271] : memref<2x4x32x8xf32, #tpu.memory_space<vmem>>, vector<1x1x32x8xf32>
    %419 = vector.shape_cast %418 : vector<1x1x32x8xf32> to vector<32x8xf32>
    %cst_272 = arith.constant dense<0.000000e+00> : vector<34x8xf32>
    %420 = tpu.matmul %311, %419, %cst_272 {dimension_numbers = #tpu.dot_dimension_numbers<[1], [0], [0], [1], [0, 0, 1, 1], [], []>} : vector<34x32xf32>, vector<32x8xf32>, vector<34x8xf32> -> vector<34x8xf32>
    %421 = vector.extract_strided_slice %414 {offsets = [0, 0], sizes = [17, 8], strides = [1, 1]} : vector<34x8xf32> to vector<17x8xf32>
    %422 = vector.extract_strided_slice %417 {offsets = [0, 0], sizes = [17, 8], strides = [1, 1]} : vector<34x8xf32> to vector<17x8xf32>
    %423 = vector.extract_strided_slice %420 {offsets = [0, 0], sizes = [17, 8], strides = [1, 1]} : vector<34x8xf32> to vector<17x8xf32>
    %424 = tpu.transpose %422, [1, 0] : vector<17x8xf32> -> vector<8x17xf32>
    %cst_273 = arith.constant dense<0.000000e+00> : vector<17x17xf32>
    %425 = tpu.matmul %421, %424, %cst_273 {dimension_numbers = #tpu.dot_dimension_numbers<[1], [0], [0], [1], [0, 0, 1, 1], [], []>} : vector<17x8xf32>, vector<8x17xf32>, vector<17x17xf32> -> vector<17x17xf32>
    %cst_274 = arith.constant dense<0xFF800000> : vector<17xf32>
    %426 = vector.multi_reduction <maximumf>, %425, %cst_274 [1] : vector<17x17xf32> to vector<17xf32>
    %427 = vector.shape_cast %426 : vector<17xf32> to vector<17x1xf32>
    %428 = vector.broadcast %427 : vector<17x1xf32> to vector<17x17xf32>
    %429 = arith.subf %425, %428 : vector<17x17xf32>
    %430 = math.exp %429 : vector<17x17xf32>
    %cst_275 = arith.constant dense<0.000000e+00> : vector<17xf32>
    %431 = vector.multi_reduction <add>, %430, %cst_275 [1] : vector<17x17xf32> to vector<17xf32>
    %432 = vector.shape_cast %431 : vector<17xf32> to vector<17x1xf32>
    %433 = tpu.reciprocal %432 {approx = true} : vector<17x1xf32> -> vector<17x1xf32>
    %434 = vector.broadcast %433 : vector<17x1xf32> to vector<17x17xf32>
    %435 = arith.mulf %430, %434 : vector<17x17xf32>
    %cst_276 = arith.constant dense<0.000000e+00> : vector<17x8xf32>
    %436 = tpu.matmul %435, %423, %cst_276 {dimension_numbers = #tpu.dot_dimension_numbers<[1], [0], [0], [1], [0, 0, 1, 1], [], []>} : vector<17x17xf32>, vector<17x8xf32>, vector<17x8xf32> -> vector<17x8xf32>
    %c1_277 = arith.constant 1 : index
    %c2_278 = arith.constant 2 : index
    %c0_279 = arith.constant 0 : index
    %c0_280 = arith.constant 0 : index
    %437 = vector.load %arg9[%c1_277, %c2_278, %c0_279, %c0_280] : memref<2x4x8x32xf32, #tpu.memory_space<vmem>>, vector<1x1x8x32xf32>
    %438 = vector.shape_cast %437 : vector<1x1x8x32xf32> to vector<8x32xf32>
    %cst_281 = arith.constant dense<0.000000e+00> : vector<17x32xf32>
    %439 = tpu.matmul %436, %438, %cst_281 {dimension_numbers = #tpu.dot_dimension_numbers<[1], [0], [0], [1], [0, 0, 1, 1], [], []>} : vector<17x8xf32>, vector<8x32xf32>, vector<17x32xf32> -> vector<17x32xf32>
    %440 = arith.addf %391, %439 : vector<17x32xf32>
    %441 = vector.extract_strided_slice %414 {offsets = [17, 0], sizes = [17, 8], strides = [1, 1]} : vector<34x8xf32> to vector<17x8xf32>
    %442 = vector.extract_strided_slice %417 {offsets = [17, 0], sizes = [17, 8], strides = [1, 1]} : vector<34x8xf32> to vector<17x8xf32>
    %443 = vector.extract_strided_slice %420 {offsets = [17, 0], sizes = [17, 8], strides = [1, 1]} : vector<34x8xf32> to vector<17x8xf32>
    %444 = tpu.transpose %442, [1, 0] : vector<17x8xf32> -> vector<8x17xf32>
    %cst_282 = arith.constant dense<0.000000e+00> : vector<17x17xf32>
    %445 = tpu.matmul %441, %444, %cst_282 {dimension_numbers = #tpu.dot_dimension_numbers<[1], [0], [0], [1], [0, 0, 1, 1], [], []>} : vector<17x8xf32>, vector<8x17xf32>, vector<17x17xf32> -> vector<17x17xf32>
    %cst_283 = arith.constant dense<0xFF800000> : vector<17xf32>
    %446 = vector.multi_reduction <maximumf>, %445, %cst_283 [1] : vector<17x17xf32> to vector<17xf32>
    %447 = vector.shape_cast %446 : vector<17xf32> to vector<17x1xf32>
    %448 = vector.broadcast %447 : vector<17x1xf32> to vector<17x17xf32>
    %449 = arith.subf %445, %448 : vector<17x17xf32>
    %450 = math.exp %449 : vector<17x17xf32>
    %cst_284 = arith.constant dense<0.000000e+00> : vector<17xf32>
    %451 = vector.multi_reduction <add>, %450, %cst_284 [1] : vector<17x17xf32> to vector<17xf32>
    %452 = vector.shape_cast %451 : vector<17xf32> to vector<17x1xf32>
    %453 = tpu.reciprocal %452 {approx = true} : vector<17x1xf32> -> vector<17x1xf32>
    %454 = vector.broadcast %453 : vector<17x1xf32> to vector<17x17xf32>
    %455 = arith.mulf %450, %454 : vector<17x17xf32>
    %cst_285 = arith.constant dense<0.000000e+00> : vector<17x8xf32>
    %456 = tpu.matmul %455, %443, %cst_285 {dimension_numbers = #tpu.dot_dimension_numbers<[1], [0], [0], [1], [0, 0, 1, 1], [], []>} : vector<17x17xf32>, vector<17x8xf32>, vector<17x8xf32> -> vector<17x8xf32>
    %c1_286 = arith.constant 1 : index
    %c2_287 = arith.constant 2 : index
    %c0_288 = arith.constant 0 : index
    %c0_289 = arith.constant 0 : index
    %457 = vector.load %arg9[%c1_286, %c2_287, %c0_288, %c0_289] : memref<2x4x8x32xf32, #tpu.memory_space<vmem>>, vector<1x1x8x32xf32>
    %458 = vector.shape_cast %457 : vector<1x1x8x32xf32> to vector<8x32xf32>
    %cst_290 = arith.constant dense<0.000000e+00> : vector<17x32xf32>
    %459 = tpu.matmul %456, %458, %cst_290 {dimension_numbers = #tpu.dot_dimension_numbers<[1], [0], [0], [1], [0, 0, 1, 1], [], []>} : vector<17x8xf32>, vector<8x32xf32>, vector<17x32xf32> -> vector<17x32xf32>
    %460 = arith.addf %411, %459 : vector<17x32xf32>
    %c1_291 = arith.constant 1 : index
    %c3_292 = arith.constant 3 : index
    %c0_293 = arith.constant 0 : index
    %c0_294 = arith.constant 0 : index
    %461 = vector.load %arg6[%c1_291, %c3_292, %c0_293, %c0_294] : memref<2x4x32x8xf32, #tpu.memory_space<vmem>>, vector<1x1x32x8xf32>
    %462 = vector.shape_cast %461 : vector<1x1x32x8xf32> to vector<32x8xf32>
    %cst_295 = arith.constant dense<0.000000e+00> : vector<34x8xf32>
    %463 = tpu.matmul %311, %462, %cst_295 {dimension_numbers = #tpu.dot_dimension_numbers<[1], [0], [0], [1], [0, 0, 1, 1], [], []>} : vector<34x32xf32>, vector<32x8xf32>, vector<34x8xf32> -> vector<34x8xf32>
    %c1_296 = arith.constant 1 : index
    %c3_297 = arith.constant 3 : index
    %c0_298 = arith.constant 0 : index
    %c0_299 = arith.constant 0 : index
    %464 = vector.load %arg7[%c1_296, %c3_297, %c0_298, %c0_299] : memref<2x4x32x8xf32, #tpu.memory_space<vmem>>, vector<1x1x32x8xf32>
    %465 = vector.shape_cast %464 : vector<1x1x32x8xf32> to vector<32x8xf32>
    %cst_300 = arith.constant dense<0.000000e+00> : vector<34x8xf32>
    %466 = tpu.matmul %311, %465, %cst_300 {dimension_numbers = #tpu.dot_dimension_numbers<[1], [0], [0], [1], [0, 0, 1, 1], [], []>} : vector<34x32xf32>, vector<32x8xf32>, vector<34x8xf32> -> vector<34x8xf32>
    %c1_301 = arith.constant 1 : index
    %c3_302 = arith.constant 3 : index
    %c0_303 = arith.constant 0 : index
    %c0_304 = arith.constant 0 : index
    %467 = vector.load %arg8[%c1_301, %c3_302, %c0_303, %c0_304] : memref<2x4x32x8xf32, #tpu.memory_space<vmem>>, vector<1x1x32x8xf32>
    %468 = vector.shape_cast %467 : vector<1x1x32x8xf32> to vector<32x8xf32>
    %cst_305 = arith.constant dense<0.000000e+00> : vector<34x8xf32>
    %469 = tpu.matmul %311, %468, %cst_305 {dimension_numbers = #tpu.dot_dimension_numbers<[1], [0], [0], [1], [0, 0, 1, 1], [], []>} : vector<34x32xf32>, vector<32x8xf32>, vector<34x8xf32> -> vector<34x8xf32>
    %470 = vector.extract_strided_slice %463 {offsets = [0, 0], sizes = [17, 8], strides = [1, 1]} : vector<34x8xf32> to vector<17x8xf32>
    %471 = vector.extract_strided_slice %466 {offsets = [0, 0], sizes = [17, 8], strides = [1, 1]} : vector<34x8xf32> to vector<17x8xf32>
    %472 = vector.extract_strided_slice %469 {offsets = [0, 0], sizes = [17, 8], strides = [1, 1]} : vector<34x8xf32> to vector<17x8xf32>
    %473 = tpu.transpose %471, [1, 0] : vector<17x8xf32> -> vector<8x17xf32>
    %cst_306 = arith.constant dense<0.000000e+00> : vector<17x17xf32>
    %474 = tpu.matmul %470, %473, %cst_306 {dimension_numbers = #tpu.dot_dimension_numbers<[1], [0], [0], [1], [0, 0, 1, 1], [], []>} : vector<17x8xf32>, vector<8x17xf32>, vector<17x17xf32> -> vector<17x17xf32>
    %cst_307 = arith.constant dense<0xFF800000> : vector<17xf32>
    %475 = vector.multi_reduction <maximumf>, %474, %cst_307 [1] : vector<17x17xf32> to vector<17xf32>
    %476 = vector.shape_cast %475 : vector<17xf32> to vector<17x1xf32>
    %477 = vector.broadcast %476 : vector<17x1xf32> to vector<17x17xf32>
    %478 = arith.subf %474, %477 : vector<17x17xf32>
    %479 = math.exp %478 : vector<17x17xf32>
    %cst_308 = arith.constant dense<0.000000e+00> : vector<17xf32>
    %480 = vector.multi_reduction <add>, %479, %cst_308 [1] : vector<17x17xf32> to vector<17xf32>
    %481 = vector.shape_cast %480 : vector<17xf32> to vector<17x1xf32>
    %482 = tpu.reciprocal %481 {approx = true} : vector<17x1xf32> -> vector<17x1xf32>
    %483 = vector.broadcast %482 : vector<17x1xf32> to vector<17x17xf32>
    %484 = arith.mulf %479, %483 : vector<17x17xf32>
    %cst_309 = arith.constant dense<0.000000e+00> : vector<17x8xf32>
    %485 = tpu.matmul %484, %472, %cst_309 {dimension_numbers = #tpu.dot_dimension_numbers<[1], [0], [0], [1], [0, 0, 1, 1], [], []>} : vector<17x17xf32>, vector<17x8xf32>, vector<17x8xf32> -> vector<17x8xf32>
    %c1_310 = arith.constant 1 : index
    %c3_311 = arith.constant 3 : index
    %c0_312 = arith.constant 0 : index
    %c0_313 = arith.constant 0 : index
    %486 = vector.load %arg9[%c1_310, %c3_311, %c0_312, %c0_313] : memref<2x4x8x32xf32, #tpu.memory_space<vmem>>, vector<1x1x8x32xf32>
    %487 = vector.shape_cast %486 : vector<1x1x8x32xf32> to vector<8x32xf32>
    %cst_314 = arith.constant dense<0.000000e+00> : vector<17x32xf32>
    %488 = tpu.matmul %485, %487, %cst_314 {dimension_numbers = #tpu.dot_dimension_numbers<[1], [0], [0], [1], [0, 0, 1, 1], [], []>} : vector<17x8xf32>, vector<8x32xf32>, vector<17x32xf32> -> vector<17x32xf32>
    %489 = arith.addf %440, %488 : vector<17x32xf32>
    %490 = vector.extract_strided_slice %463 {offsets = [17, 0], sizes = [17, 8], strides = [1, 1]} : vector<34x8xf32> to vector<17x8xf32>
    %491 = vector.extract_strided_slice %466 {offsets = [17, 0], sizes = [17, 8], strides = [1, 1]} : vector<34x8xf32> to vector<17x8xf32>
    %492 = vector.extract_strided_slice %469 {offsets = [17, 0], sizes = [17, 8], strides = [1, 1]} : vector<34x8xf32> to vector<17x8xf32>
    %493 = tpu.transpose %491, [1, 0] : vector<17x8xf32> -> vector<8x17xf32>
    %cst_315 = arith.constant dense<0.000000e+00> : vector<17x17xf32>
    %494 = tpu.matmul %490, %493, %cst_315 {dimension_numbers = #tpu.dot_dimension_numbers<[1], [0], [0], [1], [0, 0, 1, 1], [], []>} : vector<17x8xf32>, vector<8x17xf32>, vector<17x17xf32> -> vector<17x17xf32>
    %cst_316 = arith.constant dense<0xFF800000> : vector<17xf32>
    %495 = vector.multi_reduction <maximumf>, %494, %cst_316 [1] : vector<17x17xf32> to vector<17xf32>
    %496 = vector.shape_cast %495 : vector<17xf32> to vector<17x1xf32>
    %497 = vector.broadcast %496 : vector<17x1xf32> to vector<17x17xf32>
    %498 = arith.subf %494, %497 : vector<17x17xf32>
    %499 = math.exp %498 : vector<17x17xf32>
    %cst_317 = arith.constant dense<0.000000e+00> : vector<17xf32>
    %500 = vector.multi_reduction <add>, %499, %cst_317 [1] : vector<17x17xf32> to vector<17xf32>
    %501 = vector.shape_cast %500 : vector<17xf32> to vector<17x1xf32>
    %502 = tpu.reciprocal %501 {approx = true} : vector<17x1xf32> -> vector<17x1xf32>
    %503 = vector.broadcast %502 : vector<17x1xf32> to vector<17x17xf32>
    %504 = arith.mulf %499, %503 : vector<17x17xf32>
    %cst_318 = arith.constant dense<0.000000e+00> : vector<17x8xf32>
    %505 = tpu.matmul %504, %492, %cst_318 {dimension_numbers = #tpu.dot_dimension_numbers<[1], [0], [0], [1], [0, 0, 1, 1], [], []>} : vector<17x17xf32>, vector<17x8xf32>, vector<17x8xf32> -> vector<17x8xf32>
    %c1_319 = arith.constant 1 : index
    %c3_320 = arith.constant 3 : index
    %c0_321 = arith.constant 0 : index
    %c0_322 = arith.constant 0 : index
    %506 = vector.load %arg9[%c1_319, %c3_320, %c0_321, %c0_322] : memref<2x4x8x32xf32, #tpu.memory_space<vmem>>, vector<1x1x8x32xf32>
    %507 = vector.shape_cast %506 : vector<1x1x8x32xf32> to vector<8x32xf32>
    %cst_323 = arith.constant dense<0.000000e+00> : vector<17x32xf32>
    %508 = tpu.matmul %505, %507, %cst_323 {dimension_numbers = #tpu.dot_dimension_numbers<[1], [0], [0], [1], [0, 0, 1, 1], [], []>} : vector<17x8xf32>, vector<8x32xf32>, vector<17x32xf32> -> vector<17x32xf32>
    %509 = arith.addf %460, %508 : vector<17x32xf32>
    %510 = tpu.concatenate %489, %509 in 0 : vector<17x32xf32>, vector<17x32xf32> -> vector<34x32xf32>
    %511 = arith.addf %285, %510 : vector<34x32xf32>
    %c1_324 = arith.constant 1 : index
    %c0_325 = arith.constant 0 : index
    %c0_326 = arith.constant 0 : index
    %512 = vector.load %arg10[%c1_324, %c0_325, %c0_326] : memref<2x1x32xf32, #tpu.memory_space<vmem>>, vector<1x1x32xf32>
    %513 = vector.shape_cast %512 : vector<1x1x32xf32> to vector<1x32xf32>
    %514 = vector.broadcast %513 : vector<1x32xf32> to vector<34x32xf32>
    %515 = arith.addf %511, %514 : vector<34x32xf32>
    %c1_327 = arith.constant 1 : index
    %c0_328 = arith.constant 0 : index
    %c0_329 = arith.constant 0 : index
    %516 = vector.load %arg11[%c1_327, %c0_328, %c0_329] : memref<2x1x32xf32, #tpu.memory_space<vmem>>, vector<1x1x32xf32>
    %517 = vector.shape_cast %516 : vector<1x1x32xf32> to vector<1x32xf32>
    %c1_330 = arith.constant 1 : index
    %c0_331 = arith.constant 0 : index
    %c0_332 = arith.constant 0 : index
    %518 = vector.load %arg12[%c1_330, %c0_331, %c0_332] : memref<2x1x32xf32, #tpu.memory_space<vmem>>, vector<1x1x32xf32>
    %519 = vector.shape_cast %518 : vector<1x1x32xf32> to vector<1x32xf32>
    %cst_333 = arith.constant dense<0.000000e+00> : vector<34xf32>
    %520 = vector.multi_reduction <add>, %515, %cst_333 [1] : vector<34x32xf32> to vector<34xf32>
    %521 = vector.shape_cast %520 : vector<34xf32> to vector<34x1xf32>
    %cst_334 = arith.constant 3.200000e+01 : f32
    %522 = vector.broadcast %cst_334 : f32 to vector<34x1xf32>
    %523 = arith.divf %521, %522 : vector<34x1xf32>
    %524 = vector.broadcast %523 : vector<34x1xf32> to vector<34x32xf32>
    %525 = arith.subf %515, %524 : vector<34x32xf32>
    %526 = arith.mulf %525, %525 : vector<34x32xf32>
    %cst_335 = arith.constant dense<0.000000e+00> : vector<34xf32>
    %527 = vector.multi_reduction <add>, %526, %cst_335 [1] : vector<34x32xf32> to vector<34xf32>
    %528 = vector.shape_cast %527 : vector<34xf32> to vector<34x1xf32>
    %cst_336 = arith.constant 3.200000e+01 : f32
    %529 = vector.broadcast %cst_336 : f32 to vector<34x1xf32>
    %530 = arith.divf %528, %529 : vector<34x1xf32>
    %531 = vector.broadcast %523 : vector<34x1xf32> to vector<34x32xf32>
    %532 = arith.subf %515, %531 : vector<34x32xf32>
    %cst_337 = arith.constant 9.99999974E-6 : f32
    %533 = vector.broadcast %cst_337 : f32 to vector<34x1xf32>
    %534 = arith.addf %530, %533 : vector<34x1xf32>
    %535 = math.rsqrt %534 : vector<34x1xf32>
    %536 = vector.broadcast %535 : vector<34x1xf32> to vector<34x32xf32>
    %537 = arith.mulf %532, %536 : vector<34x32xf32>
    %538 = vector.broadcast %517 : vector<1x32xf32> to vector<34x32xf32>
    %539 = arith.mulf %537, %538 : vector<34x32xf32>
    %540 = vector.broadcast %519 : vector<1x32xf32> to vector<34x32xf32>
    %541 = arith.addf %539, %540 : vector<34x32xf32>
    %c1_338 = arith.constant 1 : index
    %c0_339 = arith.constant 0 : index
    %c0_340 = arith.constant 0 : index
    %542 = vector.load %arg13[%c1_338, %c0_339, %c0_340] : memref<2x32x64xf32, #tpu.memory_space<vmem>>, vector<1x32x64xf32>
    %543 = vector.shape_cast %542 : vector<1x32x64xf32> to vector<32x64xf32>
    %cst_341 = arith.constant dense<0.000000e+00> : vector<34x64xf32>
    %544 = tpu.matmul %541, %543, %cst_341 {dimension_numbers = #tpu.dot_dimension_numbers<[1], [0], [0], [1], [0, 0, 1, 1], [], []>} : vector<34x32xf32>, vector<32x64xf32>, vector<34x64xf32> -> vector<34x64xf32>
    %c1_342 = arith.constant 1 : index
    %c0_343 = arith.constant 0 : index
    %c0_344 = arith.constant 0 : index
    %545 = vector.load %arg14[%c1_342, %c0_343, %c0_344] : memref<2x1x64xf32, #tpu.memory_space<vmem>>, vector<1x1x64xf32>
    %546 = vector.shape_cast %545 : vector<1x1x64xf32> to vector<1x64xf32>
    %547 = vector.broadcast %546 : vector<1x64xf32> to vector<34x64xf32>
    %548 = arith.addf %544, %547 : vector<34x64xf32>
    %cst_345 = arith.constant 5.000000e-01 : f32
    %549 = vector.broadcast %cst_345 : f32 to vector<34x64xf32>
    %550 = arith.mulf %549, %548 : vector<34x64xf32>
    %cst_346 = arith.constant 2.000000e+00 : f32
    %551 = math.sqrt %cst_346 : f32
    %cst_347 = arith.constant 1.000000e+00 : f32
    %552 = arith.divf %cst_347, %551 : f32
    %553 = vector.broadcast %552 : f32 to vector<34x64xf32>
    %554 = arith.mulf %548, %553 : vector<34x64xf32>
    %555 = math.erf %554 : vector<34x64xf32>
    %cst_348 = arith.constant 1.000000e+00 : f32
    %556 = vector.broadcast %cst_348 : f32 to vector<34x64xf32>
    %557 = arith.addf %556, %555 : vector<34x64xf32>
    %558 = arith.mulf %550, %557 : vector<34x64xf32>
    %c1_349 = arith.constant 1 : index
    %c0_350 = arith.constant 0 : index
    %c0_351 = arith.constant 0 : index
    %559 = vector.load %arg15[%c1_349, %c0_350, %c0_351] : memref<2x64x32xf32, #tpu.memory_space<vmem>>, vector<1x64x32xf32>
    %560 = vector.shape_cast %559 : vector<1x64x32xf32> to vector<64x32xf32>
    %cst_352 = arith.constant dense<0.000000e+00> : vector<34x32xf32>
    %561 = tpu.matmul %558, %560, %cst_352 {dimension_numbers = #tpu.dot_dimension_numbers<[1], [0], [0], [1], [0, 0, 1, 1], [], []>} : vector<34x64xf32>, vector<64x32xf32>, vector<34x32xf32> -> vector<34x32xf32>
    %562 = arith.addf %515, %561 : vector<34x32xf32>
    %c1_353 = arith.constant 1 : index
    %c0_354 = arith.constant 0 : index
    %c0_355 = arith.constant 0 : index
    %563 = vector.load %arg16[%c1_353, %c0_354, %c0_355] : memref<2x1x32xf32, #tpu.memory_space<vmem>>, vector<1x1x32xf32>
    %564 = vector.shape_cast %563 : vector<1x1x32xf32> to vector<1x32xf32>
    %565 = vector.broadcast %564 : vector<1x32xf32> to vector<34x32xf32>
    %566 = arith.addf %562, %565 : vector<34x32xf32>
    %567 = vector.extract_strided_slice %566 {offsets = [0, 0], sizes = [1, 32], strides = [1, 1]} : vector<34x32xf32> to vector<1x32xf32>
    %568 = vector.extract_strided_slice %566 {offsets = [17, 0], sizes = [1, 32], strides = [1, 1]} : vector<34x32xf32> to vector<1x32xf32>
    %569 = tpu.concatenate %567, %568 in 0 : vector<1x32xf32>, vector<1x32xf32> -> vector<2x32xf32>
    %c0_356 = arith.constant 0 : index
    %c0_357 = arith.constant 0 : index
    %570 = vector.load %arg17[%c0_356, %c0_357] : memref<1x32xf32, #tpu.memory_space<vmem>>, vector<1x32xf32>
    %c0_358 = arith.constant 0 : index
    %c0_359 = arith.constant 0 : index
    %571 = vector.load %arg18[%c0_358, %c0_359] : memref<1x32xf32, #tpu.memory_space<vmem>>, vector<1x32xf32>
    %cst_360 = arith.constant dense<0.000000e+00> : vector<2xf32>
    %572 = vector.multi_reduction <add>, %569, %cst_360 [1] : vector<2x32xf32> to vector<2xf32>
    %573 = vector.shape_cast %572 : vector<2xf32> to vector<2x1xf32>
    %cst_361 = arith.constant 3.200000e+01 : f32
    %574 = vector.broadcast %cst_361 : f32 to vector<2x1xf32>
    %575 = arith.divf %573, %574 : vector<2x1xf32>
    %576 = vector.broadcast %575 : vector<2x1xf32> to vector<2x32xf32>
    %577 = arith.subf %569, %576 : vector<2x32xf32>
    %578 = arith.mulf %577, %577 : vector<2x32xf32>
    %cst_362 = arith.constant dense<0.000000e+00> : vector<2xf32>
    %579 = vector.multi_reduction <add>, %578, %cst_362 [1] : vector<2x32xf32> to vector<2xf32>
    %580 = vector.shape_cast %579 : vector<2xf32> to vector<2x1xf32>
    %cst_363 = arith.constant 3.200000e+01 : f32
    %581 = vector.broadcast %cst_363 : f32 to vector<2x1xf32>
    %582 = arith.divf %580, %581 : vector<2x1xf32>
    %583 = vector.broadcast %575 : vector<2x1xf32> to vector<2x32xf32>
    %584 = arith.subf %569, %583 : vector<2x32xf32>
    %cst_364 = arith.constant 9.99999974E-6 : f32
    %585 = vector.broadcast %cst_364 : f32 to vector<2x1xf32>
    %586 = arith.addf %582, %585 : vector<2x1xf32>
    %587 = math.rsqrt %586 : vector<2x1xf32>
    %588 = vector.broadcast %587 : vector<2x1xf32> to vector<2x32xf32>
    %589 = arith.mulf %584, %588 : vector<2x32xf32>
    %590 = vector.broadcast %570 : vector<1x32xf32> to vector<2x32xf32>
    %591 = arith.mulf %589, %590 : vector<2x32xf32>
    %592 = vector.broadcast %571 : vector<1x32xf32> to vector<2x32xf32>
    %593 = arith.addf %591, %592 : vector<2x32xf32>
    %c0_365 = arith.constant 0 : index
    %c0_366 = arith.constant 0 : index
    %594 = vector.load %arg19[%c0_365, %c0_366] : memref<32x10xf32, #tpu.memory_space<vmem>>, vector<32x10xf32>
    %cst_367 = arith.constant dense<0.000000e+00> : vector<2x10xf32>
    %595 = tpu.matmul %593, %594, %cst_367 {dimension_numbers = #tpu.dot_dimension_numbers<[1], [0], [0], [1], [0, 0, 1, 1], [], []>} : vector<2x32xf32>, vector<32x10xf32>, vector<2x10xf32> -> vector<2x10xf32>
    %c0_368 = arith.constant 0 : index
    %c0_369 = arith.constant 0 : index
    %596 = vector.load %arg20[%c0_368, %c0_369] : memref<1x10xf32, #tpu.memory_space<vmem>>, vector<1x10xf32>
    %597 = vector.broadcast %596 : vector<1x10xf32> to vector<2x10xf32>
    %598 = arith.addf %595, %597 : vector<2x10xf32>
    %c0_370 = arith.constant 0 : index
    %c0_371 = arith.constant 0 : index
    %599 = vector.load %arg21[%c0_370, %c0_371] : memref<2x10xf32, #tpu.memory_space<vmem>>, vector<2x10xf32>
    tpu.vector_store %arg21[%c0_370, %c0_371], %598 {strides = array<i32>} : memref<2x10xf32, #tpu.memory_space<vmem>>, vector<2x10xf32>,
    return
  }
  func.func @transform_0(%arg0: i32) -> (i32, i32) {
    %c0_i32 = arith.constant 0 : i32
    %c0_i32_0 = arith.constant 0 : i32
    %c0_i32_1 = arith.constant 0 : i32
    return %c0_i32, %c0_i32_0 : i32, i32
  }
  func.func @transform_1(%arg0: i32) -> (i32, i32) {
    %c0_i32 = arith.constant 0 : i32
    %c0_i32_0 = arith.constant 0 : i32
    %c0_i32_1 = arith.constant 0 : i32
    return %c0_i32, %c0_i32_0 : i32, i32
  }
  func.func @transform_2(%arg0: i32) -> (i32, i32) {
    %c0_i32 = arith.constant 0 : i32
    %c0_i32_0 = arith.constant 0 : i32
    %c0_i32_1 = arith.constant 0 : i32
    return %c0_i32, %c0_i32_0 : i32, i32
  }
  func.func @transform_3(%arg0: i32) -> (i32, i32, i32) {
    %c0_i32 = arith.constant 0 : i32
    %c0_i32_0 = arith.constant 0 : i32
    %c0_i32_1 = arith.constant 0 : i32
    %c0_i32_2 = arith.constant 0 : i32
    return %c0_i32, %c0_i32_0, %c0_i32_1 : i32, i32, i32
  }
  func.func @transform_4(%arg0: i32) -> (i32, i32, i32) {
    %c0_i32 = arith.constant 0 : i32
    %c0_i32_0 = arith.constant 0 : i32
    %c0_i32_1 = arith.constant 0 : i32
    %c0_i32_2 = arith.constant 0 : i32
    return %c0_i32, %c0_i32_0, %c0_i32_1 : i32, i32, i32
  }
  func.func @transform_5(%arg0: i32) -> (i32, i32, i32, i32) {
    %c0_i32 = arith.constant 0 : i32
    %c0_i32_0 = arith.constant 0 : i32
    %c0_i32_1 = arith.constant 0 : i32
    %c0_i32_2 = arith.constant 0 : i32
    %c0_i32_3 = arith.constant 0 : i32
    return %c0_i32, %c0_i32_0, %c0_i32_1, %c0_i32_2 : i32, i32, i32, i32
  }
  func.func @transform_6(%arg0: i32) -> (i32, i32, i32, i32) {
    %c0_i32 = arith.constant 0 : i32
    %c0_i32_0 = arith.constant 0 : i32
    %c0_i32_1 = arith.constant 0 : i32
    %c0_i32_2 = arith.constant 0 : i32
    %c0_i32_3 = arith.constant 0 : i32
    return %c0_i32, %c0_i32_0, %c0_i32_1, %c0_i32_2 : i32, i32, i32, i32
  }
  func.func @transform_7(%arg0: i32) -> (i32, i32, i32, i32) {
    %c0_i32 = arith.constant 0 : i32
    %c0_i32_0 = arith.constant 0 : i32
    %c0_i32_1 = arith.constant 0 : i32
    %c0_i32_2 = arith.constant 0 : i32
    %c0_i32_3 = arith.constant 0 : i32
    return %c0_i32, %c0_i32_0, %c0_i32_1, %c0_i32_2 : i32, i32, i32, i32
  }
  func.func @transform_8(%arg0: i32) -> (i32, i32, i32, i32) {
    %c0_i32 = arith.constant 0 : i32
    %c0_i32_0 = arith.constant 0 : i32
    %c0_i32_1 = arith.constant 0 : i32
    %c0_i32_2 = arith.constant 0 : i32
    %c0_i32_3 = arith.constant 0 : i32
    return %c0_i32, %c0_i32_0, %c0_i32_1, %c0_i32_2 : i32, i32, i32, i32
  }
  func.func @transform_9(%arg0: i32) -> (i32, i32, i32) {
    %c0_i32 = arith.constant 0 : i32
    %c0_i32_0 = arith.constant 0 : i32
    %c0_i32_1 = arith.constant 0 : i32
    %c0_i32_2 = arith.constant 0 : i32
    return %c0_i32, %c0_i32_0, %c0_i32_1 : i32, i32, i32
  }
  func.func @transform_10(%arg0: i32) -> (i32, i32, i32) {
    %c0_i32 = arith.constant 0 : i32
    %c0_i32_0 = arith.constant 0 : i32
    %c0_i32_1 = arith.constant 0 : i32
    %c0_i32_2 = arith.constant 0 : i32
    return %c0_i32, %c0_i32_0, %c0_i32_1 : i32, i32, i32
  }
  func.func @transform_11(%arg0: i32) -> (i32, i32, i32) {
    %c0_i32 = arith.constant 0 : i32
    %c0_i32_0 = arith.constant 0 : i32
    %c0_i32_1 = arith.constant 0 : i32
    %c0_i32_2 = arith.constant 0 : i32
    return %c0_i32, %c0_i32_0, %c0_i32_1 : i32, i32, i32
  }
  func.func @transform_12(%arg0: i32) -> (i32, i32, i32) {
    %c0_i32 = arith.constant 0 : i32
    %c0_i32_0 = arith.constant 0 : i32
    %c0_i32_1 = arith.constant 0 : i32
    %c0_i32_2 = arith.constant 0 : i32
    return %c0_i32, %c0_i32_0, %c0_i32_1 : i32, i32, i32
  }
  func.func @transform_13(%arg0: i32) -> (i32, i32, i32) {
    %c0_i32 = arith.constant 0 : i32
    %c0_i32_0 = arith.constant 0 : i32
    %c0_i32_1 = arith.constant 0 : i32
    %c0_i32_2 = arith.constant 0 : i32
    return %c0_i32, %c0_i32_0, %c0_i32_1 : i32, i32, i32
  }
  func.func @transform_14(%arg0: i32) -> (i32, i32, i32) {
    %c0_i32 = arith.constant 0 : i32
    %c0_i32_0 = arith.constant 0 : i32
    %c0_i32_1 = arith.constant 0 : i32
    %c0_i32_2 = arith.constant 0 : i32
    return %c0_i32, %c0_i32_0, %c0_i32_1 : i32, i32, i32
  }
  func.func @transform_15(%arg0: i32) -> (i32, i32, i32) {
    %c0_i32 = arith.constant 0 : i32
    %c0_i32_0 = arith.constant 0 : i32
    %c0_i32_1 = arith.constant 0 : i32
    %c0_i32_2 = arith.constant 0 : i32
    return %c0_i32, %c0_i32_0, %c0_i32_1 : i32, i32, i32
  }
  func.func @transform_16(%arg0: i32) -> (i32, i32) {
    %c0_i32 = arith.constant 0 : i32
    %c0_i32_0 = arith.constant 0 : i32
    %c0_i32_1 = arith.constant 0 : i32
    return %c0_i32, %c0_i32_0 : i32, i32
  }
  func.func @transform_17(%arg0: i32) -> (i32, i32) {
    %c0_i32 = arith.constant 0 : i32
    %c0_i32_0 = arith.constant 0 : i32
    %c0_i32_1 = arith.constant 0 : i32
    return %c0_i32, %c0_i32_0 : i32, i32
  }
  func.func @transform_18(%arg0: i32) -> (i32, i32) {
    %c0_i32 = arith.constant 0 : i32
    %c0_i32_0 = arith.constant 0 : i32
    %c0_i32_1 = arith.constant 0 : i32
    return %c0_i32, %c0_i32_0 : i32, i32
  }
  func.func @transform_19(%arg0: i32) -> (i32, i32) {
    %c0_i32 = arith.constant 0 : i32
    %c0_i32_0 = arith.constant 0 : i32
    %c0_i32_1 = arith.constant 0 : i32
    return %c0_i32, %c0_i32_0 : i32, i32
  }
  func.func @transform_20(%arg0: i32) -> (i32, i32) {
    %c0_i32 = arith.constant 0 : i32
    %c0_i32_0 = arith.constant 0 : i32
    %c0_i32_1 = arith.constant 0 : i32
    return %c0_i32, %c0_i32_0 : i32, i32
  }
}

</mosaic_0001>

<bundles_post_ra>
// kernel: tile.9
= control target key start
LH: loop header
LB: loop body
LE: loop exit
PB: predicated region body
PF: predicated region fallthrough
CT: control target
= control target key end

     0   :  { %vm3_vm0 = vcmask 261120   ;;  %s11_s6 = smov 3  ;;  %s74_s0 = inlined_call_operand.vmem [shape: f32[2,17,32], index: 0, kind: input, shape index: {}]   ;;  %s75_s1 = inlined_call_operand.vmem [shape: f32[34,32], index: 1, kind: output, shape index: {}]  }
   0x1   :  { %v2_v0 = vld [vmem:[%s74_s0] sm:$0xff]   ;;  %v26_v1 = vld [vmem:[%s74_s0 + $0x8] sm:$0xff]  }
   0x2   :  { %v28_v2 = vld [vmem:[%s74_s0 + $0x10] ss:$8 sm:%s11_s6]   ;;  %4 = vst.msk [vmem:[%s75_s1] sm:$0xff] %vm3_vm0, %v2_v0   ;;  %27 = vst.msk [vmem:[%s75_s1 + $0x8] sm:$0xff] %vm3_vm0, %v26_v1  }
   0x3   :  { %29 = vst.msk [vmem:[%s75_s1 + $0x10] sm:$0x3] %vm3_vm0, %v28_v2   ;;  %v30_v3 = vld [vmem:[%s74_s0 + $0x19] sm:$0xff]   ;;  %v32_v4 = vld [vmem:[%s74_s0 + $0x21] sm:$0xff]  }
   0x4   :  { %31 = vst.msk [vmem:[%s75_s1 + $0x12] sm:$0xff] %vm3_vm0, %v30_v3   ;;  %33 = vst.msk [vmem:[%s75_s1 + $0x1a] sm:$0xff] %vm3_vm0, %v32_v4  }

// kernel: vit_forward.1
= control target key start
LH: loop header
LB: loop body
LE: loop exit
PB: predicated region body
PF: predicated region fallthrough
CT: control target
= control target key end

     0   :  { %s14166_s0 = inlined_call_operand.vmem [shape: f32[34,48], index: 0, kind: input, shape index: {}]   ;;  %s14167_s1 = inlined_call_operand.vmem [shape: f32[48,32], index: 1, kind: input, shape index: {}]   ;;  %s14168_s2 = inlined_call_operand.vmem [shape: f32[34,32], index: 2, kind: input, shape index: {}]   ;;  %s14169_s3 = inlined_call_operand.vmem [shape: f32[2,1,32], index: 3, kind: input, shape index: {}]   ;;  %s14170_s4 = inlined_call_operand.vmem [shape: f32[2,1,32], index: 4, kind: input, shape index: {}]   ;;  %s14171_s5 = inlined_call_operand.vmem [shape: f32[2,4,32,8], index: 5, kind: input, shape index: {}]   ;;  %s14172_s6 = inlined_call_operand.vmem [shape: f32[2,4,32,8], index: 6, kind: input, shape index: {}]   ;;  %s14173_s7 = inlined_call_operand.vmem [shape: f32[2,4,32,8], index: 7, kind: input, shape index: {}]   ;;  %s14174_s8 = inlined_call_operand.vmem [shape: f32[2,4,8,32], index: 8, kind: input, shape index: {}]   ;;  %s14175_s9 = inlined_call_operand.vmem [shape: f32[2,1,32], index: 9, kind: input, shape index: {}]   ;;  %s14176_s10 = inlined_call_operand.vmem [shape: f32[2,1,32], index: 10, kind: input, shape index: {}]   ;;  %s14177_s11 = inlined_call_operand.vmem [shape: f32[2,1,32], index: 11, kind: input, shape index: {}]   ;;  %s14178_s12 = inlined_call_operand.vmem [shape: f32[2,32,64], index: 12, kind: input, shape index: {}]   ;;  %s14179_s13 = inlined_call_operand.vmem [shape: f32[2,1,64], index: 13, kind: input, shape index: {}]   ;;  %s14180_s14 = inlined_call_operand.vmem [shape: f32[2,64,32], index: 14, kind: input, shape index: {}]   ;;  %s14181_s15 = inlined_call_operand.vmem [shape: f32[2,1,32], index: 15, kind: input, shape index: {}]   ;;  %s14182_s16 = inlined_call_operand.vmem [shape: f32[1,32], index: 16, kind: input, shape index: {}]   ;;  %s14183_s17 = inlined_call_operand.vmem [shape: f32[1,32], index: 17, kind: input, shape index: {}]   ;;  %s14184_s18 = inlined_call_operand.vmem [shape: f32[32,10], index: 18, kind: input, shape index: {}]   ;;  %s14185_s19 = inlined_call_operand.vmem [shape: f32[1,10], index: 19, kind: input, shape index: {}]   ;;  %s14186_s20 = inlined_call_operand.hbm [shape: f32[2,10], index: 20, kind: output, shape index: {}]  }
   0x1   :  { %14192 = sst [smem:[#allocation5_spill]] %s14166_s0 }
   0x2   :  { %14193 = sst [smem:[#allocation6_spill]] %s14167_s1 }
   0x3   :  { %14194 = sst [smem:[#allocation7_spill]] %s14168_s2 }
   0x4   :  { %14195 = sst [smem:[#allocation8_spill]] %s14169_s3 }
   0x5   :  { %14196 = sst [smem:[#allocation9_spill]] %s14170_s4 }
   0x6   :  { %s14197_s23 = sld [smem:[#allocation6_spill]]  ;;  %v11401_v1 = vmov 0.0   ;;  %vm11402_vm0 = vmmov 0  }
   0x7   :  { %9762 = vmatprep.subr.mxu0 %v11401_v1  ;;  %9774 = vmatprep.mubr.msk.f32.mxu0 %vm11402_vm0, %v11401_v1 }
   0x8   :  { %9789 = vmatprep.subr.mxu1 %v11401_v1  ;;  %9797 = vmatprep.mubr.msk.f32.mxu1 %vm11402_vm0, %v11401_v1 }
   0xc   :  { %v76_v0 = vld [vmem:[%s14197_s23 + $0x28] sm:$0xff]  ;;  %v75_v2 = vld [vmem:[%s14197_s23 + $0x20] sm:$0xff]  ;;  %v74_v3 = vld [vmem:[%s14197_s23 + $0x18] sm:$0xff] }
   0xd   :  { %9763 = vmatpush3.msra.mxu0 %v76_v0 }
   0xe   :  { %9764 = vmatprep.subr.mxu0 %v11401_v1 }
   0xf   :  { %9765 = vmatpush3.msra.mxu0 %v75_v2 }
  0x10   :  { %25 = vsyncpa [#allocation3], 0  ;;  %9766 = vmatprep.subr.mxu0 %v11401_v1  ;;  %v73_v4 = vld [vmem:[%s14197_s23 + $0x10] sm:$0xff]  ;;  %v72_v5 = vld [vmem:[%s14197_s23 + $0x8] sm:$0xff]  ;;  %s14198_s1 = sld [smem:[#allocation5_spill]]  ;;  %vm82_vm1 = vcmask 392192  }
  0x11   :  { %9767 = vmatpush3.msra.mxu0 %v74_v3  ;;  %v71_v6 = vld [vmem:[%s14197_s23] sm:$0xff]  ;;  %s14199_s29 = sld [smem:[#allocation7_spill]]  ;;  %vm190_vm2 = vcmask 261120   ;;  %vm203_vm3 = vcmask 254976   ;;  %v283_v62 = vld [vmem:[%s14171_s5 + $0x18] sm:$0xff]  ;;  %v282_v0 = vld [vmem:[%s14171_s5 + $0x10] sm:$0xff] }
  0x12   :  { %9768 = vmatprep.subr.mxu0 %v11401_v1  ;;  %v486_v63 = vld [vmem:[%s14173_s7 + $0x18] sm:$0xff]  ;;  %9790 = vmatpush3.msra.mxu1 %v283_v62  ;;  %v485_v2 = vld [vmem:[%s14173_s7 + $0x10] sm:$0xff]  ;;  %v281_v3 = vld [vmem:[%s14171_s5 + $0x8] sm:$0xff]  ;;  %s14200_s27 = sld [smem:[#allocation8_spill]]  ;;  %vm720_vm4 = vcmask 1040384   ;;  %vm577_vm5 = vcmask 64512  }
  0x13   :  { %9769 = vmatpush3.msra.mxu0 %v73_v4  ;;  %9791 = vmatprep.subr.mxu1 %v11401_v1  ;;  %v484_v4 = vld [vmem:[%s14173_s7 + $0x8] sm:$0xff]  ;;  %vm807_vm6 = vcmask 1046528   ;;  %vm676_vm7 = vcmask 138240   ;;  %vm683_vm8 = vcmask 131072   ;;  %vm4283_vm9 = vcmask 523264  }
  0x14   :  { %9770 = vmatprep.subr.mxu0 %v11401_v1  ;;  %9792 = vmatpush3.msra.mxu1 %v282_v0  ;;  %vm8733_vm10 = vcmask 74752  }
  0x15   :  { %9771 = vmatpush3.msra.mxu0 %v72_v5  ;;  %9793 = vmatprep.subr.mxu1 %v11401_v1  ;;  %v280_v5 = vld [vmem:[%s14171_s5] sm:$0xff] }
  0x16   :  { %v66_v7 = vld [vmem:[%s14198_s1] sm:$0xff]  ;;  %9772 = vmatprep.subr.mxu0 %v11401_v1  ;;  %v67_v8 = vld [vmem:[%s14198_s1 + $0x8] sm:$0xff]  ;;  %v68_v9 = vld [vmem:[%s14198_s1 + $0x10] sm:$0xff]  ;;  %9794 = vmatpush3.msra.mxu1 %v281_v3 }
  0x17   :  { %9773 = vmatpush3.msra.mxu0 %v71_v6  ;;  %v69_v10 = vld [vmem:[%s14198_s1 + $0x18] sm:$0xff]  ;;  %v70_v11 = vld [vmem:[%s14198_s1 + $0x20] sm:$0x3]  ;;  %v78_v16 = vld [vmem:[%s14199_s29 + $0x8] sm:$0xff]  ;;  %9795 = vmatprep.subr.mxu1 %v11401_v1 }
  0x18   :  { %9775 = vmatmul.mubr.msk.f32.vlgmr.msra.gmra.mxu0 %vm82_vm1, %v66_v7  ;;  %9835 = vmatprep.subr.mxu0 %v11401_v1  ;;  %v77_v12 = vld [vmem:[%s14199_s29] sm:$0xff]  ;;  %v79_v21 = vld [vmem:[%s14199_s29 + $0x10] sm:$0xff]  ;;  %v80_v26 = vld [vmem:[%s14199_s29 + $0x18] sm:$0xff] }
  0x19   :  { %9777 = vmatprep.mubr.msk.f32.mxu0 %vm11402_vm0, %v11401_v1  ;;  %v81_v31 = vld [vmem:[%s14199_s29 + $0x20] sm:$0x3]  ;;  %9836 = vmatpush3.msra.mxu0 %v486_v63  ;;  %s14201_s29 = sld [smem:[#allocation9_spill]] }
  0x1a   :  { %9837 = vmatprep.subr.mxu0 %v11401_v1  ;;  %v483_v6 = vld [vmem:[%s14173_s7] sm:$0xff]  ;;  %9796 = vmatpush3.msra.mxu1 %v280_v5 }
  0x1b   :  { %9838 = vmatpush3.msra.mxu0 %v485_v2  ;;  %9812 = vmatprep.subr.mxu1 %v11401_v1 }
  0x1c   :  { %9778 = vmatmul.mubr.msk.f32.gmra.mxu0 %vm82_vm1, %v67_v8  ;;  %9839 = vmatprep.subr.mxu0 %v11401_v1 }
  0x1d   :  { %9780 = vmatprep.mubr.msk.f32.mxu0 %vm11402_vm0, %v11401_v1  ;;  %9840 = vmatpush3.msra.mxu0 %v484_v4 }
  0x1e   :  { %9841 = vmatprep.subr.mxu0 %v11401_v1 }
  0x1f   :  { %9842 = vmatpush3.msra.mxu0 %v483_v6 }
  0x20   :  { %9781 = vmatmul.mubr.msk.f32.gmra.mxu0 %vm82_vm1, %v68_v9  ;;  %9873 = vmatprep.subr.mxu0 %v11401_v1 }
  0x21   :  { %9783 = vmatprep.mubr.msk.f32.mxu0 %vm11402_vm0, %v11401_v1 }
  0x24   :  { %9784 = vmatmul.mubr.msk.f32.gmra.mxu0 %vm82_vm1, %v69_v10 }
  0x25   :  { %9786 = vmatprep.mubr.msk.f32.mxu0 %vm11402_vm0, %v11401_v1 }
  0x28   :  { %9787 = vmatmul.mubr.msk.f32.gmra.mxu0 %vm82_vm1, %v70_v11 }
  0x29   :  { %9843 = vmatprep.mubr.msk.f32.mxu0 %vm11402_vm0, %v11401_v1 }
  0xd8   :  { %v164_v13 = vpop.f32.mrf.mxu0 }
  0xd9   :  { %v11572_v14 = vadd.f32 %v164_v13, %v77_v12 }
  0xda   :  { %v9776_v15 = vpop.f32.mrf.mxu0 }
  0xdb   :  { %v191_v17 = vsel %vm190_vm2, %v11572_v14, 0.0 }
  0xdc   :  { %192 = vadd.xlane.f32.xlu0 %v191_v17  ;;  %v169_v18 = vpop.f32.mrf.mxu0 }
  0xdd   :  { %v11579_v19 = vadd.f32 %v169_v18, %v78_v16 }
  0xde   :  { %v9779_v20 = vpop.f32.mrf.mxu0 }
  0xdf   :  { %v194_v22 = vsel %vm190_vm2, %v11579_v19, 0.0 }
  0xe0   :  { %195 = vadd.xlane.f32.xlu0 %v194_v22  ;;  %v174_v23 = vpop.f32.mrf.mxu0 }
  0xe1   :  { %v11586_v24 = vadd.f32 %v174_v23, %v79_v21 }
  0xe2   :  { %v9782_v25 = vpop.f32.mrf.mxu0 }
  0xe3   :  { %v197_v27 = vsel %vm190_vm2, %v11586_v24, 0.0  ;;  %v8754_v25 = vld [vmem:[%s14200_s27] ss:$0 sm:$0xff] }
  0xe4   :  { %198 = vadd.xlane.f32.xlu1 %v197_v27  ;;  %v179_v28 = vpop.f32.mrf.mxu0 }
  0xe5   :  { %v11593_v29 = vadd.f32 %v179_v28, %v80_v26  ;;  %v8755_v28 = vld [vmem:[%s14201_s29] ss:$0 sm:$0xff] }
  0xe6   :  { %v9785_v30 = vpop.f32.mrf.mxu0 }
  0xe7   :  { %v200_v32 = vsel %vm190_vm2, %v11593_v29, 0.0 }
  0xe8   :  { %201 = vadd.xlane.f32.xlu1 %v200_v32  ;;  %v184_v33 = vpop.f32.mrf.mxu0 }
  0xe9   :  { %v11600_v34 = vadd.f32 %v184_v33, %v81_v31 }
  0xea   :  { %v9788_v35 = vpop.f32.mrf.mxu0 }
  0xeb   :  { %v204_v36 = vsel %vm203_vm3, %v11600_v34, 0.0  ;;  %v392_v35 = vld [vmem:[%s14172_s6 + $0x18] sm:$0xff] }
  0xec   :  { %205 = vadd.xlane.f32.xlu0 %v204_v36 }
 0x165   :  { %v193_v37 = vpop.xlane.xlu0 %192 }
 0x166   :  { %v208_v38 = vmul.f32 0.03125, %v193_v37 }
 0x168   :  { %v11605_v39 = vsub.f32 %v11572_v14, %v208_v38 }
 0x169   :  { %v196_v40 = vpop.xlane.xlu0 %195 }
 0x16a   :  { %v209_v41 = vmul.f32 0.03125, %v196_v40  ;;  %v218_v42 = vmul.f32 %v11605_v39, %v11605_v39  ;;  %v391_v40 = vld [vmem:[%s14172_s6 + $0x10] sm:$0xff] }
 0x16c   :  { %v11610_v43 = vsub.f32 %v11579_v19, %v209_v41  ;;  %v223_v44 = vsel %vm190_vm2, %v218_v42, 0.0 }
 0x16d   :  { %v199_v45 = vpop.xlane.xlu1 %198  ;;  %224 = vadd.xlane.f32.xlu1 %v223_v44 }
 0x16e   :  { %v210_v46 = vmul.f32 0.03125, %v199_v45  ;;  %v219_v47 = vmul.f32 %v11610_v43, %v11610_v43  ;;  %v390_v45 = vld [vmem:[%s14172_s6 + $0x8] sm:$0xff] }
 0x170   :  { %v11616_v48 = vsub.f32 %v11586_v24, %v210_v46  ;;  %v226_v49 = vsel %vm190_vm2, %v219_v47, 0.0 }
 0x171   :  { %v202_v50 = vpop.xlane.xlu1 %201  ;;  %227 = vadd.xlane.f32.xlu0 %v226_v49 }
 0x172   :  { %v211_v51 = vmul.f32 0.03125, %v202_v50  ;;  %v220_v52 = vmul.f32 %v11616_v48, %v11616_v48  ;;  %v389_v50 = vld [vmem:[%s14172_s6] sm:$0xff] }
 0x174   :  { %v11622_v53 = vsub.f32 %v11593_v29, %v211_v51  ;;  %v229_v54 = vsel %vm190_vm2, %v220_v52, 0.0 }
 0x175   :  { %230 = vadd.xlane.f32.xlu1 %v229_v54  ;;  %v206_v55 = vpop.xlane.xlu0 %205 }
 0x176   :  { %v212_v56 = vmul.f32 0.03125, %v206_v55  ;;  %v221_v57 = vmul.f32 %v11622_v53, %v11622_v53 }
 0x178   :  { %v11628_v58 = vsub.f32 %v11600_v34, %v212_v56  ;;  %v232_v59 = vsel %vm190_vm2, %v221_v57, 0.0 }
 0x179   :  { %233 = vadd.xlane.f32.xlu0 %v232_v59 }
 0x17a   :  { %v222_v60 = vmul.f32 %v11628_v58, %v11628_v58 }
 0x17c   :  { %v235_v61 = vsel %vm203_vm3, %v222_v60, 0.0 }
 0x17d   :  { %236 = vadd.xlane.f32.xlu1 %v235_v61 }
 0x1f6   :  { %v225_v7 = vpop.xlane.xlu1 %224 }
 0x1f7   :  { %v238_v8 = vmul.f32 0.03125, %v225_v7 }
 0x1f9   :  { %v243_v9 = vadd.f32 1e-05, %v238_v8 }
 0x1fa   :  { %v228_v10 = vpop.xlane.xlu0 %227 }
 0x1fb   :  { %11125 = vrsqrt.f32 %v243_v9  ;;  %v239_v11 = vmul.f32 0.03125, %v228_v10 }
 0x1fd   :  { %v244_v12 = vadd.f32 1e-05, %v239_v11 }
 0x1fe   :  { %v231_v13 = vpop.xlane.xlu1 %230 }
 0x1ff   :  { %11127 = vrsqrt.f32 %v244_v12  ;;  %v240_v15 = vmul.f32 0.03125, %v231_v13 }
 0x201   :  { %v245_v16 = vadd.f32 1e-05, %v240_v15 }
 0x202   :  { %v234_v17 = vpop.xlane.xlu0 %233 }
 0x203   :  { %11129 = vrsqrt.f32 %v245_v16  ;;  %v241_v18 = vmul.f32 0.03125, %v234_v17 }
 0x205   :  { %v246_v20 = vadd.f32 1e-05, %v241_v18 }
 0x206   :  { %v237_v21 = vpop.xlane.xlu1 %236 }
 0x207   :  { %11131 = vrsqrt.f32 %v246_v20  ;;  %v242_v22 = vmul.f32 0.03125, %v237_v21 }
 0x208   :  { %v11126_v23 = vpop.eup %11125 }
 0x209   :  { %v253_v26 = vmul.f32 %v11126_v23, %v11605_v39  ;;  %v247_v27 = vadd.f32 1e-05, %v242_v22 }
 0x20b   :  { %v264_v30 = vmul.f32 %v8754_v25, %v253_v26  ;;  %11133 = vrsqrt.f32 %v247_v27 }
 0x20c   :  { %v11128_v31 = vpop.eup %11127 }
 0x20d   :  { %v11673_v32 = vadd.f32 %v8755_v28, %v264_v30  ;;  %v254_v33 = vmul.f32 %v11128_v31, %v11610_v43 }
 0x20f   :  { %v265_v36 = vmul.f32 %v8754_v25, %v254_v33  ;;  %9798 = vmatmul.mubr.msk.f32.vlgmr.msra.gmra.mxu1 %vm190_vm2, %v11673_v32  ;;  %9844 = vmatmul.mubr.msk.f32.vlgmr.msra.gmra.mxu0 %vm190_vm2, %v11673_v32 }
 0x210   :  { %v11130_v37 = vpop.eup %11129  ;;  %9800 = vmatprep.mubr.msk.f32.mxu1 %vm11402_vm0, %v11401_v1  ;;  %9846 = vmatprep.mubr.msk.f32.mxu0 %vm11402_vm0, %v11401_v1 }
 0x211   :  { %v11687_v38 = vadd.f32 %v8755_v28, %v265_v36  ;;  %v255_v39 = vmul.f32 %v11130_v37, %v11616_v48  ;;  %9813 = vmatpush3.msra.mxu1 %v392_v35 }
 0x212   :  { %9814 = vmatprep.subr.mxu1 %v11401_v1 }
 0x213   :  { %v266_v41 = vmul.f32 %v8754_v25, %v255_v39  ;;  %9801 = vmatmul.mubr.msk.f32.gmra.mxu1 %vm190_vm2, %v11687_v38  ;;  %9847 = vmatmul.mubr.msk.f32.gmra.mxu0 %vm190_vm2, %v11687_v38 }
 0x214   :  { %v11132_v42 = vpop.eup %11131  ;;  %9803 = vmatprep.mubr.msk.f32.mxu1 %vm11402_vm0, %v11401_v1  ;;  %9849 = vmatprep.mubr.msk.f32.mxu0 %vm11402_vm0, %v11401_v1 }
 0x215   :  { %v11702_v43 = vadd.f32 %v8755_v28, %v266_v41  ;;  %v256_v44 = vmul.f32 %v11132_v42, %v11622_v53  ;;  %9815 = vmatpush3.msra.mxu1 %v391_v40 }
 0x216   :  { %9816 = vmatprep.subr.mxu1 %v11401_v1 }
 0x217   :  { %v267_v46 = vmul.f32 %v8754_v25, %v256_v44  ;;  %9804 = vmatmul.mubr.msk.f32.gmra.mxu1 %vm190_vm2, %v11702_v43  ;;  %9850 = vmatmul.mubr.msk.f32.gmra.mxu0 %vm190_vm2, %v11702_v43 }
 0x218   :  { %v11134_v47 = vpop.eup %11133  ;;  %9806 = vmatprep.mubr.msk.f32.mxu1 %vm11402_vm0, %v11401_v1  ;;  %9852 = vmatprep.mubr.msk.f32.mxu0 %vm11402_vm0, %v11401_v1 }
 0x219   :  { %v11717_v48 = vadd.f32 %v8755_v28, %v267_v46  ;;  %v257_v49 = vmul.f32 %v11134_v47, %v11628_v58  ;;  %9817 = vmatpush3.msra.mxu1 %v390_v45 }
 0x21a   :  { %9818 = vmatprep.subr.mxu1 %v11401_v1 }
 0x21b   :  { %v268_v51 = vmul.f32 %v8754_v25, %v257_v49  ;;  %9807 = vmatmul.mubr.msk.f32.gmra.mxu1 %vm190_vm2, %v11717_v48  ;;  %9853 = vmatmul.mubr.msk.f32.gmra.mxu0 %vm190_vm2, %v11717_v48 }
 0x21c   :  { %9809 = vmatprep.mubr.msk.f32.mxu1 %vm11402_vm0, %v11401_v1  ;;  %9855 = vmatprep.mubr.msk.f32.mxu0 %vm11402_vm0, %v11401_v1 }
 0x21d   :  { %v11732_v52 = vadd.f32 %v8755_v28, %v268_v51  ;;  %9819 = vmatpush3.msra.mxu1 %v389_v50 }
 0x21e   :  { %9858 = vmatprep.subr.mxu1 %v11401_v1 }
 0x21f   :  { %9810 = vmatmul.mubr.msk.f32.gmra.mxu1 %vm190_vm2, %v11732_v52  ;;  %9856 = vmatmul.mubr.msk.f32.gmra.mxu0 %vm190_vm2, %v11732_v52 }
 0x220   :  { %9820 = vmatprep.mubr.msk.f32.mxu1 %vm11402_vm0, %v11401_v1  ;;  %9879 = vmatprep.mubr.msk.f32.mxu0 %vm11402_vm0, %v11401_v1 }
 0x223   :  { %9821 = vmatmul.mubr.msk.f32.vlgmr.msra.gmra.mxu1 %vm190_vm2, %v11673_v32 }
 0x224   :  { %9823 = vmatprep.mubr.msk.f32.mxu1 %vm11402_vm0, %v11401_v1 }
 0x227   :  { %9824 = vmatmul.mubr.msk.f32.gmra.mxu1 %vm190_vm2, %v11687_v38 }
 0x228   :  { %9826 = vmatprep.mubr.msk.f32.mxu1 %vm11402_vm0, %v11401_v1 }
 0x22b   :  { %9827 = vmatmul.mubr.msk.f32.gmra.mxu1 %vm190_vm2, %v11702_v43 }
 0x22c   :  { %9829 = vmatprep.mubr.msk.f32.mxu1 %vm11402_vm0, %v11401_v1 }
 0x22f   :  { %9830 = vmatmul.mubr.msk.f32.gmra.mxu1 %vm190_vm2, %v11717_v48 }
 0x230   :  { %9832 = vmatprep.mubr.msk.f32.mxu1 %vm11402_vm0, %v11401_v1 }
 0x233   :  { %9833 = vmatmul.mubr.msk.f32.gmra.mxu1 %vm190_vm2, %v11732_v52 }
 0x234   :  { %9864 = vmatprep.mubr.msk.f32.mxu1 %vm11402_vm0, %v11401_v1 }
 0x2cf   :  { %v365_v53 = vpop.f32.mrf.mxu1  ;;  %v553_v54 = vpop.f32.mrf.mxu0 }
 0x2d1   :  { %v9799_v55 = vpop.f32.mrf.mxu1  ;;  %v9845_v56 = vpop.f32.mrf.mxu0 }
 0x2d3   :  { %v370_v57 = vpop.f32.mrf.mxu1  ;;  %v558_v58 = vpop.f32.mrf.mxu0 }
 0x2d5   :  { %v9802_v59 = vpop.f32.mrf.mxu1  ;;  %v9848_v60 = vpop.f32.mrf.mxu0 }
 0x2d7   :  { %v375_v61 = vpop.f32.mrf.mxu1  ;;  %v11763_v62 = vpop.f32.mrf.mxu0 }
 0x2d8   :  { %9874 = vmatpush3.msk.msra.mxu0 %vm720_vm4, %v11763_v62  ;;  %v808_v30 = vrot.slane %v375_v61, 1  ;;  %v947_v37 = vrot.slane %v11763_v62, 1 }
 0x2d9   :  { %v9805_v63 = vpop.f32.mrf.mxu1  ;;  %v9851_v0 = vpop.f32.mrf.mxu0  ;;  %9875 = vmatprep.subr.mxu0 %v11401_v1 }
 0x2da   :  { %9876 = vmatpush3.msra.mxu0 %v558_v58 }
 0x2db   :  { %v380_v2 = vpop.f32.mrf.mxu1  ;;  %v11768_v3 = vpop.f32.mrf.mxu0  ;;  %9877 = vmatprep.subr.mxu0 %v11401_v1 }
 0x2dc   :  { %9878 = vmatpush3.msra.mxu0 %v553_v54  ;;  %v809_v27 = vrot.slane %v380_v2, 1  ;;  %v948_v36 = vrot.slane %v11768_v3, 1 }
 0x2dd   :  { %v9808_v4 = vpop.f32.mrf.mxu1  ;;  %v9854_v5 = vpop.f32.mrf.mxu0  ;;  %9903 = vmatprep.subr.mxu0 %v11401_v1 }
 0x2de   :  { %v810_v33 = vsel %vm807_vm6, %v808_v30, %v809_v27  ;;  %v11815_v41 = vsel %vm807_vm6, %v947_v37, %v948_v36 }
 0x2df   :  { %v385_v6 = vpop.f32.mrf.mxu1  ;;  %v573_v7 = vpop.f32.mrf.mxu0 }
 0x2e0   :  { %v11794_v31 = vrot.slane %v573_v7, 1  ;;  %v811_v35 = vrot.slane %v385_v6, 1 }
 0x2e1   :  { %v9811_v8 = vpop.f32.mrf.mxu1  ;;  %v9857_v9 = vpop.f32.mrf.mxu0 }
 0x2e2   :  { %v11808_v39 = vsel %vm807_vm6, %v948_v36, %v11794_v31  ;;  %v812_v40 = vsel %vm807_vm6, %v809_v27, %v811_v35 }
 0x2e3   :  { %v459_v10 = vpop.f32.mrf.mxu1 }
 0x2e5   :  { %v9822_v11 = vpop.f32.mrf.mxu1 }
 0x2e7   :  { %v464_v12 = vpop.f32.mrf.mxu1 }
 0x2e9   :  { %v9825_v13 = vpop.f32.mrf.mxu1 }
 0x2eb   :  { %v469_v15 = vpop.f32.mrf.mxu1 }
 0x2ec   :  { %9859 = vmatpush3.xpose.msk.msra.mxu1 %vm577_vm5, %v469_v15  ;;  %v815_v26 = vrot.slane %v469_v15, 1 }
 0x2ed   :  { %v9828_v16 = vpop.f32.mrf.mxu1  ;;  %9860 = vmatprep.subr.mxu1 %v11401_v1 }
 0x2ef   :  { %v474_v17 = vpop.f32.mrf.mxu1 }
 0x2f0   :  { %9861 = vmatpush3.xpose.msk.msra.mxu1 %vm577_vm5, %v464_v12  ;;  %v816_v23 = vrot.slane %v474_v17, 1 }
 0x2f1   :  { %v9831_v18 = vpop.f32.mrf.mxu1  ;;  %9862 = vmatprep.subr.mxu1 %v11401_v1 }
 0x2f2   :  { %v817_v28 = vsel %vm807_vm6, %v815_v26, %v816_v23 }
 0x2f3   :  { %v479_v20 = vpop.f32.mrf.mxu1 }
 0x2f4   :  { %9863 = vmatpush3.xpose.msk.msra.mxu1 %vm577_vm5, %v459_v10  ;;  %v818_v22 = vrot.slane %v479_v20, 1 }
 0x2f5   :  { %v9834_v21 = vpop.f32.mrf.mxu1  ;;  %9888 = vmatprep.subr.mxu1 %v11401_v1 }
 0x2f6   :  { %v819_v25 = vsel %vm807_vm6, %v816_v23, %v818_v22 }
 0x2f7   :  { %9865 = vmatmul.mubr.msk.f32.vlgmr.msra.gmra.mxu1 %vm577_vm5, %v365_v53 }
 0x2f8   :  { %9889 = vmatpush3.xpose.msk.msra.mxu1 %vm577_vm5, %v818_v22  ;;  %9867 = vmatprep.mubr.msk.f32.mxu1 %vm11402_vm0, %v11401_v1 }
 0x2f9   :  { %9890 = vmatprep.subr.mxu1 %v11401_v1 }
 0x2fb   :  { %9868 = vmatmul.mubr.msk.f32.gmra.mxu1 %vm577_vm5, %v370_v57 }
 0x2fc   :  { %9891 = vmatpush3.xpose.msk.msra.mxu1 %vm577_vm5, %v819_v25  ;;  %9870 = vmatprep.mubr.msk.f32.mxu1 %vm11402_vm0, %v11401_v1 }
 0x2fd   :  { %9892 = vmatprep.subr.mxu1 %v11401_v1 }
 0x2ff   :  { %9871 = vmatmul.mubr.msk.f32.gmra.mxu1 %vm577_vm5, %v375_v61 }
 0x300   :  { %9893 = vmatpush3.xpose.msk.msra.mxu1 %vm577_vm5, %v817_v28  ;;  %9894 = vmatprep.mubr.msk.f32.mxu1 %vm11402_vm0, %v11401_v1 }
 0x301   :  { %11116 = vmatprep.subr.mxu1 %v11401_v1 }
 0x303   :  { %9895 = vmatmul.mubr.msk.f32.vlgmr.msra.gmra.mxu1 %vm577_vm5, %v810_v33 }
 0x304   :  { %11119 = vmatpush3.msk.msra.mxu1 %vm720_vm4, %v11794_v31  ;;  %9897 = vmatprep.mubr.msk.f32.mxu1 %vm11402_vm0, %v11401_v1 }
 0x305   :  { %11117 = vmatprep.subr.mxu1 %v11401_v1 }
 0x306   :  { %11120 = vmatpush3.msra.mxu1 %v11808_v39 }
 0x307   :  { %9898 = vmatmul.mubr.msk.f32.gmra.mxu1 %vm577_vm5, %v812_v40  ;;  %11118 = vmatprep.subr.mxu1 %v11401_v1 }
 0x308   :  { %11121 = vmatpush3.msra.mxu1 %v11815_v41  ;;  %9900 = vmatprep.mubr.msk.f32.mxu1 %vm11402_vm0, %v11401_v1 }
 0x309   :  { %9918 = vmatprep.subr.mxu1 %v11401_v1 }
 0x30b   :  { %9901 = vmatmul.mubr.msk.f32.gmra.mxu1 %vm577_vm5, %v811_v35 }
 0x30c   :  { %9915 = vmatprep.mubr.msk.f32.mxu1 %vm11402_vm0, %v11401_v1 }
 0x3b7   :  { %v662_v42 = vpop.f32.mrf.mxu1 }
 0x3b8   :  { %v677_v44 = vsel %vm676_vm7, %v662_v42, -inf }
 0x3b9   :  { %678 = vmax.xlane.f32.xlu0 %v677_v44  ;;  %v9866_v45 = vpop.f32.mrf.mxu1 }
 0x3bb   :  { %v667_v46 = vpop.f32.mrf.mxu1 }
 0x3bc   :  { %v680_v47 = vsel %vm676_vm7, %v667_v46, -inf }
 0x3bd   :  { %681 = vmax.xlane.f32.xlu1 %v680_v47  ;;  %v9869_v49 = vpop.f32.mrf.mxu1 }
 0x3bf   :  { %v672_v50 = vpop.f32.mrf.mxu1 }
 0x3c0   :  { %v684_v51 = vsel %vm683_vm8, %v672_v50, -inf }
 0x3c1   :  { %685 = vmax.xlane.f32.xlu0 %v684_v51  ;;  %v9872_v53 = vpop.f32.mrf.mxu1 }
 0x3c3   :  { %v898_v54 = vpop.f32.mrf.mxu1 }
 0x3c4   :  { %v912_v55 = vsel %vm676_vm7, %v898_v54, -inf }
 0x3c5   :  { %913 = vmax.xlane.f32.xlu1 %v912_v55  ;;  %v9896_v56 = vpop.f32.mrf.mxu1  ;;  %v8803_v55 = vld [vmem:[%s14172_s6 + $0x38] sm:$0xff] }
 0x3c7   :  { %v903_v57 = vpop.f32.mrf.mxu1 }
 0x3c8   :  { %v915_v58 = vsel %vm676_vm7, %v903_v57, -inf }
 0x3c9   :  { %916 = vmax.xlane.f32.xlu0 %v915_v58  ;;  %v9899_v59 = vpop.f32.mrf.mxu1  ;;  %v8801_v58 = vld [vmem:[%s14172_s6 + $0x28] sm:$0xff] }
 0x3ca   :  { %v8800_v59 = vld [vmem:[%s14172_s6 + $0x20] sm:$0xff] }
 0x3cb   :  { %v908_v60 = vpop.f32.mrf.mxu1 }
 0x3cc   :  { %v918_v61 = vsel %vm683_vm8, %v908_v60, -inf }
 0x3cd   :  { %919 = vmax.xlane.f32.xlu1 %v918_v61  ;;  %v9902_v62 = vpop.f32.mrf.mxu1 }
 0x3ce   :  { %v8794_v62 = vld [vmem:[%s14171_s5 + $0x38] sm:$0xff] }
 0x442   :  { %v679_v63 = vpop.xlane.xlu0 %678 }
 0x443   :  { %v687_v0 = vsub.f32 %v662_v42, %v679_v63  ;;  %v8793_v63 = vld [vmem:[%s14171_s5 + $0x30] sm:$0xff] }
 0x445   :  { %v690_v2 = vmul.f32 1.442695, %v687_v0  ;;  %v8792_v0 = vld [vmem:[%s14171_s5 + $0x28] sm:$0xff] }
 0x446   :  { %v682_v3 = vpop.xlane.xlu1 %681 }
 0x447   :  { %11135 = vpow2.f32 %v690_v2  ;;  %v688_v4 = vsub.f32 %v667_v46, %v682_v3  ;;  %v8791_v2 = vld [vmem:[%s14171_s5 + $0x20] sm:$0xff]  ;;  %v8812_v3 = vld [vmem:[%s14173_s7 + $0x38] sm:$0xff] }
 0x449   :  { %v692_v5 = vmul.f32 1.442695, %v688_v4  ;;  %v8811_v4 = vld [vmem:[%s14173_s7 + $0x30] sm:$0xff] }
 0x44a   :  { %v686_v6 = vpop.xlane.xlu0 %685 }
 0x44b   :  { %11137 = vpow2.f32 %v692_v5  ;;  %v689_v7 = vsub.f32 %v672_v50, %v686_v6  ;;  %v8810_v5 = vld [vmem:[%s14173_s7 + $0x28] sm:$0xff]  ;;  %v8809_v6 = vld [vmem:[%s14173_s7 + $0x20] sm:$0xff] }
 0x44d   :  { %v694_v8 = vmul.f32 1.442695, %v689_v7 }
 0x44e   :  { %v914_v9 = vpop.xlane.xlu1 %913 }
 0x44f   :  { %11139 = vpow2.f32 %v694_v8  ;;  %v921_v10 = vsub.f32 %v898_v54, %v914_v9 }
 0x451   :  { %v924_v11 = vmul.f32 1.442695, %v921_v10 }
 0x452   :  { %v917_v12 = vpop.xlane.xlu0 %916 }
 0x453   :  { %11141 = vpow2.f32 %v924_v11  ;;  %v922_v13 = vsub.f32 %v903_v57, %v917_v12 }
 0x454   :  { %v11136_v15 = vpop.eup %11135 }
 0x455   :  { %v926_v16 = vmul.f32 1.442695, %v922_v13  ;;  %v696_v17 = vsel %vm676_vm7, %v11136_v15, 0.0 }
 0x456   :  { %697 = vadd.xlane.f32.xlu0 %v696_v17  ;;  %v920_v18 = vpop.xlane.xlu1 %919 }
 0x457   :  { %11143 = vpow2.f32 %v926_v16  ;;  %v923_v20 = vsub.f32 %v908_v60, %v920_v18 }
 0x458   :  { %v11138_v21 = vpop.eup %11137 }
 0x459   :  { %v928_v22 = vmul.f32 1.442695, %v923_v20  ;;  %v699_v23 = vsel %vm676_vm7, %v11138_v21, 0.0 }
 0x45a   :  { %700 = vadd.xlane.f32.xlu1 %v699_v23 }
 0x45b   :  { %11145 = vpow2.f32 %v928_v22 }
 0x45c   :  { %v11140_v25 = vpop.eup %11139 }
 0x45d   :  { %v702_v26 = vsel %vm683_vm8, %v11140_v25, 0.0 }
 0x45e   :  { %703 = vadd.xlane.f32.xlu0 %v702_v26 }
 0x460   :  { %v11142_v27 = vpop.eup %11141 }
 0x461   :  { %v930_v28 = vsel %vm676_vm7, %v11142_v27, 0.0 }
 0x462   :  { %931 = vadd.xlane.f32.xlu1 %v930_v28 }
 0x464   :  { %v11144_v30 = vpop.eup %11143 }
 0x465   :  { %v933_v33 = vsel %vm676_vm7, %v11144_v30, 0.0 }
 0x466   :  { %934 = vadd.xlane.f32.xlu0 %v933_v33 }
 0x468   :  { %v11146_v35 = vpop.eup %11145 }
 0x469   :  { %v936_v36 = vsel %vm683_vm8, %v11146_v35, 0.0 }
 0x46a   :  { %937 = vadd.xlane.f32.xlu1 %v936_v36 }
 0x4df   :  { %v698_v37 = vpop.xlane.xlu0 %697 }
 0x4e0   :  { %11147 = vrcp.f32 %v698_v37 }
 0x4e3   :  { %v701_v40 = vpop.xlane.xlu1 %700 }
 0x4e4   :  { %11149 = vrcp.f32 %v701_v40 }
 0x4e7   :  { %v704_v42 = vpop.xlane.xlu0 %703 }
 0x4e8   :  { %11151 = vrcp.f32 %v704_v42 }
 0x4eb   :  { %v932_v44 = vpop.xlane.xlu1 %931 }
 0x4ec   :  { %11153 = vrcp.f32 %v932_v44 }
 0x4ed   :  { %v11148_v45 = vpop.eup %11147 }
 0x4ee   :  { %v708_v46 = vmul.f32 %v11148_v45, %v11136_v15 }
 0x4ef   :  { %v935_v47 = vpop.xlane.xlu0 %934 }
 0x4f0   :  { %11155 = vrcp.f32 %v935_v47  ;;  %9880 = vmatmul.mubr.msk.f32.vlgmr.msra.gmra.mxu0 %vm676_vm7, %v708_v46 }
 0x4f1   :  { %v11150_v49 = vpop.eup %11149  ;;  %9904 = vmatpush3.msk.msra.mxu0 %vm720_vm4, %v11794_v31  ;;  %9882 = vmatprep.mubr.msk.f32.mxu0 %vm11402_vm0, %v11401_v1 }
 0x4f2   :  { %9905 = vmatprep.subr.mxu0 %v11401_v1  ;;  %v709_v50 = vmul.f32 %v11150_v49, %v11138_v21 }
 0x4f3   :  { %9906 = vmatpush3.msra.mxu0 %v11808_v39  ;;  %v938_v51 = vpop.xlane.xlu1 %937 }
 0x4f4   :  { %11157 = vrcp.f32 %v938_v51  ;;  %9907 = vmatprep.subr.mxu0 %v11401_v1  ;;  %9883 = vmatmul.mubr.msk.f32.gmra.mxu0 %vm676_vm7, %v709_v50 }
 0x4f5   :  { %v11152_v53 = vpop.eup %11151  ;;  %9908 = vmatpush3.msra.mxu0 %v11815_v41  ;;  %9885 = vmatprep.mubr.msk.f32.mxu0 %vm11402_vm0, %v11401_v1  ;;  %v8802_v41 = vld [vmem:[%s14172_s6 + $0x30] sm:$0xff] }
 0x4f6   :  { %v710_v31 = vmul.f32 %v11152_v53, %v11140_v25  ;;  %9941 = vmatprep.subr.mxu0 %v11401_v1 }
 0x4f8   :  { %9886 = vmatmul.mubr.msk.f32.gmra.mxu0 %vm676_vm7, %v710_v31 }
 0x4f9   :  { %v11154_v54 = vpop.eup %11153  ;;  %9909 = vmatprep.mubr.msk.f32.mxu0 %vm11402_vm0, %v11401_v1 }
 0x4fa   :  { %v942_v39 = vmul.f32 %v11154_v54, %v11142_v27 }
 0x4fc   :  { %9910 = vmatmul.mubr.msk.f32.vlgmr.msra.gmra.mxu0 %vm676_vm7, %v942_v39 }
 0x4fd   :  { %v11156_v56 = vpop.eup %11155  ;;  %9942 = vmatpush3.msra.mxu0 %v8803_v55  ;;  %9912 = vmatprep.mubr.msk.f32.mxu0 %vm11402_vm0, %v11401_v1 }
 0x4fe   :  { %9943 = vmatprep.subr.mxu0 %v11401_v1  ;;  %v943_v57 = vmul.f32 %v11156_v56, %v11144_v30 }
 0x4ff   :  { %9944 = vmatpush3.msra.mxu0 %v8802_v41 }
 0x500   :  { %9913 = vmatmul.mubr.msk.f32.gmra.mxu0 %vm676_vm7, %v943_v57  ;;  %9945 = vmatprep.subr.mxu0 %v11401_v1 }
 0x501   :  { %v11158_v60 = vpop.eup %11157  ;;  %9946 = vmatpush3.msra.mxu0 %v8801_v58  ;;  %9949 = vmatprep.mubr.msk.f32.mxu0 %vm11402_vm0, %v11401_v1 }
 0x502   :  { %v944_v61 = vmul.f32 %v11158_v60, %v11146_v35  ;;  %9947 = vmatprep.subr.mxu0 %v11401_v1 }
 0x503   :  { %9948 = vmatpush3.msra.mxu0 %v8800_v59 }
 0x504   :  { %9916 = vmatmul.mubr.msk.f32.vlgmr.msra.gmra.mxu1 %vm676_vm7, %v944_v61  ;;  %9950 = vmatmul.mubr.msk.f32.vlgmr.msra.gmra.mxu0 %vm190_vm2, %v11673_v32 }
 0x505   :  { %9919 = vmatpush3.msra.mxu1 %v8794_v62  ;;  %9952 = vmatprep.mubr.msk.f32.mxu0 %vm11402_vm0, %v11401_v1 }
 0x506   :  { %9920 = vmatprep.subr.mxu1 %v11401_v1  ;;  %9926 = vmatprep.mubr.msk.f32.mxu1 %vm11402_vm0, %v11401_v1 }
 0x507   :  { %9921 = vmatpush3.msra.mxu1 %v8793_v63  ;;  %9987 = vmatprep.subr.mxu0 %v11401_v1 }
 0x508   :  { %9922 = vmatprep.subr.mxu1 %v11401_v1  ;;  %9953 = vmatmul.mubr.msk.f32.gmra.mxu0 %vm190_vm2, %v11687_v38 }
 0x509   :  { %9923 = vmatpush3.msra.mxu1 %v8792_v0  ;;  %9955 = vmatprep.mubr.msk.f32.mxu0 %vm11402_vm0, %v11401_v1 }
 0x50a   :  { %9924 = vmatprep.subr.mxu1 %v11401_v1 }
 0x50b   :  { %9925 = vmatpush3.msra.mxu1 %v8791_v2 }
 0x50c   :  { %9927 = vmatmul.mubr.msk.f32.vlgmr.msra.gmra.mxu1 %vm190_vm2, %v11673_v32  ;;  %9956 = vmatmul.mubr.msk.f32.gmra.mxu0 %vm190_vm2, %v11702_v43 }
 0x50d   :  { %9929 = vmatprep.mubr.msk.f32.mxu1 %vm11402_vm0, %v11401_v1  ;;  %9958 = vmatprep.mubr.msk.f32.mxu0 %vm11402_vm0, %v11401_v1 }
 0x50e   :  { %9964 = vmatprep.subr.mxu1 %v11401_v1 }
 0x50f   :  { %9965 = vmatpush3.msra.mxu1 %v8812_v3 }
 0x510   :  { %9930 = vmatmul.mubr.msk.f32.gmra.mxu1 %vm190_vm2, %v11687_v38  ;;  %9959 = vmatmul.mubr.msk.f32.gmra.mxu0 %vm190_vm2, %v11717_v48 }
 0x511   :  { %9932 = vmatprep.mubr.msk.f32.mxu1 %vm11402_vm0, %v11401_v1  ;;  %9961 = vmatprep.mubr.msk.f32.mxu0 %vm11402_vm0, %v11401_v1 }
 0x512   :  { %9966 = vmatprep.subr.mxu1 %v11401_v1 }
 0x513   :  { %9967 = vmatpush3.msra.mxu1 %v8811_v4 }
 0x514   :  { %9933 = vmatmul.mubr.msk.f32.gmra.mxu1 %vm190_vm2, %v11702_v43  ;;  %9962 = vmatmul.mubr.msk.f32.gmra.mxu0 %vm190_vm2, %v11732_v52 }
 0x515   :  { %9935 = vmatprep.mubr.msk.f32.mxu1 %vm11402_vm0, %v11401_v1  ;;  %9968 = vmatprep.subr.mxu1 %v11401_v1 }
 0x516   :  { %9969 = vmatpush3.msra.mxu1 %v8810_v5  ;;  %9993 = vmatprep.mubr.msk.f32.mxu0 %vm11402_vm0, %v11401_v1 }
 0x517   :  { %9970 = vmatprep.subr.mxu1 %v11401_v1 }
 0x518   :  { %9936 = vmatmul.mubr.msk.f32.gmra.mxu1 %vm190_vm2, %v11717_v48 }
 0x519   :  { %9938 = vmatprep.mubr.msk.f32.mxu1 %vm11402_vm0, %v11401_v1  ;;  %9971 = vmatpush3.msra.mxu1 %v8809_v6 }
 0x51a   :  { %10017 = vmatprep.subr.mxu1 %v11401_v1 }
 0x51c   :  { %9939 = vmatmul.mubr.msk.f32.gmra.mxu1 %vm190_vm2, %v11732_v52 }
 0x51d   :  { %9972 = vmatprep.mubr.msk.f32.mxu1 %vm11402_vm0, %v11401_v1 }
 0x520   :  { %9973 = vmatmul.mubr.msk.f32.vlgmr.msra.gmra.mxu1 %vm190_vm2, %v11673_v32 }
 0x521   :  { %9975 = vmatprep.mubr.msk.f32.mxu1 %vm11402_vm0, %v11401_v1 }
 0x524   :  { %9976 = vmatmul.mubr.msk.f32.gmra.mxu1 %vm190_vm2, %v11687_v38 }
 0x525   :  { %9978 = vmatprep.mubr.msk.f32.mxu1 %vm11402_vm0, %v11401_v1 }
 0x528   :  { %9979 = vmatmul.mubr.msk.f32.gmra.mxu1 %vm190_vm2, %v11702_v43 }
 0x529   :  { %9981 = vmatprep.mubr.msk.f32.mxu1 %vm11402_vm0, %v11401_v1 }
 0x52c   :  { %9982 = vmatmul.mubr.msk.f32.gmra.mxu1 %vm190_vm2, %v11717_v48 }
 0x52d   :  { %9984 = vmatprep.mubr.msk.f32.mxu1 %vm11402_vm0, %v11401_v1 }
 0x530   :  { %9985 = vmatmul.mubr.msk.f32.gmra.mxu1 %vm190_vm2, %v11732_v52 }
 0x531   :  { %10019 = vmatprep.mubr.msk.f32.mxu1 %vm11402_vm0, %v11401_v1 }
 0x5b0   :  { %v11969_v7 = vpop.f32.mrf.mxu0 }
 0x5b2   :  { %v9881_v8 = vpop.f32.mrf.mxu0 }
 0x5b4   :  { %v11971_v9 = vpop.f32.mrf.mxu0 }
 0x5b6   :  { %v9884_v10 = vpop.f32.mrf.mxu0 }
 0x5b8   :  { %v11973_v11 = vpop.f32.mrf.mxu0 }
 0x5ba   :  { %v9887_v12 = vpop.f32.mrf.mxu0 }
 0x5bc   :  { %v11975_v13 = vpop.f32.mrf.mxu0 }
 0x5be   :  { %v9911_v15 = vpop.f32.mrf.mxu0 }
 0x5c0   :  { %v11977_v16 = vpop.f32.mrf.mxu0 }
 0x5c2   :  { %v9914_v17 = vpop.f32.mrf.mxu0 }
 0x5c4   :  { %v11979_v18 = vpop.f32.mrf.mxu1  ;;  %v1211_v20 = vpop.f32.mrf.mxu0 }
 0x5c6   :  { %v9917_v21 = vpop.f32.mrf.mxu1  ;;  %v9951_v22 = vpop.f32.mrf.mxu0 }
 0x5c8   :  { %v1216_v23 = vpop.f32.mrf.mxu0 }
 0x5ca   :  { %v9954_v25 = vpop.f32.mrf.mxu0 }
 0x5cc   :  { %v1116_v26 = vpop.f32.mrf.mxu1  ;;  %v1221_v27 = vpop.f32.mrf.mxu0 }
 0x5cd   :  { %9988 = vmatpush3.xpose.msk.msra.mxu0 %vm577_vm5, %v1221_v27  ;;  %v1742_v36 = vrot.slane %v1221_v27, 1 }
 0x5ce   :  { %v9928_v28 = vpop.f32.mrf.mxu1  ;;  %v9957_v30 = vpop.f32.mrf.mxu0  ;;  %9989 = vmatprep.subr.mxu0 %v11401_v1 }
 0x5d0   :  { %v1121_v33 = vpop.f32.mrf.mxu1  ;;  %v1226_v35 = vpop.f32.mrf.mxu0 }
 0x5d1   :  { %v1743_v37 = vrot.slane %v1226_v35, 1  ;;  %9990 = vmatpush3.xpose.msk.msra.mxu0 %vm577_vm5, %v1216_v23 }
 0x5d2   :  { %v9931_v40 = vpop.f32.mrf.mxu1  ;;  %v9960_v42 = vpop.f32.mrf.mxu0  ;;  %9991 = vmatprep.subr.mxu0 %v11401_v1 }
 0x5d3   :  { %v11986_v44 = vsel %vm807_vm6, %v1742_v36, %v1743_v37 }
 0x5d4   :  { %v1126_v45 = vpop.f32.mrf.mxu1  ;;  %v11988_v46 = vpop.f32.mrf.mxu0 }
 0x5d5   :  { %v1745_v47 = vrot.slane %v11988_v46, 1  ;;  %9992 = vmatpush3.xpose.msk.msra.mxu0 %vm577_vm5, %v1211_v20  ;;  %v1735_v31 = vrot.slane %v1126_v45, 1 }
 0x5d6   :  { %v9934_v49 = vpop.f32.mrf.mxu1  ;;  %v9963_v50 = vpop.f32.mrf.mxu0  ;;  %10002 = vmatprep.subr.mxu0 %v11401_v1 }
 0x5d7   :  { %v11996_v51 = vsel %vm807_vm6, %v1743_v37, %v1745_v47 }
 0x5d8   :  { %v1131_v53 = vpop.f32.mrf.mxu1  ;;  %9994 = vmatmul.mubr.msk.f32.vlgmr.msra.gmra.mxu0 %vm577_vm5, %v1116_v26 }
 0x5d9   :  { %v1736_v54 = vrot.slane %v1131_v53, 1  ;;  %9996 = vmatprep.mubr.msk.f32.mxu0 %vm11402_vm0, %v11401_v1 }
 0x5da   :  { %v9937_v39 = vpop.f32.mrf.mxu1 }
 0x5db   :  { %v12002_v55 = vsel %vm807_vm6, %v1735_v31, %v1736_v54 }
 0x5dc   :  { %v12004_v41 = vpop.f32.mrf.mxu1  ;;  %9997 = vmatmul.mubr.msk.f32.gmra.mxu0 %vm577_vm5, %v1121_v33 }
 0x5dd   :  { %v1738_v56 = vrot.slane %v12004_v41, 1  ;;  %9999 = vmatprep.mubr.msk.f32.mxu0 %vm11402_vm0, %v11401_v1 }
 0x5de   :  { %v9940_v57 = vpop.f32.mrf.mxu1 }
 0x5df   :  { %v12013_v58 = vsel %vm807_vm6, %v1736_v54, %v1738_v56 }
 0x5e0   :  { %v1306_v59 = vpop.f32.mrf.mxu1  ;;  %10000 = vmatmul.mubr.msk.f32.gmra.mxu0 %vm577_vm5, %v1126_v45 }
 0x5e1   :  { %10008 = vmatprep.mubr.msk.f32.mxu0 %vm11402_vm0, %v11401_v1 }
 0x5e2   :  { %v9974_v60 = vpop.f32.mrf.mxu1 }
 0x5e4   :  { %v1311_v61 = vpop.f32.mrf.mxu1 }
 0x5e6   :  { %v9977_v62 = vpop.f32.mrf.mxu1 }
 0x5e8   :  { %v1316_v63 = vpop.f32.mrf.mxu1 }
 0x5e9   :  { %10003 = vmatpush3.msk.msra.mxu0 %vm720_vm4, %v1316_v63  ;;  %v1874_v3 = vrot.slane %v1316_v63, 1 }
 0x5ea   :  { %v9980_v0 = vpop.f32.mrf.mxu1  ;;  %10004 = vmatprep.subr.mxu0 %v11401_v1 }
 0x5eb   :  { %10005 = vmatpush3.msra.mxu0 %v1311_v61 }
 0x5ec   :  { %v1321_v2 = vpop.f32.mrf.mxu1  ;;  %10006 = vmatprep.subr.mxu0 %v11401_v1 }
 0x5ed   :  { %v1875_v4 = vrot.slane %v1321_v2, 1  ;;  %10007 = vmatpush3.msra.mxu0 %v1306_v59  ;;  %v8828_v59 = vld [vmem:[%s14174_s8 + $0x8] sm:$0xff]  ;;  %v12042_v2 = vld [vmem:[%s14174_s8] sm:$0xff] }
 0x5ee   :  { %v9983_v5 = vpop.f32.mrf.mxu1  ;;  %10028 = vmatprep.subr.mxu0 %v11401_v1  ;;  %10018 = vmatpush3.msra.mxu1 %v8828_v59 }
 0x5ef   :  { %v12023_v6 = vsel %vm807_vm6, %v1874_v3, %v1875_v4  ;;  %10039 = vmatprep.subr.mxu1 %v11401_v1 }
 0x5f0   :  { %v12025_v8 = vpop.f32.mrf.mxu1 }
 0x5f1   :  { %v1877_v10 = vrot.slane %v12025_v8, 1 }
 0x5f2   :  { %v9986_v12 = vpop.f32.mrf.mxu1 }
 0x5f3   :  { %v1878_v15 = vsel %vm807_vm6, %v1875_v4, %v1877_v10 }
 0x698   :  { %v1414_v17 = vpop.f32.mrf.mxu0 }
 0x699   :  { %v1428_v20 = vsel %vm676_vm7, %v1414_v17, -inf }
 0x69a   :  { %1429 = vmax.xlane.f32.xlu0 %v1428_v20  ;;  %v9995_v21 = vpop.f32.mrf.mxu0 }
 0x69c   :  { %v1419_v22 = vpop.f32.mrf.mxu0 }
 0x69d   :  { %v1431_v23 = vsel %vm676_vm7, %v1419_v22, -inf }
 0x69e   :  { %1432 = vmax.xlane.f32.xlu1 %v1431_v23  ;;  %v9998_v25 = vpop.f32.mrf.mxu0 }
 0x6a0   :  { %v1424_v26 = vpop.f32.mrf.mxu0 }
 0x6a1   :  { %v1434_v27 = vsel %vm683_vm8, %v1424_v26, -inf }
 0x6a2   :  { %1435 = vmax.xlane.f32.xlu0 %v1434_v27  ;;  %v10001_v28 = vpop.f32.mrf.mxu0 }
 0x723   :  { %v1430_v30 = vpop.xlane.xlu0 %1429 }
 0x724   :  { %v1437_v33 = vsub.f32 %v1414_v17, %v1430_v30 }
 0x726   :  { %v1440_v35 = vmul.f32 1.442695, %v1437_v33 }
 0x727   :  { %v1433_v36 = vpop.xlane.xlu1 %1432 }
 0x728   :  { %11159 = vpow2.f32 %v1440_v35  ;;  %v1438_v37 = vsub.f32 %v1419_v22, %v1433_v36 }
 0x72a   :  { %v1442_v40 = vmul.f32 1.442695, %v1438_v37 }
 0x72b   :  { %v1436_v42 = vpop.xlane.xlu0 %1435 }
 0x72c   :  { %11161 = vpow2.f32 %v1442_v40  ;;  %v1439_v45 = vsub.f32 %v1424_v26, %v1436_v42 }
 0x72e   :  { %v1444_v49 = vmul.f32 1.442695, %v1439_v45 }
 0x730   :  { %11163 = vpow2.f32 %v1444_v49 }
 0x735   :  { %v11160_v50 = vpop.eup %11159 }
 0x736   :  { %v1446_v53 = vsel %vm676_vm7, %v11160_v50, 0.0 }
 0x737   :  { %1447 = vadd.xlane.f32.xlu1 %v1446_v53 }
 0x739   :  { %v11162_v31 = vpop.eup %11161 }
 0x73a   :  { %v1449_v54 = vsel %vm676_vm7, %v11162_v31, 0.0 }
 0x73b   :  { %1450 = vadd.xlane.f32.xlu0 %v1449_v54 }
 0x73d   :  { %v11164_v39 = vpop.eup %11163 }
 0x73e   :  { %v1452_v57 = vsel %vm683_vm8, %v11164_v39, 0.0 }
 0x73f   :  { %1453 = vadd.xlane.f32.xlu1 %v1452_v57 }
 0x7c0   :  { %v1448_v60 = vpop.xlane.xlu1 %1447 }
 0x7c1   :  { %11165 = vrcp.f32 %v1448_v60 }
 0x7c4   :  { %v1451_v61 = vpop.xlane.xlu0 %1450 }
 0x7c5   :  { %11167 = vrcp.f32 %v1451_v61 }
 0x7c8   :  { %v1454_v62 = vpop.xlane.xlu1 %1453 }
 0x7c9   :  { %11169 = vrcp.f32 %v1454_v62 }
 0x7ce   :  { %v11166_v63 = vpop.eup %11165 }
 0x7cf   :  { %v1458_v0 = vmul.f32 %v11166_v63, %v11160_v50 }
 0x7d1   :  { %10009 = vmatmul.mubr.msk.f32.vlgmr.msra.gmra.mxu0 %vm676_vm7, %v1458_v0 }
 0x7d2   :  { %v11168_v3 = vpop.eup %11167  ;;  %10011 = vmatprep.mubr.msk.f32.mxu0 %vm11402_vm0, %v11401_v1  ;;  %10029 = vmatpush3.msra.mxu0 %v12042_v2 }
 0x7d3   :  { %v1459_v4 = vmul.f32 %v11168_v3, %v11162_v31  ;;  %10054 = vmatprep.subr.mxu0 %v11401_v1 }
 0x7d5   :  { %10012 = vmatmul.mubr.msk.f32.gmra.mxu0 %vm676_vm7, %v1459_v4 }
 0x7d6   :  { %v11170_v5 = vpop.eup %11169  ;;  %10014 = vmatprep.mubr.msk.f32.mxu0 %vm11402_vm0, %v11401_v1 }
 0x7d7   :  { %v1460_v8 = vmul.f32 %v11170_v5, %v11164_v39 }
 0x7d9   :  { %10015 = vmatmul.mubr.msk.f32.gmra.mxu0 %vm676_vm7, %v1460_v8 }
 0x7da   :  { %10030 = vmatprep.mubr.msk.f32.mxu0 %vm11402_vm0, %v11401_v1 }
 0x7dd   :  { %10031 = vmatmul.mubr.msk.f32.vlgmr.msra.gmra.mxu0 %vm577_vm5, %v11969_v7 }
 0x7de   :  { %10055 = vmatpush3.msk.msra.mxu0 %vm720_vm4, %v1877_v10  ;;  %10033 = vmatprep.mubr.msk.f32.mxu0 %vm11402_vm0, %v11401_v1 }
 0x7df   :  { %10056 = vmatprep.subr.mxu0 %v11401_v1 }
 0x7e0   :  { %10057 = vmatpush3.msra.mxu0 %v1878_v15 }
 0x7e1   :  { %10058 = vmatprep.subr.mxu0 %v11401_v1  ;;  %10034 = vmatmul.mubr.msk.f32.gmra.mxu0 %vm577_vm5, %v11971_v9 }
 0x7e2   :  { %10059 = vmatpush3.msra.mxu0 %v12023_v6  ;;  %10036 = vmatprep.mubr.msk.f32.mxu0 %vm11402_vm0, %v11401_v1 }
 0x7e3   :  { %10080 = vmatprep.subr.mxu0 %v11401_v1 }
 0x7e5   :  { %10037 = vmatmul.mubr.msk.f32.gmra.mxu0 %vm577_vm5, %v11973_v11 }
 0x7e6   :  { %10060 = vmatprep.mubr.msk.f32.mxu0 %vm11402_vm0, %v11401_v1 }
 0x891   :  { %v1539_v7 = vpop.f32.mrf.mxu0 }
 0x892   :  { %10020 = vmatmul.mubr.msk.f32.vlgmr.msra.gmra.mxu1 %vm577_vm5, %v1539_v7 }
 0x893   :  { %10040 = vmatpush3.xpose.msk.msra.mxu1 %vm577_vm5, %v1745_v47  ;;  %v10010_v9 = vpop.f32.mrf.mxu0  ;;  %10022 = vmatprep.mubr.msk.f32.mxu1 %vm11402_vm0, %v11401_v1 }
 0x894   :  { %10041 = vmatprep.subr.mxu1 %v11401_v1 }
 0x895   :  { %v1544_v6 = vpop.f32.mrf.mxu0 }
 0x896   :  { %10023 = vmatmul.mubr.msk.f32.gmra.mxu1 %vm577_vm5, %v1544_v6  ;;  %v8863_v6 = vld [vmem:[%s14172_s6 + $0x58] sm:$0xff] }
 0x897   :  { %10042 = vmatpush3.xpose.msk.msra.mxu1 %vm577_vm5, %v11996_v51  ;;  %v10013_v11 = vpop.f32.mrf.mxu0  ;;  %10025 = vmatprep.mubr.msk.f32.mxu1 %vm11402_vm0, %v11401_v1 }
 0x898   :  { %10043 = vmatprep.subr.mxu1 %v11401_v1  ;;  %v8861_v11 = vld [vmem:[%s14172_s6 + $0x48] sm:$0xff] }
 0x899   :  { %v1549_v46 = vpop.f32.mrf.mxu0 }
 0x89a   :  { %10026 = vmatmul.mubr.msk.f32.gmra.mxu1 %vm577_vm5, %v1549_v46  ;;  %v8853_v46 = vld [vmem:[%s14171_s5 + $0x50] sm:$0xff] }
 0x89b   :  { %10044 = vmatpush3.xpose.msk.msra.mxu1 %vm577_vm5, %v11986_v44  ;;  %v10016_v47 = vpop.f32.mrf.mxu0  ;;  %10045 = vmatprep.mubr.msk.f32.mxu1 %vm11402_vm0, %v11401_v1 }
 0x89c   :  { %10069 = vmatprep.subr.mxu1 %v11401_v1 }
 0x89d   :  { %v12091_v10 = vpop.f32.mrf.mxu0 }
 0x89e   :  { %10046 = vmatmul.mubr.msk.f32.vlgmr.msra.gmra.mxu1 %vm577_vm5, %v12002_v55 }
 0x89f   :  { %v10032_v51 = vpop.f32.mrf.mxu0  ;;  %10048 = vmatprep.mubr.msk.f32.mxu1 %vm11402_vm0, %v11401_v1  ;;  %10070 = vmatpush3.msra.mxu1 %v8828_v59 }
 0x8a0   :  { %10091 = vmatprep.subr.mxu1 %v11401_v1  ;;  %v8852_v51 = vld [vmem:[%s14171_s5 + $0x48] sm:$0xff] }
 0x8a1   :  { %v12098_v12 = vpop.f32.mrf.mxu0 }
 0x8a2   :  { %10049 = vmatmul.mubr.msk.f32.gmra.mxu1 %vm577_vm5, %v12013_v58 }
 0x8a3   :  { %v10035_v44 = vpop.f32.mrf.mxu0  ;;  %10051 = vmatprep.mubr.msk.f32.mxu1 %vm11402_vm0, %v11401_v1 }
 0x8a5   :  { %v12104_v15 = vpop.f32.mrf.mxu0 }
 0x8a6   :  { %10052 = vmatmul.mubr.msk.f32.gmra.mxu1 %vm577_vm5, %v1738_v56 }
 0x8a7   :  { %v10038_v55 = vpop.f32.mrf.mxu0  ;;  %10071 = vmatprep.mubr.msk.f32.mxu1 %vm11402_vm0, %v11401_v1 }
 0x8a8   :  { %v8851_v55 = vld [vmem:[%s14171_s5 + $0x40] sm:$0xff] }
 0x952   :  { %v12111_v17 = vpop.f32.mrf.mxu1 }
 0x954   :  { %v10021_v20 = vpop.f32.mrf.mxu1 }
 0x956   :  { %v12113_v21 = vpop.f32.mrf.mxu1 }
 0x958   :  { %v10024_v58 = vpop.f32.mrf.mxu1 }
 0x95a   :  { %v12115_v22 = vpop.f32.mrf.mxu1 }
 0x95c   :  { %v10027_v23 = vpop.f32.mrf.mxu1 }
 0x95e   :  { %v1825_v25 = vpop.f32.mrf.mxu1 }
 0x95f   :  { %v1839_v26 = vsel %vm676_vm7, %v1825_v25, -inf }
 0x960   :  { %1840 = vmax.xlane.f32.xlu0 %v1839_v26  ;;  %v10047_v41 = vpop.f32.mrf.mxu1 }
 0x961   :  { %v8871_v41 = vld [vmem:[%s14173_s7 + $0x50] sm:$0xff] }
 0x962   :  { %v1830_v27 = vpop.f32.mrf.mxu1 }
 0x963   :  { %v1842_v56 = vsel %vm676_vm7, %v1830_v27, -inf }
 0x964   :  { %1843 = vmax.xlane.f32.xlu1 %v1842_v56  ;;  %v10050_v28 = vpop.f32.mrf.mxu1  ;;  %v8870_v56 = vld [vmem:[%s14173_s7 + $0x48] sm:$0xff] }
 0x966   :  { %v1835_v30 = vpop.f32.mrf.mxu1 }
 0x967   :  { %v1845_v33 = vsel %vm683_vm8, %v1835_v30, -inf }
 0x968   :  { %1846 = vmax.xlane.f32.xlu0 %v1845_v33  ;;  %v10053_v35 = vpop.f32.mrf.mxu1 }
 0x9e9   :  { %v1841_v36 = vpop.xlane.xlu0 %1840 }
 0x9ea   :  { %v1848_v37 = vsub.f32 %v1825_v25, %v1841_v36  ;;  %v8872_v25 = vld [vmem:[%s14173_s7 + $0x58] sm:$0xff] }
 0x9ec   :  { %v1851_v40 = vmul.f32 1.442695, %v1848_v37 }
 0x9ed   :  { %v1844_v42 = vpop.xlane.xlu1 %1843 }
 0x9ee   :  { %11171 = vpow2.f32 %v1851_v40  ;;  %v1849_v45 = vsub.f32 %v1830_v27, %v1844_v42 }
 0x9f0   :  { %v1853_v49 = vmul.f32 1.442695, %v1849_v45 }
 0x9f1   :  { %v1847_v50 = vpop.xlane.xlu0 %1846 }
 0x9f2   :  { %11173 = vpow2.f32 %v1853_v49  ;;  %v1850_v53 = vsub.f32 %v1835_v30, %v1847_v50  ;;  %v8869_v30 = vld [vmem:[%s14173_s7 + $0x40] sm:$0xff] }
 0x9f4   :  { %v1855_v31 = vmul.f32 1.442695, %v1850_v53 }
 0x9f6   :  { %11175 = vpow2.f32 %v1855_v31 }
 0x9fb   :  { %v11172_v54 = vpop.eup %11171 }
 0x9fc   :  { %v1857_v39 = vsel %vm676_vm7, %v11172_v54, 0.0 }
 0x9fd   :  { %1858 = vadd.xlane.f32.xlu1 %v1857_v39 }
 0x9ff   :  { %v11174_v57 = vpop.eup %11173 }
 0xa00   :  { %v1860_v59 = vsel %vm676_vm7, %v11174_v57, 0.0 }
 0xa01   :  { %1861 = vadd.xlane.f32.xlu0 %v1860_v59 }
 0xa03   :  { %v11176_v60 = vpop.eup %11175 }
 0xa04   :  { %v1863_v61 = vsel %vm683_vm8, %v11176_v60, 0.0 }
 0xa05   :  { %1864 = vadd.xlane.f32.xlu1 %v1863_v61 }
 0xa86   :  { %v1859_v62 = vpop.xlane.xlu1 %1858 }
 0xa87   :  { %11177 = vrcp.f32 %v1859_v62 }
 0xa8a   :  { %v1862_v63 = vpop.xlane.xlu0 %1861 }
 0xa8b   :  { %11179 = vrcp.f32 %v1862_v63 }
 0xa8e   :  { %v1865_v0 = vpop.xlane.xlu1 %1864 }
 0xa8f   :  { %11181 = vrcp.f32 %v1865_v0 }
 0xa94   :  { %v11178_v3 = vpop.eup %11177 }
 0xa95   :  { %v1869_v4 = vmul.f32 %v11178_v3, %v11172_v54 }
 0xa97   :  { %10061 = vmatmul.mubr.msk.f32.vlgmr.msra.gmra.mxu0 %vm676_vm7, %v1869_v4 }
 0xa98   :  { %v11180_v5 = vpop.eup %11179  ;;  %10063 = vmatprep.mubr.msk.f32.mxu0 %vm11402_vm0, %v11401_v1  ;;  %10081 = vmatpush3.msra.mxu0 %v12042_v2  ;;  %v8862_v2 = vld [vmem:[%s14172_s6 + $0x50] sm:$0xff] }
 0xa99   :  { %v1870_v8 = vmul.f32 %v11180_v5, %v11174_v57  ;;  %10114 = vmatprep.subr.mxu0 %v11401_v1 }
 0xa9b   :  { %10064 = vmatmul.mubr.msk.f32.gmra.mxu0 %vm676_vm7, %v1870_v8 }
 0xa9c   :  { %v11182_v7 = vpop.eup %11181  ;;  %10066 = vmatprep.mubr.msk.f32.mxu0 %vm11402_vm0, %v11401_v1 }
 0xa9d   :  { %v1871_v9 = vmul.f32 %v11182_v7, %v11176_v60 }
 0xa9f   :  { %10067 = vmatmul.mubr.msk.f32.gmra.mxu0 %vm676_vm7, %v1871_v9 }
 0xaa0   :  { %10082 = vmatprep.mubr.msk.f32.mxu0 %vm11402_vm0, %v11401_v1 }
 0xaa3   :  { %10083 = vmatmul.mubr.msk.f32.vlgmr.msra.gmra.mxu0 %vm577_vm5, %v11975_v13  ;;  %v8860_v13 = vld [vmem:[%s14172_s6 + $0x40] sm:$0xff] }
 0xaa4   :  { %10085 = vmatprep.mubr.msk.f32.mxu0 %vm11402_vm0, %v11401_v1  ;;  %10115 = vmatpush3.msra.mxu0 %v8863_v6 }
 0xaa5   :  { %10116 = vmatprep.subr.mxu0 %v11401_v1 }
 0xaa6   :  { %10117 = vmatpush3.msra.mxu0 %v8862_v2 }
 0xaa7   :  { %10086 = vmatmul.mubr.msk.f32.gmra.mxu0 %vm577_vm5, %v11977_v16  ;;  %10118 = vmatprep.subr.mxu0 %v11401_v1  ;;  %v8854_v16 = vld [vmem:[%s14171_s5 + $0x58] sm:$0xff] }
 0xaa8   :  { %10088 = vmatprep.mubr.msk.f32.mxu0 %vm11402_vm0, %v11401_v1  ;;  %10119 = vmatpush3.msra.mxu0 %v8861_v11 }
 0xaa9   :  { %10120 = vmatprep.subr.mxu0 %v11401_v1 }
 0xaaa   :  { %10121 = vmatpush3.msra.mxu0 %v8860_v13 }
 0xaab   :  { %10089 = vmatmul.mubr.msk.f32.gmra.mxu0 %vm577_vm5, %v11979_v18  ;;  %10160 = vmatprep.subr.mxu0 %v11401_v1 }
 0xaac   :  { %10122 = vmatprep.mubr.msk.f32.mxu0 %vm11402_vm0, %v11401_v1 }
 0xaaf   :  { %10123 = vmatmul.mubr.msk.f32.vlgmr.msra.gmra.mxu0 %vm190_vm2, %v11673_v32 }
 0xab0   :  { %10125 = vmatprep.mubr.msk.f32.mxu0 %vm11402_vm0, %v11401_v1 }
 0xab3   :  { %10126 = vmatmul.mubr.msk.f32.gmra.mxu0 %vm190_vm2, %v11687_v38 }
 0xab4   :  { %10128 = vmatprep.mubr.msk.f32.mxu0 %vm11402_vm0, %v11401_v1 }
 0xab7   :  { %10129 = vmatmul.mubr.msk.f32.gmra.mxu0 %vm190_vm2, %v11702_v43 }
 0xab8   :  { %10131 = vmatprep.mubr.msk.f32.mxu0 %vm11402_vm0, %v11401_v1 }
 0xabb   :  { %10132 = vmatmul.mubr.msk.f32.gmra.mxu0 %vm190_vm2, %v11717_v48 }
 0xabc   :  { %10134 = vmatprep.mubr.msk.f32.mxu0 %vm11402_vm0, %v11401_v1 }
 0xabf   :  { %10135 = vmatmul.mubr.msk.f32.gmra.mxu0 %vm190_vm2, %v11732_v52 }
 0xac0   :  { %10166 = vmatprep.mubr.msk.f32.mxu0 %vm11402_vm0, %v11401_v1 }
 0xb57   :  { %v1958_v18 = vpop.f32.mrf.mxu0 }
 0xb58   :  { %10072 = vmatmul.mubr.msk.f32.vlgmr.msra.gmra.mxu1 %vm577_vm5, %v1958_v18 }
 0xb59   :  { %v10062_v47 = vpop.f32.mrf.mxu0  ;;  %10074 = vmatprep.mubr.msk.f32.mxu1 %vm11402_vm0, %v11401_v1  ;;  %10092 = vmatpush3.msra.mxu1 %v8854_v16 }
 0xb5a   :  { %10093 = vmatprep.subr.mxu1 %v11401_v1 }
 0xb5b   :  { %v1963_v44 = vpop.f32.mrf.mxu0  ;;  %10094 = vmatpush3.msra.mxu1 %v8853_v46 }
 0xb5c   :  { %10075 = vmatmul.mubr.msk.f32.gmra.mxu1 %vm577_vm5, %v1963_v44  ;;  %10095 = vmatprep.subr.mxu1 %v11401_v1 }
 0xb5d   :  { %v10065_v20 = vpop.f32.mrf.mxu0  ;;  %10077 = vmatprep.mubr.msk.f32.mxu1 %vm11402_vm0, %v11401_v1  ;;  %10096 = vmatpush3.msra.mxu1 %v8852_v51 }
 0xb5e   :  { %10097 = vmatprep.subr.mxu1 %v11401_v1 }
 0xb5f   :  { %v1968_v58 = vpop.f32.mrf.mxu0  ;;  %10098 = vmatpush3.msra.mxu1 %v8851_v55 }
 0xb60   :  { %10078 = vmatmul.mubr.msk.f32.gmra.mxu1 %vm577_vm5, %v1968_v58  ;;  %10137 = vmatprep.subr.mxu1 %v11401_v1 }
 0xb61   :  { %v10068_v23 = vpop.f32.mrf.mxu0  ;;  %10099 = vmatprep.mubr.msk.f32.mxu1 %vm11402_vm0, %v11401_v1 }
 0xb63   :  { %v12210_v26 = vpop.f32.mrf.mxu0 }
 0xb64   :  { %10100 = vmatmul.mubr.msk.f32.vlgmr.msra.gmra.mxu1 %vm190_vm2, %v11673_v32 }
 0xb65   :  { %v10084_v27 = vpop.f32.mrf.mxu0  ;;  %10102 = vmatprep.mubr.msk.f32.mxu1 %vm11402_vm0, %v11401_v1  ;;  %10138 = vmatpush3.msra.mxu1 %v8872_v25 }
 0xb66   :  { %10139 = vmatprep.subr.mxu1 %v11401_v1 }
 0xb67   :  { %v12223_v28 = vpop.f32.mrf.mxu0  ;;  %10140 = vmatpush3.msra.mxu1 %v8871_v41 }
 0xb68   :  { %10103 = vmatmul.mubr.msk.f32.gmra.mxu1 %vm190_vm2, %v11687_v38  ;;  %10141 = vmatprep.subr.mxu1 %v11401_v1 }
 0xb69   :  { %v10087_v33 = vpop.f32.mrf.mxu0  ;;  %10105 = vmatprep.mubr.msk.f32.mxu1 %vm11402_vm0, %v11401_v1  ;;  %10142 = vmatpush3.msra.mxu1 %v8870_v56 }
 0xb6a   :  { %10143 = vmatprep.subr.mxu1 %v11401_v1 }
 0xb6b   :  { %v12234_v35 = vpop.f32.mrf.mxu0  ;;  %10144 = vmatpush3.msra.mxu1 %v8869_v30 }
 0xb6c   :  { %10106 = vmatmul.mubr.msk.f32.gmra.mxu1 %vm190_vm2, %v11702_v43  ;;  %10190 = vmatprep.subr.mxu1 %v11401_v1 }
 0xb6d   :  { %v10090_v36 = vpop.f32.mrf.mxu0  ;;  %10108 = vmatprep.mubr.msk.f32.mxu1 %vm11402_vm0, %v11401_v1 }
 0xb6f   :  { %v2316_v37 = vpop.f32.mrf.mxu0 }
 0xb70   :  { %10109 = vmatmul.mubr.msk.f32.gmra.mxu1 %vm190_vm2, %v11717_v48 }
 0xb71   :  { %v10124_v40 = vpop.f32.mrf.mxu0  ;;  %10111 = vmatprep.mubr.msk.f32.mxu1 %vm11402_vm0, %v11401_v1 }
 0xb73   :  { %v2321_v42 = vpop.f32.mrf.mxu0 }
 0xb74   :  { %10112 = vmatmul.mubr.msk.f32.gmra.mxu1 %vm190_vm2, %v11732_v52 }
 0xb75   :  { %v10127_v45 = vpop.f32.mrf.mxu0  ;;  %10145 = vmatprep.mubr.msk.f32.mxu1 %vm11402_vm0, %v11401_v1 }
 0xb77   :  { %v2326_v49 = vpop.f32.mrf.mxu0 }
 0xb78   :  { %10146 = vmatmul.mubr.msk.f32.vlgmr.msra.gmra.mxu1 %vm190_vm2, %v11673_v32  ;;  %10161 = vmatpush3.xpose.msk.msra.mxu0 %vm577_vm5, %v2326_v49  ;;  %v2761_v31 = vrot.slane %v2326_v49, 1 }
 0xb79   :  { %v10130_v50 = vpop.f32.mrf.mxu0  ;;  %10148 = vmatprep.mubr.msk.f32.mxu1 %vm11402_vm0, %v11401_v1  ;;  %10162 = vmatprep.subr.mxu0 %v11401_v1 }
 0xb7b   :  { %v2331_v53 = vpop.f32.mrf.mxu0 }
 0xb7c   :  { %v2762_v54 = vrot.slane %v2331_v53, 1  ;;  %10149 = vmatmul.mubr.msk.f32.gmra.mxu1 %vm190_vm2, %v11687_v38  ;;  %10163 = vmatpush3.xpose.msk.msra.mxu0 %vm577_vm5, %v2321_v42 }
 0xb7d   :  { %v10133_v39 = vpop.f32.mrf.mxu0  ;;  %10151 = vmatprep.mubr.msk.f32.mxu1 %vm11402_vm0, %v11401_v1  ;;  %10164 = vmatprep.subr.mxu0 %v11401_v1 }
 0xb7e   :  { %v12262_v57 = vsel %vm807_vm6, %v2761_v31, %v2762_v54 }
 0xb7f   :  { %v12264_v59 = vpop.f32.mrf.mxu0 }
 0xb80   :  { %v2764_v60 = vrot.slane %v12264_v59, 1  ;;  %10152 = vmatmul.mubr.msk.f32.gmra.mxu1 %vm190_vm2, %v11702_v43  ;;  %10165 = vmatpush3.xpose.msk.msra.mxu0 %vm577_vm5, %v2316_v37 }
 0xb81   :  { %v10136_v61 = vpop.f32.mrf.mxu0  ;;  %10154 = vmatprep.mubr.msk.f32.mxu1 %vm11402_vm0, %v11401_v1  ;;  %10175 = vmatprep.subr.mxu0 %v11401_v1 }
 0xb82   :  { %v12276_v62 = vsel %vm807_vm6, %v2762_v54, %v2764_v60 }
 0xb84   :  { %10155 = vmatmul.mubr.msk.f32.gmra.mxu1 %vm190_vm2, %v11717_v48 }
 0xb85   :  { %10157 = vmatprep.mubr.msk.f32.mxu1 %vm11402_vm0, %v11401_v1 }
 0xb88   :  { %10158 = vmatmul.mubr.msk.f32.gmra.mxu1 %vm190_vm2, %v11732_v52 }
 0xb89   :  { %10192 = vmatprep.mubr.msk.f32.mxu1 %vm11402_vm0, %v11401_v1 }
 0xc18   :  { %v12286_v63 = vpop.f32.mrf.mxu1 }
 0xc1a   :  { %v10073_v0 = vpop.f32.mrf.mxu1 }
 0xc1c   :  { %v12288_v3 = vpop.f32.mrf.mxu1 }
 0xc1e   :  { %v10076_v4 = vpop.f32.mrf.mxu1 }
 0xc20   :  { %v12290_v5 = vpop.f32.mrf.mxu1 }
 0xc22   :  { %v10079_v8 = vpop.f32.mrf.mxu1 }
 0xc24   :  { %v2221_v7 = vpop.f32.mrf.mxu1 }
 0xc25   :  { %10167 = vmatmul.mubr.msk.f32.vlgmr.msra.gmra.mxu0 %vm577_vm5, %v2221_v7 }
 0xc26   :  { %v10101_v9 = vpop.f32.mrf.mxu1  ;;  %10169 = vmatprep.mubr.msk.f32.mxu0 %vm11402_vm0, %v11401_v1 }
 0xc28   :  { %v2226_v6 = vpop.f32.mrf.mxu1 }
 0xc29   :  { %10170 = vmatmul.mubr.msk.f32.gmra.mxu0 %vm577_vm5, %v2226_v6 }
 0xc2a   :  { %v10104_v2 = vpop.f32.mrf.mxu1  ;;  %10172 = vmatprep.mubr.msk.f32.mxu0 %vm11402_vm0, %v11401_v1 }
 0xc2c   :  { %v2231_v11 = vpop.f32.mrf.mxu1 }
 0xc2d   :  { %10173 = vmatmul.mubr.msk.f32.gmra.mxu0 %vm577_vm5, %v2231_v11  ;;  %v2754_v18 = vrot.slane %v2231_v11, 1 }
 0xc2e   :  { %v10107_v13 = vpop.f32.mrf.mxu1  ;;  %10181 = vmatprep.mubr.msk.f32.mxu0 %vm11402_vm0, %v11401_v1 }
 0xc30   :  { %v2236_v16 = vpop.f32.mrf.mxu1 }
 0xc31   :  { %v2755_v46 = vrot.slane %v2236_v16, 1 }
 0xc32   :  { %v10110_v47 = vpop.f32.mrf.mxu1 }
 0xc33   :  { %v12302_v51 = vsel %vm807_vm6, %v2754_v18, %v2755_v46 }
 0xc34   :  { %v12304_v44 = vpop.f32.mrf.mxu1 }
 0xc35   :  { %v2757_v55 = vrot.slane %v12304_v44, 1 }
 0xc36   :  { %v10113_v20 = vpop.f32.mrf.mxu1 }
 0xc37   :  { %v12310_v58 = vsel %vm807_vm6, %v2755_v46, %v2757_v55 }
 0xc38   :  { %v2411_v23 = vpop.f32.mrf.mxu1 }
 0xc3a   :  { %v10147_v25 = vpop.f32.mrf.mxu1 }
 0xc3c   :  { %v2416_v41 = vpop.f32.mrf.mxu1 }
 0xc3e   :  { %v10150_v27 = vpop.f32.mrf.mxu1 }
 0xc40   :  { %v2421_v56 = vpop.f32.mrf.mxu1 }
 0xc41   :  { %10176 = vmatpush3.msk.msra.mxu0 %vm720_vm4, %v2421_v56  ;;  %v2893_v36 = vrot.slane %v2421_v56, 1 }
 0xc42   :  { %v10153_v30 = vpop.f32.mrf.mxu1  ;;  %10177 = vmatprep.subr.mxu0 %v11401_v1 }
 0xc43   :  { %10178 = vmatpush3.msra.mxu0 %v2416_v41 }
 0xc44   :  { %v2426_v33 = vpop.f32.mrf.mxu1  ;;  %10179 = vmatprep.subr.mxu0 %v11401_v1 }
 0xc45   :  { %v2894_v37 = vrot.slane %v2426_v33, 1  ;;  %10180 = vmatpush3.msra.mxu0 %v2411_v23  ;;  %v8888_v33 = vld [vmem:[%s14174_s8 + $0x10] sm:$0xff] }
 0xc46   :  { %v10156_v40 = vpop.f32.mrf.mxu1  ;;  %10201 = vmatprep.subr.mxu0 %v11401_v1  ;;  %10191 = vmatpush3.msra.mxu1 %v8888_v33 }
 0xc47   :  { %v12317_v42 = vsel %vm807_vm6, %v2893_v36, %v2894_v37  ;;  %10216 = vmatprep.subr.mxu1 %v11401_v1 }
 0xc48   :  { %v12319_v45 = vpop.f32.mrf.mxu1 }
 0xc49   :  { %v2896_v49 = vrot.slane %v12319_v45, 1 }
 0xc4a   :  { %v10159_v50 = vpop.f32.mrf.mxu1 }
 0xc4b   :  { %v12325_v53 = vsel %vm807_vm6, %v2894_v37, %v2896_v49 }
 0xce5   :  { %v2519_v31 = vpop.f32.mrf.mxu0 }
 0xce6   :  { %v2533_v54 = vsel %vm676_vm7, %v2519_v31, -inf }
 0xce7   :  { %2534 = vmax.xlane.f32.xlu0 %v2533_v54  ;;  %v10168_v39 = vpop.f32.mrf.mxu0 }
 0xce9   :  { %v2524_v61 = vpop.f32.mrf.mxu0 }
 0xcea   :  { %v2536_v0 = vsel %vm676_vm7, %v2524_v61, -inf }
 0xceb   :  { %2537 = vmax.xlane.f32.xlu1 %v2536_v0  ;;  %v10171_v4 = vpop.f32.mrf.mxu0 }
 0xced   :  { %v2529_v8 = vpop.f32.mrf.mxu0 }
 0xcee   :  { %v2539_v7 = vsel %vm683_vm8, %v2529_v8, -inf }
 0xcef   :  { %2540 = vmax.xlane.f32.xlu0 %v2539_v7  ;;  %v10174_v9 = vpop.f32.mrf.mxu0 }
 0xd70   :  { %v2535_v6 = vpop.xlane.xlu0 %2534 }
 0xd71   :  { %v2542_v2 = vsub.f32 %v2519_v31, %v2535_v6 }
 0xd73   :  { %v2545_v11 = vmul.f32 1.442695, %v2542_v2 }
 0xd74   :  { %v2538_v13 = vpop.xlane.xlu1 %2537 }
 0xd75   :  { %11183 = vpow2.f32 %v2545_v11  ;;  %v2543_v16 = vsub.f32 %v2524_v61, %v2538_v13 }
 0xd77   :  { %v2547_v18 = vmul.f32 1.442695, %v2543_v16 }
 0xd78   :  { %v2541_v46 = vpop.xlane.xlu0 %2540 }
 0xd79   :  { %11185 = vpow2.f32 %v2547_v18  ;;  %v2544_v47 = vsub.f32 %v2529_v8, %v2541_v46 }
 0xd7b   :  { %v2549_v20 = vmul.f32 1.442695, %v2544_v47 }
 0xd7d   :  { %11187 = vpow2.f32 %v2549_v20 }
 0xd82   :  { %v11184_v23 = vpop.eup %11183 }
 0xd83   :  { %v2551_v25 = vsel %vm676_vm7, %v11184_v23, 0.0 }
 0xd84   :  { %2552 = vadd.xlane.f32.xlu1 %v2551_v25 }
 0xd86   :  { %v11186_v41 = vpop.eup %11185 }
 0xd87   :  { %v2554_v27 = vsel %vm676_vm7, %v11186_v41, 0.0 }
 0xd88   :  { %2555 = vadd.xlane.f32.xlu0 %v2554_v27 }
 0xd8a   :  { %v11188_v56 = vpop.eup %11187 }
 0xd8b   :  { %v2557_v30 = vsel %vm683_vm8, %v11188_v56, 0.0 }
 0xd8c   :  { %2558 = vadd.xlane.f32.xlu1 %v2557_v30  ;;  %v1720_v30 = vadd.f32 %v12091_v10, %v12111_v17 }
 0xe0d   :  { %v2553_v36 = vpop.xlane.xlu1 %2552 }
 0xe0e   :  { %11189 = vrcp.f32 %v2553_v36 }
 0xe11   :  { %v2556_v37 = vpop.xlane.xlu0 %2555 }
 0xe12   :  { %11191 = vrcp.f32 %v2556_v37 }
 0xe15   :  { %v2559_v40 = vpop.xlane.xlu1 %2558 }
 0xe16   :  { %11193 = vrcp.f32 %v2559_v40  ;;  %v1725_v40 = vadd.f32 %v12098_v12, %v12113_v21  ;;  %v8908_v12 = vld [vmem:[%s14171_s5 + $0x78] sm:$0xff] }
 0xe1b   :  { %v11190_v50 = vpop.eup %11189 }
 0xe1c   :  { %v2563_v31 = vmul.f32 %v11190_v50, %v11184_v23 }
 0xe1e   :  { %10182 = vmatmul.mubr.msk.f32.vlgmr.msra.gmra.mxu0 %vm676_vm7, %v2563_v31 }
 0xe1f   :  { %v11192_v54 = vpop.eup %11191  ;;  %10202 = vmatpush3.xpose.msk.msra.mxu0 %vm577_vm5, %v2764_v60  ;;  %10184 = vmatprep.mubr.msk.f32.mxu0 %vm11402_vm0, %v11401_v1 }
 0xe20   :  { %10203 = vmatprep.subr.mxu0 %v11401_v1  ;;  %v2564_v39 = vmul.f32 %v11192_v54, %v11186_v41 }
 0xe22   :  { %10185 = vmatmul.mubr.msk.f32.gmra.mxu0 %vm676_vm7, %v2564_v39  ;;  %v1730_v39 = vadd.f32 %v12104_v15, %v12115_v22  ;;  %v8907_v15 = vld [vmem:[%s14171_s5 + $0x70] sm:$0xff] }
 0xe23   :  { %v11194_v61 = vpop.eup %11193  ;;  %10204 = vmatpush3.xpose.msk.msra.mxu0 %vm577_vm5, %v12276_v62  ;;  %10187 = vmatprep.mubr.msk.f32.mxu0 %vm11402_vm0, %v11401_v1 }
 0xe24   :  { %10205 = vmatprep.subr.mxu0 %v11401_v1  ;;  %v2565_v59 = vmul.f32 %v11194_v61, %v11188_v56 }
 0xe26   :  { %10188 = vmatmul.mubr.msk.f32.gmra.mxu0 %vm676_vm7, %v2565_v59 }
 0xe27   :  { %10206 = vmatpush3.xpose.msk.msra.mxu0 %vm577_vm5, %v12262_v57  ;;  %10207 = vmatprep.mubr.msk.f32.mxu0 %vm11402_vm0, %v11401_v1 }
 0xe28   :  { %10231 = vmatprep.subr.mxu0 %v11401_v1 }
 0xe2a   :  { %10208 = vmatmul.mubr.msk.f32.vlgmr.msra.gmra.mxu0 %vm577_vm5, %v12302_v51 }
 0xe2b   :  { %10210 = vmatprep.mubr.msk.f32.mxu0 %vm11402_vm0, %v11401_v1  ;;  %10232 = vmatpush3.msra.mxu0 %v8888_v33 }
 0xe2c   :  { %10265 = vmatprep.subr.mxu0 %v11401_v1 }
 0xe2e   :  { %10211 = vmatmul.mubr.msk.f32.gmra.mxu0 %vm577_vm5, %v12310_v58 }
 0xe2f   :  { %10213 = vmatprep.mubr.msk.f32.mxu0 %vm11402_vm0, %v11401_v1 }
 0xe32   :  { %10214 = vmatmul.mubr.msk.f32.gmra.mxu0 %vm577_vm5, %v2757_v55 }
 0xe33   :  { %10233 = vmatprep.mubr.msk.f32.mxu0 %vm11402_vm0, %v11401_v1 }
 0xede   :  { %v2644_v57 = vpop.f32.mrf.mxu0 }
 0xedf   :  { %10193 = vmatmul.mubr.msk.f32.vlgmr.msra.gmra.mxu1 %vm577_vm5, %v2644_v57 }
 0xee0   :  { %10217 = vmatpush3.msk.msra.mxu1 %vm720_vm4, %v2896_v49  ;;  %v10183_v60 = vpop.f32.mrf.mxu0  ;;  %10195 = vmatprep.mubr.msk.f32.mxu1 %vm11402_vm0, %v11401_v1 }
 0xee1   :  { %10218 = vmatprep.subr.mxu1 %v11401_v1 }
 0xee2   :  { %10219 = vmatpush3.msra.mxu1 %v12325_v53  ;;  %v2649_v62 = vpop.f32.mrf.mxu0 }
 0xee3   :  { %10220 = vmatprep.subr.mxu1 %v11401_v1  ;;  %10196 = vmatmul.mubr.msk.f32.gmra.mxu1 %vm577_vm5, %v2649_v62 }
 0xee4   :  { %10221 = vmatpush3.msra.mxu1 %v12317_v42  ;;  %v10186_v51 = vpop.f32.mrf.mxu0  ;;  %10198 = vmatprep.mubr.msk.f32.mxu1 %vm11402_vm0, %v11401_v1 }
 0xee5   :  { %10242 = vmatprep.subr.mxu1 %v11401_v1 }
 0xee6   :  { %v2654_v44 = vpop.f32.mrf.mxu0 }
 0xee7   :  { %10199 = vmatmul.mubr.msk.f32.gmra.mxu1 %vm577_vm5, %v2654_v44  ;;  %v8906_v44 = vld [vmem:[%s14171_s5 + $0x68] sm:$0xff] }
 0xee8   :  { %v10189_v55 = vpop.f32.mrf.mxu0  ;;  %10222 = vmatprep.mubr.msk.f32.mxu1 %vm11402_vm0, %v11401_v1 }
 0xee9   :  { %v8905_v55 = vld [vmem:[%s14171_s5 + $0x60] sm:$0xff] }
 0xeea   :  { %v2844_v58 = vpop.f32.mrf.mxu0 }
 0xeeb   :  { %v2858_v45 = vsel %vm676_vm7, %v2844_v58, -inf }
 0xeec   :  { %2859 = vmax.xlane.f32.xlu0 %v2858_v45  ;;  %v10209_v49 = vpop.f32.mrf.mxu0 }
 0xeed   :  { %v8926_v49 = vld [vmem:[%s14173_s7 + $0x78] sm:$0xff] }
 0xeee   :  { %v2849_v53 = vpop.f32.mrf.mxu0 }
 0xeef   :  { %v2861_v42 = vsel %vm676_vm7, %v2849_v53, -inf }
 0xef0   :  { %2862 = vmax.xlane.f32.xlu1 %v2861_v42  ;;  %v10212_v0 = vpop.f32.mrf.mxu0  ;;  %v8924_v42 = vld [vmem:[%s14173_s7 + $0x68] sm:$0xff] }
 0xef1   :  { %v8923_v0 = vld [vmem:[%s14173_s7 + $0x60] sm:$0xff] }
 0xef2   :  { %v2854_v4 = vpop.f32.mrf.mxu0 }
 0xef3   :  { %v2864_v8 = vsel %vm683_vm8, %v2854_v4, -inf }
 0xef4   :  { %2865 = vmax.xlane.f32.xlu0 %v2864_v8  ;;  %v10215_v7 = vpop.f32.mrf.mxu0 }
 0xef5   :  { %v8916_v7 = vld [vmem:[%s14172_s6 + $0x70] sm:$0xff] }
 0xf75   :  { %v2860_v9 = vpop.xlane.xlu0 %2859 }
 0xf76   :  { %v2867_v6 = vsub.f32 %v2844_v58, %v2860_v9 }
 0xf78   :  { %v2870_v2 = vmul.f32 1.442695, %v2867_v6  ;;  %v8915_v6 = vld [vmem:[%s14172_s6 + $0x68] sm:$0xff] }
 0xf79   :  { %v2863_v11 = vpop.xlane.xlu1 %2862 }
 0xf7a   :  { %11195 = vpow2.f32 %v2870_v2  ;;  %v2868_v13 = vsub.f32 %v2849_v53, %v2863_v11  ;;  %v8925_v53 = vld [vmem:[%s14173_s7 + $0x70] sm:$0xff]  ;;  %v8914_v11 = vld [vmem:[%s14172_s6 + $0x60] sm:$0xff] }
 0xf7c   :  { %v2872_v16 = vmul.f32 1.442695, %v2868_v13 }
 0xf7d   :  { %v2866_v18 = vpop.xlane.xlu0 %2865 }
 0xf7e   :  { %11197 = vpow2.f32 %v2872_v16  ;;  %v2869_v46 = vsub.f32 %v2854_v4, %v2866_v18  ;;  %v8917_v4 = vld [vmem:[%s14172_s6 + $0x78] sm:$0xff] }
 0xf80   :  { %v2874_v47 = vmul.f32 1.442695, %v2869_v46 }
 0xf82   :  { %11199 = vpow2.f32 %v2874_v47 }
 0xf87   :  { %v11196_v20 = vpop.eup %11195 }
 0xf88   :  { %v2876_v23 = vsel %vm676_vm7, %v11196_v20, 0.0 }
 0xf89   :  { %2877 = vadd.xlane.f32.xlu1 %v2876_v23 }
 0xf8b   :  { %v11198_v25 = vpop.eup %11197 }
 0xf8c   :  { %v2879_v41 = vsel %vm676_vm7, %v11198_v25, 0.0 }
 0xf8d   :  { %2880 = vadd.xlane.f32.xlu0 %v2879_v41 }
 0xf8f   :  { %v11200_v27 = vpop.eup %11199 }
 0xf90   :  { %v2882_v56 = vsel %vm683_vm8, %v11200_v27, 0.0 }
 0xf91   :  { %2883 = vadd.xlane.f32.xlu1 %v2882_v56 }
 0xf9f   :  { %v2735_v33 = vpop.f32.mrf.mxu1 }
 0xfa0   :  { %v12395_v36 = vadd.f32 %v2735_v33, %v1720_v30 }
 0xfa1   :  { %v10194_v37 = vpop.f32.mrf.mxu1 }
 0xfa3   :  { %v2740_v50 = vpop.f32.mrf.mxu1 }
 0xfa4   :  { %v12399_v31 = vadd.f32 %v2740_v50, %v1725_v40 }
 0xfa5   :  { %v10197_v54 = vpop.f32.mrf.mxu1 }
 0xfa7   :  { %v2745_v61 = vpop.f32.mrf.mxu1 }
 0xfa8   :  { %v12403_v59 = vadd.f32 %v2745_v61, %v1730_v39 }
 0xfa9   :  { %v10200_v57 = vpop.f32.mrf.mxu1 }
0x1012   :  { %v2878_v60 = vpop.xlane.xlu1 %2877 }
0x1013   :  { %11201 = vrcp.f32 %v2878_v60 }
0x1016   :  { %v2881_v10 = vpop.xlane.xlu0 %2880 }
0x1017   :  { %11203 = vrcp.f32 %v2881_v10 }
0x101a   :  { %v2884_v17 = vpop.xlane.xlu1 %2883 }
0x101b   :  { %11205 = vrcp.f32 %v2884_v17 }
0x1020   :  { %v11202_v62 = vpop.eup %11201 }
0x1021   :  { %v2888_v51 = vmul.f32 %v11202_v62, %v11196_v20 }
0x1023   :  { %10223 = vmatmul.mubr.msk.f32.vlgmr.msra.gmra.mxu1 %vm676_vm7, %v2888_v51 }
0x1024   :  { %v11204_v21 = vpop.eup %11203  ;;  %10225 = vmatprep.mubr.msk.f32.mxu1 %vm11402_vm0, %v11401_v1  ;;  %10243 = vmatpush3.msra.mxu1 %v8908_v12 }
0x1025   :  { %v2889_v22 = vmul.f32 %v11204_v21, %v11198_v25  ;;  %10244 = vmatprep.subr.mxu1 %v11401_v1 }
0x1026   :  { %10245 = vmatpush3.msra.mxu1 %v8907_v15  ;;  %v2137_v15 = vadd.f32 %v12210_v26, %v12286_v63 }
0x1027   :  { %10226 = vmatmul.mubr.msk.f32.gmra.mxu1 %vm676_vm7, %v2889_v22  ;;  %10246 = vmatprep.subr.mxu1 %v11401_v1 }
0x1028   :  { %v11206_v58 = vpop.eup %11205  ;;  %10228 = vmatprep.mubr.msk.f32.mxu1 %vm11402_vm0, %v11401_v1  ;;  %10247 = vmatpush3.msra.mxu1 %v8906_v44 }
0x1029   :  { %v2890_v45 = vmul.f32 %v11206_v58, %v11200_v27  ;;  %10248 = vmatprep.subr.mxu1 %v11401_v1 }
0x102a   :  { %10249 = vmatpush3.msra.mxu1 %v8905_v55  ;;  %v2142_v55 = vadd.f32 %v12223_v28, %v12288_v3 }
0x102b   :  { %10229 = vmatmul.mubr.msk.f32.gmra.mxu1 %vm676_vm7, %v2890_v45  ;;  %10288 = vmatprep.subr.mxu1 %v11401_v1 }
0x102c   :  { %10250 = vmatprep.mubr.msk.f32.mxu1 %vm11402_vm0, %v11401_v1 }
0x102f   :  { %10251 = vmatmul.mubr.msk.f32.vlgmr.msra.gmra.mxu1 %vm190_vm2, %v11673_v32 }
0x1030   :  { %10253 = vmatprep.mubr.msk.f32.mxu1 %vm11402_vm0, %v11401_v1  ;;  %10289 = vmatpush3.msra.mxu1 %v8926_v49 }
0x1031   :  { %10290 = vmatprep.subr.mxu1 %v11401_v1 }
0x1032   :  { %10291 = vmatpush3.msra.mxu1 %v8925_v53  ;;  %v2147_v53 = vadd.f32 %v12234_v35, %v12290_v5 }
0x1033   :  { %10254 = vmatmul.mubr.msk.f32.gmra.mxu1 %vm190_vm2, %v11687_v38  ;;  %10292 = vmatprep.subr.mxu1 %v11401_v1 }
0x1034   :  { %10256 = vmatprep.mubr.msk.f32.mxu1 %vm11402_vm0, %v11401_v1  ;;  %10293 = vmatpush3.msra.mxu1 %v8924_v42 }
0x1035   :  { %10294 = vmatprep.subr.mxu1 %v11401_v1 }
0x1036   :  { %10295 = vmatpush3.msra.mxu1 %v8923_v0 }
0x1037   :  { %10257 = vmatmul.mubr.msk.f32.gmra.mxu1 %vm190_vm2, %v11702_v43  ;;  %10326 = vmatprep.subr.mxu1 %v11401_v1 }
0x1038   :  { %10259 = vmatprep.mubr.msk.f32.mxu1 %vm11402_vm0, %v11401_v1 }
0x103b   :  { %10260 = vmatmul.mubr.msk.f32.gmra.mxu1 %vm190_vm2, %v11717_v48 }
0x103c   :  { %10262 = vmatprep.mubr.msk.f32.mxu1 %vm11402_vm0, %v11401_v1 }
0x103f   :  { %10263 = vmatmul.mubr.msk.f32.gmra.mxu1 %vm190_vm2, %v11732_v52 }
0x1040   :  { %10296 = vmatprep.mubr.msk.f32.mxu1 %vm11402_vm0, %v11401_v1 }
0x1043   :  { %10297 = vmatmul.mubr.msk.f32.vlgmr.msra.gmra.mxu1 %vm190_vm2, %v11673_v32 }
0x1044   :  { %10299 = vmatprep.mubr.msk.f32.mxu1 %vm11402_vm0, %v11401_v1 }
0x1047   :  { %10300 = vmatmul.mubr.msk.f32.gmra.mxu1 %vm190_vm2, %v11687_v38 }
0x1048   :  { %10302 = vmatprep.mubr.msk.f32.mxu1 %vm11402_vm0, %v11401_v1 }
0x104b   :  { %10303 = vmatmul.mubr.msk.f32.gmra.mxu1 %vm190_vm2, %v11702_v43 }
0x104c   :  { %10305 = vmatprep.mubr.msk.f32.mxu1 %vm11402_vm0, %v11401_v1 }
0x104f   :  { %10306 = vmatmul.mubr.msk.f32.gmra.mxu1 %vm190_vm2, %v11717_v48 }
0x1050   :  { %10308 = vmatprep.mubr.msk.f32.mxu1 %vm11402_vm0, %v11401_v1 }
0x1053   :  { %10309 = vmatmul.mubr.msk.f32.gmra.mxu1 %vm190_vm2, %v11732_v52 }
0x1054   :  { %10332 = vmatprep.mubr.msk.f32.mxu1 %vm11402_vm0, %v11401_v1 }
0x10e3   :  { %v2977_v8 = vpop.f32.mrf.mxu1 }
0x10e4   :  { %10234 = vmatmul.mubr.msk.f32.vlgmr.msra.gmra.mxu0 %vm577_vm5, %v2977_v8 }
0x10e5   :  { %v10224_v9 = vpop.f32.mrf.mxu1  ;;  %10236 = vmatprep.mubr.msk.f32.mxu0 %vm11402_vm0, %v11401_v1  ;;  %10266 = vmatpush3.msra.mxu0 %v8917_v4 }
0x10e6   :  { %10267 = vmatprep.subr.mxu0 %v11401_v1 }
0x10e7   :  { %v2982_v2 = vpop.f32.mrf.mxu1  ;;  %10268 = vmatpush3.msra.mxu0 %v8916_v7 }
0x10e8   :  { %10237 = vmatmul.mubr.msk.f32.gmra.mxu0 %vm577_vm5, %v2982_v2  ;;  %10269 = vmatprep.subr.mxu0 %v11401_v1 }
0x10e9   :  { %v10227_v13 = vpop.f32.mrf.mxu1  ;;  %10239 = vmatprep.mubr.msk.f32.mxu0 %vm11402_vm0, %v11401_v1  ;;  %10270 = vmatpush3.msra.mxu0 %v8915_v6 }
0x10ea   :  { %10271 = vmatprep.subr.mxu0 %v11401_v1 }
0x10eb   :  { %v2987_v16 = vpop.f32.mrf.mxu1  ;;  %10272 = vmatpush3.msra.mxu0 %v8914_v11 }
0x10ec   :  { %10240 = vmatmul.mubr.msk.f32.gmra.mxu0 %vm577_vm5, %v2987_v16  ;;  %10311 = vmatprep.subr.mxu0 %v11401_v1 }
0x10ed   :  { %v10230_v18 = vpop.f32.mrf.mxu1  ;;  %10273 = vmatprep.mubr.msk.f32.mxu0 %vm11402_vm0, %v11401_v1 }
0x10ef   :  { %v12511_v46 = vpop.f32.mrf.mxu1 }
0x10f0   :  { %10274 = vmatmul.mubr.msk.f32.vlgmr.msra.gmra.mxu0 %vm190_vm2, %v11673_v32 }
0x10f1   :  { %v10252_v47 = vpop.f32.mrf.mxu1  ;;  %10276 = vmatprep.mubr.msk.f32.mxu0 %vm11402_vm0, %v11401_v1 }
0x10f3   :  { %v12517_v20 = vpop.f32.mrf.mxu1 }
0x10f4   :  { %10277 = vmatmul.mubr.msk.f32.gmra.mxu0 %vm190_vm2, %v11687_v38 }
0x10f5   :  { %v10255_v23 = vpop.f32.mrf.mxu1  ;;  %10279 = vmatprep.mubr.msk.f32.mxu0 %vm11402_vm0, %v11401_v1 }
0x10f7   :  { %v12523_v25 = vpop.f32.mrf.mxu1 }
0x10f8   :  { %10280 = vmatmul.mubr.msk.f32.gmra.mxu0 %vm190_vm2, %v11702_v43 }
0x10f9   :  { %v10258_v41 = vpop.f32.mrf.mxu1  ;;  %10282 = vmatprep.mubr.msk.f32.mxu0 %vm11402_vm0, %v11401_v1 }
0x10fb   :  { %v12529_v32 = vpop.f32.mrf.mxu1 }
0x10fc   :  { %10283 = vmatmul.mubr.msk.f32.gmra.mxu0 %vm190_vm2, %v11717_v48  ;;  %v3688_v56 = vrot.slane %v12529_v32, 1 }
0x10fd   :  { %v10261_v27 = vpop.f32.mrf.mxu1  ;;  %10285 = vmatprep.mubr.msk.f32.mxu0 %vm11402_vm0, %v11401_v1 }
0x10ff   :  { %v12535_v38 = vpop.f32.mrf.mxu1 }
0x1100   :  { %v3690_v30 = vrot.slane %v12535_v38, 1  ;;  %10286 = vmatmul.mubr.msk.f32.gmra.mxu0 %vm190_vm2, %v11732_v52 }
0x1101   :  { %v10264_v43 = vpop.f32.mrf.mxu1  ;;  %10317 = vmatprep.mubr.msk.f32.mxu0 %vm11402_vm0, %v11401_v1 }
0x1102   :  { %v12548_v48 = vsel %vm807_vm6, %v3688_v56, %v3690_v30 }
0x1103   :  { %v3344_v33 = vpop.f32.mrf.mxu1 }
0x1105   :  { %v10298_v37 = vpop.f32.mrf.mxu1 }
0x1107   :  { %v3349_v40 = vpop.f32.mrf.mxu1 }
0x1109   :  { %v10301_v50 = vpop.f32.mrf.mxu1 }
0x110b   :  { %v3354_v54 = vpop.f32.mrf.mxu1 }
0x110c   :  { %10327 = vmatpush3.msk.msra.mxu1 %vm720_vm4, %v3354_v54  ;;  %v3826_v61 = vrot.slane %v3354_v54, 1 }
0x110d   :  { %v10304_v39 = vpop.f32.mrf.mxu1  ;;  %10328 = vmatprep.subr.mxu1 %v11401_v1 }
0x110e   :  { %10329 = vmatpush3.msra.mxu1 %v3349_v40 }
0x110f   :  { %v3359_v52 = vpop.f32.mrf.mxu1  ;;  %10330 = vmatprep.subr.mxu1 %v11401_v1 }
0x1110   :  { %v3827_v57 = vrot.slane %v3359_v52, 1  ;;  %10331 = vmatpush3.msra.mxu1 %v3344_v33 }
0x1111   :  { %v10307_v60 = vpop.f32.mrf.mxu1  ;;  %10352 = vmatprep.subr.mxu1 %v11401_v1 }
0x1112   :  { %v12555_v10 = vsel %vm807_vm6, %v3826_v61, %v3827_v57 }
0x1113   :  { %v12557_v17 = vpop.f32.mrf.mxu1 }
0x1114   :  { %v3829_v62 = vrot.slane %v12557_v17, 1 }
0x1115   :  { %v10310_v51 = vpop.f32.mrf.mxu1 }
0x1116   :  { %v12563_v12 = vsel %vm807_vm6, %v3827_v57, %v3829_v62 }
0x11a4   :  { %v3066_v21 = vpop.f32.mrf.mxu0 }
0x11a5   :  { %v12567_v22 = vadd.f32 %v3066_v21, %v2137_v15 }
0x11a6   :  { %v10235_v44 = vpop.f32.mrf.mxu0 }
0x11a8   :  { %v3071_v58 = vpop.f32.mrf.mxu0 }
0x11a9   :  { %v12571_v45 = vadd.f32 %v3071_v58, %v2142_v55 }
0x11aa   :  { %v10238_v49 = vpop.f32.mrf.mxu0 }
0x11ac   :  { %v3076_v42 = vpop.f32.mrf.mxu0 }
0x11ad   :  { %v12575_v0 = vadd.f32 %v3076_v42, %v2147_v53  ;;  %v8942_v53 = vld [vmem:[%s14174_s8 + $0x18] sm:$0xff] }
0x11ae   :  { %v10241_v4 = vpop.f32.mrf.mxu0 }
0x11b0   :  { %v3249_v8 = vpop.f32.mrf.mxu0 }
0x11b2   :  { %v10275_v26 = vpop.f32.mrf.mxu0 }
0x11b4   :  { %v3254_v63 = vpop.f32.mrf.mxu0 }
0x11b6   :  { %v10278_v7 = vpop.f32.mrf.mxu0 }
0x11b8   :  { %v3259_v9 = vpop.f32.mrf.mxu0 }
0x11b9   :  { %10312 = vmatpush3.xpose.msk.msra.mxu0 %vm577_vm5, %v3259_v9  ;;  %v3694_v3 = vrot.slane %v3259_v9, 1 }
0x11ba   :  { %v10281_v6 = vpop.f32.mrf.mxu0  ;;  %10313 = vmatprep.subr.mxu0 %v11401_v1 }
0x11bc   :  { %v3264_v28 = vpop.f32.mrf.mxu0 }
0x11bd   :  { %v3695_v2 = vrot.slane %v3264_v28, 1  ;;  %10314 = vmatpush3.xpose.msk.msra.mxu0 %vm577_vm5, %v3254_v63 }
0x11be   :  { %v10284_v35 = vpop.f32.mrf.mxu0  ;;  %10315 = vmatprep.subr.mxu0 %v11401_v1 }
0x11bf   :  { %v12582_v5 = vsel %vm807_vm6, %v3694_v3, %v3695_v2  ;;  %v3687_v3 = vrot.slane %v12523_v25, 1 }
0x11c0   :  { %v3269_v11 = vpop.f32.mrf.mxu0 }
0x11c1   :  { %v3697_v13 = vrot.slane %v3269_v11, 1  ;;  %10316 = vmatpush3.xpose.msk.msra.mxu0 %vm577_vm5, %v3249_v8 }
0x11c2   :  { %v10287_v16 = vpop.f32.mrf.mxu0  ;;  %10341 = vmatprep.subr.mxu0 %v11401_v1 }
0x11c3   :  { %v3698_v18 = vsel %vm807_vm6, %v3695_v2, %v3697_v13  ;;  %v3689_v2 = vsel %vm807_vm6, %v3687_v3, %v3688_v56 }
0x11c4   :  { %10318 = vmatmul.mubr.msk.f32.vlgmr.msra.gmra.mxu0 %vm577_vm5, %v12511_v46 }
0x11c5   :  { %10320 = vmatprep.mubr.msk.f32.mxu0 %vm11402_vm0, %v11401_v1  ;;  %10342 = vmatpush3.msra.mxu0 %v8942_v53 }
0x11c6   :  { %10367 = vmatprep.subr.mxu0 %v11401_v1 }
0x11c8   :  { %10321 = vmatmul.mubr.msk.f32.gmra.mxu0 %vm577_vm5, %v12517_v20 }
0x11c9   :  { %10323 = vmatprep.mubr.msk.f32.mxu0 %vm11402_vm0, %v11401_v1 }
0x11cc   :  { %10324 = vmatmul.mubr.msk.f32.gmra.mxu0 %vm577_vm5, %v12523_v25 }
0x11cd   :  { %10343 = vmatprep.mubr.msk.f32.mxu0 %vm11402_vm0, %v11401_v1 }
0x1284   :  { %v3452_v47 = vpop.f32.mrf.mxu0 }
0x1285   :  { %v3466_v23 = vsel %vm676_vm7, %v3452_v47, -inf }
0x1286   :  { %3467 = vmax.xlane.f32.xlu0 %v3466_v23  ;;  %v10319_v46 = vpop.f32.mrf.mxu0 }
0x1288   :  { %v3457_v41 = vpop.f32.mrf.mxu0 }
0x1289   :  { %v3469_v27 = vsel %vm676_vm7, %v3457_v41, -inf }
0x128a   :  { %3470 = vmax.xlane.f32.xlu1 %v3469_v27  ;;  %v10322_v43 = vpop.f32.mrf.mxu0 }
0x128c   :  { %v3462_v20 = vpop.f32.mrf.mxu0 }
0x128d   :  { %v3472_v33 = vsel %vm683_vm8, %v3462_v20, -inf }
0x128e   :  { %3473 = vmax.xlane.f32.xlu0 %v3472_v33  ;;  %v10325_v37 = vpop.f32.mrf.mxu0 }
0x130f   :  { %v3468_v40 = vpop.xlane.xlu0 %3467 }
0x1310   :  { %v3475_v50 = vsub.f32 %v3452_v47, %v3468_v40 }
0x1312   :  { %v3478_v54 = vmul.f32 1.442695, %v3475_v50 }
0x1313   :  { %v3471_v39 = vpop.xlane.xlu1 %3470 }
0x1314   :  { %11207 = vpow2.f32 %v3478_v54  ;;  %v3476_v52 = vsub.f32 %v3457_v41, %v3471_v39 }
0x1316   :  { %v3480_v61 = vmul.f32 1.442695, %v3476_v52 }
0x1317   :  { %v3474_v57 = vpop.xlane.xlu0 %3473 }
0x1318   :  { %11209 = vpow2.f32 %v3480_v61  ;;  %v3477_v60 = vsub.f32 %v3462_v20, %v3474_v57 }
0x131a   :  { %v3482_v51 = vmul.f32 1.442695, %v3477_v60  ;;  %v12669_v60 = vld [vmem:[%s14175_s9] ss:$0 sm:$0xff] }
0x131c   :  { %11211 = vpow2.f32 %v3482_v51 }
0x1321   :  { %v11208_v15 = vpop.eup %11207 }
0x1322   :  { %v3484_v21 = vsel %vm676_vm7, %v11208_v15, 0.0 }
0x1323   :  { %3485 = vadd.xlane.f32.xlu1 %v3484_v21 }
0x1325   :  { %v11210_v44 = vpop.eup %11209 }
0x1326   :  { %v3487_v55 = vsel %vm676_vm7, %v11210_v44, 0.0 }
0x1327   :  { %3488 = vadd.xlane.f32.xlu0 %v3487_v55 }
0x1329   :  { %v11212_v58 = vpop.eup %11211 }
0x132a   :  { %v3490_v49 = vsel %vm683_vm8, %v11212_v58, 0.0 }
0x132b   :  { %3491 = vadd.xlane.f32.xlu1 %v3490_v49 }
0x13ac   :  { %v3486_v42 = vpop.xlane.xlu1 %3485 }
0x13ad   :  { %11213 = vrcp.f32 %v3486_v42 }
0x13b0   :  { %v3489_v4 = vpop.xlane.xlu0 %3488 }
0x13b1   :  { %11215 = vrcp.f32 %v3489_v4 }
0x13b4   :  { %v3492_v8 = vpop.xlane.xlu1 %3491 }
0x13b5   :  { %11217 = vrcp.f32 %v3492_v8 }
0x13ba   :  { %v11214_v26 = vpop.eup %11213 }
0x13bb   :  { %v3496_v63 = vmul.f32 %v11214_v26, %v11208_v15 }
0x13bd   :  { %10333 = vmatmul.mubr.msk.f32.vlgmr.msra.gmra.mxu1 %vm676_vm7, %v3496_v63 }
0x13be   :  { %v11216_v7 = vpop.eup %11215  ;;  %10353 = vmatpush3.xpose.msk.msra.mxu1 %vm577_vm5, %v3697_v13  ;;  %10335 = vmatprep.mubr.msk.f32.mxu1 %vm11402_vm0, %v11401_v1 }
0x13bf   :  { %10354 = vmatprep.subr.mxu1 %v11401_v1  ;;  %v3497_v9 = vmul.f32 %v11216_v7, %v11210_v44 }
0x13c1   :  { %10336 = vmatmul.mubr.msk.f32.gmra.mxu1 %vm676_vm7, %v3497_v9 }
0x13c2   :  { %v11218_v6 = vpop.eup %11217  ;;  %10355 = vmatpush3.xpose.msk.msra.mxu1 %vm577_vm5, %v3698_v18  ;;  %10338 = vmatprep.mubr.msk.f32.mxu1 %vm11402_vm0, %v11401_v1 }
0x13c3   :  { %10356 = vmatprep.subr.mxu1 %v11401_v1  ;;  %v3498_v28 = vmul.f32 %v11218_v6, %v11212_v58 }
0x13c5   :  { %10339 = vmatmul.mubr.msk.f32.gmra.mxu1 %vm676_vm7, %v3498_v28 }
0x13c6   :  { %10357 = vmatpush3.xpose.msk.msra.mxu1 %vm577_vm5, %v12582_v5  ;;  %10358 = vmatprep.mubr.msk.f32.mxu1 %vm11402_vm0, %v11401_v1 }
0x13c7   :  { %10382 = vmatprep.subr.mxu1 %v11401_v1 }
0x13c9   :  { %10359 = vmatmul.mubr.msk.f32.vlgmr.msra.gmra.mxu1 %vm577_vm5, %v3689_v2 }
0x13ca   :  { %10361 = vmatprep.mubr.msk.f32.mxu1 %vm11402_vm0, %v11401_v1  ;;  %10383 = vmatpush3.msra.mxu1 %v8942_v53 }
0x13cb   :  { %10416 = vmatprep.subr.mxu1 %v11401_v1 }
0x13cd   :  { %10362 = vmatmul.mubr.msk.f32.gmra.mxu1 %vm577_vm5, %v12548_v48 }
0x13ce   :  { %10364 = vmatprep.mubr.msk.f32.mxu1 %vm11402_vm0, %v11401_v1 }
0x13d1   :  { %10365 = vmatmul.mubr.msk.f32.gmra.mxu1 %vm577_vm5, %v3690_v30 }
0x13d2   :  { %10384 = vmatprep.mubr.msk.f32.mxu1 %vm11402_vm0, %v11401_v1 }
0x147d   :  { %v3577_v25 = vpop.f32.mrf.mxu1 }
0x147e   :  { %10344 = vmatmul.mubr.msk.f32.vlgmr.msra.gmra.mxu0 %vm577_vm5, %v3577_v25 }
0x147f   :  { %10368 = vmatpush3.msk.msra.mxu0 %vm720_vm4, %v3829_v62  ;;  %v10334_v32 = vpop.f32.mrf.mxu1  ;;  %10346 = vmatprep.mubr.msk.f32.mxu0 %vm11402_vm0, %v11401_v1 }
0x1480   :  { %10369 = vmatprep.subr.mxu0 %v11401_v1 }
0x1481   :  { %10370 = vmatpush3.msra.mxu0 %v12563_v12  ;;  %v3582_v38 = vpop.f32.mrf.mxu1 }
0x1482   :  { %10371 = vmatprep.subr.mxu0 %v11401_v1  ;;  %10347 = vmatmul.mubr.msk.f32.gmra.mxu0 %vm577_vm5, %v3582_v38 }
0x1483   :  { %10372 = vmatpush3.msra.mxu0 %v12555_v10  ;;  %v10337_v56 = vpop.f32.mrf.mxu1  ;;  %10349 = vmatprep.mubr.msk.f32.mxu0 %vm11402_vm0, %v11401_v1 }
0x1484   :  { %10393 = vmatprep.subr.mxu0 %v11401_v1 }
0x1485   :  { %v3587_v30 = vpop.f32.mrf.mxu1 }
0x1486   :  { %10350 = vmatmul.mubr.msk.f32.gmra.mxu0 %vm577_vm5, %v3587_v30 }
0x1487   :  { %v10340_v48 = vpop.f32.mrf.mxu1  ;;  %10373 = vmatprep.mubr.msk.f32.mxu0 %vm11402_vm0, %v11401_v1 }
0x1489   :  { %v3777_v17 = vpop.f32.mrf.mxu1 }
0x148a   :  { %v3791_v62 = vsel %vm676_vm7, %v3777_v17, -inf }
0x148b   :  { %3792 = vmax.xlane.f32.xlu0 %v3791_v62  ;;  %v10360_v12 = vpop.f32.mrf.mxu1 }
0x148d   :  { %v3782_v35 = vpop.f32.mrf.mxu1 }
0x148e   :  { %v3794_v10 = vsel %vm676_vm7, %v3782_v35, -inf }
0x148f   :  { %3795 = vmax.xlane.f32.xlu1 %v3794_v10  ;;  %v10363_v5 = vpop.f32.mrf.mxu1 }
0x1491   :  { %v3787_v11 = vpop.f32.mrf.mxu1 }
0x1492   :  { %v3797_v13 = vsel %vm683_vm8, %v3787_v11, -inf }
0x1493   :  { %3798 = vmax.xlane.f32.xlu0 %v3797_v13  ;;  %v10366_v16 = vpop.f32.mrf.mxu1 }
0x1514   :  { %v3793_v18 = vpop.xlane.xlu0 %3792 }
0x1515   :  { %v3800_v47 = vsub.f32 %v3777_v17, %v3793_v18 }
0x1517   :  { %v3803_v23 = vmul.f32 1.442695, %v3800_v47 }
0x1518   :  { %v3796_v46 = vpop.xlane.xlu1 %3795 }
0x1519   :  { %11219 = vpow2.f32 %v3803_v23  ;;  %v3801_v41 = vsub.f32 %v3782_v35, %v3796_v46 }
0x151b   :  { %v3805_v27 = vmul.f32 1.442695, %v3801_v41 }
0x151c   :  { %v3799_v43 = vpop.xlane.xlu0 %3798 }
0x151d   :  { %11221 = vpow2.f32 %v3805_v27  ;;  %v3802_v20 = vsub.f32 %v3787_v11, %v3799_v43 }
0x151f   :  { %v3807_v33 = vmul.f32 1.442695, %v3802_v20 }
0x1521   :  { %11223 = vpow2.f32 %v3807_v33 }
0x1526   :  { %v11220_v37 = vpop.eup %11219 }
0x1527   :  { %v3809_v40 = vsel %vm676_vm7, %v11220_v37, 0.0 }
0x1528   :  { %3810 = vadd.xlane.f32.xlu1 %v3809_v40 }
0x152a   :  { %v11222_v50 = vpop.eup %11221 }
0x152b   :  { %v3812_v54 = vsel %vm676_vm7, %v11222_v50, 0.0 }
0x152c   :  { %3813 = vadd.xlane.f32.xlu0 %v3812_v54 }
0x152e   :  { %v11224_v39 = vpop.eup %11223 }
0x152f   :  { %v3815_v52 = vsel %vm683_vm8, %v11224_v39, 0.0 }
0x1530   :  { %3816 = vadd.xlane.f32.xlu1 %v3815_v52 }
0x153e   :  { %v3668_v61 = vpop.f32.mrf.mxu0 }
0x153f   :  { %v3682_v57 = vadd.f32 %v3668_v61, %v12395_v36 }
0x1540   :  { %v10345_v51 = vpop.f32.mrf.mxu0 }
0x1541   :  { %v4028_v15 = vadd.f32 %v3682_v57, %v11572_v14 }
0x1542   :  { %v3673_v21 = vpop.f32.mrf.mxu0 }
0x1543   :  { %v12673_v44 = vadd.f32 %v12669_v60, %v4028_v15  ;;  %v3683_v55 = vadd.f32 %v3673_v21, %v12399_v31  ;;  %v4135_v15 = vld [vmem:[%s14178_s12 + $0x8] sm:$0xff]  ;;  %v4134_v21 = vld [vmem:[%s14178_s12] sm:$0xff] }
0x1544   :  { %v10348_v58 = vpop.f32.mrf.mxu0 }
0x1545   :  { %v4029_v49 = vadd.f32 %v3683_v55, %v11579_v19  ;;  %v4047_v36 = vsel %vm190_vm2, %v12673_v44, 0.0 }
0x1546   :  { %4048 = vadd.xlane.f32.xlu0 %v4047_v36  ;;  %v3678_v53 = vpop.f32.mrf.mxu0 }
0x1547   :  { %v12680_v42 = vadd.f32 %v12669_v60, %v4029_v49  ;;  %v3684_v4 = vadd.f32 %v3678_v53, %v12403_v59 }
0x1548   :  { %v10351_v14 = vpop.f32.mrf.mxu0 }
0x1549   :  { %v4050_v8 = vsel %vm190_vm2, %v12680_v42, 0.0 }
0x154a   :  { %4051 = vadd.xlane.f32.xlu1 %v4050_v8 }
0x15b1   :  { %v3811_v26 = vpop.xlane.xlu1 %3810 }
0x15b2   :  { %11225 = vrcp.f32 %v3811_v26 }
0x15b5   :  { %v3814_v31 = vpop.xlane.xlu0 %3813 }
0x15b6   :  { %11227 = vrcp.f32 %v3814_v31 }
0x15b9   :  { %v3817_v19 = vpop.xlane.xlu1 %3816 }
0x15ba   :  { %11229 = vrcp.f32 %v3817_v19 }
0x15bf   :  { %v11226_v63 = vpop.eup %11225 }
0x15c0   :  { %v3821_v7 = vmul.f32 %v11226_v63, %v11220_v37 }
0x15c2   :  { %10374 = vmatmul.mubr.msk.f32.vlgmr.msra.gmra.mxu0 %vm676_vm7, %v3821_v7 }
0x15c3   :  { %v11228_v9 = vpop.eup %11227  ;;  %10376 = vmatprep.mubr.msk.f32.mxu0 %vm11402_vm0, %v11401_v1 }
0x15c4   :  { %v3822_v59 = vmul.f32 %v11228_v9, %v11222_v50 }
0x15c6   :  { %10377 = vmatmul.mubr.msk.f32.gmra.mxu0 %vm676_vm7, %v3822_v59 }
0x15c7   :  { %v11230_v6 = vpop.eup %11229  ;;  %10379 = vmatprep.mubr.msk.f32.mxu0 %vm11402_vm0, %v11401_v1 }
0x15c8   :  { %v3823_v28 = vmul.f32 %v11230_v6, %v11224_v39 }
0x15ca   :  { %10380 = vmatmul.mubr.msk.f32.gmra.mxu0 %vm676_vm7, %v3823_v28 }
0x15cb   :  { %10401 = vmatprep.mubr.msk.f32.mxu0 %vm11402_vm0, %v11401_v1 }
0x15cf   :  { %v4049_v62 = vpop.xlane.xlu0 %4048 }
0x15d0   :  { %v4062_v11 = vmul.f32 0.03125, %v4049_v62 }
0x15d2   :  { %v4067_v27 = vsub.f32 %v12673_v44, %v4062_v11  ;;  %v4282_v11 = vld [vmem:[%s14180_s14 + $0x38] sm:$0xff] }
0x15d3   :  { %v4052_v18 = vpop.xlane.xlu1 %4051 }
0x15d4   :  { %v4063_v43 = vmul.f32 0.03125, %v4052_v18  ;;  %v4072_v39 = vmul.f32 %v4067_v27, %v4067_v27  ;;  %v4279_v18 = vld [vmem:[%s14180_s14 + $0x20] sm:$0xff] }
0x15d6   :  { %v4068_v50 = vsub.f32 %v12680_v42, %v4063_v43  ;;  %v4077_v52 = vsel %vm190_vm2, %v4072_v39, 0.0 }
0x15d8   :  { %v4073_v57 = vmul.f32 %v4068_v50, %v4068_v50 }
0x15da   :  { %v4080_v51 = vsel %vm190_vm2, %v4073_v57, 0.0 }
0x1682   :  { %v3910_v3 = vpop.f32.mrf.mxu0 }
0x1683   :  { %10385 = vmatmul.mubr.msk.f32.vlgmr.msra.gmra.mxu1 %vm577_vm5, %v3910_v3 }
0x1684   :  { %v10375_v2 = vpop.f32.mrf.mxu0  ;;  %10387 = vmatprep.mubr.msk.f32.mxu1 %vm11402_vm0, %v11401_v1  ;;  %10417 = vmatpush3.msra.mxu1 %v4282_v11 }
0x1685   :  { %10418 = vmatprep.subr.mxu1 %v11401_v1 }
0x1686   :  { %v3915_v25 = vpop.f32.mrf.mxu0 }
0x1687   :  { %10388 = vmatmul.mubr.msk.f32.gmra.mxu1 %vm577_vm5, %v3915_v25 }
0x1688   :  { %v10378_v32 = vpop.f32.mrf.mxu0  ;;  %10390 = vmatprep.mubr.msk.f32.mxu1 %vm11402_vm0, %v11401_v1 }
0x168a   :  { %v3920_v38 = vpop.f32.mrf.mxu0 }
0x168b   :  { %10391 = vmatmul.mubr.msk.f32.gmra.mxu1 %vm577_vm5, %v3920_v38 }
0x168c   :  { %v10381_v56 = vpop.f32.mrf.mxu0  ;;  %10432 = vmatprep.mubr.msk.f32.mxu1 %vm11402_vm0, %v11401_v1 }
0x168d   :  { %v8960_v56 = vld [vmem:[%s14176_s10] ss:$0 sm:$0xff] }
0x1743   :  { %v3999_v30 = vpop.f32.mrf.mxu1 }
0x1744   :  { %v4013_v48 = vadd.f32 %v3999_v30, %v12567_v22 }
0x1745   :  { %v10386_v17 = vpop.f32.mrf.mxu1 }
0x1746   :  { %v4019_v12 = vrot.slane %v4013_v48, 7  ;;  %v8961_v48 = vld [vmem:[%s14177_s11] ss:$0 sm:$0xff] }
0x1747   :  { %v4004_v35 = vpop.f32.mrf.mxu1 }
0x1748   :  { %v4027_v10 = vsel %vm720_vm4, %v3684_v4, %v4019_v12  ;;  %v4014_v5 = vadd.f32 %v4004_v35, %v12571_v45 }
0x1749   :  { %v4030_v13 = vadd.f32 %v4027_v10, %v11586_v24  ;;  %v10389_v16 = vpop.f32.mrf.mxu1 }
0x174a   :  { %v4020_v47 = vrot.slane %v4014_v5, 7  ;;  %v4280_v16 = vld [vmem:[%s14180_s14 + $0x28] sm:$0xff] }
0x174b   :  { %v4009_v23 = vpop.f32.mrf.mxu1  ;;  %v12708_v46 = vadd.f32 %v12669_v60, %v4030_v13  ;;  %v4281_v13 = vld [vmem:[%s14180_s14 + $0x30] sm:$0xff] }
0x174c   :  { %v4021_v22 = vsel %vm720_vm4, %v4019_v12, %v4020_v47  ;;  %v4015_v41 = vadd.f32 %v4009_v23, %v12575_v0  ;;  %10419 = vmatpush3.msra.mxu1 %v4281_v13  ;;  %v4277_v23 = vld [vmem:[%s14180_s14 + $0x10] sm:$0xff] }
0x174d   :  { %v4031_v20 = vadd.f32 %v4021_v22, %v11593_v29  ;;  %v10392_v45 = vpop.f32.mrf.mxu1  ;;  %v4053_v24 = vsel %vm190_vm2, %v12708_v46, 0.0  ;;  %10420 = vmatprep.subr.mxu1 %v11401_v1  ;;  %v4276_v22 = vld [vmem:[%s14180_s14 + $0x8] sm:$0xff] }
0x174e   :  { %v4022_v33 = vrot.slane %v4015_v41, 7  ;;  %4054 = vadd.xlane.f32.xlu0 %v4053_v24  ;;  %10421 = vmatpush3.msra.mxu1 %v4280_v16  ;;  %v4275_v41 = vld [vmem:[%s14180_s14] sm:$0xff] }
0x174f   :  { %v12717_v37 = vadd.f32 %v12669_v60, %v4031_v20  ;;  %10422 = vmatprep.subr.mxu1 %v11401_v1 }
0x1750   :  { %v4023_v40 = vsel %vm720_vm4, %v4020_v47, %v4022_v33  ;;  %10423 = vmatpush3.msra.mxu1 %v4279_v18  ;;  %v4278_v47 = vld [vmem:[%s14180_s14 + $0x18] sm:$0xff] }
0x1751   :  { %v4032_v0 = vadd.f32 %v4023_v40, %v11600_v34  ;;  %v4056_v54 = vsel %vm190_vm2, %v12717_v37, 0.0  ;;  %v4137_v34 = vld [vmem:[%s14178_s12 + $0x18] sm:$0xff]  ;;  %10424 = vmatprep.subr.mxu1 %v11401_v1 }
0x1752   :  { %4057 = vadd.xlane.f32.xlu1 %v4056_v54  ;;  %10394 = vmatpush3.msra.mxu0 %v4137_v34 }
0x1753   :  { %v12725_v29 = vadd.f32 %v12669_v60, %v4032_v0  ;;  %10395 = vmatprep.subr.mxu0 %v11401_v1  ;;  %v4136_v60 = vld [vmem:[%s14178_s12 + $0x10] sm:$0xff]  ;;  %10425 = vmatpush3.msra.mxu1 %v4278_v47 }
0x1754   :  { %10396 = vmatpush3.msra.mxu0 %v4136_v60  ;;  %10426 = vmatprep.subr.mxu1 %v11401_v1 }
0x1755   :  { %v4059_v61 = vsel %vm203_vm3, %v12725_v29, 0.0  ;;  %10397 = vmatprep.subr.mxu0 %v11401_v1  ;;  %10427 = vmatpush3.msra.mxu1 %v4277_v23 }
0x1756   :  { %4078 = vadd.xlane.f32.xlu1 %v4077_v52  ;;  %4060 = vadd.xlane.f32.xlu0 %v4059_v61 }
0x1757   :  { %10398 = vmatpush3.msra.mxu0 %v4135_v15  ;;  %10428 = vmatprep.subr.mxu1 %v11401_v1 }
0x1758   :  { %10399 = vmatprep.subr.mxu0 %v11401_v1  ;;  %10429 = vmatpush3.msra.mxu1 %v4276_v22 }
0x1759   :  { %10400 = vmatpush3.msra.mxu0 %v4134_v21  ;;  %10430 = vmatprep.subr.mxu1 %v11401_v1 }
0x175a   :  { %4081 = vadd.xlane.f32.xlu0 %v4080_v51  ;;  %10447 = vmatprep.subr.mxu0 %v11401_v1 }
0x175b   :  { %10431 = vmatpush3.msra.mxu1 %v4275_v41 }
0x175c   :  { %10470 = vmatprep.subr.mxu1 %v11401_v1 }
0x17d7   :  { %v4055_v55 = vpop.xlane.xlu0 %4054 }
0x17d8   :  { %v4064_v58 = vmul.f32 0.03125, %v4055_v55 }
0x17da   :  { %v12748_v49 = vsub.f32 %v12708_v46, %v4064_v58 }
0x17db   :  { %v4058_v36 = vpop.xlane.xlu1 %4057 }
0x17dc   :  { %v4065_v53 = vmul.f32 0.03125, %v4058_v36  ;;  %v4074_v4 = vmul.f32 %v12748_v49, %v12748_v49 }
0x17de   :  { %v12753_v14 = vsub.f32 %v12717_v37, %v4065_v53  ;;  %v4083_v8 = vsel %vm190_vm2, %v4074_v4, 0.0 }
0x17df   :  { %4084 = vadd.xlane.f32.xlu1 %v4083_v8  ;;  %v4079_v26 = vpop.xlane.xlu1 %4078  ;;  %v4061_v31 = vpop.xlane.xlu0 %4060 }
0x17e0   :  { %v4092_v19 = vmul.f32 0.03125, %v4079_v26  ;;  %v4066_v63 = vmul.f32 0.03125, %v4061_v31  ;;  %v4075_v7 = vmul.f32 %v12753_v14, %v12753_v14 }
0x17e2   :  { %v4097_v9 = vadd.f32 1e-05, %v4092_v19  ;;  %v12759_v59 = vsub.f32 %v12725_v29, %v4066_v63  ;;  %v4086_v6 = vsel %vm190_vm2, %v4075_v7, 0.0 }
0x17e3   :  { %4087 = vadd.xlane.f32.xlu0 %v4086_v6  ;;  %v4082_v28 = vpop.xlane.xlu0 %4081 }
0x17e4   :  { %11231 = vrsqrt.f32 %v4097_v9  ;;  %v4093_v3 = vmul.f32 0.03125, %v4082_v28  ;;  %v4076_v2 = vmul.f32 %v12759_v59, %v12759_v59 }
0x17e6   :  { %v4098_v25 = vadd.f32 1e-05, %v4093_v3  ;;  %v4089_v32 = vsel %vm203_vm3, %v4076_v2, 0.0 }
0x17e7   :  { %4090 = vadd.xlane.f32.xlu1 %v4089_v32 }
0x17e8   :  { %11233 = vrsqrt.f32 %v4098_v25 }
0x17f1   :  { %v11232_v38 = vpop.eup %11231 }
0x17f2   :  { %v4107_v30 = vmul.f32 %v11232_v38, %v4067_v27 }
0x17f4   :  { %v4118_v17 = vmul.f32 %v8960_v56, %v4107_v30 }
0x17f5   :  { %v11234_v62 = vpop.eup %11233 }
0x17f6   :  { %v4129_v12 = vadd.f32 %v8961_v48, %v4118_v17  ;;  %v4108_v35 = vmul.f32 %v11234_v62, %v4068_v50 }
0x17f8   :  { %10402 = vmatmul.mubr.msk.f32.vlgmr.msra.gmra.mxu0 %vm190_vm2, %v4129_v12  ;;  %v4119_v10 = vmul.f32 %v8960_v56, %v4108_v35 }
0x17f9   :  { %10404 = vmatprep.mubr.msk.f32.mxu0 %vm11402_vm0, %v11401_v1 }
0x17fa   :  { %v4130_v5 = vadd.f32 %v8961_v48, %v4119_v10 }
0x17fc   :  { %10405 = vmatmul.mubr.msk.f32.gmra.mxu0 %vm190_vm2, %v4130_v5 }
0x17fd   :  { %10407 = vmatprep.mubr.msk.f32.mxu0 %vm11402_vm0, %v11401_v1 }
0x1868   :  { %v4085_v27 = vpop.xlane.xlu1 %4084 }
0x1869   :  { %v4094_v43 = vmul.f32 0.03125, %v4085_v27 }
0x186b   :  { %v4099_v20 = vadd.f32 1e-05, %v4094_v43 }
0x186c   :  { %v4088_v45 = vpop.xlane.xlu0 %4087 }
0x186d   :  { %11235 = vrsqrt.f32 %v4099_v20  ;;  %v4095_v24 = vmul.f32 0.03125, %v4088_v45 }
0x186f   :  { %v4100_v33 = vadd.f32 1e-05, %v4095_v24 }
0x1870   :  { %v4091_v40 = vpop.xlane.xlu1 %4090 }
0x1871   :  { %11237 = vrsqrt.f32 %v4100_v33  ;;  %v4096_v50 = vmul.f32 0.03125, %v4091_v40  ;;  %v8973_v33 = vld [vmem:[%s14181_s15] ss:$0 sm:$0xff] }
0x1873   :  { %v4101_v0 = vadd.f32 1e-05, %v4096_v50 }
0x1875   :  { %11239 = vrsqrt.f32 %v4101_v0 }
0x187a   :  { %v11236_v54 = vpop.eup %11235 }
0x187b   :  { %v4109_v39 = vmul.f32 %v11236_v54, %v12748_v49  ;;  %v8962_v49 = vld [vmem:[%s14179_s13] ss:$0 sm:$0xff] }
0x187d   :  { %v4120_v52 = vmul.f32 %v8960_v56, %v4109_v39 }
0x187e   :  { %v11238_v61 = vpop.eup %11237 }
0x187f   :  { %v4110_v57 = vmul.f32 %v11238_v61, %v12753_v14  ;;  %v4131_v51 = vadd.f32 %v8961_v48, %v4120_v52 }
0x1881   :  { %10408 = vmatmul.mubr.msk.f32.gmra.mxu0 %vm190_vm2, %v4131_v51  ;;  %v4121_v34 = vmul.f32 %v8960_v56, %v4110_v57 }
0x1882   :  { %v11240_v60 = vpop.eup %11239  ;;  %10410 = vmatprep.mubr.msk.f32.mxu0 %vm11402_vm0, %v11401_v1 }
0x1883   :  { %v4111_v15 = vmul.f32 %v11240_v60, %v12759_v59  ;;  %v4132_v21 = vadd.f32 %v8961_v48, %v4121_v34 }
0x1885   :  { %10411 = vmatmul.mubr.msk.f32.gmra.mxu0 %vm190_vm2, %v4132_v21  ;;  %v4122_v55 = vmul.f32 %v8960_v56, %v4111_v15 }
0x1886   :  { %10413 = vmatprep.mubr.msk.f32.mxu0 %vm11402_vm0, %v11401_v1 }
0x1887   :  { %v4133_v58 = vadd.f32 %v8961_v48, %v4122_v55 }
0x1889   :  { %10414 = vmatmul.mubr.msk.f32.gmra.mxu0 %vm190_vm2, %v4133_v58 }
0x188a   :  { %10455 = vmatprep.mubr.msk.f32.mxu0 %vm11402_vm0, %v11401_v1 }
0x18b8   :  { %v4226_v36 = vpop.f32.mrf.mxu0 }
0x18b9   :  { %v4227_v53 = vadd.f32 %v8962_v49, %v4226_v36 }
0x18ba   :  { %v10403_v4 = vpop.f32.mrf.mxu0 }
0x18bb   :  { %v4255_v14 = vmul.f32 0.70710677, %v4227_v53  ;;  %v4250_v7 = vmul.f32 0.5, %v4227_v53 }
0x18bc   :  { %v4231_v8 = vpop.f32.mrf.mxu0 }
0x18bd   :  { %11241 = verf.f32 %v4255_v14  ;;  %v4232_v26 = vadd.f32 %v8962_v49, %v4231_v8 }
0x18be   :  { %v10406_v31 = vpop.f32.mrf.mxu0 }
0x18bf   :  { %v4256_v19 = vmul.f32 0.70710677, %v4232_v26  ;;  %v4251_v28 = vmul.f32 0.5, %v4232_v26 }
0x18c1   :  { %11243 = verf.f32 %v4256_v19 }
0x18ca   :  { %v11242_v63 = vpop.eup %11241 }
0x18cb   :  { %v4265_v9 = vadd.f32 1.0, %v11242_v63 }
0x18cd   :  { %v4270_v59 = vmul.f32 %v4265_v9, %v4250_v7 }
0x18ce   :  { %v11244_v6 = vpop.eup %11243 }
0x18cf   :  { %v4266_v3 = vadd.f32 1.0, %v11244_v6  ;;  %10433 = vmatmul.mubr.msk.f32.vlgmr.msra.gmra.mxu1 %vm4283_vm9, %v4270_v59 }
0x18d0   :  { %10435 = vmatprep.mubr.msk.f32.mxu1 %vm11402_vm0, %v11401_v1 }
0x18d1   :  { %v4271_v2 = vmul.f32 %v4266_v3, %v4251_v28  ;;  %v8981_v28 = vld [vmem:[%s14171_s5 + $0x98] sm:$0xff] }
0x18d2   :  { %v8990_v3 = vld [vmem:[%s14172_s6 + $0x98] sm:$0xff]  ;;  %10448 = vmatpush3.msra.mxu0 %v8981_v28 }
0x18d3   :  { %10436 = vmatmul.mubr.msk.f32.gmra.mxu1 %vm4283_vm9, %v4271_v2  ;;  %10449 = vmatprep.subr.mxu0 %v11401_v1  ;;  %v8980_v2 = vld [vmem:[%s14171_s5 + $0x90] sm:$0xff] }
0x18d4   :  { %10438 = vmatprep.mubr.msk.f32.mxu1 %vm11402_vm0, %v11401_v1  ;;  %10471 = vmatpush3.msra.mxu1 %v8990_v3 }
0x18d5   :  { %10472 = vmatprep.subr.mxu1 %v11401_v1  ;;  %10450 = vmatpush3.msra.mxu0 %v8980_v2 }
0x18d6   :  { %10451 = vmatprep.subr.mxu0 %v11401_v1 }
0x1941   :  { %v4236_v25 = vpop.f32.mrf.mxu0 }
0x1942   :  { %v4237_v32 = vadd.f32 %v8962_v49, %v4236_v25  ;;  %v8989_v25 = vld [vmem:[%s14172_s6 + $0x90] sm:$0xff] }
0x1943   :  { %v10409_v38 = vpop.f32.mrf.mxu0  ;;  %10473 = vmatpush3.msra.mxu1 %v8989_v25 }
0x1944   :  { %v4257_v56 = vmul.f32 0.70710677, %v4237_v32  ;;  %v4252_v13 = vmul.f32 0.5, %v4237_v32  ;;  %10474 = vmatprep.subr.mxu1 %v11401_v1  ;;  %v8979_v32 = vld [vmem:[%s14171_s5 + $0x88] sm:$0xff] }
0x1945   :  { %v4241_v30 = vpop.f32.mrf.mxu0  ;;  %v8988_v38 = vld [vmem:[%s14172_s6 + $0x88] sm:$0xff]  ;;  %10452 = vmatpush3.msra.mxu0 %v8979_v32 }
0x1946   :  { %11245 = verf.f32 %v4257_v56  ;;  %v4242_v48 = vadd.f32 %v8962_v49, %v4241_v30  ;;  %10475 = vmatpush3.msra.mxu1 %v8988_v38  ;;  %10453 = vmatprep.subr.mxu0 %v11401_v1  ;;  %v8978_v56 = vld [vmem:[%s14171_s5 + $0x80] sm:$0xff] }
0x1947   :  { %v10412_v17 = vpop.f32.mrf.mxu0  ;;  %10476 = vmatprep.subr.mxu1 %v11401_v1  ;;  %v8987_v30 = vld [vmem:[%s14172_s6 + $0x80] sm:$0xff]  ;;  %10454 = vmatpush3.msra.mxu0 %v8978_v56 }
0x1948   :  { %v4258_v62 = vmul.f32 0.70710677, %v4242_v48  ;;  %v4253_v23 = vmul.f32 0.5, %v4242_v48  ;;  %10477 = vmatpush3.msra.mxu1 %v8987_v30  ;;  %10493 = vmatprep.subr.mxu0 %v11401_v1 }
0x1949   :  { %v4246_v12 = vpop.f32.mrf.mxu0  ;;  %10516 = vmatprep.subr.mxu1 %v11401_v1 }
0x194a   :  { %11247 = verf.f32 %v4258_v62  ;;  %v4247_v35 = vadd.f32 %v8962_v49, %v4246_v12 }
0x194b   :  { %v10415_v10 = vpop.f32.mrf.mxu0 }
0x194c   :  { %v4259_v5 = vmul.f32 0.70710677, %v4247_v35  ;;  %v4254_v43 = vmul.f32 0.5, %v4247_v35 }
0x194e   :  { %11249 = verf.f32 %v4259_v5 }
0x1953   :  { %v11246_v11 = vpop.eup %11245 }
0x1954   :  { %v4267_v16 = vadd.f32 1.0, %v11246_v11 }
0x1956   :  { %v4272_v18 = vmul.f32 %v4267_v16, %v4252_v13 }
0x1957   :  { %v11248_v47 = vpop.eup %11247 }
0x1958   :  { %v4268_v22 = vadd.f32 1.0, %v11248_v47  ;;  %10439 = vmatmul.mubr.msk.f32.gmra.mxu1 %vm4283_vm9, %v4272_v18 }
0x1959   :  { %10441 = vmatprep.mubr.msk.f32.mxu1 %vm11402_vm0, %v11401_v1 }
0x195a   :  { %v4273_v41 = vmul.f32 %v4268_v22, %v4253_v23 }
0x195b   :  { %v11250_v27 = vpop.eup %11249 }
0x195c   :  { %v4269_v20 = vadd.f32 1.0, %v11250_v27  ;;  %10442 = vmatmul.mubr.msk.f32.gmra.mxu1 %vm4283_vm9, %v4273_v41 }
0x195d   :  { %10444 = vmatprep.mubr.msk.f32.mxu1 %vm11402_vm0, %v11401_v1 }
0x195e   :  { %v4274_v45 = vmul.f32 %v4269_v20, %v4254_v43 }
0x1960   :  { %10445 = vmatmul.mubr.msk.f32.gmra.mxu1 %vm4283_vm9, %v4274_v45 }
0x1961   :  { %10478 = vmatprep.mubr.msk.f32.mxu1 %vm11402_vm0, %v11401_v1 }
0x198f   :  { %v4365_v24 = vpop.f32.mrf.mxu1 }
0x1990   :  { %v4389_v40 = vadd.f32 %v4365_v24, %v12673_v44 }
0x1991   :  { %v10434_v50 = vpop.f32.mrf.mxu1 }
0x1992   :  { %v12843_v0 = vadd.f32 %v8973_v33, %v4389_v40  ;;  %v8976_v50 = vld [vmem:[%s14200_s27 + $0x1] ss:$0 sm:$0xff] }
0x1993   :  { %v4370_v54 = vpop.f32.mrf.mxu1 }
0x1994   :  { %v4390_v39 = vadd.f32 %v4370_v54, %v12680_v42  ;;  %v4410_v52 = vsel %vm190_vm2, %v12843_v0, 0.0 }
0x1995   :  { %4411 = vadd.xlane.f32.xlu0 %v4410_v52  ;;  %v10437_v61 = vpop.f32.mrf.mxu1 }
0x1996   :  { %v12848_v57 = vadd.f32 %v8973_v33, %v4390_v39  ;;  %v8977_v39 = vld [vmem:[%s14201_s29 + $0x1] ss:$0 sm:$0xff] }
0x1998   :  { %v4413_v51 = vsel %vm190_vm2, %v12848_v57, 0.0 }
0x1999   :  { %4414 = vadd.xlane.f32.xlu1 %v4413_v51 }
0x1a18   :  { %v4375_v34 = vpop.f32.mrf.mxu1 }
0x1a19   :  { %v4391_v44 = vadd.f32 %v4375_v34, %v12708_v46 }
0x1a1a   :  { %v10440_v60 = vpop.f32.mrf.mxu1 }
0x1a1b   :  { %v12853_v15 = vadd.f32 %v8973_v33, %v4391_v44 }
0x1a1c   :  { %v4380_v21 = vpop.f32.mrf.mxu1 }
0x1a1d   :  { %v4392_v42 = vadd.f32 %v4380_v21, %v12717_v37  ;;  %v4416_v55 = vsel %vm190_vm2, %v12853_v15, 0.0  ;;  %v8999_v21 = vld [vmem:[%s14173_s7 + $0x98] sm:$0xff] }
0x1a1e   :  { %v4412_v58 = vpop.xlane.xlu0 %4411  ;;  %4417 = vadd.xlane.f32.xlu0 %v4416_v55  ;;  %v10443_v49 = vpop.f32.mrf.mxu1  ;;  %v8997_v55 = vld [vmem:[%s14173_s7 + $0x88] sm:$0xff] }
0x1a1f   :  { %v12858_v36 = vadd.f32 %v8973_v33, %v4392_v42  ;;  %v4425_v53 = vmul.f32 0.03125, %v4412_v58  ;;  %v8998_v42 = vld [vmem:[%s14173_s7 + $0x90] sm:$0xff]  ;;  %v8996_v58 = vld [vmem:[%s14173_s7 + $0x80] sm:$0xff] }
0x1a20   :  { %v4385_v4 = vpop.f32.mrf.mxu1 }
0x1a21   :  { %v12861_v14 = vsub.f32 %v12843_v0, %v4425_v53  ;;  %v4393_v46 = vadd.f32 %v4385_v4, %v12725_v29  ;;  %v4419_v8 = vsel %vm190_vm2, %v12858_v36, 0.0 }
0x1a22   :  { %v4415_v26 = vpop.xlane.xlu1 %4414  ;;  %4420 = vadd.xlane.f32.xlu1 %v4419_v8  ;;  %v10446_v37 = vpop.f32.mrf.mxu1 }
0x1a23   :  { %v12866_v31 = vadd.f32 %v8973_v33, %v4393_v46  ;;  %v4426_v19 = vmul.f32 0.03125, %v4415_v26  ;;  %v4435_v63 = vmul.f32 %v12861_v14, %v12861_v14 }
0x1a25   :  { %v12871_v7 = vsub.f32 %v12848_v57, %v4426_v19  ;;  %v4440_v9 = vsel %vm190_vm2, %v4435_v63, 0.0  ;;  %v4422_v29 = vsel %vm203_vm3, %v12866_v31, 0.0 }
0x1a26   :  { %4441 = vadd.xlane.f32.xlu1 %v4440_v9  ;;  %4423 = vadd.xlane.f32.xlu0 %v4422_v29 }
0x1a27   :  { %v4436_v59 = vmul.f32 %v12871_v7, %v12871_v7 }
0x1a29   :  { %v4443_v6 = vsel %vm190_vm2, %v4436_v59, 0.0 }
0x1a2a   :  { %4444 = vadd.xlane.f32.xlu0 %v4443_v6 }
0x1aa7   :  { %v4418_v48 = vpop.xlane.xlu0 %4417 }
0x1aa8   :  { %v4427_v17 = vmul.f32 0.03125, %v4418_v48 }
0x1aaa   :  { %v12912_v62 = vsub.f32 %v12853_v15, %v4427_v17 }
0x1aab   :  { %v4421_v12 = vpop.xlane.xlu1 %4420 }
0x1aac   :  { %v4428_v35 = vmul.f32 0.03125, %v4421_v12  ;;  %v4437_v10 = vmul.f32 %v12912_v62, %v12912_v62 }
0x1aae   :  { %v12917_v5 = vsub.f32 %v12858_v36, %v4428_v35  ;;  %v4446_v11 = vsel %vm190_vm2, %v4437_v10, 0.0 }
0x1aaf   :  { %4447 = vadd.xlane.f32.xlu1 %v4446_v11  ;;  %v4442_v13 = vpop.xlane.xlu1 %4441  ;;  %v4424_v16 = vpop.xlane.xlu0 %4423 }
0x1ab0   :  { %v4455_v18 = vmul.f32 0.03125, %v4442_v13  ;;  %v4429_v47 = vmul.f32 0.03125, %v4424_v16  ;;  %v4438_v23 = vmul.f32 %v12917_v5, %v12917_v5 }
0x1ab2   :  { %v4460_v22 = vadd.f32 1e-05, %v4455_v18  ;;  %v12923_v41 = vsub.f32 %v12866_v31, %v4429_v47  ;;  %v4449_v27 = vsel %vm190_vm2, %v4438_v23, 0.0 }
0x1ab3   :  { %4450 = vadd.xlane.f32.xlu0 %v4449_v27  ;;  %v4445_v43 = vpop.xlane.xlu0 %4444 }
0x1ab4   :  { %11251 = vrsqrt.f32 %v4460_v22  ;;  %v4456_v20 = vmul.f32 0.03125, %v4445_v43  ;;  %v4439_v45 = vmul.f32 %v12923_v41, %v12923_v41 }
0x1ab6   :  { %v4461_v24 = vadd.f32 1e-05, %v4456_v20  ;;  %v4452_v33 = vsel %vm203_vm3, %v4439_v45, 0.0 }
0x1ab7   :  { %4453 = vadd.xlane.f32.xlu1 %v4452_v33 }
0x1ab8   :  { %11253 = vrsqrt.f32 %v4461_v24 }
0x1ac1   :  { %v11252_v40 = vpop.eup %11251 }
0x1ac2   :  { %v4470_v54 = vmul.f32 %v11252_v40, %v12861_v14 }
0x1ac4   :  { %v4481_v52 = vmul.f32 %v8976_v50, %v4470_v54 }
0x1ac5   :  { %v11254_v61 = vpop.eup %11253 }
0x1ac6   :  { %v12936_v51 = vadd.f32 %v8977_v39, %v4481_v52  ;;  %v4471_v34 = vmul.f32 %v11254_v61, %v12871_v7 }
0x1ac8   :  { %v4482_v44 = vmul.f32 %v8976_v50, %v4471_v34  ;;  %10456 = vmatmul.mubr.msk.f32.vlgmr.msra.gmra.mxu0 %vm190_vm2, %v12936_v51  ;;  %10479 = vmatmul.mubr.msk.f32.vlgmr.msra.gmra.mxu1 %vm190_vm2, %v12936_v51 }
0x1ac9   :  { %10458 = vmatprep.mubr.msk.f32.mxu0 %vm11402_vm0, %v11401_v1  ;;  %10481 = vmatprep.mubr.msk.f32.mxu1 %vm11402_vm0, %v11401_v1 }
0x1aca   :  { %v12947_v60 = vadd.f32 %v8977_v39, %v4482_v44  ;;  %10494 = vmatpush3.msra.mxu0 %v8999_v21 }
0x1acb   :  { %10495 = vmatprep.subr.mxu0 %v11401_v1 }
0x1acc   :  { %10459 = vmatmul.mubr.msk.f32.gmra.mxu0 %vm190_vm2, %v12947_v60  ;;  %10482 = vmatmul.mubr.msk.f32.gmra.mxu1 %vm190_vm2, %v12947_v60 }
0x1acd   :  { %10461 = vmatprep.mubr.msk.f32.mxu0 %vm11402_vm0, %v11401_v1  ;;  %10484 = vmatprep.mubr.msk.f32.mxu1 %vm11402_vm0, %v11401_v1 }
0x1ace   :  { %10496 = vmatpush3.msra.mxu0 %v8998_v42 }
0x1acf   :  { %10497 = vmatprep.subr.mxu0 %v11401_v1 }
0x1ad0   :  { %10498 = vmatpush3.msra.mxu0 %v8997_v55 }
0x1ad1   :  { %10499 = vmatprep.subr.mxu0 %v11401_v1 }
0x1ad2   :  { %10500 = vmatpush3.msra.mxu0 %v8996_v58 }
0x1ad3   :  { %10531 = vmatprep.subr.mxu0 %v11401_v1 }
0x1b38   :  { %v4448_v49 = vpop.xlane.xlu1 %4447 }
0x1b39   :  { %v4457_v53 = vmul.f32 0.03125, %v4448_v49  ;;  %v9029_v49 = vld [vmem:[%s14171_s5 + $0xb8] sm:$0xff] }
0x1b3b   :  { %v4462_v4 = vadd.f32 1e-05, %v4457_v53 }
0x1b3c   :  { %v4451_v14 = vpop.xlane.xlu0 %4450 }
0x1b3d   :  { %11255 = vrsqrt.f32 %v4462_v4  ;;  %v4458_v46 = vmul.f32 0.03125, %v4451_v14 }
0x1b3f   :  { %v4463_v8 = vadd.f32 1e-05, %v4458_v46 }
0x1b40   :  { %v4454_v26 = vpop.xlane.xlu1 %4453 }
0x1b41   :  { %11257 = vrsqrt.f32 %v4463_v8  ;;  %v4459_v37 = vmul.f32 0.03125, %v4454_v26  ;;  %v9028_v8 = vld [vmem:[%s14171_s5 + $0xb0] sm:$0xff] }
0x1b43   :  { %v4464_v19 = vadd.f32 1e-05, %v4459_v37 }
0x1b45   :  { %11259 = vrsqrt.f32 %v4464_v19 }
0x1b4a   :  { %v11256_v63 = vpop.eup %11255 }
0x1b4b   :  { %v4472_v7 = vmul.f32 %v11256_v63, %v12912_v62  ;;  %v9027_v63 = vld [vmem:[%s14171_s5 + $0xa8] sm:$0xff] }
0x1b4d   :  { %v4483_v9 = vmul.f32 %v8976_v50, %v4472_v7 }
0x1b4e   :  { %v11258_v29 = vpop.eup %11257 }
0x1b4f   :  { %v12974_v59 = vadd.f32 %v8977_v39, %v4483_v9  ;;  %v4473_v6 = vmul.f32 %v11258_v29, %v12917_v5  ;;  %v9026_v29 = vld [vmem:[%s14171_s5 + $0xa0] sm:$0xff] }
0x1b51   :  { %v4484_v28 = vmul.f32 %v8976_v50, %v4473_v6  ;;  %10462 = vmatmul.mubr.msk.f32.gmra.mxu0 %vm190_vm2, %v12974_v59  ;;  %10485 = vmatmul.mubr.msk.f32.gmra.mxu1 %vm190_vm2, %v12974_v59 }
0x1b52   :  { %v11260_v3 = vpop.eup %11259  ;;  %10464 = vmatprep.mubr.msk.f32.mxu0 %vm11402_vm0, %v11401_v1  ;;  %10487 = vmatprep.mubr.msk.f32.mxu1 %vm11402_vm0, %v11401_v1 }
0x1b53   :  { %v12985_v2 = vadd.f32 %v8977_v39, %v4484_v28  ;;  %v4474_v25 = vmul.f32 %v11260_v3, %v12923_v41  ;;  %v9047_v28 = vld [vmem:[%s14173_s7 + $0xb8] sm:$0xff]  ;;  %v9046_v3 = vld [vmem:[%s14173_s7 + $0xb0] sm:$0xff] }
0x1b55   :  { %v4485_v32 = vmul.f32 %v8976_v50, %v4474_v25  ;;  %10465 = vmatmul.mubr.msk.f32.gmra.mxu0 %vm190_vm2, %v12985_v2  ;;  %10488 = vmatmul.mubr.msk.f32.gmra.mxu1 %vm190_vm2, %v12985_v2  ;;  %v9045_v25 = vld [vmem:[%s14173_s7 + $0xa8] sm:$0xff] }
0x1b56   :  { %10467 = vmatprep.mubr.msk.f32.mxu0 %vm11402_vm0, %v11401_v1  ;;  %10490 = vmatprep.mubr.msk.f32.mxu1 %vm11402_vm0, %v11401_v1 }
0x1b57   :  { %v12996_v38 = vadd.f32 %v8977_v39, %v4485_v32  ;;  %v9044_v32 = vld [vmem:[%s14173_s7 + $0xa0] sm:$0xff] }
0x1b59   :  { %10468 = vmatmul.mubr.msk.f32.gmra.mxu0 %vm190_vm2, %v12996_v38  ;;  %10491 = vmatmul.mubr.msk.f32.gmra.mxu1 %vm190_vm2, %v12996_v38 }
0x1b5a   :  { %10501 = vmatprep.mubr.msk.f32.mxu0 %vm11402_vm0, %v11401_v1  ;;  %10522 = vmatprep.mubr.msk.f32.mxu1 %vm11402_vm0, %v11401_v1 }
0x1b5d   :  { %10502 = vmatmul.mubr.msk.f32.vlgmr.msra.gmra.mxu0 %vm190_vm2, %v12936_v51 }
0x1b5e   :  { %10504 = vmatprep.mubr.msk.f32.mxu0 %vm11402_vm0, %v11401_v1 }
0x1b61   :  { %10505 = vmatmul.mubr.msk.f32.gmra.mxu0 %vm190_vm2, %v12947_v60 }
0x1b62   :  { %10507 = vmatprep.mubr.msk.f32.mxu0 %vm11402_vm0, %v11401_v1 }
0x1b65   :  { %10508 = vmatmul.mubr.msk.f32.gmra.mxu0 %vm190_vm2, %v12974_v59 }
0x1b66   :  { %10510 = vmatprep.mubr.msk.f32.mxu0 %vm11402_vm0, %v11401_v1 }
0x1b69   :  { %10511 = vmatmul.mubr.msk.f32.gmra.mxu0 %vm190_vm2, %v12985_v2 }
0x1b6a   :  { %10513 = vmatprep.mubr.msk.f32.mxu0 %vm11402_vm0, %v11401_v1 }
0x1b6d   :  { %10514 = vmatmul.mubr.msk.f32.gmra.mxu0 %vm190_vm2, %v12996_v38 }
0x1b6e   :  { %10537 = vmatprep.mubr.msk.f32.mxu0 %vm11402_vm0, %v11401_v1 }
0x1b88   :  { %v4583_v56 = vpop.f32.mrf.mxu0  ;;  %v4678_v30 = vpop.f32.mrf.mxu1 }
0x1b8a   :  { %v10457_v48 = vpop.f32.mrf.mxu0  ;;  %v10480_v17 = vpop.f32.mrf.mxu1 }
0x1b8c   :  { %v4588_v62 = vpop.f32.mrf.mxu0  ;;  %v4683_v12 = vpop.f32.mrf.mxu1 }
0x1b8e   :  { %v10460_v35 = vpop.f32.mrf.mxu0  ;;  %v10483_v10 = vpop.f32.mrf.mxu1 }
0x1c11   :  { %v4593_v5 = vpop.f32.mrf.mxu0  ;;  %v4688_v11 = vpop.f32.mrf.mxu1 }
0x1c12   :  { %10517 = vmatpush3.xpose.msk.msra.mxu1 %vm577_vm5, %v4688_v11  ;;  %v5031_v39 = vrot.slane %v4688_v11, 1  ;;  %v5024_v21 = vrot.slane %v4593_v5, 1 }
0x1c13   :  { %v10463_v13 = vpop.f32.mrf.mxu0  ;;  %v10486_v16 = vpop.f32.mrf.mxu1  ;;  %10518 = vmatprep.subr.mxu1 %v11401_v1 }
0x1c15   :  { %v4598_v18 = vpop.f32.mrf.mxu0  ;;  %v4693_v47 = vpop.f32.mrf.mxu1 }
0x1c16   :  { %10519 = vmatpush3.xpose.msk.msra.mxu1 %vm577_vm5, %v4683_v12  ;;  %v5032_v33 = vrot.slane %v4693_v47, 1  ;;  %v5025_v61 = vrot.slane %v4598_v18, 1 }
0x1c17   :  { %v10466_v23 = vpop.f32.mrf.mxu0  ;;  %v10489_v22 = vpop.f32.mrf.mxu1  ;;  %10520 = vmatprep.subr.mxu1 %v11401_v1 }
0x1c18   :  { %v5033_v34 = vsel %vm807_vm6, %v5031_v39, %v5032_v33  ;;  %v5026_v55 = vsel %vm807_vm6, %v5024_v21, %v5025_v61 }
0x1c19   :  { %v13030_v41 = vpop.f32.mrf.mxu0  ;;  %v4698_v27 = vpop.f32.mrf.mxu1 }
0x1c1a   :  { %10521 = vmatpush3.xpose.msk.msra.mxu1 %vm577_vm5, %v4678_v30  ;;  %v5034_v45 = vrot.slane %v4698_v27, 1  ;;  %v5027_v58 = vrot.slane %v13030_v41, 1 }
0x1c1b   :  { %v10469_v43 = vpop.f32.mrf.mxu0  ;;  %v10492_v20 = vpop.f32.mrf.mxu1  ;;  %10546 = vmatprep.subr.mxu1 %v11401_v1 }
0x1c1c   :  { %v5035_v50 = vsel %vm807_vm6, %v5032_v33, %v5034_v45  ;;  %v5028_v26 = vsel %vm807_vm6, %v5025_v61, %v5027_v58 }
0x1c1d   :  { %v4773_v24 = vpop.f32.mrf.mxu0  ;;  %10523 = vmatmul.mubr.msk.f32.vlgmr.msra.gmra.mxu1 %vm577_vm5, %v4583_v56 }
0x1c1e   :  { %10547 = vmatpush3.xpose.msk.msra.mxu1 %vm577_vm5, %v5034_v45  ;;  %10525 = vmatprep.mubr.msk.f32.mxu1 %vm11402_vm0, %v11401_v1 }
0x1c1f   :  { %v10503_v40 = vpop.f32.mrf.mxu0  ;;  %10548 = vmatprep.subr.mxu1 %v11401_v1 }
0x1c21   :  { %v4778_v54 = vpop.f32.mrf.mxu0  ;;  %10526 = vmatmul.mubr.msk.f32.gmra.mxu1 %vm577_vm5, %v4588_v62 }
0x1c22   :  { %10549 = vmatpush3.xpose.msk.msra.mxu1 %vm577_vm5, %v5035_v50  ;;  %10528 = vmatprep.mubr.msk.f32.mxu1 %vm11402_vm0, %v11401_v1 }
0x1c23   :  { %v10506_v52 = vpop.f32.mrf.mxu0  ;;  %10550 = vmatprep.subr.mxu1 %v11401_v1 }
0x1c25   :  { %v4783_v44 = vpop.f32.mrf.mxu0  ;;  %10529 = vmatmul.mubr.msk.f32.gmra.mxu1 %vm577_vm5, %v4593_v5 }
0x1c26   :  { %10532 = vmatpush3.msk.msra.mxu0 %vm720_vm4, %v4783_v44  ;;  %10551 = vmatpush3.xpose.msk.msra.mxu1 %vm577_vm5, %v5033_v34  ;;  %v5163_v4 = vrot.slane %v4783_v44, 1 }
0x1c27   :  { %v10509_v42 = vpop.f32.mrf.mxu0  ;;  %10533 = vmatprep.subr.mxu0 %v11401_v1  ;;  %10552 = vmatprep.mubr.msk.f32.mxu1 %vm11402_vm0, %v11401_v1 }
0x1c28   :  { %10534 = vmatpush3.msra.mxu0 %v4778_v54  ;;  %10576 = vmatprep.subr.mxu1 %v11401_v1 }
0x1c29   :  { %v4788_v53 = vpop.f32.mrf.mxu0  ;;  %10535 = vmatprep.subr.mxu0 %v11401_v1  ;;  %10553 = vmatmul.mubr.msk.f32.vlgmr.msra.gmra.mxu1 %vm577_vm5, %v5026_v55 }
0x1c2a   :  { %v5164_v14 = vrot.slane %v4788_v53, 1  ;;  %10536 = vmatpush3.msra.mxu0 %v4773_v24  ;;  %10555 = vmatprep.mubr.msk.f32.mxu1 %vm11402_vm0, %v11401_v1 }
0x1c2b   :  { %v10512_v46 = vpop.f32.mrf.mxu0  ;;  %10577 = vmatpush3.msra.mxu1 %v9029_v49  ;;  %10561 = vmatprep.subr.mxu0 %v11401_v1 }
0x1c2c   :  { %10578 = vmatprep.subr.mxu1 %v11401_v1  ;;  %v13069_v37 = vsel %vm807_vm6, %v5163_v4, %v5164_v14 }
0x1c2d   :  { %v13071_v19 = vpop.f32.mrf.mxu0  ;;  %10556 = vmatmul.mubr.msk.f32.gmra.mxu1 %vm577_vm5, %v5028_v26 }
0x1c2e   :  { %v5166_v7 = vrot.slane %v13071_v19, 1  ;;  %10558 = vmatprep.mubr.msk.f32.mxu1 %vm11402_vm0, %v11401_v1  ;;  %10579 = vmatpush3.msra.mxu1 %v9028_v8 }
0x1c2f   :  { %v10515_v9 = vpop.f32.mrf.mxu0  ;;  %10580 = vmatprep.subr.mxu1 %v11401_v1 }
0x1c30   :  { %10581 = vmatpush3.msra.mxu1 %v9027_v63  ;;  %v13087_v6 = vsel %vm807_vm6, %v5164_v14, %v5166_v7 }
0x1c31   :  { %10559 = vmatmul.mubr.msk.f32.gmra.mxu1 %vm577_vm5, %v5027_v58  ;;  %10582 = vmatprep.subr.mxu1 %v11401_v1 }
0x1c32   :  { %10583 = vmatpush3.msra.mxu1 %v9026_v29  ;;  %10584 = vmatprep.mubr.msk.f32.mxu1 %vm11402_vm0, %v11401_v1 }
0x1c33   :  { %10622 = vmatprep.subr.mxu1 %v11401_v1 }
0x1c35   :  { %10585 = vmatmul.mubr.msk.f32.vlgmr.msra.gmra.mxu1 %vm190_vm2, %v12936_v51 }
0x1c36   :  { %10587 = vmatprep.mubr.msk.f32.mxu1 %vm11402_vm0, %v11401_v1  ;;  %10623 = vmatpush3.msra.mxu1 %v9047_v28 }
0x1c37   :  { %10624 = vmatprep.subr.mxu1 %v11401_v1 }
0x1c38   :  { %10625 = vmatpush3.msra.mxu1 %v9046_v3 }
0x1c39   :  { %10588 = vmatmul.mubr.msk.f32.gmra.mxu1 %vm190_vm2, %v12947_v60  ;;  %10626 = vmatprep.subr.mxu1 %v11401_v1 }
0x1c3a   :  { %10590 = vmatprep.mubr.msk.f32.mxu1 %vm11402_vm0, %v11401_v1  ;;  %10627 = vmatpush3.msra.mxu1 %v9045_v25 }
0x1c3b   :  { %10628 = vmatprep.subr.mxu1 %v11401_v1 }
0x1c3c   :  { %10629 = vmatpush3.msra.mxu1 %v9044_v32 }
0x1c3d   :  { %10591 = vmatmul.mubr.msk.f32.gmra.mxu1 %vm190_vm2, %v12974_v59  ;;  %10675 = vmatprep.subr.mxu1 %v11401_v1 }
0x1c3e   :  { %10593 = vmatprep.mubr.msk.f32.mxu1 %vm11402_vm0, %v11401_v1 }
0x1c41   :  { %10594 = vmatmul.mubr.msk.f32.gmra.mxu1 %vm190_vm2, %v12985_v2 }
0x1c42   :  { %10596 = vmatprep.mubr.msk.f32.mxu1 %vm11402_vm0, %v11401_v1 }
0x1c45   :  { %10597 = vmatmul.mubr.msk.f32.gmra.mxu1 %vm190_vm2, %v12996_v38 }
0x1c46   :  { %10630 = vmatprep.mubr.msk.f32.mxu1 %vm11402_vm0, %v11401_v1 }
0x1c49   :  { %10631 = vmatmul.mubr.msk.f32.vlgmr.msra.gmra.mxu1 %vm190_vm2, %v12936_v51 }
0x1c4a   :  { %10633 = vmatprep.mubr.msk.f32.mxu1 %vm11402_vm0, %v11401_v1 }
0x1c4d   :  { %10634 = vmatmul.mubr.msk.f32.gmra.mxu1 %vm190_vm2, %v12947_v60 }
0x1c4e   :  { %10636 = vmatprep.mubr.msk.f32.mxu1 %vm11402_vm0, %v11401_v1 }
0x1c51   :  { %10637 = vmatmul.mubr.msk.f32.gmra.mxu1 %vm190_vm2, %v12974_v59 }
0x1c52   :  { %10639 = vmatprep.mubr.msk.f32.mxu1 %vm11402_vm0, %v11401_v1 }
0x1c55   :  { %10640 = vmatmul.mubr.msk.f32.gmra.mxu1 %vm190_vm2, %v12985_v2 }
0x1c56   :  { %10642 = vmatprep.mubr.msk.f32.mxu1 %vm11402_vm0, %v11401_v1 }
0x1c59   :  { %10643 = vmatmul.mubr.msk.f32.gmra.mxu1 %vm190_vm2, %v12996_v38 }
0x1c5a   :  { %10677 = vmatprep.mubr.msk.f32.mxu1 %vm11402_vm0, %v11401_v1 }
0x1cdd   :  { %v4881_v56 = vpop.f32.mrf.mxu1 }
0x1cde   :  { %v4895_v30 = vsel %vm676_vm7, %v4881_v56, -inf }
0x1cdf   :  { %4896 = vmax.xlane.f32.xlu0 %v4895_v30  ;;  %v10524_v48 = vpop.f32.mrf.mxu1 }
0x1ce1   :  { %v4886_v17 = vpop.f32.mrf.mxu1 }
0x1ce2   :  { %v4898_v62 = vsel %vm676_vm7, %v4886_v17, -inf }
0x1ce3   :  { %4899 = vmax.xlane.f32.xlu1 %v4898_v62  ;;  %v10527_v12 = vpop.f32.mrf.mxu1 }
0x1ce5   :  { %v4891_v35 = vpop.f32.mrf.mxu1 }
0x1ce6   :  { %v4901_v10 = vsel %vm683_vm8, %v4891_v35, -inf }
0x1ce7   :  { %4902 = vmax.xlane.f32.xlu0 %v4901_v10  ;;  %v10530_v5 = vpop.f32.mrf.mxu1 }
0x1ce9   :  { %v5114_v11 = vpop.f32.mrf.mxu1 }
0x1cea   :  { %v5128_v13 = vsel %vm676_vm7, %v5114_v11, -inf }
0x1ceb   :  { %5129 = vmax.xlane.f32.xlu1 %v5128_v13  ;;  %v10554_v16 = vpop.f32.mrf.mxu1 }
0x1ced   :  { %v5119_v18 = vpop.f32.mrf.mxu1 }
0x1cee   :  { %v5131_v47 = vsel %vm676_vm7, %v5119_v18, -inf }
0x1cef   :  { %5132 = vmax.xlane.f32.xlu0 %v5131_v47  ;;  %v10557_v23 = vpop.f32.mrf.mxu1 }
0x1cf1   :  { %v5124_v22 = vpop.f32.mrf.mxu1 }
0x1cf2   :  { %v5134_v41 = vsel %vm683_vm8, %v5124_v22, -inf }
0x1cf3   :  { %5135 = vmax.xlane.f32.xlu1 %v5134_v41  ;;  %v10560_v27 = vpop.f32.mrf.mxu1 }
0x1cf5   :  { %v13156_v43 = vpop.f32.mrf.mxu1 }
0x1cf7   :  { %v10586_v20 = vpop.f32.mrf.mxu1 }
0x1cf9   :  { %v13158_v45 = vpop.f32.mrf.mxu1 }
0x1cfb   :  { %v10589_v24 = vpop.f32.mrf.mxu1 }
0x1cfd   :  { %v13160_v33 = vpop.f32.mrf.mxu1 }
0x1cff   :  { %v10592_v40 = vpop.f32.mrf.mxu1 }
0x1d01   :  { %v13162_v50 = vpop.f32.mrf.mxu1 }
0x1d02   :  { %v5952_v52 = vrot.slane %v13162_v50, 1 }
0x1d03   :  { %v10595_v54 = vpop.f32.mrf.mxu1 }
0x1d05   :  { %v13164_v39 = vpop.f32.mrf.mxu1 }
0x1d06   :  { %v5954_v61 = vrot.slane %v13164_v39, 1 }
0x1d07   :  { %v10598_v34 = vpop.f32.mrf.mxu1 }
0x1d08   :  { %v13173_v44 = vsel %vm807_vm6, %v5952_v52, %v5954_v61 }
0x1d09   :  { %v13175_v21 = vpop.f32.mrf.mxu1 }
0x1d0b   :  { %v10632_v42 = vpop.f32.mrf.mxu1 }
0x1d0d   :  { %v13177_v55 = vpop.f32.mrf.mxu1 }
0x1d0f   :  { %v10635_v58 = vpop.f32.mrf.mxu1 }
0x1d11   :  { %v13179_v49 = vpop.f32.mrf.mxu1 }
0x1d13   :  { %v10638_v53 = vpop.f32.mrf.mxu1 }
0x1d15   :  { %v13181_v4 = vpop.f32.mrf.mxu1 }
0x1d16   :  { %v6091_v8 = vrot.slane %v13181_v4, 1 }
0x1d17   :  { %v10641_v14 = vpop.f32.mrf.mxu1 }
0x1d19   :  { %v13183_v46 = vpop.f32.mrf.mxu1 }
0x1d1a   :  { %v6093_v26 = vrot.slane %v13183_v46, 1 }
0x1d1b   :  { %v10644_v63 = vpop.f32.mrf.mxu1 }
0x1d1c   :  { %v13192_v9 = vsel %vm807_vm6, %v6091_v8, %v6093_v26 }
0x1d68   :  { %v4897_v29 = vpop.xlane.xlu0 %4896 }
0x1d69   :  { %v4904_v28 = vsub.f32 %v4881_v56, %v4897_v29 }
0x1d6b   :  { %v4907_v3 = vmul.f32 1.442695, %v4904_v28 }
0x1d6c   :  { %v4900_v25 = vpop.xlane.xlu1 %4899 }
0x1d6d   :  { %11261 = vpow2.f32 %v4907_v3  ;;  %v4905_v32 = vsub.f32 %v4886_v17, %v4900_v25 }
0x1d6f   :  { %v4909_v30 = vmul.f32 1.442695, %v4905_v32 }
0x1d70   :  { %v4903_v48 = vpop.xlane.xlu0 %4902 }
0x1d71   :  { %11263 = vpow2.f32 %v4909_v30  ;;  %v4906_v62 = vsub.f32 %v4891_v35, %v4903_v48 }
0x1d73   :  { %v4911_v12 = vmul.f32 1.442695, %v4906_v62 }
0x1d74   :  { %v5130_v10 = vpop.xlane.xlu1 %5129 }
0x1d75   :  { %11265 = vpow2.f32 %v4911_v12  ;;  %v5137_v5 = vsub.f32 %v5114_v11, %v5130_v10  ;;  %v9038_v12 = vld [vmem:[%s14172_s6 + $0xb8] sm:$0xff] }
0x1d77   :  { %v5140_v13 = vmul.f32 1.442695, %v5137_v5 }
0x1d78   :  { %v5133_v16 = vpop.xlane.xlu0 %5132 }
0x1d79   :  { %11267 = vpow2.f32 %v5140_v13  ;;  %v5138_v47 = vsub.f32 %v5119_v18, %v5133_v16  ;;  %v9036_v13 = vld [vmem:[%s14172_s6 + $0xa8] sm:$0xff]  ;;  %v9035_v16 = vld [vmem:[%s14172_s6 + $0xa0] sm:$0xff] }
0x1d7a   :  { %v11262_v23 = vpop.eup %11261 }
0x1d7b   :  { %v5142_v41 = vmul.f32 1.442695, %v5138_v47  ;;  %v4913_v56 = vsel %vm676_vm7, %v11262_v23, 0.0 }
0x1d7c   :  { %4914 = vadd.xlane.f32.xlu0 %v4913_v56  ;;  %v5136_v27 = vpop.xlane.xlu1 %5135 }
0x1d7d   :  { %11269 = vpow2.f32 %v5142_v41  ;;  %v5139_v17 = vsub.f32 %v5124_v22, %v5136_v27 }
0x1d7e   :  { %v11264_v20 = vpop.eup %11263 }
0x1d7f   :  { %v5144_v24 = vmul.f32 1.442695, %v5139_v17  ;;  %v4916_v35 = vsel %vm676_vm7, %v11264_v20, 0.0 }
0x1d80   :  { %4917 = vadd.xlane.f32.xlu1 %v4916_v35 }
0x1d81   :  { %11271 = vpow2.f32 %v5144_v24 }
0x1d82   :  { %v11266_v40 = vpop.eup %11265 }
0x1d83   :  { %v4919_v11 = vsel %vm683_vm8, %v11266_v40, 0.0 }
0x1d84   :  { %4920 = vadd.xlane.f32.xlu0 %v4919_v11 }
0x1d86   :  { %v11268_v54 = vpop.eup %11267 }
0x1d87   :  { %v5146_v18 = vsel %vm676_vm7, %v11268_v54, 0.0 }
0x1d88   :  { %5147 = vadd.xlane.f32.xlu1 %v5146_v18 }
0x1d8a   :  { %v11270_v34 = vpop.eup %11269 }
0x1d8b   :  { %v5149_v42 = vsel %vm676_vm7, %v11270_v34, 0.0 }
0x1d8c   :  { %5150 = vadd.xlane.f32.xlu0 %v5149_v42 }
0x1d8e   :  { %v11272_v58 = vpop.eup %11271 }
0x1d8f   :  { %v5152_v22 = vsel %vm683_vm8, %v11272_v58, 0.0 }
0x1d90   :  { %5153 = vadd.xlane.f32.xlu1 %v5152_v22 }
0x1e05   :  { %v4915_v53 = vpop.xlane.xlu0 %4914 }
0x1e06   :  { %11273 = vrcp.f32 %v4915_v53 }
0x1e09   :  { %v4918_v14 = vpop.xlane.xlu1 %4917 }
0x1e0a   :  { %11275 = vrcp.f32 %v4918_v14 }
0x1e0d   :  { %v4921_v63 = vpop.xlane.xlu0 %4920 }
0x1e0e   :  { %11277 = vrcp.f32 %v4921_v63 }
0x1e11   :  { %v5148_v29 = vpop.xlane.xlu1 %5147 }
0x1e12   :  { %11279 = vrcp.f32 %v5148_v29 }
0x1e13   :  { %v11274_v28 = vpop.eup %11273 }
0x1e14   :  { %v4925_v3 = vmul.f32 %v11274_v28, %v11262_v23 }
0x1e15   :  { %v5151_v25 = vpop.xlane.xlu0 %5150 }
0x1e16   :  { %11281 = vrcp.f32 %v5151_v25  ;;  %10538 = vmatmul.mubr.msk.f32.vlgmr.msra.gmra.mxu0 %vm676_vm7, %v4925_v3 }
0x1e17   :  { %v11276_v32 = vpop.eup %11275  ;;  %10562 = vmatpush3.msk.msra.mxu0 %vm720_vm4, %v5166_v7  ;;  %10540 = vmatprep.mubr.msk.f32.mxu0 %vm11402_vm0, %v11401_v1 }
0x1e18   :  { %10563 = vmatprep.subr.mxu0 %v11401_v1  ;;  %v4926_v30 = vmul.f32 %v11276_v32, %v11264_v20 }
0x1e19   :  { %10564 = vmatpush3.msra.mxu0 %v13087_v6  ;;  %v5154_v48 = vpop.xlane.xlu1 %5153 }
0x1e1a   :  { %11283 = vrcp.f32 %v5154_v48  ;;  %10565 = vmatprep.subr.mxu0 %v11401_v1  ;;  %10541 = vmatmul.mubr.msk.f32.gmra.mxu0 %vm676_vm7, %v4926_v30 }
0x1e1b   :  { %v11278_v62 = vpop.eup %11277  ;;  %10566 = vmatpush3.msra.mxu0 %v13069_v37  ;;  %10543 = vmatprep.mubr.msk.f32.mxu0 %vm11402_vm0, %v11401_v1  ;;  %v9037_v37 = vld [vmem:[%s14172_s6 + $0xb0] sm:$0xff] }
0x1e1c   :  { %v4927_v19 = vmul.f32 %v11278_v62, %v11266_v40  ;;  %10599 = vmatprep.subr.mxu0 %v11401_v1 }
0x1e1e   :  { %10544 = vmatmul.mubr.msk.f32.gmra.mxu0 %vm676_vm7, %v4927_v19 }
0x1e1f   :  { %v11280_v7 = vpop.eup %11279  ;;  %10567 = vmatprep.mubr.msk.f32.mxu0 %vm11402_vm0, %v11401_v1 }
0x1e20   :  { %v5158_v6 = vmul.f32 %v11280_v7, %v11268_v54 }
0x1e22   :  { %10568 = vmatmul.mubr.msk.f32.vlgmr.msra.gmra.mxu0 %vm676_vm7, %v5158_v6 }
0x1e23   :  { %v11282_v10 = vpop.eup %11281  ;;  %10570 = vmatprep.mubr.msk.f32.mxu0 %vm11402_vm0, %v11401_v1  ;;  %10600 = vmatpush3.msra.mxu0 %v9038_v12 }
0x1e24   :  { %v5159_v5 = vmul.f32 %v11282_v10, %v11270_v34  ;;  %10601 = vmatprep.subr.mxu0 %v11401_v1 }
0x1e25   :  { %10602 = vmatpush3.msra.mxu0 %v9037_v37 }
0x1e26   :  { %10571 = vmatmul.mubr.msk.f32.gmra.mxu0 %vm676_vm7, %v5159_v5  ;;  %10603 = vmatprep.subr.mxu0 %v11401_v1 }
0x1e27   :  { %v11284_v47 = vpop.eup %11283  ;;  %10573 = vmatprep.mubr.msk.f32.mxu0 %vm11402_vm0, %v11401_v1  ;;  %10604 = vmatpush3.msra.mxu0 %v9036_v13 }
0x1e28   :  { %v5160_v23 = vmul.f32 %v11284_v47, %v11272_v58  ;;  %10605 = vmatprep.subr.mxu0 %v11401_v1 }
0x1e29   :  { %10606 = vmatpush3.msra.mxu0 %v9035_v16 }
0x1e2a   :  { %10574 = vmatmul.mubr.msk.f32.gmra.mxu0 %vm676_vm7, %v5160_v23  ;;  %10645 = vmatprep.subr.mxu0 %v11401_v1 }
0x1e2b   :  { %10607 = vmatprep.mubr.msk.f32.mxu0 %vm11402_vm0, %v11401_v1 }
0x1e2e   :  { %10608 = vmatmul.mubr.msk.f32.vlgmr.msra.gmra.mxu0 %vm190_vm2, %v12936_v51 }
0x1e2f   :  { %10610 = vmatprep.mubr.msk.f32.mxu0 %vm11402_vm0, %v11401_v1 }
0x1e32   :  { %10611 = vmatmul.mubr.msk.f32.gmra.mxu0 %vm190_vm2, %v12947_v60 }
0x1e33   :  { %10613 = vmatprep.mubr.msk.f32.mxu0 %vm11402_vm0, %v11401_v1 }
0x1e36   :  { %10614 = vmatmul.mubr.msk.f32.gmra.mxu0 %vm190_vm2, %v12974_v59 }
0x1e37   :  { %10616 = vmatprep.mubr.msk.f32.mxu0 %vm11402_vm0, %v11401_v1 }
0x1e3a   :  { %10617 = vmatmul.mubr.msk.f32.gmra.mxu0 %vm190_vm2, %v12985_v2 }
0x1e3b   :  { %10619 = vmatprep.mubr.msk.f32.mxu0 %vm11402_vm0, %v11401_v1 }
0x1e3e   :  { %10620 = vmatmul.mubr.msk.f32.gmra.mxu0 %vm190_vm2, %v12996_v38 }
0x1e3f   :  { %10651 = vmatprep.mubr.msk.f32.mxu0 %vm11402_vm0, %v11401_v1 }
0x1ed6   :  { %v13262_v41 = vpop.f32.mrf.mxu0 }
0x1ed8   :  { %v10539_v56 = vpop.f32.mrf.mxu0 }
0x1eda   :  { %v13264_v27 = vpop.f32.mrf.mxu0 }
0x1edc   :  { %v10542_v17 = vpop.f32.mrf.mxu0 }
0x1ede   :  { %v13266_v20 = vpop.f32.mrf.mxu0 }
0x1ee0   :  { %v10545_v24 = vpop.f32.mrf.mxu0 }
0x1ee2   :  { %v13268_v35 = vpop.f32.mrf.mxu0 }
0x1ee4   :  { %v10569_v40 = vpop.f32.mrf.mxu0 }
0x1ee6   :  { %v13270_v11 = vpop.f32.mrf.mxu0 }
0x1ee8   :  { %v10572_v54 = vpop.f32.mrf.mxu0 }
0x1eea   :  { %v13272_v18 = vpop.f32.mrf.mxu0 }
0x1eec   :  { %v10575_v34 = vpop.f32.mrf.mxu0 }
0x1eee   :  { %v5427_v42 = vpop.f32.mrf.mxu0 }
0x1ef0   :  { %v10609_v58 = vpop.f32.mrf.mxu0 }
0x1ef2   :  { %v5432_v22 = vpop.f32.mrf.mxu0 }
0x1ef4   :  { %v10612_v53 = vpop.f32.mrf.mxu0 }
0x1ef6   :  { %v5437_v14 = vpop.f32.mrf.mxu0 }
0x1ef7   :  { %10646 = vmatpush3.xpose.msk.msra.mxu0 %vm577_vm5, %v5437_v14  ;;  %v5958_v28 = vrot.slane %v5437_v14, 1  ;;  %v9063_v14 = vld [vmem:[%s14174_s8 + $0x28] sm:$0xff] }
0x1ef8   :  { %v10615_v63 = vpop.f32.mrf.mxu0  ;;  %10647 = vmatprep.subr.mxu0 %v11401_v1  ;;  %10676 = vmatpush3.msra.mxu1 %v9063_v14 }
0x1ef9   :  { %10697 = vmatprep.subr.mxu1 %v11401_v1 }
0x1efa   :  { %v5442_v29 = vpop.f32.mrf.mxu0 }
0x1efb   :  { %v5959_v3 = vrot.slane %v5442_v29, 1  ;;  %10648 = vmatpush3.xpose.msk.msra.mxu0 %vm577_vm5, %v5432_v22 }
0x1efc   :  { %v10618_v25 = vpop.f32.mrf.mxu0  ;;  %10649 = vmatprep.subr.mxu0 %v11401_v1 }
0x1efd   :  { %v13279_v32 = vsel %vm807_vm6, %v5958_v28, %v5959_v3 }
0x1efe   :  { %v13281_v30 = vpop.f32.mrf.mxu0 }
0x1eff   :  { %v5961_v48 = vrot.slane %v13281_v30, 1  ;;  %10650 = vmatpush3.xpose.msk.msra.mxu0 %vm577_vm5, %v5427_v42 }
0x1f00   :  { %v10621_v62 = vpop.f32.mrf.mxu0  ;;  %10660 = vmatprep.subr.mxu0 %v11401_v1 }
0x1f01   :  { %v13289_v19 = vsel %vm807_vm6, %v5959_v3, %v5961_v48  ;;  %v13323_v62 = vld [vmem:[%s14174_s8 + $0x20] sm:$0xff] }
0x1f02   :  { %10652 = vmatmul.mubr.msk.f32.vlgmr.msra.gmra.mxu0 %vm577_vm5, %v13156_v43 }
0x1f03   :  { %10661 = vmatpush3.msk.msra.mxu0 %vm720_vm4, %v13179_v49  ;;  %10654 = vmatprep.mubr.msk.f32.mxu0 %vm11402_vm0, %v11401_v1 }
0x1f04   :  { %10662 = vmatprep.subr.mxu0 %v11401_v1 }
0x1f05   :  { %10663 = vmatpush3.msra.mxu0 %v13177_v55 }
0x1f06   :  { %10655 = vmatmul.mubr.msk.f32.gmra.mxu0 %vm577_vm5, %v13158_v45  ;;  %10664 = vmatprep.subr.mxu0 %v11401_v1 }
0x1f07   :  { %10665 = vmatpush3.msra.mxu0 %v13175_v21  ;;  %10657 = vmatprep.mubr.msk.f32.mxu0 %vm11402_vm0, %v11401_v1 }
0x1f08   :  { %10686 = vmatprep.subr.mxu0 %v11401_v1 }
0x1f0a   :  { %10658 = vmatmul.mubr.msk.f32.gmra.mxu0 %vm577_vm5, %v13160_v33 }
0x1f0b   :  { %10666 = vmatprep.mubr.msk.f32.mxu0 %vm11402_vm0, %v11401_v1 }
0x1fc2   :  { %v5630_v43 = vpop.f32.mrf.mxu0 }
0x1fc3   :  { %v5644_v55 = vsel %vm676_vm7, %v5630_v43, -inf }
0x1fc4   :  { %5645 = vmax.xlane.f32.xlu0 %v5644_v55  ;;  %v10653_v45 = vpop.f32.mrf.mxu0 }
0x1fc6   :  { %v5635_v7 = vpop.f32.mrf.mxu0 }
0x1fc7   :  { %v5647_v6 = vsel %vm676_vm7, %v5635_v7, -inf }
0x1fc8   :  { %5648 = vmax.xlane.f32.xlu1 %v5647_v6  ;;  %v10656_v21 = vpop.f32.mrf.mxu0  ;;  %v6090_v6 = vrot.slane %v13179_v49, 1 }
0x1fca   :  { %v5640_v12 = vpop.f32.mrf.mxu0  ;;  %v6092_v46 = vsel %vm807_vm6, %v6090_v6, %v6091_v8 }
0x1fcb   :  { %v5650_v37 = vsel %vm683_vm8, %v5640_v12, -inf }
0x1fcc   :  { %5651 = vmax.xlane.f32.xlu0 %v5650_v37  ;;  %v10659_v10 = vpop.f32.mrf.mxu0 }
0x204d   :  { %v5646_v5 = vpop.xlane.xlu0 %5645 }
0x204e   :  { %v5653_v13 = vsub.f32 %v5630_v43, %v5646_v5 }
0x2050   :  { %v5656_v16 = vmul.f32 1.442695, %v5653_v13 }
0x2051   :  { %v5649_v47 = vpop.xlane.xlu1 %5648 }
0x2052   :  { %11285 = vpow2.f32 %v5656_v16  ;;  %v5654_v23 = vsub.f32 %v5635_v7, %v5649_v47 }
0x2054   :  { %v5658_v56 = vmul.f32 1.442695, %v5654_v23 }
0x2055   :  { %v5652_v17 = vpop.xlane.xlu0 %5651 }
0x2056   :  { %11287 = vpow2.f32 %v5658_v56  ;;  %v5655_v24 = vsub.f32 %v5640_v12, %v5652_v17 }
0x2058   :  { %v5660_v40 = vmul.f32 1.442695, %v5655_v24 }
0x205a   :  { %11289 = vpow2.f32 %v5660_v40 }
0x205f   :  { %v11286_v54 = vpop.eup %11285 }
0x2060   :  { %v5662_v34 = vsel %vm676_vm7, %v11286_v54, 0.0 }
0x2061   :  { %5663 = vadd.xlane.f32.xlu1 %v5662_v34 }
0x2063   :  { %v11288_v42 = vpop.eup %11287 }
0x2064   :  { %v5665_v58 = vsel %vm676_vm7, %v11288_v42, 0.0 }
0x2065   :  { %5666 = vadd.xlane.f32.xlu0 %v5665_v58 }
0x2067   :  { %v11290_v22 = vpop.eup %11289 }
0x2068   :  { %v5668_v53 = vsel %vm683_vm8, %v11290_v22, 0.0 }
0x2069   :  { %5669 = vadd.xlane.f32.xlu1 %v5668_v53 }
0x20ea   :  { %v5664_v63 = vpop.xlane.xlu1 %5663 }
0x20eb   :  { %11291 = vrcp.f32 %v5664_v63 }
0x20ee   :  { %v5667_v29 = vpop.xlane.xlu0 %5666 }
0x20ef   :  { %11293 = vrcp.f32 %v5667_v29 }
0x20f2   :  { %v5670_v28 = vpop.xlane.xlu1 %5669 }
0x20f3   :  { %11295 = vrcp.f32 %v5670_v28 }
0x20f8   :  { %v11292_v3 = vpop.eup %11291 }
0x20f9   :  { %v5674_v25 = vmul.f32 %v11292_v3, %v11286_v54 }
0x20fb   :  { %10667 = vmatmul.mubr.msk.f32.vlgmr.msra.gmra.mxu0 %vm676_vm7, %v5674_v25 }
0x20fc   :  { %v11294_v43 = vpop.eup %11293  ;;  %10669 = vmatprep.mubr.msk.f32.mxu0 %vm11402_vm0, %v11401_v1  ;;  %10687 = vmatpush3.msra.mxu0 %v13323_v62 }
0x20fd   :  { %v5675_v55 = vmul.f32 %v11294_v43, %v11288_v42  ;;  %10712 = vmatprep.subr.mxu0 %v11401_v1 }
0x20ff   :  { %10670 = vmatmul.mubr.msk.f32.gmra.mxu0 %vm676_vm7, %v5675_v55 }
0x2100   :  { %v11296_v45 = vpop.eup %11295  ;;  %10672 = vmatprep.mubr.msk.f32.mxu0 %vm11402_vm0, %v11401_v1 }
0x2101   :  { %v5676_v7 = vmul.f32 %v11296_v45, %v11290_v22 }
0x2103   :  { %10673 = vmatmul.mubr.msk.f32.gmra.mxu0 %vm676_vm7, %v5676_v7 }
0x2104   :  { %10688 = vmatprep.mubr.msk.f32.mxu0 %vm11402_vm0, %v11401_v1 }
0x2107   :  { %10689 = vmatmul.mubr.msk.f32.vlgmr.msra.gmra.mxu0 %vm577_vm5, %v13262_v41  ;;  %v5951_v41 = vrot.slane %v13160_v33, 1 }
0x2108   :  { %10713 = vmatpush3.msk.msra.mxu0 %vm720_vm4, %v6093_v26  ;;  %10691 = vmatprep.mubr.msk.f32.mxu0 %vm11402_vm0, %v11401_v1 }
0x2109   :  { %10714 = vmatprep.subr.mxu0 %v11401_v1 }
0x210a   :  { %10715 = vmatpush3.msra.mxu0 %v13192_v9 }
0x210b   :  { %10716 = vmatprep.subr.mxu0 %v11401_v1  ;;  %10692 = vmatmul.mubr.msk.f32.gmra.mxu0 %vm577_vm5, %v13264_v27 }
0x210c   :  { %10717 = vmatpush3.msra.mxu0 %v6092_v46  ;;  %10694 = vmatprep.mubr.msk.f32.mxu0 %vm11402_vm0, %v11401_v1 }
0x210d   :  { %10738 = vmatprep.subr.mxu0 %v11401_v1 }
0x210f   :  { %10695 = vmatmul.mubr.msk.f32.gmra.mxu0 %vm577_vm5, %v13266_v20  ;;  %v5953_v20 = vsel %vm807_vm6, %v5951_v41, %v5952_v52  ;;  %v9096_v41 = vld [vmem:[%s14172_s6 + $0xc8] sm:$0xff] }
0x2110   :  { %10718 = vmatprep.mubr.msk.f32.mxu0 %vm11402_vm0, %v11401_v1 }
0x21bb   :  { %v5755_v49 = vpop.f32.mrf.mxu0 }
0x21bc   :  { %10678 = vmatmul.mubr.msk.f32.vlgmr.msra.gmra.mxu1 %vm577_vm5, %v5755_v49 }
0x21bd   :  { %10698 = vmatpush3.xpose.msk.msra.mxu1 %vm577_vm5, %v5961_v48  ;;  %v10668_v4 = vpop.f32.mrf.mxu0  ;;  %10680 = vmatprep.mubr.msk.f32.mxu1 %vm11402_vm0, %v11401_v1 }
0x21be   :  { %10699 = vmatprep.subr.mxu1 %v11401_v1 }
0x21bf   :  { %v5760_v8 = vpop.f32.mrf.mxu0 }
0x21c0   :  { %10681 = vmatmul.mubr.msk.f32.gmra.mxu1 %vm577_vm5, %v5760_v8 }
0x21c1   :  { %10700 = vmatpush3.xpose.msk.msra.mxu1 %vm577_vm5, %v13289_v19  ;;  %v10671_v26 = vpop.f32.mrf.mxu0  ;;  %10683 = vmatprep.mubr.msk.f32.mxu1 %vm11402_vm0, %v11401_v1 }
0x21c2   :  { %10701 = vmatprep.subr.mxu1 %v11401_v1 }
0x21c3   :  { %v5765_v9 = vpop.f32.mrf.mxu0 }
0x21c4   :  { %10684 = vmatmul.mubr.msk.f32.gmra.mxu1 %vm577_vm5, %v5765_v9  ;;  %v9098_v9 = vld [vmem:[%s14172_s6 + $0xd8] sm:$0xff] }
0x21c5   :  { %10702 = vmatpush3.xpose.msk.msra.mxu1 %vm577_vm5, %v13279_v32  ;;  %v10674_v27 = vpop.f32.mrf.mxu0  ;;  %10703 = vmatprep.mubr.msk.f32.mxu1 %vm11402_vm0, %v11401_v1 }
0x21c6   :  { %10727 = vmatprep.subr.mxu1 %v11401_v1  ;;  %v9088_v27 = vld [vmem:[%s14171_s5 + $0xd0] sm:$0xff] }
0x21c7   :  { %v13382_v30 = vpop.f32.mrf.mxu0 }
0x21c8   :  { %10704 = vmatmul.mubr.msk.f32.vlgmr.msra.gmra.mxu1 %vm577_vm5, %v5953_v20 }
0x21c9   :  { %v10690_v48 = vpop.f32.mrf.mxu0  ;;  %10706 = vmatprep.mubr.msk.f32.mxu1 %vm11402_vm0, %v11401_v1  ;;  %10728 = vmatpush3.msra.mxu1 %v9063_v14 }
0x21ca   :  { %10749 = vmatprep.subr.mxu1 %v11401_v1  ;;  %v9087_v48 = vld [vmem:[%s14171_s5 + $0xc8] sm:$0xff] }
0x21cb   :  { %v13388_v33 = vpop.f32.mrf.mxu0 }
0x21cc   :  { %10707 = vmatmul.mubr.msk.f32.gmra.mxu1 %vm577_vm5, %v13173_v44 }
0x21cd   :  { %v10693_v32 = vpop.f32.mrf.mxu0  ;;  %10709 = vmatprep.mubr.msk.f32.mxu1 %vm11402_vm0, %v11401_v1 }
0x21cf   :  { %v13394_v50 = vpop.f32.mrf.mxu0 }
0x21d0   :  { %10710 = vmatmul.mubr.msk.f32.gmra.mxu1 %vm577_vm5, %v5954_v61 }
0x21d1   :  { %v10696_v52 = vpop.f32.mrf.mxu0  ;;  %10729 = vmatprep.mubr.msk.f32.mxu1 %vm11402_vm0, %v11401_v1 }
0x21d2   :  { %v9086_v52 = vld [vmem:[%s14171_s5 + $0xc0] sm:$0xff] }
0x227c   :  { %v13401_v19 = vpop.f32.mrf.mxu1 }
0x227e   :  { %v10679_v21 = vpop.f32.mrf.mxu1 }
0x2280   :  { %v13403_v12 = vpop.f32.mrf.mxu1 }
0x2282   :  { %v10682_v44 = vpop.f32.mrf.mxu1 }
0x2284   :  { %v13405_v37 = vpop.f32.mrf.mxu1 }
0x2286   :  { %v10685_v10 = vpop.f32.mrf.mxu1 }
0x2288   :  { %v6041_v5 = vpop.f32.mrf.mxu1 }
0x2289   :  { %v6055_v13 = vsel %vm676_vm7, %v6041_v5, -inf }
0x228a   :  { %6056 = vmax.xlane.f32.xlu0 %v6055_v13  ;;  %v10705_v39 = vpop.f32.mrf.mxu1 }
0x228b   :  { %v9106_v39 = vld [vmem:[%s14173_s7 + $0xd0] sm:$0xff] }
0x228c   :  { %v6046_v16 = vpop.f32.mrf.mxu1 }
0x228d   :  { %v6058_v61 = vsel %vm676_vm7, %v6046_v16, -inf }
0x228e   :  { %6059 = vmax.xlane.f32.xlu1 %v6058_v61  ;;  %v10708_v47 = vpop.f32.mrf.mxu1  ;;  %v9105_v61 = vld [vmem:[%s14173_s7 + $0xc8] sm:$0xff] }
0x2290   :  { %v6051_v23 = vpop.f32.mrf.mxu1 }
0x2291   :  { %v6061_v56 = vsel %vm683_vm8, %v6051_v23, -inf }
0x2292   :  { %6062 = vmax.xlane.f32.xlu0 %v6061_v56  ;;  %v10711_v17 = vpop.f32.mrf.mxu1 }
0x2313   :  { %v6057_v24 = vpop.xlane.xlu0 %6056 }
0x2314   :  { %v6064_v40 = vsub.f32 %v6041_v5, %v6057_v24  ;;  %v9107_v5 = vld [vmem:[%s14173_s7 + $0xd8] sm:$0xff] }
0x2316   :  { %v6067_v54 = vmul.f32 1.442695, %v6064_v40 }
0x2317   :  { %v6060_v34 = vpop.xlane.xlu1 %6059 }
0x2318   :  { %11297 = vpow2.f32 %v6067_v54  ;;  %v6065_v42 = vsub.f32 %v6046_v16, %v6060_v34 }
0x231a   :  { %v6069_v58 = vmul.f32 1.442695, %v6065_v42 }
0x231b   :  { %v6063_v22 = vpop.xlane.xlu0 %6062 }
0x231c   :  { %11299 = vpow2.f32 %v6069_v58  ;;  %v6066_v53 = vsub.f32 %v6051_v23, %v6063_v22  ;;  %v9104_v23 = vld [vmem:[%s14173_s7 + $0xc0] sm:$0xff] }
0x231e   :  { %v6071_v14 = vmul.f32 1.442695, %v6066_v53 }
0x2320   :  { %11301 = vpow2.f32 %v6071_v14 }
0x2325   :  { %v11298_v63 = vpop.eup %11297 }
0x2326   :  { %v6073_v29 = vsel %vm676_vm7, %v11298_v63, 0.0 }
0x2327   :  { %6074 = vadd.xlane.f32.xlu1 %v6073_v29 }
0x2329   :  { %v11300_v28 = vpop.eup %11299 }
0x232a   :  { %v6076_v3 = vsel %vm676_vm7, %v11300_v28, 0.0 }
0x232b   :  { %6077 = vadd.xlane.f32.xlu0 %v6076_v3 }
0x232d   :  { %v11302_v25 = vpop.eup %11301 }
0x232e   :  { %v6079_v43 = vsel %vm683_vm8, %v11302_v25, 0.0 }
0x232f   :  { %6080 = vadd.xlane.f32.xlu1 %v6079_v43 }
0x23b0   :  { %v6075_v55 = vpop.xlane.xlu1 %6074 }
0x23b1   :  { %11303 = vrcp.f32 %v6075_v55 }
0x23b4   :  { %v6078_v45 = vpop.xlane.xlu0 %6077 }
0x23b5   :  { %11305 = vrcp.f32 %v6078_v45 }
0x23b8   :  { %v6081_v7 = vpop.xlane.xlu1 %6080 }
0x23b9   :  { %11307 = vrcp.f32 %v6081_v7 }
0x23be   :  { %v11304_v6 = vpop.eup %11303 }
0x23bf   :  { %v6085_v46 = vmul.f32 %v11304_v6, %v11298_v63 }
0x23c1   :  { %10719 = vmatmul.mubr.msk.f32.vlgmr.msra.gmra.mxu0 %vm676_vm7, %v6085_v46 }
0x23c2   :  { %v11306_v49 = vpop.eup %11305  ;;  %10721 = vmatprep.mubr.msk.f32.mxu0 %vm11402_vm0, %v11401_v1  ;;  %10739 = vmatpush3.msra.mxu0 %v13323_v62  ;;  %v9097_v62 = vld [vmem:[%s14172_s6 + $0xd0] sm:$0xff] }
0x23c3   :  { %v6086_v4 = vmul.f32 %v11306_v49, %v11300_v28  ;;  %10772 = vmatprep.subr.mxu0 %v11401_v1 }
0x23c5   :  { %10722 = vmatmul.mubr.msk.f32.gmra.mxu0 %vm676_vm7, %v6086_v4 }
0x23c6   :  { %v11308_v8 = vpop.eup %11307  ;;  %10724 = vmatprep.mubr.msk.f32.mxu0 %vm11402_vm0, %v11401_v1 }
0x23c7   :  { %v6087_v26 = vmul.f32 %v11308_v8, %v11302_v25 }
0x23c9   :  { %10725 = vmatmul.mubr.msk.f32.gmra.mxu0 %vm676_vm7, %v6087_v26 }
0x23ca   :  { %10740 = vmatprep.mubr.msk.f32.mxu0 %vm11402_vm0, %v11401_v1 }
0x23cd   :  { %10741 = vmatmul.mubr.msk.f32.vlgmr.msra.gmra.mxu0 %vm577_vm5, %v13268_v35  ;;  %v9095_v35 = vld [vmem:[%s14172_s6 + $0xc0] sm:$0xff] }
0x23ce   :  { %10743 = vmatprep.mubr.msk.f32.mxu0 %vm11402_vm0, %v11401_v1  ;;  %10773 = vmatpush3.msra.mxu0 %v9098_v9 }
0x23cf   :  { %10774 = vmatprep.subr.mxu0 %v11401_v1 }
0x23d0   :  { %10775 = vmatpush3.msra.mxu0 %v9097_v62 }
0x23d1   :  { %10744 = vmatmul.mubr.msk.f32.gmra.mxu0 %vm577_vm5, %v13270_v11  ;;  %10776 = vmatprep.subr.mxu0 %v11401_v1  ;;  %v9089_v11 = vld [vmem:[%s14171_s5 + $0xd8] sm:$0xff] }
0x23d2   :  { %10746 = vmatprep.mubr.msk.f32.mxu0 %vm11402_vm0, %v11401_v1  ;;  %10777 = vmatpush3.msra.mxu0 %v9096_v41 }
0x23d3   :  { %10778 = vmatprep.subr.mxu0 %v11401_v1 }
0x23d4   :  { %10779 = vmatpush3.msra.mxu0 %v9095_v35 }
0x23d5   :  { %10747 = vmatmul.mubr.msk.f32.gmra.mxu0 %vm577_vm5, %v13272_v18  ;;  %10818 = vmatprep.subr.mxu0 %v11401_v1 }
0x23d6   :  { %10780 = vmatprep.mubr.msk.f32.mxu0 %vm11402_vm0, %v11401_v1 }
0x23d9   :  { %10781 = vmatmul.mubr.msk.f32.vlgmr.msra.gmra.mxu0 %vm190_vm2, %v12936_v51 }
0x23da   :  { %10783 = vmatprep.mubr.msk.f32.mxu0 %vm11402_vm0, %v11401_v1 }
0x23dd   :  { %10784 = vmatmul.mubr.msk.f32.gmra.mxu0 %vm190_vm2, %v12947_v60 }
0x23de   :  { %10786 = vmatprep.mubr.msk.f32.mxu0 %vm11402_vm0, %v11401_v1 }
0x23e1   :  { %10787 = vmatmul.mubr.msk.f32.gmra.mxu0 %vm190_vm2, %v12974_v59 }
0x23e2   :  { %10789 = vmatprep.mubr.msk.f32.mxu0 %vm11402_vm0, %v11401_v1 }
0x23e5   :  { %10790 = vmatmul.mubr.msk.f32.gmra.mxu0 %vm190_vm2, %v12985_v2 }
0x23e6   :  { %10792 = vmatprep.mubr.msk.f32.mxu0 %vm11402_vm0, %v11401_v1 }
0x23e9   :  { %10793 = vmatmul.mubr.msk.f32.gmra.mxu0 %vm190_vm2, %v12996_v38 }
0x23ea   :  { %10824 = vmatprep.mubr.msk.f32.mxu0 %vm11402_vm0, %v11401_v1 }
0x2481   :  { %v6174_v18 = vpop.f32.mrf.mxu0 }
0x2482   :  { %10730 = vmatmul.mubr.msk.f32.vlgmr.msra.gmra.mxu1 %vm577_vm5, %v6174_v18 }
0x2483   :  { %v10720_v20 = vpop.f32.mrf.mxu0  ;;  %10732 = vmatprep.mubr.msk.f32.mxu1 %vm11402_vm0, %v11401_v1  ;;  %10750 = vmatpush3.msra.mxu1 %v9089_v11 }
0x2484   :  { %10751 = vmatprep.subr.mxu1 %v11401_v1 }
0x2485   :  { %v6179_v32 = vpop.f32.mrf.mxu0  ;;  %10752 = vmatpush3.msra.mxu1 %v9088_v27 }
0x2486   :  { %10733 = vmatmul.mubr.msk.f32.gmra.mxu1 %vm577_vm5, %v6179_v32  ;;  %10753 = vmatprep.subr.mxu1 %v11401_v1 }
0x2487   :  { %v10723_v21 = vpop.f32.mrf.mxu0  ;;  %10735 = vmatprep.mubr.msk.f32.mxu1 %vm11402_vm0, %v11401_v1  ;;  %10754 = vmatpush3.msra.mxu1 %v9087_v48 }
0x2488   :  { %10755 = vmatprep.subr.mxu1 %v11401_v1 }
0x2489   :  { %v6184_v44 = vpop.f32.mrf.mxu0  ;;  %10756 = vmatpush3.msra.mxu1 %v9086_v52 }
0x248a   :  { %10736 = vmatmul.mubr.msk.f32.gmra.mxu1 %vm577_vm5, %v6184_v44  ;;  %10795 = vmatprep.subr.mxu1 %v11401_v1 }
0x248b   :  { %v10726_v10 = vpop.f32.mrf.mxu0  ;;  %10757 = vmatprep.mubr.msk.f32.mxu1 %vm11402_vm0, %v11401_v1 }
0x248d   :  { %v13500_v13 = vpop.f32.mrf.mxu0 }
0x248e   :  { %10758 = vmatmul.mubr.msk.f32.vlgmr.msra.gmra.mxu1 %vm190_vm2, %v12936_v51 }
0x248f   :  { %v10742_v16 = vpop.f32.mrf.mxu0  ;;  %10760 = vmatprep.mubr.msk.f32.mxu1 %vm11402_vm0, %v11401_v1  ;;  %10796 = vmatpush3.msra.mxu1 %v9107_v5 }
0x2490   :  { %10797 = vmatprep.subr.mxu1 %v11401_v1 }
0x2491   :  { %v13513_v47 = vpop.f32.mrf.mxu0  ;;  %10798 = vmatpush3.msra.mxu1 %v9106_v39 }
0x2492   :  { %10761 = vmatmul.mubr.msk.f32.gmra.mxu1 %vm190_vm2, %v12947_v60  ;;  %10799 = vmatprep.subr.mxu1 %v11401_v1 }
0x2493   :  { %v10745_v56 = vpop.f32.mrf.mxu0  ;;  %10763 = vmatprep.mubr.msk.f32.mxu1 %vm11402_vm0, %v11401_v1  ;;  %10800 = vmatpush3.msra.mxu1 %v9105_v61 }
0x2494   :  { %10801 = vmatprep.subr.mxu1 %v11401_v1 }
0x2495   :  { %v13524_v17 = vpop.f32.mrf.mxu0  ;;  %10802 = vmatpush3.msra.mxu1 %v9104_v23 }
0x2496   :  { %10764 = vmatmul.mubr.msk.f32.gmra.mxu1 %vm190_vm2, %v12974_v59  ;;  %10833 = vmatprep.subr.mxu1 %v11401_v1 }
0x2497   :  { %v10748_v24 = vpop.f32.mrf.mxu0  ;;  %10766 = vmatprep.mubr.msk.f32.mxu1 %vm11402_vm0, %v11401_v1 }
0x2499   :  { %v6532_v40 = vpop.f32.mrf.mxu0 }
0x249a   :  { %10767 = vmatmul.mubr.msk.f32.gmra.mxu1 %vm190_vm2, %v12985_v2 }
0x249b   :  { %v10782_v54 = vpop.f32.mrf.mxu0  ;;  %10769 = vmatprep.mubr.msk.f32.mxu1 %vm11402_vm0, %v11401_v1 }
0x249d   :  { %v6537_v34 = vpop.f32.mrf.mxu0 }
0x249e   :  { %10770 = vmatmul.mubr.msk.f32.gmra.mxu1 %vm190_vm2, %v12996_v38 }
0x249f   :  { %v10785_v42 = vpop.f32.mrf.mxu0  ;;  %10803 = vmatprep.mubr.msk.f32.mxu1 %vm11402_vm0, %v11401_v1 }
0x24a1   :  { %v6542_v58 = vpop.f32.mrf.mxu0 }
0x24a2   :  { %10804 = vmatmul.mubr.msk.f32.vlgmr.msra.gmra.mxu1 %vm190_vm2, %v12936_v51  ;;  %10819 = vmatpush3.xpose.msk.msra.mxu0 %vm577_vm5, %v6542_v58  ;;  %v6977_v14 = vrot.slane %v6542_v58, 1 }
0x24a3   :  { %v10788_v22 = vpop.f32.mrf.mxu0  ;;  %10806 = vmatprep.mubr.msk.f32.mxu1 %vm11402_vm0, %v11401_v1  ;;  %10820 = vmatprep.subr.mxu0 %v11401_v1 }
0x24a5   :  { %v6547_v53 = vpop.f32.mrf.mxu0 }
0x24a6   :  { %v6978_v63 = vrot.slane %v6547_v53, 1  ;;  %10807 = vmatmul.mubr.msk.f32.gmra.mxu1 %vm190_vm2, %v12947_v60  ;;  %10821 = vmatpush3.xpose.msk.msra.mxu0 %vm577_vm5, %v6537_v34 }
0x24a7   :  { %v10791_v29 = vpop.f32.mrf.mxu0  ;;  %10809 = vmatprep.mubr.msk.f32.mxu1 %vm11402_vm0, %v11401_v1  ;;  %10822 = vmatprep.subr.mxu0 %v11401_v1 }
0x24a8   :  { %v13552_v28 = vsel %vm807_vm6, %v6977_v14, %v6978_v63 }
0x24a9   :  { %v13554_v3 = vpop.f32.mrf.mxu0 }
0x24aa   :  { %v6980_v25 = vrot.slane %v13554_v3, 1  ;;  %10810 = vmatmul.mubr.msk.f32.gmra.mxu1 %vm190_vm2, %v12974_v59  ;;  %10823 = vmatpush3.xpose.msk.msra.mxu0 %vm577_vm5, %v6532_v40 }
0x24ab   :  { %v10794_v43 = vpop.f32.mrf.mxu0  ;;  %10812 = vmatprep.mubr.msk.f32.mxu1 %vm11402_vm0, %v11401_v1  ;;  %10848 = vmatprep.subr.mxu0 %v11401_v1 }
0x24ac   :  { %v13566_v55 = vsel %vm807_vm6, %v6978_v63, %v6980_v25 }
0x24ae   :  { %10813 = vmatmul.mubr.msk.f32.gmra.mxu1 %vm190_vm2, %v12985_v2 }
0x24af   :  { %10815 = vmatprep.mubr.msk.f32.mxu1 %vm11402_vm0, %v11401_v1 }
0x24b2   :  { %10816 = vmatmul.mubr.msk.f32.gmra.mxu1 %vm190_vm2, %v12996_v38 }
0x24b3   :  { %10839 = vmatprep.mubr.msk.f32.mxu1 %vm11402_vm0, %v11401_v1 }
0x2542   :  { %v13576_v45 = vpop.f32.mrf.mxu1 }
0x2544   :  { %v10731_v7 = vpop.f32.mrf.mxu1 }
0x2546   :  { %v13578_v6 = vpop.f32.mrf.mxu1 }
0x2548   :  { %v10734_v46 = vpop.f32.mrf.mxu1 }
0x254a   :  { %v13580_v49 = vpop.f32.mrf.mxu1 }
0x254c   :  { %v10737_v4 = vpop.f32.mrf.mxu1 }
0x254e   :  { %v6437_v8 = vpop.f32.mrf.mxu1 }
0x254f   :  { %10825 = vmatmul.mubr.msk.f32.vlgmr.msra.gmra.mxu0 %vm577_vm5, %v6437_v8 }
0x2550   :  { %v10759_v26 = vpop.f32.mrf.mxu1  ;;  %10827 = vmatprep.mubr.msk.f32.mxu0 %vm11402_vm0, %v11401_v1 }
0x2552   :  { %v6442_v9 = vpop.f32.mrf.mxu1 }
0x2553   :  { %10828 = vmatmul.mubr.msk.f32.gmra.mxu0 %vm577_vm5, %v6442_v9 }
0x2554   :  { %v10762_v62 = vpop.f32.mrf.mxu1  ;;  %10830 = vmatprep.mubr.msk.f32.mxu0 %vm11402_vm0, %v11401_v1 }
0x2556   :  { %v6447_v41 = vpop.f32.mrf.mxu1 }
0x2557   :  { %10831 = vmatmul.mubr.msk.f32.gmra.mxu0 %vm577_vm5, %v6447_v41  ;;  %v6970_v18 = vrot.slane %v6447_v41, 1 }
0x2558   :  { %v10765_v35 = vpop.f32.mrf.mxu1  ;;  %10850 = vmatprep.mubr.msk.f32.mxu0 %vm11402_vm0, %v11401_v1 }
0x255a   :  { %v6452_v11 = vpop.f32.mrf.mxu1 }
0x255b   :  { %v6971_v27 = vrot.slane %v6452_v11, 1 }
0x255c   :  { %v10768_v20 = vpop.f32.mrf.mxu1 }
0x255d   :  { %v13592_v48 = vsel %vm807_vm6, %v6970_v18, %v6971_v27 }
0x255e   :  { %v13594_v32 = vpop.f32.mrf.mxu1 }
0x255f   :  { %v6973_v52 = vrot.slane %v13594_v32, 1 }
0x2560   :  { %v10771_v21 = vpop.f32.mrf.mxu1 }
0x2561   :  { %v13600_v44 = vsel %vm807_vm6, %v6971_v27, %v6973_v52 }
0x2562   :  { %v6627_v10 = vpop.f32.mrf.mxu1 }
0x2564   :  { %v10805_v5 = vpop.f32.mrf.mxu1 }
0x2566   :  { %v6632_v39 = vpop.f32.mrf.mxu1 }
0x2568   :  { %v10808_v16 = vpop.f32.mrf.mxu1 }
0x256a   :  { %v6637_v61 = vpop.f32.mrf.mxu1 }
0x256b   :  { %10834 = vmatpush3.msk.msra.mxu1 %vm720_vm4, %v6637_v61  ;;  %v7109_v24 = vrot.slane %v6637_v61, 1 }
0x256c   :  { %v10811_v23 = vpop.f32.mrf.mxu1  ;;  %10835 = vmatprep.subr.mxu1 %v11401_v1 }
0x256d   :  { %10836 = vmatpush3.msra.mxu1 %v6632_v39 }
0x256e   :  { %v6642_v56 = vpop.f32.mrf.mxu1  ;;  %10837 = vmatprep.subr.mxu1 %v11401_v1 }
0x256f   :  { %v7110_v40 = vrot.slane %v6642_v56, 1  ;;  %10838 = vmatpush3.msra.mxu1 %v6627_v10  ;;  %v9123_v56 = vld [vmem:[%s14174_s8 + $0x30] sm:$0xff] }
0x2570   :  { %v10814_v54 = vpop.f32.mrf.mxu1  ;;  %10859 = vmatprep.subr.mxu1 %v11401_v1  ;;  %10849 = vmatpush3.msra.mxu0 %v9123_v56 }
0x2571   :  { %v13607_v34 = vsel %vm807_vm6, %v7109_v24, %v7110_v40  ;;  %10874 = vmatprep.subr.mxu0 %v11401_v1 }
0x2572   :  { %v13609_v42 = vpop.f32.mrf.mxu1 }
0x2573   :  { %v7112_v58 = vrot.slane %v13609_v42, 1 }
0x2574   :  { %v10817_v22 = vpop.f32.mrf.mxu1 }
0x2575   :  { %v13615_v53 = vsel %vm807_vm6, %v7110_v40, %v7112_v58 }
0x260f   :  { %v6735_v14 = vpop.f32.mrf.mxu0 }
0x2610   :  { %v6749_v63 = vsel %vm676_vm7, %v6735_v14, -inf }
0x2611   :  { %6750 = vmax.xlane.f32.xlu0 %v6749_v63  ;;  %v10826_v29 = vpop.f32.mrf.mxu0 }
0x2613   :  { %v6740_v43 = vpop.f32.mrf.mxu0 }
0x2614   :  { %v6752_v7 = vsel %vm676_vm7, %v6740_v43, -inf }
0x2615   :  { %6753 = vmax.xlane.f32.xlu1 %v6752_v7  ;;  %v10829_v46 = vpop.f32.mrf.mxu0 }
0x2617   :  { %v6745_v4 = vpop.f32.mrf.mxu0 }
0x2618   :  { %v6755_v8 = vsel %vm683_vm8, %v6745_v4, -inf }
0x2619   :  { %6756 = vmax.xlane.f32.xlu0 %v6755_v8  ;;  %v10832_v26 = vpop.f32.mrf.mxu0 }
0x269a   :  { %v6751_v9 = vpop.xlane.xlu0 %6750 }
0x269b   :  { %v6758_v62 = vsub.f32 %v6735_v14, %v6751_v9 }
0x269d   :  { %v6761_v41 = vmul.f32 1.442695, %v6758_v62 }
0x269e   :  { %v6754_v35 = vpop.xlane.xlu1 %6753 }
0x269f   :  { %11309 = vpow2.f32 %v6761_v41  ;;  %v6759_v11 = vsub.f32 %v6740_v43, %v6754_v35 }
0x26a1   :  { %v6763_v18 = vmul.f32 1.442695, %v6759_v11 }
0x26a2   :  { %v6757_v27 = vpop.xlane.xlu0 %6756 }
0x26a3   :  { %11311 = vpow2.f32 %v6763_v18  ;;  %v6760_v20 = vsub.f32 %v6745_v4, %v6757_v27 }
0x26a5   :  { %v6765_v21 = vmul.f32 1.442695, %v6760_v20 }
0x26a7   :  { %11313 = vpow2.f32 %v6765_v21 }
0x26ac   :  { %v11310_v10 = vpop.eup %11309 }
0x26ad   :  { %v6767_v5 = vsel %vm676_vm7, %v11310_v10, 0.0 }
0x26ae   :  { %6768 = vadd.xlane.f32.xlu1 %v6767_v5 }
0x26b0   :  { %v11312_v39 = vpop.eup %11311 }
0x26b1   :  { %v6770_v16 = vsel %vm676_vm7, %v11312_v39, 0.0 }
0x26b2   :  { %6771 = vadd.xlane.f32.xlu0 %v6770_v16 }
0x26b4   :  { %v11314_v61 = vpop.eup %11313 }
0x26b5   :  { %v6773_v23 = vsel %vm683_vm8, %v11314_v61, 0.0 }
0x26b6   :  { %6774 = vadd.xlane.f32.xlu1 %v6773_v23  ;;  %v5936_v23 = vadd.f32 %v13382_v30, %v13401_v19 }
0x2737   :  { %v6769_v24 = vpop.xlane.xlu1 %6768 }
0x2738   :  { %11315 = vrcp.f32 %v6769_v24 }
0x273b   :  { %v6772_v40 = vpop.xlane.xlu0 %6771 }
0x273c   :  { %11317 = vrcp.f32 %v6772_v40 }
0x273f   :  { %v6775_v54 = vpop.xlane.xlu1 %6774 }
0x2740   :  { %11319 = vrcp.f32 %v6775_v54  ;;  %v5941_v54 = vadd.f32 %v13388_v33, %v13403_v12  ;;  %v9143_v33 = vld [vmem:[%s14171_s5 + $0xf8] sm:$0xff] }
0x2745   :  { %v11316_v22 = vpop.eup %11315 }
0x2746   :  { %v6779_v14 = vmul.f32 %v11316_v22, %v11310_v10 }
0x2748   :  { %10840 = vmatmul.mubr.msk.f32.vlgmr.msra.gmra.mxu1 %vm676_vm7, %v6779_v14 }
0x2749   :  { %v11318_v63 = vpop.eup %11317  ;;  %10860 = vmatpush3.xpose.msk.msra.mxu1 %vm577_vm5, %v6980_v25  ;;  %10842 = vmatprep.mubr.msk.f32.mxu1 %vm11402_vm0, %v11401_v1 }
0x274a   :  { %10861 = vmatprep.subr.mxu1 %v11401_v1  ;;  %v6780_v29 = vmul.f32 %v11318_v63, %v11312_v39 }
0x274c   :  { %10843 = vmatmul.mubr.msk.f32.gmra.mxu1 %vm676_vm7, %v6780_v29  ;;  %v5946_v29 = vadd.f32 %v13394_v50, %v13405_v37  ;;  %v9142_v50 = vld [vmem:[%s14171_s5 + $0xf0] sm:$0xff] }
0x274d   :  { %v11320_v43 = vpop.eup %11319  ;;  %10862 = vmatpush3.xpose.msk.msra.mxu1 %vm577_vm5, %v13566_v55  ;;  %10845 = vmatprep.mubr.msk.f32.mxu1 %vm11402_vm0, %v11401_v1 }
0x274e   :  { %10863 = vmatprep.subr.mxu1 %v11401_v1  ;;  %v6781_v3 = vmul.f32 %v11320_v43, %v11314_v61 }
0x2750   :  { %10846 = vmatmul.mubr.msk.f32.gmra.mxu1 %vm676_vm7, %v6781_v3 }
0x2751   :  { %10864 = vmatpush3.xpose.msk.msra.mxu1 %vm577_vm5, %v13552_v28  ;;  %10865 = vmatprep.mubr.msk.f32.mxu1 %vm11402_vm0, %v11401_v1 }
0x2752   :  { %10889 = vmatprep.subr.mxu1 %v11401_v1 }
0x2754   :  { %10866 = vmatmul.mubr.msk.f32.vlgmr.msra.gmra.mxu1 %vm577_vm5, %v13592_v48 }
0x2755   :  { %10868 = vmatprep.mubr.msk.f32.mxu1 %vm11402_vm0, %v11401_v1  ;;  %10890 = vmatpush3.msra.mxu1 %v9123_v56 }
0x2756   :  { %10923 = vmatprep.subr.mxu1 %v11401_v1 }
0x2758   :  { %10869 = vmatmul.mubr.msk.f32.gmra.mxu1 %vm577_vm5, %v13600_v44 }
0x2759   :  { %10871 = vmatprep.mubr.msk.f32.mxu1 %vm11402_vm0, %v11401_v1 }
0x275c   :  { %10872 = vmatmul.mubr.msk.f32.gmra.mxu1 %vm577_vm5, %v6973_v52 }
0x275d   :  { %10891 = vmatprep.mubr.msk.f32.mxu1 %vm11402_vm0, %v11401_v1 }
0x2808   :  { %v6860_v28 = vpop.f32.mrf.mxu1 }
0x2809   :  { %10851 = vmatmul.mubr.msk.f32.vlgmr.msra.gmra.mxu0 %vm577_vm5, %v6860_v28 }
0x280a   :  { %10875 = vmatpush3.msk.msra.mxu0 %vm720_vm4, %v7112_v58  ;;  %v10841_v25 = vpop.f32.mrf.mxu1  ;;  %10853 = vmatprep.mubr.msk.f32.mxu0 %vm11402_vm0, %v11401_v1 }
0x280b   :  { %10876 = vmatprep.subr.mxu0 %v11401_v1 }
0x280c   :  { %10877 = vmatpush3.msra.mxu0 %v13615_v53  ;;  %v6865_v55 = vpop.f32.mrf.mxu1 }
0x280d   :  { %10878 = vmatprep.subr.mxu0 %v11401_v1  ;;  %10854 = vmatmul.mubr.msk.f32.gmra.mxu0 %vm577_vm5, %v6865_v55 }
0x280e   :  { %10879 = vmatpush3.msra.mxu0 %v13607_v34  ;;  %v10844_v48 = vpop.f32.mrf.mxu1  ;;  %10856 = vmatprep.mubr.msk.f32.mxu0 %vm11402_vm0, %v11401_v1 }
0x280f   :  { %10900 = vmatprep.subr.mxu0 %v11401_v1 }
0x2810   :  { %v6870_v32 = vpop.f32.mrf.mxu1 }
0x2811   :  { %10857 = vmatmul.mubr.msk.f32.gmra.mxu0 %vm577_vm5, %v6870_v32  ;;  %v9141_v32 = vld [vmem:[%s14171_s5 + $0xe8] sm:$0xff] }
0x2812   :  { %v10847_v52 = vpop.f32.mrf.mxu1  ;;  %10880 = vmatprep.mubr.msk.f32.mxu0 %vm11402_vm0, %v11401_v1 }
0x2813   :  { %v9140_v52 = vld [vmem:[%s14171_s5 + $0xe0] sm:$0xff] }
0x2814   :  { %v7060_v44 = vpop.f32.mrf.mxu1 }
0x2815   :  { %v7074_v42 = vsel %vm676_vm7, %v7060_v44, -inf }
0x2816   :  { %7075 = vmax.xlane.f32.xlu0 %v7074_v42  ;;  %v10867_v58 = vpop.f32.mrf.mxu1 }
0x2817   :  { %v9161_v58 = vld [vmem:[%s14173_s7 + $0xf8] sm:$0xff] }
0x2818   :  { %v7065_v53 = vpop.f32.mrf.mxu1 }
0x2819   :  { %v7077_v34 = vsel %vm676_vm7, %v7065_v53, -inf }
0x281a   :  { %7078 = vmax.xlane.f32.xlu1 %v7077_v34  ;;  %v10870_v7 = vpop.f32.mrf.mxu1  ;;  %v9159_v34 = vld [vmem:[%s14173_s7 + $0xe8] sm:$0xff] }
0x281b   :  { %v9158_v7 = vld [vmem:[%s14173_s7 + $0xe0] sm:$0xff] }
0x281c   :  { %v7070_v46 = vpop.f32.mrf.mxu1 }
0x281d   :  { %v7080_v4 = vsel %vm683_vm8, %v7070_v46, -inf }
0x281e   :  { %7081 = vmax.xlane.f32.xlu0 %v7080_v4  ;;  %v10873_v8 = vpop.f32.mrf.mxu1 }
0x281f   :  { %v9151_v8 = vld [vmem:[%s14172_s6 + $0xf0] sm:$0xff] }
0x289f   :  { %v7076_v26 = vpop.xlane.xlu0 %7075 }
0x28a0   :  { %v7083_v9 = vsub.f32 %v7060_v44, %v7076_v26 }
0x28a2   :  { %v7086_v62 = vmul.f32 1.442695, %v7083_v9  ;;  %v9150_v9 = vld [vmem:[%s14172_s6 + $0xe8] sm:$0xff] }
0x28a3   :  { %v7079_v41 = vpop.xlane.xlu1 %7078 }
0x28a4   :  { %11321 = vpow2.f32 %v7086_v62  ;;  %v7084_v35 = vsub.f32 %v7065_v53, %v7079_v41  ;;  %v9160_v53 = vld [vmem:[%s14173_s7 + $0xf0] sm:$0xff]  ;;  %v9149_v41 = vld [vmem:[%s14172_s6 + $0xe0] sm:$0xff] }
0x28a6   :  { %v7088_v11 = vmul.f32 1.442695, %v7084_v35 }
0x28a7   :  { %v7082_v18 = vpop.xlane.xlu0 %7081 }
0x28a8   :  { %11323 = vpow2.f32 %v7088_v11  ;;  %v7085_v27 = vsub.f32 %v7070_v46, %v7082_v18  ;;  %v9152_v46 = vld [vmem:[%s14172_s6 + $0xf8] sm:$0xff]  ;;  %s11403_s6 = smov [#allocation2]  }
0x28a9   :  { %s8741_s23 = sshll.u32 %s11403_s6, 4  ;;  %s8742_s23 = int_to_ptr.vmem [resolvable:$true] %s8741_s23 }
0x28aa   :  { %v7090_v20 = vmul.f32 1.442695, %v7085_v27  ;;  %p11384_p1 = scmp.lt.s32.totalorder %s8742_s23, %s8742_s23 }
0x28ac   :  { %11325 = vpow2.f32 %v7090_v20 }
0x28b1   :  { %v11322_v21 = vpop.eup %11321 }
0x28b2   :  { %v7092_v10 = vsel %vm676_vm7, %v11322_v21, 0.0 }
0x28b3   :  { %7093 = vadd.xlane.f32.xlu1 %v7092_v10 }
0x28b5   :  { %v11324_v5 = vpop.eup %11323 }
0x28b6   :  { %v7095_v39 = vsel %vm676_vm7, %v11324_v5, 0.0 }
0x28b7   :  { %7096 = vadd.xlane.f32.xlu0 %v7095_v39 }
0x28b9   :  { %v11326_v16 = vpop.eup %11325 }
0x28ba   :  { %v7098_v61 = vsel %vm683_vm8, %v11326_v16, 0.0 }
0x28bb   :  { %7099 = vadd.xlane.f32.xlu1 %v7098_v61 }
0x28c9   :  { %v6951_v56 = vpop.f32.mrf.mxu0 }
0x28ca   :  { %v13685_v24 = vadd.f32 %v6951_v56, %v5936_v23 }
0x28cb   :  { %v10852_v40 = vpop.f32.mrf.mxu0 }
0x28cd   :  { %v6956_v22 = vpop.f32.mrf.mxu0 }
0x28ce   :  { %v13689_v14 = vadd.f32 %v6956_v22, %v5941_v54 }
0x28cf   :  { %v10855_v63 = vpop.f32.mrf.mxu0 }
0x28d1   :  { %v6961_v43 = vpop.f32.mrf.mxu0 }
0x28d2   :  { %v13693_v3 = vadd.f32 %v6961_v43, %v5946_v29 }
0x28d3   :  { %v10858_v28 = vpop.f32.mrf.mxu0 }
0x293c   :  { %v7094_v25 = vpop.xlane.xlu1 %7093 }
0x293d   :  { %11327 = vrcp.f32 %v7094_v25 }
0x2940   :  { %v7097_v30 = vpop.xlane.xlu0 %7096 }
0x2941   :  { %11329 = vrcp.f32 %v7097_v30 }
0x2944   :  { %v7100_v19 = vpop.xlane.xlu1 %7099 }
0x2945   :  { %11331 = vrcp.f32 %v7100_v19 }
0x294a   :  { %v11328_v55 = vpop.eup %11327 }
0x294b   :  { %v7104_v48 = vmul.f32 %v11328_v55, %v11322_v21 }
0x294d   :  { %10881 = vmatmul.mubr.msk.f32.vlgmr.msra.gmra.mxu0 %vm676_vm7, %v7104_v48 }
0x294e   :  { %v11330_v12 = vpop.eup %11329  ;;  %10883 = vmatprep.mubr.msk.f32.mxu0 %vm11402_vm0, %v11401_v1  ;;  %10901 = vmatpush3.msra.mxu0 %v9143_v33 }
0x294f   :  { %v7105_v37 = vmul.f32 %v11330_v12, %v11324_v5  ;;  %10902 = vmatprep.subr.mxu0 %v11401_v1 }
0x2950   :  { %10903 = vmatpush3.msra.mxu0 %v9142_v50  ;;  %v6353_v50 = vadd.f32 %v13500_v13, %v13576_v45 }
0x2951   :  { %10884 = vmatmul.mubr.msk.f32.gmra.mxu0 %vm676_vm7, %v7105_v37  ;;  %10904 = vmatprep.subr.mxu0 %v11401_v1 }
0x2952   :  { %v11332_v44 = vpop.eup %11331  ;;  %10886 = vmatprep.mubr.msk.f32.mxu0 %vm11402_vm0, %v11401_v1  ;;  %10905 = vmatpush3.msra.mxu0 %v9141_v32 }
0x2953   :  { %v7106_v42 = vmul.f32 %v11332_v44, %v11326_v16  ;;  %10906 = vmatprep.subr.mxu0 %v11401_v1 }
0x2954   :  { %10907 = vmatpush3.msra.mxu0 %v9140_v52  ;;  %v6358_v52 = vadd.f32 %v13513_v47, %v13578_v6 }
0x2955   :  { %10887 = vmatmul.mubr.msk.f32.gmra.mxu0 %vm676_vm7, %v7106_v42  ;;  %10946 = vmatprep.subr.mxu0 %v11401_v1 }
0x2956   :  { %10908 = vmatprep.mubr.msk.f32.mxu0 %vm11402_vm0, %v11401_v1 }
0x2959   :  { %10909 = vmatmul.mubr.msk.f32.vlgmr.msra.gmra.mxu0 %vm190_vm2, %v12936_v51 }
0x295a   :  { %10911 = vmatprep.mubr.msk.f32.mxu0 %vm11402_vm0, %v11401_v1  ;;  %10947 = vmatpush3.msra.mxu0 %v9161_v58 }
0x295b   :  { %10948 = vmatprep.subr.mxu0 %v11401_v1 }
0x295c   :  { %10949 = vmatpush3.msra.mxu0 %v9160_v53  ;;  %v6363_v53 = vadd.f32 %v13524_v17, %v13580_v49 }
0x295d   :  { %10912 = vmatmul.mubr.msk.f32.gmra.mxu0 %vm190_vm2, %v12947_v60  ;;  %10950 = vmatprep.subr.mxu0 %v11401_v1 }
0x295e   :  { %10914 = vmatprep.mubr.msk.f32.mxu0 %vm11402_vm0, %v11401_v1  ;;  %10951 = vmatpush3.msra.mxu0 %v9159_v34 }
0x295f   :  { %10952 = vmatprep.subr.mxu0 %v11401_v1 }
0x2960   :  { %10953 = vmatpush3.msra.mxu0 %v9158_v7 }
0x2961   :  { %10915 = vmatmul.mubr.msk.f32.gmra.mxu0 %vm190_vm2, %v12974_v59  ;;  %10984 = vmatprep.subr.mxu0 %v11401_v1 }
0x2962   :  { %10917 = vmatprep.mubr.msk.f32.mxu0 %vm11402_vm0, %v11401_v1 }
0x2965   :  { %10918 = vmatmul.mubr.msk.f32.gmra.mxu0 %vm190_vm2, %v12985_v2 }
0x2966   :  { %10920 = vmatprep.mubr.msk.f32.mxu0 %vm11402_vm0, %v11401_v1 }
0x2969   :  { %10921 = vmatmul.mubr.msk.f32.gmra.mxu0 %vm190_vm2, %v12996_v38 }
0x296a   :  { %10954 = vmatprep.mubr.msk.f32.mxu0 %vm11402_vm0, %v11401_v1 }
0x296d   :  { %10955 = vmatmul.mubr.msk.f32.vlgmr.msra.gmra.mxu0 %vm190_vm2, %v12936_v51 }
0x296e   :  { %10957 = vmatprep.mubr.msk.f32.mxu0 %vm11402_vm0, %v11401_v1 }
0x2971   :  { %10958 = vmatmul.mubr.msk.f32.gmra.mxu0 %vm190_vm2, %v12947_v60 }
0x2972   :  { %10960 = vmatprep.mubr.msk.f32.mxu0 %vm11402_vm0, %v11401_v1 }
0x2975   :  { %10961 = vmatmul.mubr.msk.f32.gmra.mxu0 %vm190_vm2, %v12974_v59 }
0x2976   :  { %10963 = vmatprep.mubr.msk.f32.mxu0 %vm11402_vm0, %v11401_v1 }
0x2979   :  { %10964 = vmatmul.mubr.msk.f32.gmra.mxu0 %vm190_vm2, %v12985_v2 }
0x297a   :  { %10966 = vmatprep.mubr.msk.f32.mxu0 %vm11402_vm0, %v11401_v1 }
0x297d   :  { %10967 = vmatmul.mubr.msk.f32.gmra.mxu0 %vm190_vm2, %v12996_v38 }
0x297e   :  { %10990 = vmatprep.mubr.msk.f32.mxu0 %vm11402_vm0, %v11401_v1 }
0x2a0d   :  { %v7193_v4 = vpop.f32.mrf.mxu0 }
0x2a0e   :  { %10892 = vmatmul.mubr.msk.f32.vlgmr.msra.gmra.mxu1 %vm577_vm5, %v7193_v4 }
0x2a0f   :  { %v10882_v26 = vpop.f32.mrf.mxu0  ;;  %10894 = vmatprep.mubr.msk.f32.mxu1 %vm11402_vm0, %v11401_v1  ;;  %10924 = vmatpush3.msra.mxu1 %v9152_v46 }
0x2a10   :  { %10925 = vmatprep.subr.mxu1 %v11401_v1 }
0x2a11   :  { %v7198_v62 = vpop.f32.mrf.mxu0  ;;  %10926 = vmatpush3.msra.mxu1 %v9151_v8 }
0x2a12   :  { %10895 = vmatmul.mubr.msk.f32.gmra.mxu1 %vm577_vm5, %v7198_v62  ;;  %10927 = vmatprep.subr.mxu1 %v11401_v1 }
0x2a13   :  { %v10885_v35 = vpop.f32.mrf.mxu0  ;;  %10897 = vmatprep.mubr.msk.f32.mxu1 %vm11402_vm0, %v11401_v1  ;;  %10928 = vmatpush3.msra.mxu1 %v9150_v9 }
0x2a14   :  { %10929 = vmatprep.subr.mxu1 %v11401_v1 }
0x2a15   :  { %v7203_v11 = vpop.f32.mrf.mxu0  ;;  %10930 = vmatpush3.msra.mxu1 %v9149_v41 }
0x2a16   :  { %10898 = vmatmul.mubr.msk.f32.gmra.mxu1 %vm577_vm5, %v7203_v11  ;;  %10969 = vmatprep.subr.mxu1 %v11401_v1 }
0x2a17   :  { %v10888_v18 = vpop.f32.mrf.mxu0  ;;  %10931 = vmatprep.mubr.msk.f32.mxu1 %vm11402_vm0, %v11401_v1 }
0x2a19   :  { %v13801_v27 = vpop.f32.mrf.mxu0 }
0x2a1a   :  { %10932 = vmatmul.mubr.msk.f32.vlgmr.msra.gmra.mxu1 %vm190_vm2, %v12936_v51 }
0x2a1b   :  { %v10910_v20 = vpop.f32.mrf.mxu0  ;;  %10934 = vmatprep.mubr.msk.f32.mxu1 %vm11402_vm0, %v11401_v1 }
0x2a1d   :  { %v13807_v21 = vpop.f32.mrf.mxu0 }
0x2a1e   :  { %10935 = vmatmul.mubr.msk.f32.gmra.mxu1 %vm190_vm2, %v12947_v60 }
0x2a1f   :  { %v10913_v10 = vpop.f32.mrf.mxu0  ;;  %10937 = vmatprep.mubr.msk.f32.mxu1 %vm11402_vm0, %v11401_v1 }
0x2a21   :  { %v13813_v5 = vpop.f32.mrf.mxu0 }
0x2a22   :  { %10938 = vmatmul.mubr.msk.f32.gmra.mxu1 %vm190_vm2, %v12974_v59 }
0x2a23   :  { %v10916_v39 = vpop.f32.mrf.mxu0  ;;  %10940 = vmatprep.mubr.msk.f32.mxu1 %vm11402_vm0, %v11401_v1 }
0x2a25   :  { %v13819_v51 = vpop.f32.mrf.mxu0 }
0x2a26   :  { %10941 = vmatmul.mubr.msk.f32.gmra.mxu1 %vm190_vm2, %v12985_v2  ;;  %v7904_v61 = vrot.slane %v13819_v51, 1 }
0x2a27   :  { %v10919_v16 = vpop.f32.mrf.mxu0  ;;  %10943 = vmatprep.mubr.msk.f32.mxu1 %vm11402_vm0, %v11401_v1 }
0x2a29   :  { %v13825_v60 = vpop.f32.mrf.mxu0 }
0x2a2a   :  { %v7906_v23 = vrot.slane %v13825_v60, 1  ;;  %10944 = vmatmul.mubr.msk.f32.gmra.mxu1 %vm190_vm2, %v12996_v38 }
0x2a2b   :  { %v10922_v59 = vpop.f32.mrf.mxu0  ;;  %10975 = vmatprep.mubr.msk.f32.mxu1 %vm11402_vm0, %v11401_v1 }
0x2a2c   :  { %v13838_v2 = vsel %vm807_vm6, %v7904_v61, %v7906_v23 }
0x2a2d   :  { %v7560_v56 = vpop.f32.mrf.mxu0 }
0x2a2f   :  { %v10956_v40 = vpop.f32.mrf.mxu0 }
0x2a31   :  { %v7565_v54 = vpop.f32.mrf.mxu0 }
0x2a33   :  { %v10959_v22 = vpop.f32.mrf.mxu0 }
0x2a35   :  { %v7570_v63 = vpop.f32.mrf.mxu0 }
0x2a36   :  { %10985 = vmatpush3.msk.msra.mxu0 %vm720_vm4, %v7570_v63  ;;  %v8042_v43 = vrot.slane %v7570_v63, 1 }
0x2a37   :  { %v10962_v29 = vpop.f32.mrf.mxu0  ;;  %10986 = vmatprep.subr.mxu0 %v11401_v1 }
0x2a38   :  { %10987 = vmatpush3.msra.mxu0 %v7565_v54 }
0x2a39   :  { %v7575_v38 = vpop.f32.mrf.mxu0  ;;  %10988 = vmatprep.subr.mxu0 %v11401_v1 }
0x2a3a   :  { %v8043_v28 = vrot.slane %v7575_v38, 1  ;;  %10989 = vmatpush3.msra.mxu0 %v7560_v56 }
0x2a3b   :  { %v10965_v25 = vpop.f32.mrf.mxu0  ;;  %11010 = vmatprep.subr.mxu0 %v11401_v1 }
0x2a3c   :  { %v13845_v30 = vsel %vm807_vm6, %v8042_v43, %v8043_v28 }
0x2a3d   :  { %v13847_v19 = vpop.f32.mrf.mxu0 }
0x2a3e   :  { %v8045_v55 = vrot.slane %v13847_v19, 1 }
0x2a3f   :  { %v10968_v48 = vpop.f32.mrf.mxu0 }
0x2a40   :  { %v13853_v33 = vsel %vm807_vm6, %v8043_v28, %v8045_v55 }
0x2ace   :  { %v7282_v12 = vpop.f32.mrf.mxu1 }
0x2acf   :  { %v13857_v37 = vadd.f32 %v7282_v12, %v6353_v50 }
0x2ad0   :  { %v10893_v32 = vpop.f32.mrf.mxu1 }
0x2ad2   :  { %v7287_v44 = vpop.f32.mrf.mxu1 }
0x2ad3   :  { %v13861_v42 = vadd.f32 %v7287_v44, %v6358_v52 }
0x2ad4   :  { %v10896_v58 = vpop.f32.mrf.mxu1 }
0x2ad6   :  { %v7292_v34 = vpop.f32.mrf.mxu1 }
0x2ad7   :  { %v13865_v7 = vadd.f32 %v7292_v34, %v6363_v53  ;;  %v9177_v53 = vld [vmem:[%s14174_s8 + $0x38] sm:$0xff] }
0x2ad8   :  { %v10899_v46 = vpop.f32.mrf.mxu1 }
0x2ada   :  { %v7465_v4 = vpop.f32.mrf.mxu1 }
0x2adc   :  { %v10933_v13 = vpop.f32.mrf.mxu1 }
0x2ade   :  { %v7470_v45 = vpop.f32.mrf.mxu1 }
0x2ae0   :  { %v10936_v8 = vpop.f32.mrf.mxu1 }
0x2ae2   :  { %v7475_v26 = vpop.f32.mrf.mxu1 }
0x2ae3   :  { %10970 = vmatpush3.xpose.msk.msra.mxu1 %vm577_vm5, %v7475_v26  ;;  %v7910_v6 = vrot.slane %v7475_v26, 1 }
0x2ae4   :  { %v10939_v9 = vpop.f32.mrf.mxu1  ;;  %10971 = vmatprep.subr.mxu1 %v11401_v1 }
0x2ae6   :  { %v7480_v47 = vpop.f32.mrf.mxu1 }
0x2ae7   :  { %v7911_v62 = vrot.slane %v7480_v47, 1  ;;  %10972 = vmatpush3.xpose.msk.msra.mxu1 %vm577_vm5, %v7470_v45 }
0x2ae8   :  { %v10942_v17 = vpop.f32.mrf.mxu1  ;;  %10973 = vmatprep.subr.mxu1 %v11401_v1 }
0x2ae9   :  { %v13872_v49 = vsel %vm807_vm6, %v7910_v6, %v7911_v62  ;;  %v7903_v6 = vrot.slane %v13813_v5, 1 }
0x2aea   :  { %v7485_v41 = vpop.f32.mrf.mxu1 }
0x2aeb   :  { %v7913_v35 = vrot.slane %v7485_v41, 1  ;;  %10974 = vmatpush3.xpose.msk.msra.mxu1 %vm577_vm5, %v7465_v4 }
0x2aec   :  { %v10945_v11 = vpop.f32.mrf.mxu1  ;;  %10999 = vmatprep.subr.mxu1 %v11401_v1 }
0x2aed   :  { %v7914_v18 = vsel %vm807_vm6, %v7911_v62, %v7913_v35  ;;  %v7905_v62 = vsel %vm807_vm6, %v7903_v6, %v7904_v61 }
0x2aee   :  { %10976 = vmatmul.mubr.msk.f32.vlgmr.msra.gmra.mxu1 %vm577_vm5, %v13801_v27 }
0x2aef   :  { %10978 = vmatprep.mubr.msk.f32.mxu1 %vm11402_vm0, %v11401_v1  ;;  %11000 = vmatpush3.msra.mxu1 %v9177_v53 }
0x2af0   :  { %11025 = vmatprep.subr.mxu1 %v11401_v1 }
0x2af2   :  { %10979 = vmatmul.mubr.msk.f32.gmra.mxu1 %vm577_vm5, %v13807_v21 }
0x2af3   :  { %10981 = vmatprep.mubr.msk.f32.mxu1 %vm11402_vm0, %v11401_v1 }
0x2af6   :  { %10982 = vmatmul.mubr.msk.f32.gmra.mxu1 %vm577_vm5, %v13813_v5 }
0x2af7   :  { %11001 = vmatprep.mubr.msk.f32.mxu1 %vm11402_vm0, %v11401_v1 }
0x2bae   :  { %v7668_v20 = vpop.f32.mrf.mxu1 }
0x2baf   :  { %v7682_v10 = vsel %vm676_vm7, %v7668_v20, -inf }
0x2bb0   :  { %7683 = vmax.xlane.f32.xlu0 %v7682_v10  ;;  %v10977_v27 = vpop.f32.mrf.mxu1 }
0x2bb2   :  { %v7673_v39 = vpop.f32.mrf.mxu1 }
0x2bb3   :  { %v7685_v16 = vsel %vm676_vm7, %v7673_v39, -inf }
0x2bb4   :  { %7686 = vmax.xlane.f32.xlu1 %v7685_v16  ;;  %v10980_v59 = vpop.f32.mrf.mxu1 }
0x2bb6   :  { %v7678_v21 = vpop.f32.mrf.mxu1 }
0x2bb7   :  { %v7688_v56 = vsel %vm683_vm8, %v7678_v21, -inf }
0x2bb8   :  { %7689 = vmax.xlane.f32.xlu0 %v7688_v56  ;;  %v10983_v40 = vpop.f32.mrf.mxu1 }
0x2c39   :  { %v7684_v54 = vpop.xlane.xlu0 %7683 }
0x2c3a   :  { %v7691_v22 = vsub.f32 %v7668_v20, %v7684_v54 }
0x2c3c   :  { %v7694_v63 = vmul.f32 1.442695, %v7691_v22 }
0x2c3d   :  { %v7687_v29 = vpop.xlane.xlu1 %7686 }
0x2c3e   :  { %11333 = vpow2.f32 %v7694_v63  ;;  %v7692_v38 = vsub.f32 %v7673_v39, %v7687_v29  ;;  %v13958_v63 = vld [vmem:[%s14175_s9 + $0x1] ss:$0 sm:$0xff] }
0x2c40   :  { %v7696_v43 = vmul.f32 1.442695, %v7692_v38 }
0x2c41   :  { %v7690_v28 = vpop.xlane.xlu0 %7689 }
0x2c42   :  { %11335 = vpow2.f32 %v7696_v43  ;;  %v7693_v25 = vsub.f32 %v7678_v21, %v7690_v28 }
0x2c44   :  { %v7698_v48 = vmul.f32 1.442695, %v7693_v25 }
0x2c46   :  { %11337 = vpow2.f32 %v7698_v48 }
0x2c4b   :  { %v11334_v50 = vpop.eup %11333 }
0x2c4c   :  { %v7700_v12 = vsel %vm676_vm7, %v11334_v50, 0.0 }
0x2c4d   :  { %7701 = vadd.xlane.f32.xlu1 %v7700_v12 }
0x2c4f   :  { %v11336_v32 = vpop.eup %11335 }
0x2c50   :  { %v7703_v52 = vsel %vm676_vm7, %v11336_v32, 0.0 }
0x2c51   :  { %7704 = vadd.xlane.f32.xlu0 %v7703_v52 }
0x2c53   :  { %v11338_v44 = vpop.eup %11337 }
0x2c54   :  { %v7706_v58 = vsel %vm683_vm8, %v11338_v44, 0.0 }
0x2c55   :  { %7707 = vadd.xlane.f32.xlu1 %v7706_v58 }
0x2cd6   :  { %v7702_v34 = vpop.xlane.xlu1 %7701 }
0x2cd7   :  { %11339 = vrcp.f32 %v7702_v34 }
0x2cda   :  { %v7705_v46 = vpop.xlane.xlu0 %7704 }
0x2cdb   :  { %11341 = vrcp.f32 %v7705_v46 }
0x2cde   :  { %v7708_v4 = vpop.xlane.xlu1 %7707 }
0x2cdf   :  { %11343 = vrcp.f32 %v7708_v4 }
0x2ce4   :  { %v11340_v13 = vpop.eup %11339 }
0x2ce5   :  { %v7712_v45 = vmul.f32 %v11340_v13, %v11334_v50 }
0x2ce7   :  { %10991 = vmatmul.mubr.msk.f32.vlgmr.msra.gmra.mxu0 %vm676_vm7, %v7712_v45 }
0x2ce8   :  { %v11342_v8 = vpop.eup %11341  ;;  %11011 = vmatpush3.xpose.msk.msra.mxu0 %vm577_vm5, %v7913_v35  ;;  %10993 = vmatprep.mubr.msk.f32.mxu0 %vm11402_vm0, %v11401_v1 }
0x2ce9   :  { %11012 = vmatprep.subr.mxu0 %v11401_v1  ;;  %v7713_v26 = vmul.f32 %v11342_v8, %v11336_v32 }
0x2ceb   :  { %10994 = vmatmul.mubr.msk.f32.gmra.mxu0 %vm676_vm7, %v7713_v26 }
0x2cec   :  { %v11344_v9 = vpop.eup %11343  ;;  %11013 = vmatpush3.xpose.msk.msra.mxu0 %vm577_vm5, %v7914_v18  ;;  %10996 = vmatprep.mubr.msk.f32.mxu0 %vm11402_vm0, %v11401_v1 }
0x2ced   :  { %11014 = vmatprep.subr.mxu0 %v11401_v1  ;;  %v7714_v47 = vmul.f32 %v11344_v9, %v11338_v44 }
0x2cef   :  { %10997 = vmatmul.mubr.msk.f32.gmra.mxu0 %vm676_vm7, %v7714_v47 }
0x2cf0   :  { %11015 = vmatpush3.xpose.msk.msra.mxu0 %vm577_vm5, %v13872_v49  ;;  %11016 = vmatprep.mubr.msk.f32.mxu0 %vm11402_vm0, %v11401_v1 }
0x2cf1   :  { %11040 = vmatprep.subr.mxu0 %v11401_v1 }
0x2cf3   :  { %11017 = vmatmul.mubr.msk.f32.vlgmr.msra.gmra.mxu0 %vm577_vm5, %v7905_v62 }
0x2cf4   :  { %11019 = vmatprep.mubr.msk.f32.mxu0 %vm11402_vm0, %v11401_v1  ;;  %11041 = vmatpush3.msra.mxu0 %v9177_v53 }
0x2cf5   :  { %11074 = vmatprep.subr.mxu0 %v11401_v1 }
0x2cf7   :  { %11020 = vmatmul.mubr.msk.f32.gmra.mxu0 %vm577_vm5, %v13838_v2 }
0x2cf8   :  { %11022 = vmatprep.mubr.msk.f32.mxu0 %vm11402_vm0, %v11401_v1 }
0x2cfb   :  { %11023 = vmatmul.mubr.msk.f32.gmra.mxu0 %vm577_vm5, %v7906_v23 }
0x2cfc   :  { %11042 = vmatprep.mubr.msk.f32.mxu0 %vm11402_vm0, %v11401_v1 }
0x2da7   :  { %v7793_v5 = vpop.f32.mrf.mxu0 }
0x2da8   :  { %11002 = vmatmul.mubr.msk.f32.vlgmr.msra.gmra.mxu1 %vm577_vm5, %v7793_v5  ;;  %v9203_v5 = vld [vmem:[%s14178_s12 + $0x38] sm:$0xff] }
0x2da9   :  { %11026 = vmatpush3.msk.msra.mxu1 %vm720_vm4, %v8045_v55  ;;  %v10992_v51 = vpop.f32.mrf.mxu0  ;;  %11004 = vmatprep.mubr.msk.f32.mxu1 %vm11402_vm0, %v11401_v1 }
0x2daa   :  { %11027 = vmatprep.subr.mxu1 %v11401_v1  ;;  %v9202_v51 = vld [vmem:[%s14178_s12 + $0x30] sm:$0xff] }
0x2dab   :  { %11028 = vmatpush3.msra.mxu1 %v13853_v33  ;;  %v7798_v60 = vpop.f32.mrf.mxu0 }
0x2dac   :  { %11029 = vmatprep.subr.mxu1 %v11401_v1  ;;  %11005 = vmatmul.mubr.msk.f32.gmra.mxu1 %vm577_vm5, %v7798_v60  ;;  %v9201_v60 = vld [vmem:[%s14178_s12 + $0x28] sm:$0xff] }
0x2dad   :  { %11030 = vmatpush3.msra.mxu1 %v13845_v30  ;;  %v10995_v61 = vpop.f32.mrf.mxu0  ;;  %11007 = vmatprep.mubr.msk.f32.mxu1 %vm11402_vm0, %v11401_v1 }
0x2dae   :  { %11051 = vmatprep.subr.mxu1 %v11401_v1  ;;  %v9200_v61 = vld [vmem:[%s14178_s12 + $0x20] sm:$0xff] }
0x2daf   :  { %v7803_v23 = vpop.f32.mrf.mxu0 }
0x2db0   :  { %11008 = vmatmul.mubr.msk.f32.gmra.mxu1 %vm577_vm5, %v7803_v23 }
0x2db1   :  { %v10998_v2 = vpop.f32.mrf.mxu0  ;;  %11031 = vmatprep.mubr.msk.f32.mxu1 %vm11402_vm0, %v11401_v1 }
0x2db3   :  { %v7993_v19 = vpop.f32.mrf.mxu0 }
0x2db4   :  { %v8007_v55 = vsel %vm676_vm7, %v7993_v19, -inf }
0x2db5   :  { %8008 = vmax.xlane.f32.xlu0 %v8007_v55  ;;  %v11018_v33 = vpop.f32.mrf.mxu0 }
0x2db7   :  { %v7998_v17 = vpop.f32.mrf.mxu0 }
0x2db8   :  { %v8010_v30 = vsel %vm676_vm7, %v7998_v17, -inf }
0x2db9   :  { %8011 = vmax.xlane.f32.xlu0 %v8010_v30  ;;  %v11021_v49 = vpop.f32.mrf.mxu0 }
0x2dbb   :  { %v8003_v41 = vpop.f32.mrf.mxu0 }
0x2dbc   :  { %v8013_v40 = vsel %vm683_vm8, %v8003_v41, -inf }
0x2dbd   :  { %v11024_v35 = vpop.f32.mrf.mxu0 }
0x2e3e   :  { %v8009_v11 = vpop.xlane.xlu0 %8008 }
0x2e3f   :  { %v8016_v18 = vsub.f32 %v7993_v19, %v8009_v11  ;;  %v14012_v11 = vld [vmem:[%s14177_s11 + $0x1] ss:$0 sm:$0xff] }
0x2e41   :  { %v8019_v20 = vmul.f32 1.442695, %v8016_v18 }
0x2e42   :  { %v8012_v10 = vpop.xlane.xlu0 %8011 }
0x2e43   :  { %11345 = vpow2.f32 %v8019_v20  ;;  %v8017_v27 = vsub.f32 %v7998_v17, %v8012_v10 }
0x2e45   :  { %v8021_v39 = vmul.f32 1.442695, %v8017_v27 }
0x2e47   :  { %11347 = vpow2.f32 %v8021_v39 }
0x2e50   :  { %v11346_v16 = vpop.eup %11345 }
0x2e51   :  { %v8025_v59 = vsel %vm676_vm7, %v11346_v16, 0.0 }
0x2e52   :  { %8026 = vadd.xlane.f32.xlu1 %v8025_v59  ;;  %v9218_v59 = vld [vmem:[%s14180_s14 + $0x78] sm:$0xff] }
0x2e54   :  { %v11348_v21 = vpop.eup %11347 }
0x2e55   :  { %v8028_v56 = vsel %vm676_vm7, %v11348_v21, 0.0 }
0x2e56   :  { %8029 = vadd.xlane.f32.xlu0 %v8028_v56  ;;  %8014 = vmax.xlane.f32.xlu1 %v8013_v40  ;;  %v9216_v56 = vld [vmem:[%s14180_s14 + $0x68] sm:$0xff]  ;;  %v9215_v40 = vld [vmem:[%s14180_s14 + $0x60] sm:$0xff] }
0x2e68   :  { %v7884_v54 = vpop.f32.mrf.mxu1 }
0x2e69   :  { %v7898_v22 = vadd.f32 %v7884_v54, %v13685_v24  ;;  %v9214_v54 = vld [vmem:[%s14180_s14 + $0x58] sm:$0xff] }
0x2e6a   :  { %v11003_v29 = vpop.f32.mrf.mxu1 }
0x2e6b   :  { %v8244_v38 = vadd.f32 %v7898_v22, %v12843_v0  ;;  %v9213_v22 = vld [vmem:[%s14180_s14 + $0x50] sm:$0xff]  ;;  %v9212_v29 = vld [vmem:[%s14180_s14 + $0x48] sm:$0xff] }
0x2e6c   :  { %v7889_v43 = vpop.f32.mrf.mxu1 }
0x2e6d   :  { %v13962_v28 = vadd.f32 %v13958_v63, %v8244_v38  ;;  %v7899_v25 = vadd.f32 %v7889_v43, %v13689_v14  ;;  %v9211_v38 = vld [vmem:[%s14180_s14 + $0x40] sm:$0xff] }
0x2e6e   :  { %v11006_v48 = vpop.f32.mrf.mxu1 }
0x2e6f   :  { %v8266_v50 = vsel %vm190_vm2, %v13962_v28, 0.0  ;;  %v14062_v48 = vld [vmem:[%s14179_s13 + $0x1] ss:$0 sm:$0xff] }
0x2e70   :  { %v7894_v12 = vpop.f32.mrf.mxu1  ;;  %8267 = vadd.xlane.f32.xlu0 %v8266_v50 }
0x2e71   :  { %v13968_v24 = vadd.f32 %v7894_v12, %v13693_v3  ;;  %v8245_v3 = vadd.f32 %v7899_v25, %v12848_v57 }
0x2e72   :  { %v11009_v32 = vpop.f32.mrf.mxu1 }
0x2e73   :  { %v13979_v8 = vadd.f32 %v13958_v63, %v8245_v3 }
0x2e75   :  { %v8269_v26 = vsel %vm190_vm2, %v13979_v8, 0.0 }
0x2edb   :  { %v8027_v52 = vpop.xlane.xlu1 %8026 }
0x2edc   :  { %11349 = vrcp.f32 %v8027_v52 }
0x2edf   :  { %v8030_v44 = vpop.xlane.xlu0 %8029  ;;  %v8015_v0 = vpop.xlane.xlu1 %8014 }
0x2ee0   :  { %11351 = vrcp.f32 %v8030_v44  ;;  %v8018_v58 = vsub.f32 %v8003_v41, %v8015_v0  ;;  %v14007_v41 = vld [vmem:[%s14176_s10 + $0x1] ss:$0 sm:$0xff] }
0x2ee2   :  { %v8023_v53 = vmul.f32 1.442695, %v8018_v58 }
0x2ee4   :  { %11353 = vpow2.f32 %v8023_v53 }
0x2ee9   :  { %v11350_v34 = vpop.eup %11349 }
0x2eea   :  { %v8037_v14 = vmul.f32 %v11350_v34, %v11346_v16 }
0x2eec   :  { %11032 = vmatmul.mubr.msk.f32.vlgmr.msra.gmra.mxu1 %vm676_vm7, %v8037_v14 }
0x2eed   :  { %v11352_v46 = vpop.eup %11351  ;;  %11034 = vmatprep.mubr.msk.f32.mxu1 %vm11402_vm0, %v11401_v1  ;;  %11052 = vmatpush3.msra.mxu1 %v9203_v5 }
0x2eee   :  { %v8038_v4 = vmul.f32 %v11352_v46, %v11348_v21  ;;  %11053 = vmatprep.subr.mxu1 %v11401_v1  ;;  %v9217_v21 = vld [vmem:[%s14180_s14 + $0x70] sm:$0xff] }
0x2eef   :  { %11054 = vmatpush3.msra.mxu1 %v9202_v51 }
0x2ef0   :  { %11035 = vmatmul.mubr.msk.f32.gmra.mxu1 %vm676_vm7, %v8038_v4  ;;  %11055 = vmatprep.subr.mxu1 %v11401_v1 }
0x2ef1   :  { %v11354_v13 = vpop.eup %11353  ;;  %11037 = vmatprep.mubr.msk.f32.mxu1 %vm11402_vm0, %v11401_v1  ;;  %11056 = vmatpush3.msra.mxu1 %v9201_v60 }
0x2ef2   :  { %v8031_v45 = vsel %vm683_vm8, %v11354_v13, 0.0  ;;  %11057 = vmatprep.subr.mxu1 %v11401_v1 }
0x2ef3   :  { %8032 = vadd.xlane.f32.xlu1 %v8031_v45  ;;  %11058 = vmatpush3.msra.mxu1 %v9200_v61 }
0x2ef4   :  { %11105 = vmatprep.subr.mxu1 %v11401_v1 }
0x2ef7   :  { %8270 = vadd.xlane.f32.xlu1 %v8269_v26 }
0x2ef9   :  { %v8268_v9 = vpop.xlane.xlu0 %8267 }
0x2efa   :  { %v8281_v47 = vmul.f32 0.03125, %v8268_v9 }
0x2efc   :  { %v8286_v57 = vsub.f32 %v13962_v28, %v8281_v47 }
0x2efe   :  { %v8291_v6 = vmul.f32 %v8286_v57, %v8286_v57 }
0x2f00   :  { %v8296_v62 = vsel %vm190_vm2, %v8291_v6, 0.0 }
0x2f01   :  { %8297 = vadd.xlane.f32.xlu1 %v8296_v62 }
0x2f7c   :  { %v8033_v23 = vpop.xlane.xlu1 %8032 }
0x2f7d   :  { %11355 = vrcp.f32 %v8033_v23 }
0x2f80   :  { %v8271_v2 = vpop.xlane.xlu1 %8270 }
0x2f81   :  { %v8282_v58 = vmul.f32 0.03125, %v8271_v2 }
0x2f83   :  { %v8287_v4 = vsub.f32 %v13979_v8, %v8282_v58 }
0x2f8a   :  { %v11356_v19 = vpop.eup %11355  ;;  %v8298_v55 = vpop.xlane.xlu1 %8297 }
0x2f8b   :  { %v8311_v33 = vmul.f32 0.03125, %v8298_v55  ;;  %v8039_v17 = vmul.f32 %v11356_v19, %v11354_v13 }
0x2f8d   :  { %v8316_v30 = vadd.f32 1e-05, %v8311_v33  ;;  %11038 = vmatmul.mubr.msk.f32.gmra.mxu1 %vm676_vm7, %v8039_v17 }
0x2f8e   :  { %11059 = vmatprep.mubr.msk.f32.mxu1 %vm11402_vm0, %v11401_v1 }
0x2f8f   :  { %11357 = vrsqrt.f32 %v8316_v30 }
0x2f9c   :  { %v11358_v49 = vpop.eup %11357 }
0x2f9d   :  { %v8326_v35 = vmul.f32 %v11358_v49, %v8286_v57 }
0x2f9f   :  { %v8337_v18 = vmul.f32 %v14007_v41, %v8326_v35 }
0x2fa1   :  { %v8348_v20 = vadd.f32 %v14012_v11, %v8337_v18 }
0x2fa3   :  { %11060 = vmatmul.mubr.msk.f32.vlgmr.msra.gmra.mxu1 %vm190_vm2, %v8348_v20 }
0x2fa4   :  { %11062 = vmatprep.mubr.msk.f32.mxu1 %vm11402_vm0, %v11401_v1 }
0x2fac   :  { %v8126_v10 = vpop.f32.mrf.mxu1 }
0x2fad   :  { %11043 = vmatmul.mubr.msk.f32.vlgmr.msra.gmra.mxu0 %vm577_vm5, %v8126_v10 }
0x2fae   :  { %v11033_v27 = vpop.f32.mrf.mxu1  ;;  %11045 = vmatprep.mubr.msk.f32.mxu0 %vm11402_vm0, %v11401_v1  ;;  %11075 = vmatpush3.msra.mxu0 %v9218_v59 }
0x2faf   :  { %11076 = vmatprep.subr.mxu0 %v11401_v1 }
0x2fb0   :  { %v8131_v39 = vpop.f32.mrf.mxu1  ;;  %11077 = vmatpush3.msra.mxu0 %v9217_v21 }
0x2fb1   :  { %11046 = vmatmul.mubr.msk.f32.gmra.mxu0 %vm577_vm5, %v8131_v39  ;;  %11078 = vmatprep.subr.mxu0 %v11401_v1 }
0x2fb2   :  { %v11036_v16 = vpop.f32.mrf.mxu1  ;;  %11048 = vmatprep.mubr.msk.f32.mxu0 %vm11402_vm0, %v11401_v1  ;;  %11079 = vmatpush3.msra.mxu0 %v9216_v56 }
0x2fb3   :  { %11080 = vmatprep.subr.mxu0 %v11401_v1 }
0x2fb4   :  { %11081 = vmatpush3.msra.mxu0 %v9215_v40 }
0x2fb5   :  { %11082 = vmatprep.subr.mxu0 %v11401_v1 }
0x2fb6   :  { %11083 = vmatpush3.msra.mxu0 %v9214_v54 }
0x2fb7   :  { %11084 = vmatprep.subr.mxu0 %v11401_v1 }
0x2fb8   :  { %11085 = vmatpush3.msra.mxu0 %v9213_v22 }
0x2fb9   :  { %11086 = vmatprep.subr.mxu0 %v11401_v1 }
0x2fba   :  { %11087 = vmatpush3.msra.mxu0 %v9212_v29 }
0x2fbb   :  { %11088 = vmatprep.subr.mxu0 %v11401_v1 }
0x2fbc   :  { %11089 = vmatpush3.msra.mxu0 %v9211_v38 }
0x304d   :  { %v8136_v43 = vpop.f32.mrf.mxu1 }
0x304e   :  { %11049 = vmatmul.mubr.msk.f32.gmra.mxu0 %vm577_vm5, %v8136_v43 }
0x304f   :  { %v11039_v25 = vpop.f32.mrf.mxu1  ;;  %11090 = vmatprep.mubr.msk.f32.mxu0 %vm11402_vm0, %v11401_v1 }
0x3063   :  { %v8447_v50 = vpop.f32.mrf.mxu1 }
0x3064   :  { %v8448_v12 = vadd.f32 %v14062_v48, %v8447_v50 }
0x3065   :  { %v11061_v32 = vpop.f32.mrf.mxu1 }
0x3066   :  { %v8476_v52 = vmul.f32 0.70710677, %v8448_v12 }
0x3068   :  { %11359 = verf.f32 %v8476_v52 }
0x306d   :  { %v8215_v44 = vpop.f32.mrf.mxu0 }
0x306e   :  { %v8229_v0 = vadd.f32 %v8215_v44, %v13857_v37  ;;  %v8471_v37 = vmul.f32 0.5, %v8448_v12 }
0x306f   :  { %v11044_v53 = vpop.f32.mrf.mxu0 }
0x3070   :  { %v8235_v34 = vrot.slane %v8229_v0, 7 }
0x3071   :  { %v8220_v14 = vpop.f32.mrf.mxu0 }
0x3072   :  { %v8243_v46 = vsel %vm720_vm4, %v13968_v24, %v8235_v34  ;;  %v8230_v3 = vadd.f32 %v8220_v14, %v13861_v42  ;;  %v8292_v24 = vmul.f32 %v8287_v4, %v8287_v4 }
0x3073   :  { %v8246_v13 = vadd.f32 %v8243_v46, %v12853_v15  ;;  %v11047_v45 = vpop.f32.mrf.mxu0 }
0x3074   :  { %v8236_v26 = vrot.slane %v8230_v3, 7  ;;  %v8299_v15 = vsel %vm190_vm2, %v8292_v24, 0.0 }
0x3075   :  { %v11360_v9 = vpop.eup %11359  ;;  %v14072_v47 = vadd.f32 %v13958_v63, %v8246_v13 }
0x3076   :  { %v8486_v57 = vadd.f32 1.0, %v11360_v9  ;;  %v8237_v6 = vsel %vm720_vm4, %v8235_v34, %v8236_v26 }
0x3077   :  { %v8272_v62 = vsel %vm190_vm2, %v14072_v47, 0.0  ;;  %v8247_v42 = vadd.f32 %v8237_v6, %v12858_v36 }
0x3078   :  { %v8491_v5 = vmul.f32 %v8486_v57, %v8471_v37  ;;  %8273 = vadd.xlane.f32.xlu0 %v8272_v62 }
0x3079   :  { %v8260_v8 = vadd.f32 %v13958_v63, %v8247_v42 }
0x307a   :  { %11091 = vmatmul.mubr.msk.f32.vlgmr.msra.gmra.mxu0 %vm4283_vm9, %v8491_v5 }
0x307b   :  { %11093 = vmatprep.mubr.msk.f32.mxu0 %vm11402_vm0, %v11401_v1  ;;  %v8275_v51 = vsel %vm190_vm2, %v8260_v8, 0.0 }
0x307c   :  { %8300 = vadd.xlane.f32.xlu0 %v8299_v15 }
0x3080   :  { %8276 = vadd.xlane.f32.xlu0 %v8275_v51 }
0x3101   :  { %v8274_v60 = vpop.xlane.xlu0 %8273 }
0x3102   :  { %v8283_v61 = vmul.f32 0.03125, %v8274_v60 }
0x3104   :  { %v8288_v23 = vsub.f32 %v14072_v47, %v8283_v61 }
0x3105   :  { %v8301_v36 = vpop.xlane.xlu0 %8300 }
0x3106   :  { %v8312_v2 = vmul.f32 0.03125, %v8301_v36  ;;  %v8293_v19 = vmul.f32 %v8288_v23, %v8288_v23 }
0x3108   :  { %v8317_v55 = vadd.f32 1e-05, %v8312_v2  ;;  %v8302_v33 = vsel %vm190_vm2, %v8293_v19, 0.0 }
0x3109   :  { %8303 = vadd.xlane.f32.xlu1 %v8302_v33  ;;  %v8277_v17 = vpop.xlane.xlu0 %8276 }
0x310a   :  { %11361 = vrsqrt.f32 %v8317_v55  ;;  %v8284_v30 = vmul.f32 0.03125, %v8277_v17 }
0x310c   :  { %v8289_v49 = vsub.f32 %v8260_v8, %v8284_v30 }
0x310e   :  { %v8225_v35 = vpop.f32.mrf.mxu0  ;;  %v8294_v18 = vmul.f32 %v8289_v49, %v8289_v49 }
0x310f   :  { %v8231_v20 = vadd.f32 %v8225_v35, %v13865_v7 }
0x3110   :  { %v11050_v10 = vpop.f32.mrf.mxu0  ;;  %v8305_v27 = vsel %vm190_vm2, %v8294_v18, 0.0 }
0x3111   :  { %v8238_v39 = vrot.slane %v8231_v20, 7  ;;  %8306 = vadd.xlane.f32.xlu0 %v8305_v27 }
0x3113   :  { %v8239_v16 = vsel %vm720_vm4, %v8236_v26, %v8238_v39 }
0x3114   :  { %v8248_v59 = vadd.f32 %v8239_v16, %v12866_v31 }
0x3116   :  { %v8261_v21 = vadd.f32 %v13958_v63, %v8248_v59 }
0x3117   :  { %v11362_v56 = vpop.eup %11361 }
0x3118   :  { %v8327_v40 = vmul.f32 %v11362_v56, %v8287_v4  ;;  %v8278_v54 = vsel %vm203_vm3, %v8261_v21, 0.0 }
0x3119   :  { %8279 = vadd.xlane.f32.xlu1 %v8278_v54 }
0x311a   :  { %v8338_v22 = vmul.f32 %v14007_v41, %v8327_v40 }
0x311c   :  { %v8349_v7 = vadd.f32 %v14012_v11, %v8338_v22 }
0x311e   :  { %11063 = vmatmul.mubr.msk.f32.gmra.mxu1 %vm190_vm2, %v8349_v7 }
0x311f   :  { %11065 = vmatprep.mubr.msk.f32.mxu1 %vm11402_vm0, %v11401_v1 }
0x313a   :  { %v14097_v29 = vpop.f32.mrf.mxu0 }
0x313c   :  { %v11092_v38 = vpop.f32.mrf.mxu0 }
0x3192   :  { %v8304_v31 = vpop.xlane.xlu1 %8303 }
0x3193   :  { %v8313_v43 = vmul.f32 0.03125, %v8304_v31 }
0x3195   :  { %v8318_v63 = vadd.f32 1e-05, %v8313_v43  ;;  %v8607_v43 = vadd.f32 %v14097_v29, %v13962_v28 }
0x3197   :  { %11363 = vrsqrt.f32 %v8318_v63  ;;  %v9225_v63 = vld [vmem:[%s14181_s15 + $0x1] ss:$0 sm:$0xff] }
0x319a   :  { %v8307_v25 = vpop.xlane.xlu0 %8306 }
0x319b   :  { %v8314_v50 = vmul.f32 0.03125, %v8307_v25 }
0x319d   :  { %v8319_v12 = vadd.f32 1e-05, %v8314_v50 }
0x319f   :  { %11365 = vrsqrt.f32 %v8319_v12  ;;  %v8617_v12 = vadd.f32 %v9225_v63, %v8607_v43 }
0x31a2   :  { %v8280_v32 = vpop.xlane.xlu1 %8279 }
0x31a3   :  { %v8285_v52 = vmul.f32 0.03125, %v8280_v32 }
0x31a4   :  { %v11364_v44 = vpop.eup %11363 }
0x31a5   :  { %v8328_v0 = vmul.f32 %v11364_v44, %v8288_v23  ;;  %v8290_v58 = vsub.f32 %v8261_v21, %v8285_v52 }
0x31a7   :  { %v8295_v53 = vmul.f32 %v8290_v58, %v8290_v58  ;;  %v8339_v34 = vmul.f32 %v14007_v41, %v8328_v0 }
0x31a9   :  { %v8308_v14 = vsel %vm203_vm3, %v8295_v53, 0.0  ;;  %v8350_v46 = vadd.f32 %v14012_v11, %v8339_v34 }
0x31aa   :  { %8309 = vadd.xlane.f32.xlu1 %v8308_v14 }
0x31ab   :  { %11066 = vmatmul.mubr.msk.f32.gmra.mxu1 %vm190_vm2, %v8350_v46 }
0x31ac   :  { %v11366_v3 = vpop.eup %11365  ;;  %11068 = vmatprep.mubr.msk.f32.mxu1 %vm11402_vm0, %v11401_v1 }
0x31ad   :  { %v8329_v4 = vmul.f32 %v11366_v3, %v8289_v49 }
0x31af   :  { %v8340_v13 = vmul.f32 %v14007_v41, %v8329_v4  ;;  %v8651_v4 = vld [vmem:[%s14184_s18 + $0x10] sm:$0xff] }
0x31b1   :  { %v8351_v45 = vadd.f32 %v14012_v11, %v8340_v13  ;;  %v8650_v13 = vld [vmem:[%s14184_s18 + $0x8] sm:$0xff] }
0x31b3   :  { %11069 = vmatmul.mubr.msk.f32.gmra.mxu1 %vm190_vm2, %v8351_v45  ;;  %v8649_v45 = vld [vmem:[%s14184_s18] sm:$0xff] }
0x31b4   :  { %11071 = vmatprep.mubr.msk.f32.mxu1 %vm11402_vm0, %v11401_v1 }
0x31de   :  { %v8452_v26 = vpop.f32.mrf.mxu1 }
0x31df   :  { %v8453_v9 = vadd.f32 %v14062_v48, %v8452_v26 }
0x31e0   :  { %v11064_v37 = vpop.f32.mrf.mxu1 }
0x31e1   :  { %v8477_v57 = vmul.f32 0.70710677, %v8453_v9  ;;  %v8472_v62 = vmul.f32 0.5, %v8453_v9 }
0x31e3   :  { %11367 = verf.f32 %v8477_v57 }
0x31f0   :  { %v11368_v6 = vpop.eup %11367 }
0x31f1   :  { %v8487_v24 = vadd.f32 1.0, %v11368_v6  ;;  %v9226_v6 = vld [vmem:[%s14182_s16] ss:$0 sm:$0xff]  ;;  %s11379_s16 = scalar_lea.vmem %s8742_s23, 32 }
0x31f2   :  { %p11380_p0 = scmp.ne.s32.totalorder %s8742_s23, %s11379_s16  ;;  %p11385_p2 = scmp.lt.s32.totalorder %s11379_s16, %s11379_s16 }
0x31f3   :  { %v8492_v42 = vmul.f32 %v8487_v24, %v8472_v62  ;;  %v9227_v24 = vld [vmem:[%s14183_s17] ss:$0 sm:$0xff] }
0x31f4   :  { %p11386_p3 = por %p11385_p2, %p11384_p1 }
0x31f5   :  { %11094 = vmatmul.mubr.msk.f32.gmra.mxu0 %vm4283_vm9, %v8492_v42 }
0x31f6   :  { %11096 = vmatprep.mubr.msk.f32.mxu0 %vm11402_vm0, %v11401_v1  ;;  %p11387_p4 = pnand %p11386_p3, %p11380_p0 }
0x3233   :  { %v8310_v5 = vpop.xlane.xlu1 %8309 }
0x3234   :  { %v8315_v15 = vmul.f32 0.03125, %v8310_v5 }
0x3236   :  { %v8320_v8 = vadd.f32 1e-05, %v8315_v15 }
0x3238   :  { %11369 = vrsqrt.f32 %v8320_v8 }
0x3245   :  { %v11370_v51 = vpop.eup %11369 }
0x3246   :  { %v8330_v60 = vmul.f32 %v11370_v51, %v8290_v58 }
0x3248   :  { %v8341_v61 = vmul.f32 %v14007_v41, %v8330_v60 }
0x324a   :  { %v8352_v23 = vadd.f32 %v14012_v11, %v8341_v61 }
0x324c   :  { %11072 = vmatmul.mubr.msk.f32.gmra.mxu1 %vm190_vm2, %v8352_v23 }
0x324d   :  { %11113 = vmatprep.mubr.msk.f32.mxu1 %vm11402_vm0, %v11401_v1 }
0x326b   :  { %v8457_v36 = vpop.f32.mrf.mxu1 }
0x326c   :  { %v8458_v2 = vadd.f32 %v14062_v48, %v8457_v36 }
0x326d   :  { %v11067_v19 = vpop.f32.mrf.mxu1 }
0x326e   :  { %v8478_v55 = vmul.f32 0.70710677, %v8458_v2  ;;  %v8473_v35 = vmul.f32 0.5, %v8458_v2 }
0x3270   :  { %11371 = verf.f32 %v8478_v55 }
0x3273   :  { %v8462_v33 = vpop.f32.mrf.mxu1 }
0x3274   :  { %v8463_v17 = vadd.f32 %v14062_v48, %v8462_v33 }
0x3275   :  { %v11070_v30 = vpop.f32.mrf.mxu1 }
0x3276   :  { %v8479_v49 = vmul.f32 0.70710677, %v8463_v17  ;;  %v8474_v10 = vmul.f32 0.5, %v8463_v17 }
0x3278   :  { %11373 = verf.f32 %v8479_v49 }
0x327d   :  { %v11372_v41 = vpop.eup %11371 }
0x327e   :  { %v8488_v11 = vadd.f32 1.0, %v11372_v41 }
0x3280   :  { %v8493_v18 = vmul.f32 %v8488_v11, %v8473_v35 }
0x3282   :  { %11097 = vmatmul.mubr.msk.f32.gmra.mxu0 %vm4283_vm9, %v8493_v18 }
0x3283   :  { %11099 = vmatprep.mubr.msk.f32.mxu0 %vm11402_vm0, %v11401_v1 }
0x3285   :  { %v11374_v20 = vpop.eup %11373 }
0x3286   :  { %v8489_v27 = vadd.f32 1.0, %v11374_v20 }
0x3288   :  { %v8494_v39 = vmul.f32 %v8489_v27, %v8474_v10 }
0x328a   :  { %11100 = vmatmul.mubr.msk.f32.gmra.mxu0 %vm4283_vm9, %v8494_v39 }
0x328b   :  { %11102 = vmatprep.mubr.msk.f32.mxu0 %vm11402_vm0, %v11401_v1 }
0x32b5   :  { %v8591_v16 = vpop.f32.mrf.mxu0 }
0x32b7   :  { %v11095_v59 = vpop.f32.mrf.mxu0 }
0x330c   :  { %v8467_v21 = vpop.f32.mrf.mxu1 }
0x330d   :  { %v8468_v56 = vadd.f32 %v14062_v48, %v8467_v21 }
0x330e   :  { %v11073_v40 = vpop.f32.mrf.mxu1 }
0x330f   :  { %v8480_v54 = vmul.f32 0.70710677, %v8468_v56  ;;  %v8475_v7 = vmul.f32 0.5, %v8468_v56 }
0x3311   :  { %11375 = verf.f32 %v8480_v54 }
0x331e   :  { %v11376_v22 = vpop.eup %11375 }
0x331f   :  { %v8490_v38 = vadd.f32 1.0, %v11376_v22 }
0x3321   :  { %v8495_v31 = vmul.f32 %v8490_v38, %v8475_v7 }
0x3323   :  { %11103 = vmatmul.mubr.msk.f32.gmra.mxu0 %vm4283_vm9, %v8495_v31 }
0x3342   :  { %v8595_v25 = vpop.f32.mrf.mxu0 }
0x3343   :  { %v8608_v50 = vadd.f32 %v8595_v25, %v14072_v47  ;;  %v8652_v47 = vld [vmem:[%s14184_s18 + $0x18] sm:$0xff] }
0x3344   :  { %v11098_v48 = vpop.f32.mrf.mxu0  ;;  %11106 = vmatpush3.msra.mxu1 %v8652_v47 }
0x3345   :  { %v8618_v32 = vadd.f32 %v9225_v63, %v8608_v50  ;;  %11107 = vmatprep.subr.mxu1 %v11401_v1 }
0x3346   :  { %11108 = vmatpush3.msra.mxu1 %v8651_v4 }
0x3347   :  { %v8619_v52 = vsel %vm720_vm4, %v8617_v12, %v8618_v32  ;;  %11109 = vmatprep.subr.mxu1 %v11401_v1 }
0x3348   :  { %v8622_v44 = vsel %vm203_vm3, %v8619_v52, 0.0  ;;  %11110 = vmatpush3.msra.mxu1 %v8650_v13 }
0x3349   :  { %8623 = vadd.xlane.f32.xlu0 %v8622_v44  ;;  %11111 = vmatprep.subr.mxu1 %v11401_v1  ;;  %v9228_v1 = vld [vmem:[%s14185_s19] ss:$0 sm:$0xff] }
0x334a   :  { %v8600_v0 = vpop.f32.mrf.mxu0  ;;  %11112 = vmatpush3.msra.mxu1 %v8649_v45 }
0x334c   :  { %v11101_v58 = vpop.f32.mrf.mxu0 }
0x33d2   :  { %v8624_v53 = vpop.xlane.xlu0 %8623 }
0x33d3   :  { %v8625_v34 = vmul.f32 0.03125, %v8624_v53 }
0x33d5   :  { %v8626_v28 = vsub.f32 %v8619_v52, %v8625_v34 }
0x33d7   :  { %v8627_v29 = vmul.f32 %v8626_v28, %v8626_v28 }
0x33d9   :  { %v8628_v14 = vsel %vm203_vm3, %v8627_v29, 0.0 }
0x33da   :  { %8629 = vadd.xlane.f32.xlu1 %v8628_v14 }
0x33e3   :  { %v8604_v46 = vpop.f32.mrf.mxu0 }
0x33e5   :  { %v11104_v3 = vpop.f32.mrf.mxu0 }
0x3463   :  { %v8630_v26 = vpop.xlane.xlu1 %8629 }
0x3464   :  { %v8631_v9 = vmul.f32 0.03125, %v8630_v26 }
0x3466   :  { %v8632_v37 = vadd.f32 1e-05, %v8631_v9 }
0x3468   :  { %11377 = vrsqrt.f32 %v8632_v37 }
0x3475   :  { %v11378_v57 = vpop.eup %11377 }
0x3476   :  { %v8634_v62 = vmul.f32 %v11378_v57, %v8626_v28 }
0x3478   :  { %v8641_v42 = vmul.f32 %v9226_v6, %v8634_v62 }
0x347a   :  { %v8648_v5 = vadd.f32 %v9227_v24, %v8641_v42 }
0x347c   :  { %11114 = vmatmul.mubr.msk.f32.vlgmr.msra.gmra.mxu1 %vm190_vm2, %v8648_v5 }
0x353c   :  { %v8729_v15 = vpop.f32.mrf.mxu1 }
0x353d   :  { %v8730_v8 = vadd.f32 %v9228_v1, %v8729_v15 }
0x353e   :  { %v11115_v51 = vpop.f32.mrf.mxu1 }
0x353f   :  { %8734 = vst.msk [vmem:[#allocation2] sm:$0x3] %vm8733_vm10, %v8730_v8 }
0x3540   :  { %11390 = shalt.err (!%p11387_p4)
}
0x3541   :  { %8744 = dma.vmem_to_hbm [thread:$0]  %s8742_s23, 32, %s14186_s20, [#allocation3]  }
0x3542   :  { %11399 = dma.done.wait [#allocation3], 32  }
0x3543   :  { %11400 = vsyncadd [#allocation3], 4294967264 }
0x3544   :  { %8748 = vsyncpa [#allocation3], 1 }

</bundles_post_ra>
